<compile_context>
chip_gen: v7x
topology: tpu7x:2x2x1
jax: 0.10.0
libtpu: 0.0.40
codegen_flags: <defaults>
</compile_context>

<pallas_src>
import functools

import jax
import jax.numpy as jnp
from jax import lax
from jax.experimental import pallas as pl
from jax.experimental.pallas import tpu as pltpu


# ---------------------------------------------------------------------------
# Relative-position tables.
#
# Reference builds R[2i, q, j] = sin((q-j) w_i), R[2i+1, q, j] = cos((q-j) w_i)
# with w_i = 10000^(-2i/head_dim).  Angle-difference identities factorize every
# channel as R[d, q, j] = Aq[q, d] * Ck[j, d] + Bq[q, d] * Sk[j, d], so the
# positional term sum_d (Q+v)[q,d] R[d,q,j] becomes part of one MXU contraction
# and the dense [hd, Sq, Sk] tensor never exists.
# ---------------------------------------------------------------------------
def make_rel_tables(sq, sk, head_dim):
    d = jnp.arange(head_dim)
    w = 10000.0 ** (-2.0 * (d // 2).astype(jnp.float32) / head_dim)      # [hd]
    is_even = (d % 2 == 0)[None, :]

    qang = jnp.arange(sq, dtype=jnp.float32)[:, None] * w[None, :]       # [Sq, hd]
    kang = jnp.arange(sk, dtype=jnp.float32)[:, None] * w[None, :]       # [Sk, hd]

    aq = jnp.where(is_even, jnp.sin(qang), jnp.cos(qang))                # [Sq, hd]
    bq = jnp.where(is_even, -jnp.cos(qang), jnp.sin(qang))               # [Sq, hd]
    ck = jnp.cos(kang)                                                   # [Sk, hd]
    sk_t = jnp.sin(kang)                                                 # [Sk, hd]
    return aq, bq, ck, sk_t


# ---------------------------------------------------------------------------
# Fused decoder-stack kernel: one grid step == one decoderBlock layer.
# ---------------------------------------------------------------------------
def _decoder_stack_kernel(
        x_ref, enc_kv_ref, mask_ref,
        aq_ref, bq_ref, cks_ref, sks_ref, ckc_ref, skc_ref,
        wqkv_s_ref, uv_s_ref, wo3_s_ref,
        wq_c_ref, wkv_c_ref, uv_c_ref, wo3_c_ref,
        w1_ref, b1_ref, w2_ref, dvec_ref,
        out_ref, act_ref,
        *, heads, head_dim, compute_dtype):
    layer = pl.program_id(0)

    @pl.when(layer == 0)
    def _init():
        act_ref[...] = x_ref[...]

    x = act_ref[...]                 # [Sd, D] carried decoder stream (f32)
    enc_kv = enc_kv_ref[...]         # [2, Se, D]  (row 0 = Enc_keys, 1 = Enc_values)
    mask_bias = mask_ref[...]        # [Sd, Sd] additive causal mask (0 / -1e18), f32
    aq = aq_ref[...]                 # [Sd, hd]
    bq = bq_ref[...]

    cd = compute_dtype
    is_f32 = jnp.dtype(cd) == jnp.dtype(jnp.float32)
    prec = lax.Precision.HIGHEST if is_f32 else None
    dim = x.shape[1]

    def mm(a, b):                    # [M,K]@[K,N] on the MXU, f32 accumulation
        return lax.dot_general(a.astype(cd), b.astype(cd),
                               (((1,), (0,)), ((), ())),
                               precision=prec,
                               preferred_element_type=jnp.float32)

    def bmm(a, b):                   # [H,M,K]@[H,K,N] -> [H,M,N]
        return lax.dot_general(a.astype(cd), b.astype(cd),
                               (((2,), (1,)), ((0,), (0,))),
                               precision=prec,
                               preferred_element_type=jnp.float32)

    def bmm_nt(a, b):                # [H,M,K]@[H,N,K]^T -> [H,M,N]
        return lax.dot_general(a.astype(cd), b.astype(cd),
                               (((2,), (2,)), ((0,), (0,))),
                               precision=prec,
                               preferred_element_type=jnp.float32)

    def split_heads(t):              # [S, D] -> [H, S, hd]  (one relayout per proj.)
        s = t.shape[0]
        return jnp.swapaxes(t.reshape(s, heads, head_dim), 0, 1)

    def layer_norm(y, g, b, eps=1e-5):
        mu = jnp.mean(y, axis=-1, keepdims=True)
        var = jnp.mean((y - mu) ** 2, axis=-1, keepdims=True)
        return (y - mu) * lax.rsqrt(var + eps) * g + b

    def rel_attention(q3, k3, v3, u, vv, ck, sk_tab, wo3, bo, mask_add, scale):
        # q3/k3/v3: [H, Sq/Sk, hd] (f32).  Single K=3*hd score contraction:
        #   att[h,q,j] = (q+u)[h,q,:]·k[h,j,:]
        #              + ((q+v)*aq)[h,q,:]·ck[j,:] + ((q+v)*bq)[h,q,:]·sk[j,:]
        sk_len = k3.shape[1]
        qv = q3 + vv[:, None, :]
        lhs = jnp.concatenate(
            [q3 + u[:, None, :], qv * aq[None], qv * bq[None]], axis=-1)   # [H,Sq,3hd]
        rhs = jnp.concatenate(
            [k3,
             jnp.broadcast_to(ck[None], (heads, sk_len, head_dim)),
             jnp.broadcast_to(sk_tab[None], (heads, sk_len, head_dim))],
            axis=-1)                                                        # [H,Sk,3hd]
        att = bmm_nt(lhs, rhs)                                              # [H,Sq,Sk] f32

        if mask_add is not None:
            att = att + mask_add[None]
        if scale:
            att = att * (head_dim ** -0.5)

        # softmax over keys (f32).  Exact divide on the f32 validation path;
        # EUP approx reciprocal on the bf16 performance path.
        att = jnp.exp(att - jnp.max(att, axis=-1, keepdims=True))
        denom = jnp.sum(att, axis=-1, keepdims=True)
        if is_f32:
            att = att / denom
        else:
            att = att * pl.reciprocal(denom, approx=True)

        # P@V (probabilities cast to the compute dtype in the bf16 path,
        # f32 accumulation — intentional, documented precision loss).
        out3 = bmm(att, v3)                                                 # [H,Sq,hd]
        # fold the head concat into the output projection:
        #   concat(heads) @ Wo == sum_h out3[h] @ Wo[h*hd:(h+1)*hd, :]
        partial = bmm(out3, wo3)                                            # [H,Sq,D]
        return jnp.sum(partial, axis=0) + bo

    dv = dvec_ref[0]                 # [9, D] f32
    bo_s, bo_c, b2 = dv[0], dv[1], dv[2]
    ng, nb = dv[3], dv[4]
    g0, b0 = dv[5], dv[6]
    g1, b1ln = dv[7], dv[8]
    uvs = uv_s_ref[0]                # [2, H, hd]
    uvc = uv_c_ref[0]

    # 1) masked relative self-attention on the decoder stream (scale=False).
    qkv = mm(x, wqkv_s_ref[0])                                  # [Sd, 3D]
    q3 = split_heads(qkv[:, :dim])
    k3 = split_heads(qkv[:, dim:2 * dim])
    v3 = split_heads(qkv[:, 2 * dim:])
    self_att = rel_attention(q3, k3, v3, uvs[0], uvs[1],
                             cks_ref[...], sks_ref[...],
                             wo3_s_ref[0], bo_s, mask_bias, scale=False)
    queries = layer_norm(self_att + x, ng, nb)

    # 2) cross-attention: queries from the decoder stream, K from Enc_keys,
    #    V from Enc_values (transformerBlock.attention, mask=False, scale=False).
    q3c = split_heads(mm(queries, wq_c_ref[0]))
    kvc = bmm(enc_kv, wkv_c_ref[0])                             # [2, Se, D]
    k3c = split_heads(kvc[0])
    v3c = split_heads(kvc[1])
    cross_att = rel_attention(q3c, k3c, v3c, uvc[0], uvc[1],
                              ckc_ref[...], skc_ref[...],
                              wo3_c_ref[0], bo_c, None, scale=False)
    x1 = layer_norm(cross_att + queries, g0, b0)

    # 3) feed-forward: Linear -> ELU -> Linear.
    hid = mm(x1, w1_ref[0]) + b1_ref[0, 0]
    hid = jnp.where(hid > 0, hid, jnp.exp(jnp.minimum(hid, 0.0)) - 1.0)
    ffw = mm(hid, w2_ref[0]) + b2

    new_x = layer_norm(ffw + x1, g1, b1ln)
    act_ref[...] = new_x

    @pl.when(layer == pl.num_programs(0) - 1)
    def _finalize():
        out_ref[...] = new_x


# ---------------------------------------------------------------------------
# Wrapper: stack per-layer weights on a leading layer axis and run ONE fused
# pallas_call over the whole decoder stack.
# ---------------------------------------------------------------------------
def decoder_stack_forward(x, enc_keys, enc_values, layer_params, *, heads,
                          head_dim, compute_dtype=jnp.bfloat16,
                          vmem_limit_bytes=None):
    s_dec, dim = x.shape
    s_enc = enc_keys.shape[0]
    num_layers = len(layer_params)

    is_f32 = jnp.dtype(compute_dtype) == jnp.dtype(jnp.float32)
    wdt = compute_dtype                       # weight / matmul-operand stream dtype
    sdt = jnp.float32 if is_f32 else compute_dtype   # tables / encoder-stream dtype

    # layer-invariant inputs --------------------------------------------------
    aq, bq, cks, sks = make_rel_tables(s_dec, s_dec, head_dim)
    _, _, ckc, skc = make_rel_tables(s_dec, s_enc, head_dim)
    aq, bq = aq.astype(sdt), bq.astype(sdt)
    cks, sks, ckc, skc = (t.astype(sdt) for t in (cks, sks, ckc, skc))
    enc_kv = jnp.stack([enc_keys, enc_values], axis=0).astype(sdt)   # [2, Se, D]
    keep = (jnp.arange(s_dec)[:, None] >= jnp.arange(s_dec)[None, :])
    mask_bias = jnp.where(keep, 0.0, -1e18).astype(jnp.float32)      # [Sd, Sd]

    # per-layer weight slabs --------------------------------------------------
    def stack(fn, dtype=jnp.float32):
        return jnp.stack([fn(p) for p in layer_params], axis=0).astype(dtype)

    wqkv_s = stack(lambda p: jnp.concatenate(
        [p["self"]["wq"], p["self"]["wk"], p["self"]["wv"]], axis=1), wdt)   # [L,D,3D]
    uv_s = stack(lambda p: jnp.stack([p["self"]["u"], p["self"]["v"]], 0))   # [L,2,H,hd]
    wo3_s = stack(lambda p: p["self"]["wo"].reshape(heads, head_dim, dim), wdt)
    wq_c = stack(lambda p: p["cross"]["wq"], wdt)                            # [L,D,D]
    wkv_c = stack(lambda p: jnp.stack(
        [p["cross"]["wk"], p["cross"]["wv"]], axis=0), wdt)                  # [L,2,D,D]
    uv_c = stack(lambda p: jnp.stack([p["cross"]["u"], p["cross"]["v"]], 0))
    wo3_c = stack(lambda p: p["cross"]["wo"].reshape(heads, head_dim, dim), wdt)
    w1 = stack(lambda p: p["w1"], wdt)                                       # [L,D,FF]
    b1 = stack(lambda p: p["b1"].reshape(1, -1))                             # [L,1,FF]
    w2 = stack(lambda p: p["w2"], wdt)                                       # [L,FF,D]
    dvecs = stack(lambda p: jnp.stack(
        [p["self"]["bo"], p["cross"]["bo"], p["b2"],
         p["norm_g"], p["norm_b"], p["ln0_g"], p["ln0_b"],
         p["ln1_g"], p["ln1_b"]], axis=0))                                   # [L,9,D]

    fulls = (x, enc_kv, mask_bias, aq, bq, cks, sks, ckc, skc)
    per_layer = (wqkv_s, uv_s, wo3_s, wq_c, wkv_c, uv_c, wo3_c,
                 w1, b1, w2, dvecs)
    inputs = fulls + per_layer

    def full_spec(a):      # whole array resident, same block every layer
        nd = a.ndim
        return pl.BlockSpec(a.shape, lambda l, _nd=nd: (0,) * _nd)

    def layer_spec(a):     # per-layer slab: layer l+1 weights DMA while layer l computes
        nd = a.ndim
        return pl.BlockSpec((1,) + a.shape[1:],
                            lambda l, _nd=nd: (l,) + (0,) * (_nd - 1))

    in_specs = [full_spec(a) for a in fulls] + [layer_spec(a) for a in per_layer]

    # VMEM limit derived from the real footprint (2x double-buffered weight
    # slabs, 4x slack for sublane/lane padding + intermediates, 8 MiB headroom),
    # clamped to <= 32 MiB so it is safe on v7x's 64 MiB/TC as well.
    if vmem_limit_bytes is None:
        nbytes = lambda a: int(a.size) * jnp.dtype(a.dtype).itemsize
        full_b = sum(nbytes(a) for a in fulls)
        slab_b = sum(nbytes(a) for a in per_layer) // num_layers
        vmem_limit_bytes = min(32 * 1024 * 1024,
                               max(8 * 1024 * 1024,
                                   4 * (full_b + 2 * slab_b) + 8 * 1024 * 1024))

    kernel = functools.partial(_decoder_stack_kernel, heads=heads,
                               head_dim=head_dim, compute_dtype=compute_dtype)

    return pl.pallas_call(
        kernel,
        out_shape=jax.ShapeDtypeStruct((s_dec, dim), jnp.float32),
        grid_spec=pltpu.PrefetchScalarGridSpec(
            num_scalar_prefetch=0,
            grid=(num_layers,),
            in_specs=in_specs,
            out_specs=pl.BlockSpec((s_dec, dim), lambda l: (0, 0)),
            scratch_shapes=[pltpu.VMEM((s_dec, dim), jnp.float32)],
        ),
        compiler_params=pltpu.CompilerParams(
            dimension_semantics=("arbitrary",),   # layers are sequential
            vmem_limit_bytes=int(vmem_limit_bytes)),
    )(*inputs)


# ---------------------------------------------------------------------------
# Pure-JAX reference (direct port of the PyTorch module, dense R) — used to
# validate the kernel's f32 compute path.
# ---------------------------------------------------------------------------
_PREC = lax.Precision.HIGHEST


def _ref_layer_norm(y, g, b, eps=1e-5):
    mu = jnp.mean(y, axis=-1, keepdims=True)
    var = jnp.mean((y - mu) ** 2, axis=-1, keepdims=True)
    return (y - mu) / jnp.sqrt(var + eps) * g + b


def _ref_rel_attention(value, key, query, p, *, heads, head_dim, scale, mask):
    sq, dim = query.shape
    sk = key.shape[0]
    q = jnp.matmul(query, p["wq"], precision=_PREC).reshape(sq, heads, head_dim).transpose(1, 0, 2)
    k = jnp.matmul(key, p["wk"], precision=_PREC).reshape(sk, heads, head_dim).transpose(1, 0, 2)
    v = jnp.matmul(value, p["wv"], precision=_PREC).reshape(sk, heads, head_dim).transpose(1, 0, 2)

    pos = (jnp.arange(sq, dtype=jnp.float32)[:, None]
           - jnp.arange(sk, dtype=jnp.float32)[None, :])                 # [Sq, Sk]
    d = jnp.arange(head_dim)
    freq = 10000.0 ** (-2.0 * (d // 2).astype(jnp.float32) / head_dim)
    ang = pos[None, :, :] * freq[:, None, None]                          # [hd, Sq, Sk]
    R = jnp.where((d % 2 == 0)[:, None, None], jnp.sin(ang), jnp.cos(ang))

    att = jnp.einsum('hqd,hkd->hqk', q, k, precision=_PREC)
    att = att + jnp.einsum('hqd,dqk->hqk', q, R, precision=_PREC)
    att = att + jnp.einsum('hd,hkd->hk', p["u"], k, precision=_PREC)[:, None, :]
    att = att + jnp.einsum('hd,dqk->hqk', p["v"], R, precision=_PREC)
    if mask:
        keep = jnp.arange(sq)[:, None] >= jnp.arange(sk)[None, :]
        att = jnp.where(keep, att, jnp.float32(-1e18))
    if scale:
        att = att * head_dim ** -0.5
    att = jax.nn.softmax(att, axis=-1)
    out = jnp.einsum('hqk,hkd->hqd', att, v, precision=_PREC)
    out = out.transpose(1, 0, 2).reshape(sq, dim)
    return jnp.matmul(out, p["wo"], precision=_PREC) + p["bo"]


def _ref_decoder_block(x, values, keys, p, *, heads, head_dim):
    att = _ref_rel_attention(x, x, x, p["self"], heads=heads,
                             head_dim=head_dim, scale=False, mask=True)
    queries = _ref_layer_norm(att + x, p["norm_g"], p["norm_b"])
    att2 = _ref_rel_attention(values, keys, queries, p["cross"], heads=heads,
                              head_dim=head_dim, scale=False, mask=False)
    x1 = _ref_layer_norm(att2 + queries, p["ln0_g"], p["ln0_b"])
    h = jnp.matmul(x1, p["w1"], precision=_PREC) + p["b1"]
    h = jnp.where(h > 0, h, jnp.exp(jnp.minimum(h, 0.0)) - 1.0)          # ELU
    ffw = jnp.matmul(h, p["w2"], precision=_PREC) + p["b2"]
    return _ref_layer_norm(ffw + x1, p["ln1_g"], p["ln1_b"])


def decoder_stack_reference(x, enc_keys, enc_values, layer_params, *, heads,
                            head_dim):
    out = x
    for p in layer_params:
        out = _ref_decoder_block(out, enc_values, enc_keys, p, heads=heads,
                                 head_dim=head_dim)
    return out


# ---------------------------------------------------------------------------
# Parameter init (nn.Linear-style uniform; distinct keys for every tensor).
# ---------------------------------------------------------------------------
def _uniform(key, shape, bound):
    return jax.random.uniform(key, shape, jnp.float32, -bound, bound)


def init_attention_params(key, model_dim, heads):
    hd = model_dim // heads
    ks = jax.random.split(key, 7)
    bound = 1.0 / (model_dim ** 0.5)
    return {
        # per-head projections stored as full-width [D, D] matrices (columns
        # h*hd:(h+1)*hd == head h), so the kernel runs a single fused matmul.
        "wq": _uniform(ks[0], (model_dim, model_dim), bound),
        "wk": _uniform(ks[1], (model_dim, model_dim), bound),
        "wv": _uniform(ks[2], (model_dim, model_dim), bound),
        "u": jax.random.uniform(ks[3], (heads, hd), jnp.float32),   # torch.rand-like
        "v": jax.random.uniform(ks[4], (heads, hd), jnp.float32),
        "wo": _uniform(ks[5], (model_dim, model_dim), bound),       # output Linear (W^T)
        "bo": _uniform(ks[6], (model_dim,), bound),
    }


def init_decoder_block_params(key, model_dim, heads, forward_expansion):
    ff = model_dim * forward_expansion
    ks = jax.random.split(key, 6)
    return {
        "self": init_attention_params(ks[0], model_dim, heads),
        "cross": init_attention_params(ks[1], model_dim, heads),
        "norm_g": jnp.ones((model_dim,), jnp.float32),
        "norm_b": jnp.zeros((model_dim,), jnp.float32),
        "ln0_g": jnp.ones((model_dim,), jnp.float32),
        "ln0_b": jnp.zeros((model_dim,), jnp.float32),
        "ln1_g": jnp.ones((model_dim,), jnp.float32),
        "ln1_b": jnp.zeros((model_dim,), jnp.float32),
        "w1": _uniform(ks[2], (model_dim, ff), 1.0 / model_dim ** 0.5),
        "b1": _uniform(ks[3], (ff,), 1.0 / model_dim ** 0.5),
        "w2": _uniform(ks[4], (ff, model_dim), 1.0 / ff ** 0.5),
        "b2": _uniform(ks[5], (model_dim,), 1.0 / ff ** 0.5),
    }


if __name__ == "__main__":
    model_dim, heads, num_layers, forward_expansion = 128, 4, 2, 4
    s_dec, s_enc, num_classes = 8, 16, 10
    head_dim = model_dim // heads

    root = jax.random.PRNGKey(0)
    kx, kk, kv, kp, ko = jax.random.split(root, 5)
    x = jax.random.normal(kx, (s_dec, model_dim), jnp.float32)            # decoder stream
    enc_keys = jax.random.normal(kk, (s_enc, model_dim), jnp.float32)     # encoder keys
    enc_values = jax.random.normal(kv, (s_enc, model_dim), jnp.float32)   # encoder values
    layer_params = [
        init_decoder_block_params(jax.random.fold_in(kp, i), model_dim, heads,
                                  forward_expansion)
        for i in range(num_layers)
    ]

    # --- correctness: f32 compute path vs. the pure-JAX port of the PyTorch code
    out_f32 = jax.block_until_ready(
        decoder_stack_forward(x, enc_keys, enc_values, layer_params,
                              heads=heads, head_dim=head_dim,
                              compute_dtype=jnp.float32))
    ref = decoder_stack_reference(x, enc_keys, enc_values, layer_params,
                                  heads=heads, head_dim=head_dim)
    err = float(jnp.max(jnp.abs(out_f32 - ref)))
    assert err < 2e-3, f"f32 kernel mismatch vs reference: max |err| = {err}"

    # --- performance path: bf16 matmul operands (incl. softmax probabilities),
    #     f32 accumulation / softmax / LayerNorm.  Validated with a looser,
    #     bf16-appropriate tolerance against the f32 reference.
    out = jax.block_until_ready(
        decoder_stack_forward(x, enc_keys, enc_values, layer_params,
                              heads=heads, head_dim=head_dim,
                              compute_dtype=jnp.bfloat16))
    assert out.shape == (s_dec, model_dim)
    assert bool(jnp.all(jnp.isfinite(out)))
    err_bf16 = float(jnp.max(jnp.abs(out - ref)))
    assert err_bf16 < 0.5, f"bf16 path drifted too far: max |err| = {err_bf16}"

    # Output head for one decode step (tiny -> plain JAX): linear_Out on the
    # last position + softmax over classes.
    w_out = _uniform(ko, (model_dim, num_classes), 1.0 / model_dim ** 0.5)
    b_out = _uniform(jax.random.fold_in(ko, 1), (num_classes,),
                     1.0 / model_dim ** 0.5)
    probs = jax.nn.softmax(out[-1] @ w_out + b_out, axis=0)
    assert bool(jnp.all(jnp.isfinite(probs)))
    # TODO(synk): the autoregressive greedy decode loop (heapq argmax over a
    # python word-embedding dict, dynamic sequence growth) has no Pallas
    # equivalent; this script runs one full decode step of the layer stack.

    print("KERNEL_OK")
</pallas_src>

<mosaic_0001>
module attributes {stable_mosaic.version = 11 : i64} {
  func.func @_decoder_stack_kernel(%arg0: i32, %arg1: memref<8x128xf32, #tpu.memory_space<vmem>>, %arg2: memref<2x16x128xf32, #tpu.memory_space<vmem>>, %arg3: memref<8x8xf32, #tpu.memory_space<vmem>>, %arg4: memref<8x32xf32, #tpu.memory_space<vmem>>, %arg5: memref<8x32xf32, #tpu.memory_space<vmem>>, %arg6: memref<8x32xf32, #tpu.memory_space<vmem>>, %arg7: memref<8x32xf32, #tpu.memory_space<vmem>>, %arg8: memref<16x32xf32, #tpu.memory_space<vmem>>, %arg9: memref<16x32xf32, #tpu.memory_space<vmem>>, %arg10: memref<1x128x384xf32, #tpu.memory_space<vmem>>, %arg11: memref<1x2x4x32xf32, #tpu.memory_space<vmem>>, %arg12: memref<1x4x32x128xf32, #tpu.memory_space<vmem>>, %arg13: memref<1x128x128xf32, #tpu.memory_space<vmem>>, %arg14: memref<1x2x128x128xf32, #tpu.memory_space<vmem>>, %arg15: memref<1x2x4x32xf32, #tpu.memory_space<vmem>>, %arg16: memref<1x4x32x128xf32, #tpu.memory_space<vmem>>, %arg17: memref<1x128x512xf32, #tpu.memory_space<vmem>>, %arg18: memref<1x1x512xf32, #tpu.memory_space<vmem>>, %arg19: memref<1x512x128xf32, #tpu.memory_space<vmem>>, %arg20: memref<1x9x128xf32, #tpu.memory_space<vmem>>, %arg21: memref<8x128xf32, #tpu.memory_space<vmem>>, %arg22: memref<8x128xf32, #tpu.memory_space<vmem>>) attributes {dimension_semantics = [#tpu.dimension_semantics<arbitrary>], iteration_bounds = array<i64: 2>, scalar_prefetch = 0 : i64, scratch_operands = 1 : i64, tpu.core_type = #tpu.core_type<tc>, window_params = [{pipeline_mode = #tpu.pipeline_mode<synchronous>, transform_indices = @transform_0, window_bounds = array<i64: 8, 128>}, {pipeline_mode = #tpu.pipeline_mode<synchronous>, transform_indices = @transform_1, window_bounds = array<i64: 2, 16, 128>}, {pipeline_mode = #tpu.pipeline_mode<synchronous>, transform_indices = @transform_2, window_bounds = array<i64: 8, 8>}, {pipeline_mode = #tpu.pipeline_mode<synchronous>, transform_indices = @transform_3, window_bounds = array<i64: 8, 32>}, {pipeline_mode = #tpu.pipeline_mode<synchronous>, transform_indices = @transform_4, window_bounds = array<i64: 8, 32>}, {pipeline_mode = #tpu.pipeline_mode<synchronous>, transform_indices = @transform_5, window_bounds = array<i64: 8, 32>}, {pipeline_mode = #tpu.pipeline_mode<synchronous>, transform_indices = @transform_6, window_bounds = array<i64: 8, 32>}, {pipeline_mode = #tpu.pipeline_mode<synchronous>, transform_indices = @transform_7, window_bounds = array<i64: 16, 32>}, {pipeline_mode = #tpu.pipeline_mode<synchronous>, transform_indices = @transform_8, window_bounds = array<i64: 16, 32>}, {transform_indices = @transform_9, window_bounds = array<i64: 1, 128, 384>}, {transform_indices = @transform_10, window_bounds = array<i64: 1, 2, 4, 32>}, {transform_indices = @transform_11, window_bounds = array<i64: 1, 4, 32, 128>}, {transform_indices = @transform_12, window_bounds = array<i64: 1, 128, 128>}, {transform_indices = @transform_13, window_bounds = array<i64: 1, 2, 128, 128>}, {transform_indices = @transform_14, window_bounds = array<i64: 1, 2, 4, 32>}, {transform_indices = @transform_15, window_bounds = array<i64: 1, 4, 32, 128>}, {transform_indices = @transform_16, window_bounds = array<i64: 1, 128, 512>}, {transform_indices = @transform_17, window_bounds = array<i64: 1, 1, 512>}, {transform_indices = @transform_18, window_bounds = array<i64: 1, 512, 128>}, {transform_indices = @transform_19, window_bounds = array<i64: 1, 9, 128>}, {pipeline_mode = #tpu.pipeline_mode<synchronous>, transform_indices = @transform_20, window_bounds = array<i64: 8, 128>}]} {
    %c0_i32 = arith.constant 0 : i32
    %0 = arith.cmpi eq, %arg0, %c0_i32 : i32
    %1 = arith.extui %0 : i1 to i32
    %c0_i32_0 = arith.constant 0 : i32
    %2 = arith.cmpi ne, %1, %c0_i32_0 : i32
    scf.if %2 {
      %c0_94 = arith.constant 0 : index
      %c0_95 = arith.constant 0 : index
      %252 = vector.load %arg1[%c0_94, %c0_95] : memref<8x128xf32, #tpu.memory_space<vmem>>, vector<8x128xf32>
      %c0_96 = arith.constant 0 : index
      %c0_97 = arith.constant 0 : index
      %253 = vector.load %arg22[%c0_96, %c0_97] : memref<8x128xf32, #tpu.memory_space<vmem>>, vector<8x128xf32>
      tpu.vector_store %arg22[%c0_96, %c0_97], %252 {strides = array<i32>} : memref<8x128xf32, #tpu.memory_space<vmem>>, vector<8x128xf32>,
    } else {
    }
    %c0 = arith.constant 0 : index
    %c0_1 = arith.constant 0 : index
    %3 = vector.load %arg22[%c0, %c0_1] : memref<8x128xf32, #tpu.memory_space<vmem>>, vector<8x128xf32>
    %c0_2 = arith.constant 0 : index
    %c0_3 = arith.constant 0 : index
    %c0_4 = arith.constant 0 : index
    %4 = vector.load %arg2[%c0_2, %c0_3, %c0_4] : memref<2x16x128xf32, #tpu.memory_space<vmem>>, vector<2x16x128xf32>
    %c0_5 = arith.constant 0 : index
    %c0_6 = arith.constant 0 : index
    %5 = vector.load %arg3[%c0_5, %c0_6] : memref<8x8xf32, #tpu.memory_space<vmem>>, vector<8x8xf32>
    %c0_7 = arith.constant 0 : index
    %c0_8 = arith.constant 0 : index
    %6 = vector.load %arg4[%c0_7, %c0_8] : memref<8x32xf32, #tpu.memory_space<vmem>>, vector<8x32xf32>
    %c0_9 = arith.constant 0 : index
    %c0_10 = arith.constant 0 : index
    %7 = vector.load %arg5[%c0_9, %c0_10] : memref<8x32xf32, #tpu.memory_space<vmem>>, vector<8x32xf32>
    %c0_11 = arith.constant 0 : index
    %c0_12 = arith.constant 0 : index
    %c0_13 = arith.constant 0 : index
    %8 = vector.load %arg20[%c0_11, %c0_12, %c0_13] : memref<1x9x128xf32, #tpu.memory_space<vmem>>, vector<1x9x128xf32>
    %9 = vector.shape_cast %8 : vector<1x9x128xf32> to vector<9x128xf32>
    %10 = vector.extract_strided_slice %9 {offsets = [0, 0], sizes = [1, 128], strides = [1, 1]} : vector<9x128xf32> to vector<1x128xf32>
    %11 = vector.shape_cast %10 : vector<1x128xf32> to vector<128xf32>
    %12 = vector.extract_strided_slice %9 {offsets = [1, 0], sizes = [1, 128], strides = [1, 1]} : vector<9x128xf32> to vector<1x128xf32>
    %13 = vector.shape_cast %12 : vector<1x128xf32> to vector<128xf32>
    %14 = vector.extract_strided_slice %9 {offsets = [2, 0], sizes = [1, 128], strides = [1, 1]} : vector<9x128xf32> to vector<1x128xf32>
    %15 = vector.shape_cast %14 : vector<1x128xf32> to vector<128xf32>
    %16 = vector.extract_strided_slice %9 {offsets = [3, 0], sizes = [1, 128], strides = [1, 1]} : vector<9x128xf32> to vector<1x128xf32>
    %17 = vector.shape_cast %16 : vector<1x128xf32> to vector<128xf32>
    %18 = vector.extract_strided_slice %9 {offsets = [4, 0], sizes = [1, 128], strides = [1, 1]} : vector<9x128xf32> to vector<1x128xf32>
    %19 = vector.shape_cast %18 : vector<1x128xf32> to vector<128xf32>
    %20 = vector.extract_strided_slice %9 {offsets = [5, 0], sizes = [1, 128], strides = [1, 1]} : vector<9x128xf32> to vector<1x128xf32>
    %21 = vector.shape_cast %20 : vector<1x128xf32> to vector<128xf32>
    %22 = vector.extract_strided_slice %9 {offsets = [6, 0], sizes = [1, 128], strides = [1, 1]} : vector<9x128xf32> to vector<1x128xf32>
    %23 = vector.shape_cast %22 : vector<1x128xf32> to vector<128xf32>
    %24 = vector.extract_strided_slice %9 {offsets = [7, 0], sizes = [1, 128], strides = [1, 1]} : vector<9x128xf32> to vector<1x128xf32>
    %25 = vector.shape_cast %24 : vector<1x128xf32> to vector<128xf32>
    %26 = vector.extract_strided_slice %9 {offsets = [8, 0], sizes = [1, 128], strides = [1, 1]} : vector<9x128xf32> to vector<1x128xf32>
    %27 = vector.shape_cast %26 : vector<1x128xf32> to vector<128xf32>
    %c0_14 = arith.constant 0 : index
    %c0_15 = arith.constant 0 : index
    %c0_16 = arith.constant 0 : index
    %c0_17 = arith.constant 0 : index
    %28 = vector.load %arg11[%c0_14, %c0_15, %c0_16, %c0_17] : memref<1x2x4x32xf32, #tpu.memory_space<vmem>>, vector<1x2x4x32xf32>
    %29 = vector.shape_cast %28 : vector<1x2x4x32xf32> to vector<2x4x32xf32>
    %c0_18 = arith.constant 0 : index
    %c0_19 = arith.constant 0 : index
    %c0_20 = arith.constant 0 : index
    %c0_21 = arith.constant 0 : index
    %30 = vector.load %arg15[%c0_18, %c0_19, %c0_20, %c0_21] : memref<1x2x4x32xf32, #tpu.memory_space<vmem>>, vector<1x2x4x32xf32>
    %31 = vector.shape_cast %30 : vector<1x2x4x32xf32> to vector<2x4x32xf32>
    %c0_22 = arith.constant 0 : index
    %c0_23 = arith.constant 0 : index
    %c0_24 = arith.constant 0 : index
    %32 = vector.load %arg10[%c0_22, %c0_23, %c0_24] : memref<1x128x384xf32, #tpu.memory_space<vmem>>, vector<1x128x384xf32>
    %33 = vector.shape_cast %32 : vector<1x128x384xf32> to vector<128x384xf32>
    %cst = arith.constant dense<0.000000e+00> : vector<8x384xf32>
    %34 = tpu.matmul %3, %33, %cst {dimension_numbers = #tpu.dot_dimension_numbers<[1], [0], [0], [1], [0, 0, 1, 1], [], []>, precision = #tpu.contract_precision<fp32>} : vector<8x128xf32>, vector<128x384xf32>, vector<8x384xf32> -> vector<8x384xf32>
    %35 = vector.extract_strided_slice %34 {offsets = [0, 0], sizes = [8, 128], strides = [1, 1]} : vector<8x384xf32> to vector<8x128xf32>
    %36 = vector.shape_cast %35 : vector<8x128xf32> to vector<8x4x32xf32>
    %37 = tpu.transpose %36, [1, 0, 2] : vector<8x4x32xf32> -> vector<4x8x32xf32>
    %38 = vector.extract_strided_slice %34 {offsets = [0, 128], sizes = [8, 128], strides = [1, 1]} : vector<8x384xf32> to vector<8x128xf32>
    %39 = vector.shape_cast %38 : vector<8x128xf32> to vector<8x4x32xf32>
    %40 = tpu.transpose %39, [1, 0, 2] : vector<8x4x32xf32> -> vector<4x8x32xf32>
    %41 = vector.extract_strided_slice %34 {offsets = [0, 256], sizes = [8, 128], strides = [1, 1]} : vector<8x384xf32> to vector<8x128xf32>
    %42 = vector.shape_cast %41 : vector<8x128xf32> to vector<8x4x32xf32>
    %43 = tpu.transpose %42, [1, 0, 2] : vector<8x4x32xf32> -> vector<4x8x32xf32>
    %44 = vector.extract_strided_slice %29 {offsets = [0, 0, 0], sizes = [1, 4, 32], strides = [1, 1, 1]} : vector<2x4x32xf32> to vector<1x4x32xf32>
    %45 = vector.shape_cast %44 : vector<1x4x32xf32> to vector<4x32xf32>
    %46 = vector.extract_strided_slice %29 {offsets = [1, 0, 0], sizes = [1, 4, 32], strides = [1, 1, 1]} : vector<2x4x32xf32> to vector<1x4x32xf32>
    %47 = vector.shape_cast %46 : vector<1x4x32xf32> to vector<4x32xf32>
    %c0_25 = arith.constant 0 : index
    %c0_26 = arith.constant 0 : index
    %48 = vector.load %arg6[%c0_25, %c0_26] : memref<8x32xf32, #tpu.memory_space<vmem>>, vector<8x32xf32>
    %c0_27 = arith.constant 0 : index
    %c0_28 = arith.constant 0 : index
    %49 = vector.load %arg7[%c0_27, %c0_28] : memref<8x32xf32, #tpu.memory_space<vmem>>, vector<8x32xf32>
    %c0_29 = arith.constant 0 : index
    %c0_30 = arith.constant 0 : index
    %c0_31 = arith.constant 0 : index
    %c0_32 = arith.constant 0 : index
    %50 = vector.load %arg12[%c0_29, %c0_30, %c0_31, %c0_32] : memref<1x4x32x128xf32, #tpu.memory_space<vmem>>, vector<1x4x32x128xf32>
    %51 = vector.shape_cast %50 : vector<1x4x32x128xf32> to vector<4x32x128xf32>
    %52 = vector.shape_cast %47 : vector<4x32xf32> to vector<4x1x32xf32>
    %53 = vector.broadcast %52 : vector<4x1x32xf32> to vector<4x8x32xf32>
    %54 = arith.addf %37, %53 : vector<4x8x32xf32>
    %55 = vector.shape_cast %45 : vector<4x32xf32> to vector<4x1x32xf32>
    %56 = vector.broadcast %55 : vector<4x1x32xf32> to vector<4x8x32xf32>
    %57 = arith.addf %37, %56 : vector<4x8x32xf32>
    %58 = vector.shape_cast %6 : vector<8x32xf32> to vector<1x8x32xf32>
    %59 = vector.broadcast %58 : vector<1x8x32xf32> to vector<4x8x32xf32>
    %60 = arith.mulf %54, %59 : vector<4x8x32xf32>
    %61 = vector.shape_cast %7 : vector<8x32xf32> to vector<1x8x32xf32>
    %62 = vector.broadcast %61 : vector<1x8x32xf32> to vector<4x8x32xf32>
    %63 = arith.mulf %54, %62 : vector<4x8x32xf32>
    %64 = tpu.concatenate %57, %60, %63 in 2 : vector<4x8x32xf32>, vector<4x8x32xf32>, vector<4x8x32xf32> -> vector<4x8x96xf32>
    %65 = vector.shape_cast %48 : vector<8x32xf32> to vector<1x8x32xf32>
    %66 = vector.shape_cast %65 : vector<1x8x32xf32> to vector<1x8x32xf32>
    %67 = vector.broadcast %66 : vector<1x8x32xf32> to vector<4x8x32xf32>
    %68 = vector.shape_cast %49 : vector<8x32xf32> to vector<1x8x32xf32>
    %69 = vector.shape_cast %68 : vector<1x8x32xf32> to vector<1x8x32xf32>
    %70 = vector.broadcast %69 : vector<1x8x32xf32> to vector<4x8x32xf32>
    %71 = tpu.concatenate %40, %67, %70 in 2 : vector<4x8x32xf32>, vector<4x8x32xf32>, vector<4x8x32xf32> -> vector<4x8x96xf32>
    %cst_33 = arith.constant dense<0.000000e+00> : vector<4x8x8xf32>
    %72 = tpu.matmul %64, %71, %cst_33 {dimension_numbers = #tpu.dot_dimension_numbers<[2], [2], [1], [1], [0, 0, 0, 1, 1, 1], [0], [0]>, precision = #tpu.contract_precision<fp32>} : vector<4x8x96xf32>, vector<4x8x96xf32>, vector<4x8x8xf32> -> vector<4x8x8xf32>
    %73 = vector.shape_cast %5 : vector<8x8xf32> to vector<1x8x8xf32>
    %74 = vector.broadcast %73 : vector<1x8x8xf32> to vector<4x8x8xf32>
    %75 = arith.addf %72, %74 : vector<4x8x8xf32>
    %cst_34 = arith.constant dense<0xFF800000> : vector<4x8xf32>
    %76 = vector.multi_reduction <maximumf>, %75, %cst_34 [2] : vector<4x8x8xf32> to vector<4x8xf32>
    %77 = vector.shape_cast %76 : vector<4x8xf32> to vector<4x8x1xf32>
    %78 = vector.broadcast %77 : vector<4x8x1xf32> to vector<4x8x8xf32>
    %79 = arith.subf %75, %78 : vector<4x8x8xf32>
    %80 = math.exp %79 : vector<4x8x8xf32>
    %cst_35 = arith.constant dense<0.000000e+00> : vector<4x8xf32>
    %81 = vector.multi_reduction <add>, %80, %cst_35 [2] : vector<4x8x8xf32> to vector<4x8xf32>
    %82 = vector.shape_cast %81 : vector<4x8xf32> to vector<4x8x1xf32>
    %83 = vector.broadcast %82 : vector<4x8x1xf32> to vector<4x8x8xf32>
    %84 = arith.divf %80, %83 : vector<4x8x8xf32>
    %cst_36 = arith.constant dense<0.000000e+00> : vector<4x8x32xf32>
    %85 = tpu.matmul %84, %43, %cst_36 {dimension_numbers = #tpu.dot_dimension_numbers<[2], [1], [1], [2], [0, 0, 0, 1, 1, 2], [0], [0]>, precision = #tpu.contract_precision<fp32>} : vector<4x8x8xf32>, vector<4x8x32xf32>, vector<4x8x32xf32> -> vector<4x8x32xf32>
    %cst_37 = arith.constant dense<0.000000e+00> : vector<4x8x128xf32>
    %86 = tpu.matmul %85, %51, %cst_37 {dimension_numbers = #tpu.dot_dimension_numbers<[2], [1], [1], [2], [0, 0, 0, 1, 1, 2], [0], [0]>, precision = #tpu.contract_precision<fp32>} : vector<4x8x32xf32>, vector<4x32x128xf32>, vector<4x8x128xf32> -> vector<4x8x128xf32>
    %cst_38 = arith.constant dense<0.000000e+00> : vector<8x128xf32>
    %87 = vector.multi_reduction <add>, %86, %cst_38 [0] : vector<4x8x128xf32> to vector<8x128xf32>
    %88 = vector.shape_cast %11 : vector<128xf32> to vector<1x128xf32>
    %89 = vector.broadcast %88 : vector<1x128xf32> to vector<8x128xf32>
    %90 = arith.addf %87, %89 : vector<8x128xf32>
    %91 = arith.addf %90, %3 : vector<8x128xf32>
    %cst_39 = arith.constant dense<0.000000e+00> : vector<8xf32>
    %92 = vector.multi_reduction <add>, %91, %cst_39 [1] : vector<8x128xf32> to vector<8xf32>
    %93 = vector.shape_cast %92 : vector<8xf32> to vector<8x1xf32>
    %cst_40 = arith.constant 1.280000e+02 : f32
    %94 = vector.broadcast %cst_40 : f32 to vector<8x1xf32>
    %95 = arith.divf %93, %94 : vector<8x1xf32>
    %96 = vector.broadcast %95 : vector<8x1xf32> to vector<8x128xf32>
    %97 = arith.subf %91, %96 : vector<8x128xf32>
    %98 = arith.mulf %97, %97 : vector<8x128xf32>
    %cst_41 = arith.constant dense<0.000000e+00> : vector<8xf32>
    %99 = vector.multi_reduction <add>, %98, %cst_41 [1] : vector<8x128xf32> to vector<8xf32>
    %100 = vector.shape_cast %99 : vector<8xf32> to vector<8x1xf32>
    %cst_42 = arith.constant 1.280000e+02 : f32
    %101 = vector.broadcast %cst_42 : f32 to vector<8x1xf32>
    %102 = arith.divf %100, %101 : vector<8x1xf32>
    %103 = vector.broadcast %95 : vector<8x1xf32> to vector<8x128xf32>
    %104 = arith.subf %91, %103 : vector<8x128xf32>
    %cst_43 = arith.constant 9.99999974E-6 : f32
    %105 = vector.broadcast %cst_43 : f32 to vector<8x1xf32>
    %106 = arith.addf %102, %105 : vector<8x1xf32>
    %107 = math.rsqrt %106 : vector<8x1xf32>
    %108 = vector.broadcast %107 : vector<8x1xf32> to vector<8x128xf32>
    %109 = arith.mulf %104, %108 : vector<8x128xf32>
    %110 = vector.shape_cast %17 : vector<128xf32> to vector<1x128xf32>
    %111 = vector.broadcast %110 : vector<1x128xf32> to vector<8x128xf32>
    %112 = arith.mulf %109, %111 : vector<8x128xf32>
    %113 = vector.shape_cast %19 : vector<128xf32> to vector<1x128xf32>
    %114 = vector.broadcast %113 : vector<1x128xf32> to vector<8x128xf32>
    %115 = arith.addf %112, %114 : vector<8x128xf32>
    %c0_44 = arith.constant 0 : index
    %c0_45 = arith.constant 0 : index
    %c0_46 = arith.constant 0 : index
    %116 = vector.load %arg13[%c0_44, %c0_45, %c0_46] : memref<1x128x128xf32, #tpu.memory_space<vmem>>, vector<1x128x128xf32>
    %117 = vector.shape_cast %116 : vector<1x128x128xf32> to vector<128x128xf32>
    %cst_47 = arith.constant dense<0.000000e+00> : vector<8x128xf32>
    %118 = tpu.matmul %115, %117, %cst_47 {dimension_numbers = #tpu.dot_dimension_numbers<[1], [0], [0], [1], [0, 0, 1, 1], [], []>, precision = #tpu.contract_precision<fp32>} : vector<8x128xf32>, vector<128x128xf32>, vector<8x128xf32> -> vector<8x128xf32>
    %119 = vector.shape_cast %118 : vector<8x128xf32> to vector<8x4x32xf32>
    %120 = tpu.transpose %119, [1, 0, 2] : vector<8x4x32xf32> -> vector<4x8x32xf32>
    %c0_48 = arith.constant 0 : index
    %c0_49 = arith.constant 0 : index
    %c0_50 = arith.constant 0 : index
    %c0_51 = arith.constant 0 : index
    %121 = vector.load %arg14[%c0_48, %c0_49, %c0_50, %c0_51] : memref<1x2x128x128xf32, #tpu.memory_space<vmem>>, vector<1x2x128x128xf32>
    %122 = vector.shape_cast %121 : vector<1x2x128x128xf32> to vector<2x128x128xf32>
    %cst_52 = arith.constant dense<0.000000e+00> : vector<2x16x128xf32>
    %123 = tpu.matmul %4, %122, %cst_52 {dimension_numbers = #tpu.dot_dimension_numbers<[2], [1], [1], [2], [0, 0, 0, 1, 1, 2], [0], [0]>, precision = #tpu.contract_precision<fp32>} : vector<2x16x128xf32>, vector<2x128x128xf32>, vector<2x16x128xf32> -> vector<2x16x128xf32>
    %124 = vector.extract_strided_slice %123 {offsets = [0, 0, 0], sizes = [1, 16, 128], strides = [1, 1, 1]} : vector<2x16x128xf32> to vector<1x16x128xf32>
    %125 = vector.shape_cast %124 : vector<1x16x128xf32> to vector<16x128xf32>
    %126 = vector.shape_cast %125 : vector<16x128xf32> to vector<16x4x32xf32>
    %127 = tpu.transpose %126, [1, 0, 2] : vector<16x4x32xf32> -> vector<4x16x32xf32>
    %128 = vector.extract_strided_slice %123 {offsets = [1, 0, 0], sizes = [1, 16, 128], strides = [1, 1, 1]} : vector<2x16x128xf32> to vector<1x16x128xf32>
    %129 = vector.shape_cast %128 : vector<1x16x128xf32> to vector<16x128xf32>
    %130 = vector.shape_cast %129 : vector<16x128xf32> to vector<16x4x32xf32>
    %131 = tpu.transpose %130, [1, 0, 2] : vector<16x4x32xf32> -> vector<4x16x32xf32>
    %132 = vector.extract_strided_slice %31 {offsets = [0, 0, 0], sizes = [1, 4, 32], strides = [1, 1, 1]} : vector<2x4x32xf32> to vector<1x4x32xf32>
    %133 = vector.shape_cast %132 : vector<1x4x32xf32> to vector<4x32xf32>
    %134 = vector.extract_strided_slice %31 {offsets = [1, 0, 0], sizes = [1, 4, 32], strides = [1, 1, 1]} : vector<2x4x32xf32> to vector<1x4x32xf32>
    %135 = vector.shape_cast %134 : vector<1x4x32xf32> to vector<4x32xf32>
    %c0_53 = arith.constant 0 : index
    %c0_54 = arith.constant 0 : index
    %136 = vector.load %arg8[%c0_53, %c0_54] : memref<16x32xf32, #tpu.memory_space<vmem>>, vector<16x32xf32>
    %c0_55 = arith.constant 0 : index
    %c0_56 = arith.constant 0 : index
    %137 = vector.load %arg9[%c0_55, %c0_56] : memref<16x32xf32, #tpu.memory_space<vmem>>, vector<16x32xf32>
    %c0_57 = arith.constant 0 : index
    %c0_58 = arith.constant 0 : index
    %c0_59 = arith.constant 0 : index
    %c0_60 = arith.constant 0 : index
    %138 = vector.load %arg16[%c0_57, %c0_58, %c0_59, %c0_60] : memref<1x4x32x128xf32, #tpu.memory_space<vmem>>, vector<1x4x32x128xf32>
    %139 = vector.shape_cast %138 : vector<1x4x32x128xf32> to vector<4x32x128xf32>
    %140 = vector.shape_cast %135 : vector<4x32xf32> to vector<4x1x32xf32>
    %141 = vector.broadcast %140 : vector<4x1x32xf32> to vector<4x8x32xf32>
    %142 = arith.addf %120, %141 : vector<4x8x32xf32>
    %143 = vector.shape_cast %133 : vector<4x32xf32> to vector<4x1x32xf32>
    %144 = vector.broadcast %143 : vector<4x1x32xf32> to vector<4x8x32xf32>
    %145 = arith.addf %120, %144 : vector<4x8x32xf32>
    %146 = vector.shape_cast %6 : vector<8x32xf32> to vector<1x8x32xf32>
    %147 = vector.broadcast %146 : vector<1x8x32xf32> to vector<4x8x32xf32>
    %148 = arith.mulf %142, %147 : vector<4x8x32xf32>
    %149 = vector.shape_cast %7 : vector<8x32xf32> to vector<1x8x32xf32>
    %150 = vector.broadcast %149 : vector<1x8x32xf32> to vector<4x8x32xf32>
    %151 = arith.mulf %142, %150 : vector<4x8x32xf32>
    %152 = tpu.concatenate %145, %148, %151 in 2 : vector<4x8x32xf32>, vector<4x8x32xf32>, vector<4x8x32xf32> -> vector<4x8x96xf32>
    %153 = vector.shape_cast %136 : vector<16x32xf32> to vector<1x16x32xf32>
    %154 = vector.shape_cast %153 : vector<1x16x32xf32> to vector<1x16x32xf32>
    %155 = vector.broadcast %154 : vector<1x16x32xf32> to vector<4x16x32xf32>
    %156 = vector.shape_cast %137 : vector<16x32xf32> to vector<1x16x32xf32>
    %157 = vector.shape_cast %156 : vector<1x16x32xf32> to vector<1x16x32xf32>
    %158 = vector.broadcast %157 : vector<1x16x32xf32> to vector<4x16x32xf32>
    %159 = tpu.concatenate %127, %155, %158 in 2 : vector<4x16x32xf32>, vector<4x16x32xf32>, vector<4x16x32xf32> -> vector<4x16x96xf32>
    %cst_61 = arith.constant dense<0.000000e+00> : vector<4x8x16xf32>
    %160 = tpu.matmul %152, %159, %cst_61 {dimension_numbers = #tpu.dot_dimension_numbers<[2], [2], [1], [1], [0, 0, 0, 1, 1, 1], [0], [0]>, precision = #tpu.contract_precision<fp32>} : vector<4x8x96xf32>, vector<4x16x96xf32>, vector<4x8x16xf32> -> vector<4x8x16xf32>
    %cst_62 = arith.constant dense<0xFF800000> : vector<4x8xf32>
    %161 = vector.multi_reduction <maximumf>, %160, %cst_62 [2] : vector<4x8x16xf32> to vector<4x8xf32>
    %162 = vector.shape_cast %161 : vector<4x8xf32> to vector<4x8x1xf32>
    %163 = vector.broadcast %162 : vector<4x8x1xf32> to vector<4x8x16xf32>
    %164 = arith.subf %160, %163 : vector<4x8x16xf32>
    %165 = math.exp %164 : vector<4x8x16xf32>
    %cst_63 = arith.constant dense<0.000000e+00> : vector<4x8xf32>
    %166 = vector.multi_reduction <add>, %165, %cst_63 [2] : vector<4x8x16xf32> to vector<4x8xf32>
    %167 = vector.shape_cast %166 : vector<4x8xf32> to vector<4x8x1xf32>
    %168 = vector.broadcast %167 : vector<4x8x1xf32> to vector<4x8x16xf32>
    %169 = arith.divf %165, %168 : vector<4x8x16xf32>
    %cst_64 = arith.constant dense<0.000000e+00> : vector<4x8x32xf32>
    %170 = tpu.matmul %169, %131, %cst_64 {dimension_numbers = #tpu.dot_dimension_numbers<[2], [1], [1], [2], [0, 0, 0, 1, 1, 2], [0], [0]>, precision = #tpu.contract_precision<fp32>} : vector<4x8x16xf32>, vector<4x16x32xf32>, vector<4x8x32xf32> -> vector<4x8x32xf32>
    %cst_65 = arith.constant dense<0.000000e+00> : vector<4x8x128xf32>
    %171 = tpu.matmul %170, %139, %cst_65 {dimension_numbers = #tpu.dot_dimension_numbers<[2], [1], [1], [2], [0, 0, 0, 1, 1, 2], [0], [0]>, precision = #tpu.contract_precision<fp32>} : vector<4x8x32xf32>, vector<4x32x128xf32>, vector<4x8x128xf32> -> vector<4x8x128xf32>
    %cst_66 = arith.constant dense<0.000000e+00> : vector<8x128xf32>
    %172 = vector.multi_reduction <add>, %171, %cst_66 [0] : vector<4x8x128xf32> to vector<8x128xf32>
    %173 = vector.shape_cast %13 : vector<128xf32> to vector<1x128xf32>
    %174 = vector.broadcast %173 : vector<1x128xf32> to vector<8x128xf32>
    %175 = arith.addf %172, %174 : vector<8x128xf32>
    %176 = arith.addf %175, %115 : vector<8x128xf32>
    %cst_67 = arith.constant dense<0.000000e+00> : vector<8xf32>
    %177 = vector.multi_reduction <add>, %176, %cst_67 [1] : vector<8x128xf32> to vector<8xf32>
    %178 = vector.shape_cast %177 : vector<8xf32> to vector<8x1xf32>
    %cst_68 = arith.constant 1.280000e+02 : f32
    %179 = vector.broadcast %cst_68 : f32 to vector<8x1xf32>
    %180 = arith.divf %178, %179 : vector<8x1xf32>
    %181 = vector.broadcast %180 : vector<8x1xf32> to vector<8x128xf32>
    %182 = arith.subf %176, %181 : vector<8x128xf32>
    %183 = arith.mulf %182, %182 : vector<8x128xf32>
    %cst_69 = arith.constant dense<0.000000e+00> : vector<8xf32>
    %184 = vector.multi_reduction <add>, %183, %cst_69 [1] : vector<8x128xf32> to vector<8xf32>
    %185 = vector.shape_cast %184 : vector<8xf32> to vector<8x1xf32>
    %cst_70 = arith.constant 1.280000e+02 : f32
    %186 = vector.broadcast %cst_70 : f32 to vector<8x1xf32>
    %187 = arith.divf %185, %186 : vector<8x1xf32>
    %188 = vector.broadcast %180 : vector<8x1xf32> to vector<8x128xf32>
    %189 = arith.subf %176, %188 : vector<8x128xf32>
    %cst_71 = arith.constant 9.99999974E-6 : f32
    %190 = vector.broadcast %cst_71 : f32 to vector<8x1xf32>
    %191 = arith.addf %187, %190 : vector<8x1xf32>
    %192 = math.rsqrt %191 : vector<8x1xf32>
    %193 = vector.broadcast %192 : vector<8x1xf32> to vector<8x128xf32>
    %194 = arith.mulf %189, %193 : vector<8x128xf32>
    %195 = vector.shape_cast %21 : vector<128xf32> to vector<1x128xf32>
    %196 = vector.broadcast %195 : vector<1x128xf32> to vector<8x128xf32>
    %197 = arith.mulf %194, %196 : vector<8x128xf32>
    %198 = vector.shape_cast %23 : vector<128xf32> to vector<1x128xf32>
    %199 = vector.broadcast %198 : vector<1x128xf32> to vector<8x128xf32>
    %200 = arith.addf %197, %199 : vector<8x128xf32>
    %c0_72 = arith.constant 0 : index
    %c0_73 = arith.constant 0 : index
    %c0_74 = arith.constant 0 : index
    %201 = vector.load %arg17[%c0_72, %c0_73, %c0_74] : memref<1x128x512xf32, #tpu.memory_space<vmem>>, vector<1x128x512xf32>
    %202 = vector.shape_cast %201 : vector<1x128x512xf32> to vector<128x512xf32>
    %cst_75 = arith.constant dense<0.000000e+00> : vector<8x512xf32>
    %203 = tpu.matmul %200, %202, %cst_75 {dimension_numbers = #tpu.dot_dimension_numbers<[1], [0], [0], [1], [0, 0, 1, 1], [], []>, precision = #tpu.contract_precision<fp32>} : vector<8x128xf32>, vector<128x512xf32>, vector<8x512xf32> -> vector<8x512xf32>
    %c0_76 = arith.constant 0 : index
    %c0_77 = arith.constant 0 : index
    %c0_78 = arith.constant 0 : index
    %204 = vector.load %arg18[%c0_76, %c0_77, %c0_78] : memref<1x1x512xf32, #tpu.memory_space<vmem>>, vector<1x1x512xf32>
    %205 = vector.shape_cast %204 : vector<1x1x512xf32> to vector<512xf32>
    %206 = vector.shape_cast %205 : vector<512xf32> to vector<1x512xf32>
    %207 = vector.broadcast %206 : vector<1x512xf32> to vector<8x512xf32>
    %208 = arith.addf %203, %207 : vector<8x512xf32>
    %cst_79 = arith.constant 0.000000e+00 : f32
    %209 = vector.broadcast %cst_79 : f32 to vector<8x512xf32>
    %210 = arith.cmpf ogt, %208, %209 : vector<8x512xf32>
    %cst_80 = arith.constant 0.000000e+00 : f32
    %211 = vector.broadcast %cst_80 : f32 to vector<8x512xf32>
    %212 = arith.minimumf %208, %211 : vector<8x512xf32>
    %213 = math.exp %212 : vector<8x512xf32>
    %cst_81 = arith.constant 1.000000e+00 : f32
    %214 = vector.broadcast %cst_81 : f32 to vector<8x512xf32>
    %215 = arith.subf %213, %214 : vector<8x512xf32>
    %216 = arith.select %210, %208, %215 : vector<8x512xi1>, vector<8x512xf32>
    %c0_82 = arith.constant 0 : index
    %c0_83 = arith.constant 0 : index
    %c0_84 = arith.constant 0 : index
    %217 = vector.load %arg19[%c0_82, %c0_83, %c0_84] : memref<1x512x128xf32, #tpu.memory_space<vmem>>, vector<1x512x128xf32>
    %218 = vector.shape_cast %217 : vector<1x512x128xf32> to vector<512x128xf32>
    %cst_85 = arith.constant dense<0.000000e+00> : vector<8x128xf32>
    %219 = tpu.matmul %216, %218, %cst_85 {dimension_numbers = #tpu.dot_dimension_numbers<[1], [0], [0], [1], [0, 0, 1, 1], [], []>, precision = #tpu.contract_precision<fp32>} : vector<8x512xf32>, vector<512x128xf32>, vector<8x128xf32> -> vector<8x128xf32>
    %220 = vector.shape_cast %15 : vector<128xf32> to vector<1x128xf32>
    %221 = vector.broadcast %220 : vector<1x128xf32> to vector<8x128xf32>
    %222 = arith.addf %219, %221 : vector<8x128xf32>
    %223 = arith.addf %222, %200 : vector<8x128xf32>
    %cst_86 = arith.constant dense<0.000000e+00> : vector<8xf32>
    %224 = vector.multi_reduction <add>, %223, %cst_86 [1] : vector<8x128xf32> to vector<8xf32>
    %225 = vector.shape_cast %224 : vector<8xf32> to vector<8x1xf32>
    %cst_87 = arith.constant 1.280000e+02 : f32
    %226 = vector.broadcast %cst_87 : f32 to vector<8x1xf32>
    %227 = arith.divf %225, %226 : vector<8x1xf32>
    %228 = vector.broadcast %227 : vector<8x1xf32> to vector<8x128xf32>
    %229 = arith.subf %223, %228 : vector<8x128xf32>
    %230 = arith.mulf %229, %229 : vector<8x128xf32>
    %cst_88 = arith.constant dense<0.000000e+00> : vector<8xf32>
    %231 = vector.multi_reduction <add>, %230, %cst_88 [1] : vector<8x128xf32> to vector<8xf32>
    %232 = vector.shape_cast %231 : vector<8xf32> to vector<8x1xf32>
    %cst_89 = arith.constant 1.280000e+02 : f32
    %233 = vector.broadcast %cst_89 : f32 to vector<8x1xf32>
    %234 = arith.divf %232, %233 : vector<8x1xf32>
    %235 = vector.broadcast %227 : vector<8x1xf32> to vector<8x128xf32>
    %236 = arith.subf %223, %235 : vector<8x128xf32>
    %cst_90 = arith.constant 9.99999974E-6 : f32
    %237 = vector.broadcast %cst_90 : f32 to vector<8x1xf32>
    %238 = arith.addf %234, %237 : vector<8x1xf32>
    %239 = math.rsqrt %238 : vector<8x1xf32>
    %240 = vector.broadcast %239 : vector<8x1xf32> to vector<8x128xf32>
    %241 = arith.mulf %236, %240 : vector<8x128xf32>
    %242 = vector.shape_cast %25 : vector<128xf32> to vector<1x128xf32>
    %243 = vector.broadcast %242 : vector<1x128xf32> to vector<8x128xf32>
    %244 = arith.mulf %241, %243 : vector<8x128xf32>
    %245 = vector.shape_cast %27 : vector<128xf32> to vector<1x128xf32>
    %246 = vector.broadcast %245 : vector<1x128xf32> to vector<8x128xf32>
    %247 = arith.addf %244, %246 : vector<8x128xf32>
    %c0_91 = arith.constant 0 : index
    %c0_92 = arith.constant 0 : index
    %248 = vector.load %arg22[%c0_91, %c0_92] : memref<8x128xf32, #tpu.memory_space<vmem>>, vector<8x128xf32>
    tpu.vector_store %arg22[%c0_91, %c0_92], %247 {strides = array<i32>} : memref<8x128xf32, #tpu.memory_space<vmem>>, vector<8x128xf32>,
    %c1_i32 = arith.constant 1 : i32
    %249 = arith.cmpi eq, %arg0, %c1_i32 : i32
    %250 = arith.extui %249 : i1 to i32
    %c0_i32_93 = arith.constant 0 : i32
    %251 = arith.cmpi ne, %250, %c0_i32_93 : i32
    scf.if %251 {
      %c0_94 = arith.constant 0 : index
      %c0_95 = arith.constant 0 : index
      %252 = vector.load %arg21[%c0_94, %c0_95] : memref<8x128xf32, #tpu.memory_space<vmem>>, vector<8x128xf32>
      tpu.vector_store %arg21[%c0_94, %c0_95], %247 {strides = array<i32>} : memref<8x128xf32, #tpu.memory_space<vmem>>, vector<8x128xf32>,
    } else {
    }
    return
  }
  func.func @transform_0(%arg0: i32) -> (i32, i32) {
    %c0_i32 = arith.constant 0 : i32
    %c0_i32_0 = arith.constant 0 : i32
    %c0_i32_1 = arith.constant 0 : i32
    return %c0_i32, %c0_i32_0 : i32, i32
  }
  func.func @transform_1(%arg0: i32) -> (i32, i32, i32) {
    %c0_i32 = arith.constant 0 : i32
    %c0_i32_0 = arith.constant 0 : i32
    %c0_i32_1 = arith.constant 0 : i32
    %c0_i32_2 = arith.constant 0 : i32
    return %c0_i32, %c0_i32_0, %c0_i32_1 : i32, i32, i32
  }
  func.func @transform_2(%arg0: i32) -> (i32, i32) {
    %c0_i32 = arith.constant 0 : i32
    %c0_i32_0 = arith.constant 0 : i32
    %c0_i32_1 = arith.constant 0 : i32
    return %c0_i32, %c0_i32_0 : i32, i32
  }
  func.func @transform_3(%arg0: i32) -> (i32, i32) {
    %c0_i32 = arith.constant 0 : i32
    %c0_i32_0 = arith.constant 0 : i32
    %c0_i32_1 = arith.constant 0 : i32
    return %c0_i32, %c0_i32_0 : i32, i32
  }
  func.func @transform_4(%arg0: i32) -> (i32, i32) {
    %c0_i32 = arith.constant 0 : i32
    %c0_i32_0 = arith.constant 0 : i32
    %c0_i32_1 = arith.constant 0 : i32
    return %c0_i32, %c0_i32_0 : i32, i32
  }
  func.func @transform_5(%arg0: i32) -> (i32, i32) {
    %c0_i32 = arith.constant 0 : i32
    %c0_i32_0 = arith.constant 0 : i32
    %c0_i32_1 = arith.constant 0 : i32
    return %c0_i32, %c0_i32_0 : i32, i32
  }
  func.func @transform_6(%arg0: i32) -> (i32, i32) {
    %c0_i32 = arith.constant 0 : i32
    %c0_i32_0 = arith.constant 0 : i32
    %c0_i32_1 = arith.constant 0 : i32
    return %c0_i32, %c0_i32_0 : i32, i32
  }
  func.func @transform_7(%arg0: i32) -> (i32, i32) {
    %c0_i32 = arith.constant 0 : i32
    %c0_i32_0 = arith.constant 0 : i32
    %c0_i32_1 = arith.constant 0 : i32
    return %c0_i32, %c0_i32_0 : i32, i32
  }
  func.func @transform_8(%arg0: i32) -> (i32, i32) {
    %c0_i32 = arith.constant 0 : i32
    %c0_i32_0 = arith.constant 0 : i32
    %c0_i32_1 = arith.constant 0 : i32
    return %c0_i32, %c0_i32_0 : i32, i32
  }
  func.func @transform_9(%arg0: i32) -> (i32, i32, i32) {
    %c0_i32 = arith.constant 0 : i32
    %c0_i32_0 = arith.constant 0 : i32
    %c0_i32_1 = arith.constant 0 : i32
    return %arg0, %c0_i32, %c0_i32_0 : i32, i32, i32
  }
  func.func @transform_10(%arg0: i32) -> (i32, i32, i32, i32) {
    %c0_i32 = arith.constant 0 : i32
    %c0_i32_0 = arith.constant 0 : i32
    %c0_i32_1 = arith.constant 0 : i32
    %c0_i32_2 = arith.constant 0 : i32
    return %arg0, %c0_i32, %c0_i32_0, %c0_i32_1 : i32, i32, i32, i32
  }
  func.func @transform_11(%arg0: i32) -> (i32, i32, i32, i32) {
    %c0_i32 = arith.constant 0 : i32
    %c0_i32_0 = arith.constant 0 : i32
    %c0_i32_1 = arith.constant 0 : i32
    %c0_i32_2 = arith.constant 0 : i32
    return %arg0, %c0_i32, %c0_i32_0, %c0_i32_1 : i32, i32, i32, i32
  }
  func.func @transform_12(%arg0: i32) -> (i32, i32, i32) {
    %c0_i32 = arith.constant 0 : i32
    %c0_i32_0 = arith.constant 0 : i32
    %c0_i32_1 = arith.constant 0 : i32
    return %arg0, %c0_i32, %c0_i32_0 : i32, i32, i32
  }
  func.func @transform_13(%arg0: i32) -> (i32, i32, i32, i32) {
    %c0_i32 = arith.constant 0 : i32
    %c0_i32_0 = arith.constant 0 : i32
    %c0_i32_1 = arith.constant 0 : i32
    %c0_i32_2 = arith.constant 0 : i32
    return %arg0, %c0_i32, %c0_i32_0, %c0_i32_1 : i32, i32, i32, i32
  }
  func.func @transform_14(%arg0: i32) -> (i32, i32, i32, i32) {
    %c0_i32 = arith.constant 0 : i32
    %c0_i32_0 = arith.constant 0 : i32
    %c0_i32_1 = arith.constant 0 : i32
    %c0_i32_2 = arith.constant 0 : i32
    return %arg0, %c0_i32, %c0_i32_0, %c0_i32_1 : i32, i32, i32, i32
  }
  func.func @transform_15(%arg0: i32) -> (i32, i32, i32, i32) {
    %c0_i32 = arith.constant 0 : i32
    %c0_i32_0 = arith.constant 0 : i32
    %c0_i32_1 = arith.constant 0 : i32
    %c0_i32_2 = arith.constant 0 : i32
    return %arg0, %c0_i32, %c0_i32_0, %c0_i32_1 : i32, i32, i32, i32
  }
  func.func @transform_16(%arg0: i32) -> (i32, i32, i32) {
    %c0_i32 = arith.constant 0 : i32
    %c0_i32_0 = arith.constant 0 : i32
    %c0_i32_1 = arith.constant 0 : i32
    return %arg0, %c0_i32, %c0_i32_0 : i32, i32, i32
  }
  func.func @transform_17(%arg0: i32) -> (i32, i32, i32) {
    %c0_i32 = arith.constant 0 : i32
    %c0_i32_0 = arith.constant 0 : i32
    %c0_i32_1 = arith.constant 0 : i32
    return %arg0, %c0_i32, %c0_i32_0 : i32, i32, i32
  }
  func.func @transform_18(%arg0: i32) -> (i32, i32, i32) {
    %c0_i32 = arith.constant 0 : i32
    %c0_i32_0 = arith.constant 0 : i32
    %c0_i32_1 = arith.constant 0 : i32
    return %arg0, %c0_i32, %c0_i32_0 : i32, i32, i32
  }
  func.func @transform_19(%arg0: i32) -> (i32, i32, i32) {
    %c0_i32 = arith.constant 0 : i32
    %c0_i32_0 = arith.constant 0 : i32
    %c0_i32_1 = arith.constant 0 : i32
    return %arg0, %c0_i32, %c0_i32_0 : i32, i32, i32
  }
  func.func @transform_20(%arg0: i32) -> (i32, i32) {
    %c0_i32 = arith.constant 0 : i32
    %c0_i32_0 = arith.constant 0 : i32
    %c0_i32_1 = arith.constant 0 : i32
    return %c0_i32, %c0_i32_0 : i32, i32
  }
}

</mosaic_0001>

<bundles_post_ra>
// kernel: tpu_custom_call.1
= control target key start
LH: loop header
LB: loop body
LE: loop exit
PB: predicated region body
PF: predicated region fallthrough
CT: control target
= control target key end

     0   :  { %s34736_s0 = inlined_call_operand.hbm [shape: f32[8,128], index: 0, kind: input, shape index: {}]   ;;  %s34737_s1 = inlined_call_operand.vmem [shape: f32[2,16,128], index: 1, kind: input, shape index: {}]   ;;  %s34738_s2 = inlined_call_operand.hbm [shape: f32[8,8], index: 2, kind: input, shape index: {}]   ;;  %s34739_s3 = inlined_call_operand.hbm [shape: f32[8,32], index: 3, kind: input, shape index: {}]   ;;  %s34740_s4 = inlined_call_operand.hbm [shape: f32[8,32], index: 4, kind: input, shape index: {}]   ;;  %s34741_s5 = inlined_call_operand.hbm [shape: f32[8,32], index: 5, kind: input, shape index: {}]   ;;  %s34742_s6 = inlined_call_operand.hbm [shape: f32[8,32], index: 6, kind: input, shape index: {}]   ;;  %s34743_s7 = inlined_call_operand.vmem [shape: f32[16,32], index: 7, kind: input, shape index: {}]   ;;  %s34744_s8 = inlined_call_operand.vmem [shape: f32[16,32], index: 8, kind: input, shape index: {}]   ;;  %s34745_s9 = inlined_call_operand.hbm [shape: f32[2,128,384], index: 9, kind: input, shape index: {}]   ;;  %s34746_s10 = inlined_call_operand.hbm [shape: f32[2,2,4,32], index: 10, kind: input, shape index: {}]   ;;  %s34747_s11 = inlined_call_operand.hbm [shape: f32[2,4,32,128], index: 11, kind: input, shape index: {}]   ;;  %s34748_s12 = inlined_call_operand.hbm [shape: f32[2,128,128], index: 12, kind: input, shape index: {}]   ;;  %s34749_s13 = inlined_call_operand.hbm [shape: f32[2,2,128,128], index: 13, kind: input, shape index: {}]   ;;  %s34750_s14 = inlined_call_operand.vmem [shape: f32[2,2,4,32], index: 14, kind: input, shape index: {}]   ;;  %s34751_s15 = inlined_call_operand.hbm [shape: f32[2,4,32,128], index: 15, kind: input, shape index: {}]   ;;  %s34752_s16 = inlined_call_operand.hbm [shape: f32[2,128,512], index: 16, kind: input, shape index: {}]   ;;  %s34753_s17 = inlined_call_operand.vmem [shape: f32[2,1,512], index: 17, kind: input, shape index: {}]   ;;  %s34754_s18 = inlined_call_operand.hbm [shape: f32[2,512,128], index: 18, kind: input, shape index: {}]   ;;  %s34755_s19 = inlined_call_operand.vmem [shape: f32[2,9,128], index: 19, kind: input, shape index: {}]   ;;  %s34756_s20 = inlined_call_operand.hbm [shape: f32[8,128], index: 20, kind: output, shape index: {}]  }
   0x1   :  { %35280 = sst [smem:[#allocation138_spill]] %s34736_s0 }
   0x2   :  { %35281 = sst [smem:[#allocation139_spill]] %s34737_s1 }
   0x3   :  { %35282 = sst [smem:[#allocation140_spill]] %s34738_s2 }
   0x4   :  { %35283 = sst [smem:[#allocation141_spill]] %s34739_s3 }
   0x5   :  { %35284 = sst [smem:[#allocation142_spill]] %s34740_s4 }
   0x6   :  { %35285 = sst [smem:[#allocation143_spill]] %s34743_s7 }
   0x7   :  { %35286 = sst [smem:[#allocation144_spill]] %s34744_s8 }
   0x8   :  { %35287 = sst [smem:[#allocation145_spill]] %s34745_s9 }
   0x9   :  { %35288 = sst [smem:[#allocation146_spill]] %s34746_s10 }
   0xa   :  { %35289 = sst [smem:[#allocation147_spill]] %s34747_s11 }
   0xb   :  { %35290 = sst [smem:[#allocation148_spill]] %s34748_s12 }
   0xc   :  { %35291 = sst [smem:[#allocation149_spill]] %s34749_s13 }
   0xd   :  { %35292 = sst [smem:[#allocation150_spill]] %s34750_s14 }
   0xe   :  { %35293 = sst [smem:[#allocation151_spill]] %s34751_s15 }
   0xf   :  { %35294 = sst [smem:[#allocation152_spill]] %s34752_s16 }
  0x10   :  { %35295 = sst [smem:[#allocation153_spill]] %s34753_s17 }
  0x11   :  { %35296 = sst [smem:[#allocation154_spill]] %s34755_s19 }
  0x12   :  { %35297 = sst [smem:[#allocation155_spill]] %s34756_s20 }
  0x13   :  { %25 = vsyncpa [#allocation4], 0 }
  0x14   :  { %26 = vsyncpa [#allocation7], 0 }
  0x15   :  { %27 = vsyncpa [#allocation10], 0 }
  0x16   :  { %28 = vsyncpa [#allocation13], 0 }
  0x17   :  { %29 = vsyncpa [#allocation5], 0  ;;  %s28001_s1 = smov 0   ;;  %s28003_s22 = smov 0  }
  0x18   :  { %s28005_s23 = smov 0   ;;  %s28007_s24 = smov 0  }
  0x19 LB: > { %35298 = sst [smem:[#allocation29_spill]] %s27858_s23  ;;  %s28020_s2 = sadd.s32 4294967295, %s27862_s24   ;;  %s27862_s24 = sphi %s28007_s24, %s36269_s24   ;;  %s27858_s23 = sphi %s28005_s23, %s36271_s23   ;;  %s27854_s22 = sphi %s28003_s22, %s36273_s22   ;;  %s27850_s1 = sphi %s28001_s1, %s36272_s1  }
  0x1a   : > { %p244_p0 = scmp.ne.s32.totalorder %s27854_s22, %s27850_s1  ;;  %p34767_p1 = scmp.eq.s32.totalorder %s28020_s2, 0 }
  0x1b   : > { %p21505_p2 = scmp.ge.s32.totalorder %s27862_s24, 1  ;;  %p536_p3 = scmp.lt.s32.totalorder %s27862_s24, 3 }
  0x1c   : > { %p28029_p5 = por %p34767_p1, %p244_p0  ;;  %s27864_s26 = smov [#allocation3]  }
  0x1d   : > { %p28033_p6 = pnand %p21505_p2, %p536_p3  ;;  %s549_s27 = sshll.u32 %s27864_s26, 4  ;;  %s550_s27 = int_to_ptr.vmem [resolvable:$true] %s549_s27 }
  0x1e   : > { %s35299_s25 = scalar_select %p28029_p5, 1, 0 }
  0x1f   : > { %s35301_s3 = scalar_select %p28033_p6, 1, 0 }
  0x20   : > { %35300 = sst [smem:[#allocation30_spill]] %s35299_s25  ;;  %p27207_p7 = pneg %p28033_p6 }
  0x21   : > { %s28040_s28 = sadd.s32 1, %s27862_s24   ;;  %s231_s0 = sadd.s32 1, %s27858_s23 }
  0x22   : > { %35302 = sst [smem:[#allocation31_spill]] %s28040_s28  ;;  %p28044_p8 = pnand %p27207_p7, %p34767_p1 }
  0x23   : > { %s228_s29 = ssub.s32 %s27862_s24, %s28040_s28  ;;  %s35305_s26 = sld [smem:[#allocation138_spill]] }
  0x24   : > { %s35303_s4 = scalar_select %p28044_p8, 1, 0 }
  0x25   : > { %p28050_p9 = scmp.eq.s32.totalorder %s228_s29, 0  ;;  %p28065_p12 = pneg %p28044_p8 }
  0x27   : > { %s35304_s30 = scalar_select %p28050_p9, 1, 0 }
  0x28   : > { %s35306_s19 = scalar_select %p28065_p12, 1, 0 }
  0x29   : > { %s27374_s20 = scalar_lea.hbm %s35305_s26, 128 }
  0x2a   : > { %p27375_p11 = scmp.ne.s32.totalorder %s35305_s26, %s27374_s20  ;;  %p27381_p2 = scmp.lt.u32.totalorder %s27374_s20, %s35305_s26 }
  0x2c   : > { %p27377_p13 = pnand %p28065_p12, %p27375_p11 }
  0x2e   : > { %p27378_p0 = pneg %p27377_p13 }
  0x30   : > { %p27383_p3 = pnand %p27381_p2, %p27378_p0 }
  0x32   : > { %27386 = shalt.err (!%p27383_p3)
}
  0x33   : > { %s27387_s21 = scalar_lea.vmem %s550_s27, 128  ;;  %p27395_p10 = scmp.lt.s32.totalorder %s550_s27, %s550_s27 }
  0x34   : > { %p27388_p7 = scmp.ne.s32.totalorder %s550_s27, %s27387_s21  ;;  %p27396_p5 = scmp.lt.s32.totalorder %s27387_s21, %s27387_s21 }
  0x36   : > { %p27390_p4 = pnand %p27388_p7, %p28065_p12  ;;  %p27397_p6 = por %p27396_p5, %p27395_p10 }
  0x38   : > { %p27391_p1 = pneg %p27390_p4 }
  0x3a   : > { %p27398_p9 = pnand %p27397_p6, %p27391_p1 }
  0x3c   : > { %27401 = shalt.err (!%p27398_p9)
}
  0x3d   : > { %27210 = dma.hbm_to_vmem [thread:$0]  (!%p28044_p8), %s35305_s26, 128, %s550_s27, [#allocation4]  }
  0x3e   : > { %p35307_p4 = scmp.ne.s32.totalorder %s35304_s30, 0  ;;  %p239_p1 = scmp.eq.s32.totalorder %s27862_s24, 0 }
  0x3f   : > { %p27257_p5 = scmp.lt.s32.totalorder %s27862_s24, 2  ;;  %s624_s28 = sand.u32 1, %s27862_s24  }
  0x40   : > { %s28084_s20 = scalar_select %p35307_p4, %s27858_s23, %s231_s0  }
  0x41   : > { %s28090_s1 = sand.u32 1, %s27858_s23   ;;  %p35309_p6 = scmp.ne.s32.totalorder %s27858_s23, %s27854_s22 }
  0x42   : > { %35308 = sst [smem:[#allocation32_spill]] %s28084_s20  ;;  %s27160_s29 = smul.u32 384, %s28090_s1 }
  0x43   : > { %p240_p9 = por %p239_p1, %p35309_p6  ;;  %s27161_s21 = smul.u32 6144, %s27862_s24 }
  0x44   : > { %s35311_s9 = sld [smem:[#allocation145_spill]]  ;;  %s628_s30 = scalar_lea.vmem [#allocation14], %s27160_s29 }
  0x45   : > { %p28097_p10 = pnand %p27257_p5, %p240_p9  ;;  %s635_s0 = sshll.u32 %s628_s30, 4  ;;  %s28106_s0 = int_to_ptr.vmem [resolvable:$true] %s635_s0 }
  0x46   : > { %s28108_s26 = scalar_lea.sflag [#allocation4], %s624_s28 }
  0x47   : > { %s35310_s7 = scalar_select %p28097_p10, 1, 0 }
  0x48   : > { %p28114_p13 = pneg %p28097_p10 }
  0x4a   : > { %s28104_s27 = scalar_lea.hbm %s35311_s9, %s27161_s21  ;;  %s27407_s29 = scalar_lea.hbm %s35311_s9, 12288 }
  0x4b   : > { %s27402_s20 = scalar_lea.hbm %s28104_s27, 6144  ;;  %p27408_p3 = scmp.lt.u32.totalorder %s28104_s27, %s35311_s9 }
  0x4c   : > { %p27403_p11 = scmp.ne.s32.totalorder %s28104_s27, %s27402_s20  ;;  %p27409_p7 = scmp.lt.u32.totalorder %s27407_s29, %s27402_s20 }
  0x4d   : > { %s35312_s23 = scalar_select %p28114_p13, 1, 0 }
  0x4e   : > { %p27405_p0 = pnand %p28114_p13, %p27403_p11  ;;  %p27410_p4 = por %p27409_p7, %p27408_p3 }
  0x4f   : > { %p27411_p1 = scmp.lt.u32.totalorder %s27402_s20, %s28104_s27 }
  0x50   : > { %p27406_p2 = pneg %p27405_p0 }
  0x51   : > { %p27412_p5 = por %p27411_p1, %p27410_p4 }
  0x53   : > { %p27413_p6 = pnand %p27412_p5, %p27406_p2 }
  0x55   : > { %27416 = shalt.err (!%p27413_p6)
}
  0x56   : > { %s27417_s28 = scalar_lea.vmem %s28106_s0, 6144  ;;  %s27865_s17 = smov [#allocation14]  }
  0x57   : > { %p27418_p9 = scmp.ne.s32.totalorder %s28106_s0, %s27417_s28  ;;  %s27422_s21 = sshll.u32 %s27865_s17, 4  ;;  %s27423_s21 = int_to_ptr.vmem [resolvable:$false] %s27422_s21 }
  0x58   : > { %s27424_s8 = scalar_lea.vmem %s27423_s21, 12288  ;;  %p27425_p8 = scmp.lt.s32.totalorder %s28106_s0, %s27423_s21 }
  0x59   : > { %p27420_p11 = pnand %p27418_p9, %p28114_p13  ;;  %p27426_p12 = scmp.lt.s32.totalorder %s27424_s8, %s27417_s28 }
  0x5b   : > { %p27421_p0 = pneg %p27420_p11  ;;  %p27427_p3 = por %p27426_p12, %p27425_p8 }
  0x5d   : > { %p27428_p7 = pnand %p27427_p3, %p27421_p0 }
  0x5f   : > { %27431 = shalt.err (!%p27428_p7)
}
  0x60   : > { %s27866_s20 = smov 384   ;;  %s27867_s29 = smov 24  }
  0x61   : > { %27229 = dma.hbm_to_vmem [thread:$0]  (!%p28097_p10), %s28104_s27, 6144, %s28106_s0, %s28108_s26, %s27866_s20, %s27866_s20, %s27867_s29  }
  0x62   : > { %s21514_s30 = sshll.u32 %s28090_s1, 3  ;;  %s21585_s17 = sshll.u32 %s27862_s24, 7 }
  0x63   : > { %s35313_s10 = sld [smem:[#allocation146_spill]]  ;;  %s649_s21 = scalar_lea.vmem [#allocation15], %s21514_s30 }
  0x64   : > { %s656_s8 = sshll.u32 %s649_s21, 4  ;;  %s28145_s8 = int_to_ptr.vmem [resolvable:$true] %s656_s8 }
  0x69   : > { %s28143_s28 = scalar_lea.hbm %s35313_s10, %s21585_s17  ;;  %s27437_s20 = scalar_lea.hbm %s35313_s10, 256 }
  0x6a   : > { %s27432_s25 = scalar_lea.hbm %s28143_s28, 128  ;;  %p27438_p4 = scmp.lt.u32.totalorder %s28143_s28, %s35313_s10 }
  0x6b   : > { %p27433_p8 = scmp.ne.s32.totalorder %s28143_s28, %s27432_s25  ;;  %p27439_p1 = scmp.lt.u32.totalorder %s27437_s20, %s27432_s25 }
  0x6c   : > { %p27441_p6 = scmp.lt.u32.totalorder %s27432_s25, %s28143_s28 }
  0x6d   : > { %p27435_p12 = pnand %p27433_p8, %p28114_p13  ;;  %p27440_p5 = por %p27439_p1, %p27438_p4 }
  0x6f   : > { %p27436_p2 = pneg %p27435_p12  ;;  %p27442_p9 = por %p27441_p6, %p27440_p5 }
  0x71   : > { %p27443_p11 = pnand %p27442_p9, %p27436_p2 }
  0x73   : > { %27446 = shalt.err (!%p27443_p11)
}
  0x74   : > { %s27447_s29 = scalar_lea.vmem %s28145_s8, 128  ;;  %s27868_s30 = smov [#allocation15]  }
  0x75   : > { %p27448_p0 = scmp.ne.s32.totalorder %s28145_s8, %s27447_s29  ;;  %s27452_s17 = sshll.u32 %s27868_s30, 4  ;;  %s27453_s17 = int_to_ptr.vmem [resolvable:$false] %s27452_s17 }
  0x76   : > { %s27454_s21 = scalar_lea.vmem %s27453_s17, 256  ;;  %p27455_p8 = scmp.lt.s32.totalorder %s28145_s8, %s27453_s17 }
  0x77   : > { %p27450_p3 = pnand %p27448_p0, %p28114_p13  ;;  %p27456_p12 = scmp.lt.s32.totalorder %s27454_s21, %s27447_s29 }
  0x79   : > { %p27451_p7 = pneg %p27450_p3  ;;  %p27457_p4 = por %p27456_p12, %p27455_p8 }
  0x7b   : > { %p27458_p1 = pnand %p27457_p4, %p27451_p7 }
  0x7d   : > { %27461 = shalt.err (!%p27458_p1)
}
  0x7e   : > { %s27869_s25 = smov 64   ;;  %s27870_s27 = smov 4  }
  0x7f   : > { %27232 = dma.hbm_to_vmem [thread:$0]  (!%p28097_p10), %s28143_s28, 128, %s28145_s8, %s28108_s26, %s27869_s25, %s27869_s25, %s27870_s27  }
  0x80   : > { %s28170_s0 = sshll.u32 %s28090_s1, 7  ;;  %s28173_s20 = sshll.u32 %s27862_s24, 11 }
  0x81   : > { %s35314_s11 = sld [smem:[#allocation147_spill]]  ;;  %s670_s30 = scalar_lea.vmem [#allocation16], %s28170_s0 }
  0x82   : > { %s677_s17 = sshll.u32 %s670_s30, 4  ;;  %s28182_s17 = int_to_ptr.vmem [resolvable:$true] %s677_s17 }
  0x87   : > { %s28179_s29 = scalar_lea.hbm %s35314_s11, %s28173_s20  ;;  %s27467_s25 = scalar_lea.hbm %s35314_s11, 4096 }
  0x88   : > { %s27462_s28 = scalar_lea.hbm %s28179_s29, 2048  ;;  %p27468_p9 = scmp.lt.u32.totalorder %s28179_s29, %s35314_s11 }
  0x89   : > { %p27463_p2 = scmp.ne.s32.totalorder %s28179_s29, %s27462_s28  ;;  %p27469_p11 = scmp.lt.u32.totalorder %s27467_s25, %s27462_s28 }
  0x8a   : > { %p27471_p3 = scmp.lt.u32.totalorder %s27462_s28, %s28179_s29 }
  0x8b   : > { %p27465_p5 = pnand %p27463_p2, %p28114_p13  ;;  %p27470_p0 = por %p27469_p11, %p27468_p9 }
  0x8d   : > { %p27466_p6 = pneg %p27465_p5  ;;  %p27472_p7 = por %p27471_p3, %p27470_p0 }
  0x8f   : > { %p27473_p8 = pnand %p27472_p7, %p27466_p6 }
  0x91   : > { %27476 = shalt.err (!%p27473_p8)
}
  0x92   : > { %s27477_s14 = scalar_lea.vmem %s28182_s17, 2048  ;;  %s27871_s30 = smov [#allocation16]  }
  0x93   : > { %p27478_p12 = scmp.ne.s32.totalorder %s28182_s17, %s27477_s14  ;;  %s27482_s8 = sshll.u32 %s27871_s30, 4  ;;  %s27483_s8 = int_to_ptr.vmem [resolvable:$false] %s27482_s8 }
  0x94   : > { %s27484_s21 = scalar_lea.vmem %s27483_s8, 4096  ;;  %p27485_p2 = scmp.lt.s32.totalorder %s28182_s17, %s27483_s8 }
  0x95   : > { %p27480_p4 = pnand %p27478_p12, %p28114_p13  ;;  %p27486_p5 = scmp.lt.s32.totalorder %s27484_s21, %s27477_s14 }
  0x97   : > { %p27481_p1 = pneg %p27480_p4  ;;  %p27487_p9 = por %p27486_p5, %p27485_p2 }
  0x99   : > { %p27488_p11 = pnand %p27487_p9, %p27481_p1 }
  0x9b   : > { %27491 = shalt.err (!%p27488_p11)
}
  0x9c   : > { %s34778_s28 = smov 128   ;;  %s34780_s25 = smov 8  }
  0x9d   : > { %27235 = dma.hbm_to_vmem [thread:$0]  (!%p28097_p10), %s28179_s29, 2048, %s28182_s17, %s28108_s26, %s34778_s28, %s34778_s28, %s34780_s25  }
  0x9e   : > { %s35315_s12 = sld [smem:[#allocation148_spill]]  ;;  %s691_s30 = scalar_lea.vmem [#allocation17], %s28170_s0 }
  0x9f   : > { %s698_s8 = sshll.u32 %s691_s30, 4  ;;  %s21523_s21 = sshll.u32 %s28090_s1, 8  ;;  %s28217_s8 = int_to_ptr.vmem [resolvable:$true] %s698_s8 }
  0xa4   : > { %s28213_s14 = scalar_lea.hbm %s35315_s12, %s28173_s20  ;;  %s27497_s27 = scalar_lea.hbm %s35315_s12, 4096 }
  0xa5   : > { %s27492_s10 = scalar_lea.hbm %s28213_s14, 2048  ;;  %p27498_p7 = scmp.lt.u32.totalorder %s28213_s14, %s35315_s12 }
  0xa6   : > { %p27493_p6 = scmp.ne.s32.totalorder %s28213_s14, %s27492_s10  ;;  %p27499_p8 = scmp.lt.u32.totalorder %s27497_s27, %s27492_s10 }
  0xa7   : > { %p27501_p4 = scmp.lt.u32.totalorder %s27492_s10, %s28213_s14 }
  0xa8   : > { %p27495_p0 = pnand %p27493_p6, %p28114_p13  ;;  %p27500_p12 = por %p27499_p8, %p27498_p7 }
  0xaa   : > { %p27496_p3 = pneg %p27495_p0  ;;  %p27502_p1 = por %p27501_p4, %p27500_p12 }
  0xac   : > { %p27503_p2 = pnand %p27502_p1, %p27496_p3 }
  0xae   : > { %27506 = shalt.err (!%p27503_p2)
}
  0xaf   : > { %s27507_s30 = scalar_lea.vmem %s28217_s8, 2048  ;;  %s27874_s29 = smov [#allocation17]  }
  0xb0   : > { %p27508_p5 = scmp.ne.s32.totalorder %s28217_s8, %s27507_s30  ;;  %s27512_s17 = sshll.u32 %s27874_s29, 4  ;;  %s27513_s17 = int_to_ptr.vmem [resolvable:$false] %s27512_s17 }
  0xb1   : > { %s27514_s28 = scalar_lea.vmem %s27513_s17, 4096  ;;  %p27515_p6 = scmp.lt.s32.totalorder %s28217_s8, %s27513_s17 }
  0xb2   : > { %p27510_p9 = pnand %p27508_p5, %p28114_p13  ;;  %p27516_p0 = scmp.lt.s32.totalorder %s27514_s28, %s27507_s30 }
  0xb4   : > { %p27511_p11 = pneg %p27510_p9  ;;  %p27517_p7 = por %p27516_p0, %p27515_p6 }
  0xb6   : > { %p27518_p8 = pnand %p27517_p7, %p27511_p11 }
  0xb8   : > { %27521 = shalt.err (!%p27518_p8)
}
  0xb9   : > { %s35316_s10 = smov 128   ;;  %s21588_s27 = sshll.u32 %s27862_s24, 12 }
  0xba   : > { %27238 = dma.hbm_to_vmem [thread:$0]  (!%p28097_p10), %s28213_s14, 2048, %s28217_s8, %s28108_s26, %s35316_s10, %s35316_s10, %s34780_s25  }
  0xbb   : > { %s712_s9 = scalar_lea.vmem [#allocation18], %s21523_s21  ;;  %s35317_s13 = sld [smem:[#allocation149_spill]] }
  0xbc   : > { %s719_s29 = sshll.u32 %s712_s9, 4  ;;  %s28252_s29 = int_to_ptr.vmem [resolvable:$true] %s719_s29 }
  0xc1   : > { %s28250_s28 = scalar_lea.hbm %s35317_s13, %s21588_s27  ;;  %s27527_s21 = scalar_lea.hbm %s35317_s13, 8192 }
  0xc2   : > { %s27522_s11 = scalar_lea.hbm %s28250_s28, 4096  ;;  %p27528_p1 = scmp.lt.u32.totalorder %s28250_s28, %s35317_s13 }
  0xc3   : > { %p27523_p3 = scmp.ne.s32.totalorder %s28250_s28, %s27522_s11  ;;  %p27529_p2 = scmp.lt.u32.totalorder %s27527_s21, %s27522_s11 }
  0xc4   : > { %p27531_p9 = scmp.lt.u32.totalorder %s27522_s11, %s28250_s28 }
  0xc5   : > { %p27525_p12 = pnand %p27523_p3, %p28114_p13  ;;  %p27530_p5 = por %p27529_p2, %p27528_p1 }
  0xc7   : > { %p27526_p4 = pneg %p27525_p12  ;;  %p27532_p11 = por %p27531_p9, %p27530_p5 }
  0xc9   : > { %p27533_p6 = pnand %p27532_p11, %p27526_p4 }
  0xcb   : > { %27536 = shalt.err (!%p27533_p6)
}
  0xcc   : > { %s27537_s27 = scalar_lea.vmem %s28252_s29, 4096  ;;  %s27875_s30 = smov [#allocation18]  }
  0xcd   : > { %p27538_p0 = scmp.ne.s32.totalorder %s28252_s29, %s27537_s27  ;;  %s27542_s17 = sshll.u32 %s27875_s30, 4  ;;  %s27543_s17 = int_to_ptr.vmem [resolvable:$false] %s27542_s17 }
  0xce   : > { %s27544_s25 = scalar_lea.vmem %s27543_s17, 8192  ;;  %p27545_p3 = scmp.lt.s32.totalorder %s28252_s29, %s27543_s17 }
  0xcf   : > { %p27540_p7 = pnand %p27538_p0, %p28114_p13  ;;  %p27546_p12 = scmp.lt.s32.totalorder %s27544_s25, %s27537_s27 }
  0xd1   : > { %p27541_p8 = pneg %p27540_p7  ;;  %p27547_p1 = por %p27546_p12, %p27545_p3 }
  0xd3   : > { %p27548_p2 = pnand %p27547_p1, %p27541_p8 }
  0xd5   : > { %27551 = shalt.err (!%p27548_p2)
}
  0xd6   : > { %s35318_s11 = smov 8   ;;  %s35319_s15 = sld [smem:[#allocation151_spill]] }
  0xd7   : > { %27241 = dma.hbm_to_vmem [thread:$0]  (!%p28097_p10), %s28250_s28, 4096, %s28252_s29, %s28108_s26, %s35316_s10, %s35316_s10, %s35318_s11  }
  0xd8   : > { %s741_s9 = scalar_lea.vmem [#allocation19], %s28170_s0  ;;  %s27876_s30 = smov [#allocation6]  }
  0xd9   : > { %s748_s27 = sshll.u32 %s741_s9, 4  ;;  %s28288_s17 = sshll.u32 %s27876_s30, 4  ;;  %s28286_s27 = int_to_ptr.vmem [resolvable:$true] %s748_s27  ;;  %s564_s17 = int_to_ptr.vmem [resolvable:$true] %s28288_s17 }
  0xdc   : > { %s28283_s21 = scalar_lea.hbm %s35319_s15, %s28173_s20  ;;  %s27557_s20 = scalar_lea.hbm %s35319_s15, 4096 }
  0xdd   : > { %s27552_s25 = scalar_lea.hbm %s28283_s21, 2048  ;;  %p27558_p11 = scmp.lt.u32.totalorder %s28283_s21, %s35319_s15 }
  0xde   : > { %p27553_p4 = scmp.ne.s32.totalorder %s28283_s21, %s27552_s25  ;;  %p27559_p6 = scmp.lt.u32.totalorder %s27557_s20, %s27552_s25 }
  0xdf   : > { %p27561_p7 = scmp.lt.u32.totalorder %s27552_s25, %s28283_s21 }
  0xe0   : > { %p27555_p5 = pnand %p27553_p4, %p28114_p13  ;;  %p27560_p0 = por %p27559_p6, %p27558_p11 }
  0xe2   : > { %p27556_p9 = pneg %p27555_p5  ;;  %p27562_p8 = por %p27561_p7, %p27560_p0 }
  0xe4   : > { %p27563_p3 = pnand %p27562_p8, %p27556_p9 }
  0xe6   : > { %27566 = shalt.err (!%p27563_p3)
}
  0xe7   : > { %s27567_s0 = scalar_lea.vmem %s28286_s27, 2048  ;;  %s27877_s9 = smov [#allocation19]  }
  0xe8   : > { %p27568_p12 = scmp.ne.s32.totalorder %s28286_s27, %s27567_s0  ;;  %s27572_s30 = sshll.u32 %s27877_s9, 4  ;;  %s27573_s30 = int_to_ptr.vmem [resolvable:$false] %s27572_s30 }
  0xe9   : > { %s27574_s29 = scalar_lea.vmem %s27573_s30, 4096  ;;  %p27575_p4 = scmp.lt.s32.totalorder %s28286_s27, %s27573_s30 }
  0xea   : > { %p27570_p1 = pnand %p27568_p12, %p28114_p13  ;;  %p27576_p5 = scmp.lt.s32.totalorder %s27574_s29, %s27567_s0 }
  0xec   : > { %p27571_p2 = pneg %p27570_p1  ;;  %p27577_p11 = por %p27576_p5, %p27575_p4 }
  0xee   : > { %p27578_p6 = pnand %p27577_p11, %p27571_p2 }
  0xf0   : > { %27581 = shalt.err (!%p27578_p6)
}
  0xf1   : > { %27244 = dma.hbm_to_vmem [thread:$0]  (!%p28097_p10), %s28283_s21, 2048, %s28286_s27, %s28108_s26, %s35316_s10, %s35316_s10, %s35318_s11  }
  0xf2   : > { %s35320_s20 = sld [smem:[#allocation140_spill]]  ;;  %p35321_p0 = scmp.ne.s32.totalorder %s35306_s19, 0 }
  0xf8   : > { %s27582_s14 = scalar_lea.hbm %s35320_s20, 128 }
  0xf9   : > { %p27583_p9 = scmp.ne.s32.totalorder %s35320_s20, %s27582_s14  ;;  %p27589_p3 = scmp.lt.u32.totalorder %s27582_s14, %s35320_s20 }
  0xfb   : > { %p27585_p7 = pnand %p27583_p9, %p35321_p0 }
  0xfd   : > { %p27586_p8 = pneg %p27585_p7 }
  0xff   : > { %p27591_p12 = pnand %p27589_p3, %p27586_p8 }
 0x101   : > { %27594 = shalt.err (!%p27591_p12)
}
 0x102   : > { %s27595_s29 = scalar_lea.vmem %s564_s17, 128  ;;  %p27603_p5 = scmp.lt.s32.totalorder %s564_s17, %s564_s17 }
 0x103   : > { %p27596_p1 = scmp.ne.s32.totalorder %s564_s17, %s27595_s29  ;;  %p27604_p11 = scmp.lt.s32.totalorder %s27595_s29, %s27595_s29 }
 0x105   : > { %p27598_p2 = pnand %p27596_p1, %p35321_p0  ;;  %p27605_p6 = por %p27604_p11, %p27603_p5 }
 0x107   : > { %p27599_p4 = pneg %p27598_p2 }
 0x109   : > { %p27606_p10 = pnand %p27605_p6, %p27599_p4 }
 0x10b   : > { %27609 = shalt.err (!%p27606_p10)
}
 0x10c   : > { %p35322_p9 = scmp.ne.s32.totalorder %s35303_s4, 0  ;;  %s27878_s25 = smov [#allocation9]  }
 0x10d   : > { %s585_s28 = sshll.u32 %s27878_s25, 4  ;;  %s34787_s14 = sshll.u32 %s28090_s1, 9  ;;  %s586_s28 = int_to_ptr.vmem [resolvable:$true] %s585_s28 }
 0x10e   : > { %27213 = dma.hbm_to_vmem [thread:$0]  (!%p35322_p9), %s35320_s20, 128, %s564_s17, [#allocation7]  }
 0x10f   : > { %s35323_s9 = sld [smem:[#allocation142_spill]] }
 0x115   : > { %s27610_s30 = scalar_lea.hbm %s35323_s9, 128 }
 0x116   : > { %p27611_p10 = scmp.ne.s32.totalorder %s35323_s9, %s27610_s30  ;;  %p27617_p3 = scmp.lt.u32.totalorder %s27610_s30, %s35323_s9 }
 0x118   : > { %p27613_p7 = pnand %p27611_p10, %p35321_p0 }
 0x11a   : > { %p27614_p8 = pneg %p27613_p7 }
 0x11c   : > { %p27619_p12 = pnand %p27617_p3, %p27614_p8 }
 0x11e   : > { %27622 = shalt.err (!%p27619_p12)
}
 0x11f   : > { %s27623_s17 = scalar_lea.vmem %s586_s28, 128  ;;  %p27631_p5 = scmp.lt.s32.totalorder %s586_s28, %s586_s28 }
 0x120   : > { %p27624_p1 = scmp.ne.s32.totalorder %s586_s28, %s27623_s17  ;;  %p27632_p11 = scmp.lt.s32.totalorder %s27623_s17, %s27623_s17 }
 0x122   : > { %p27626_p2 = pnand %p27624_p1, %p35321_p0  ;;  %p27633_p6 = por %p27632_p11, %p27631_p5 }
 0x124   : > { %p27627_p4 = pneg %p27626_p2 }
 0x126   : > { %p27634_p13 = pnand %p27633_p6, %p27627_p4 }
 0x128   : > { %27637 = shalt.err (!%p27634_p13)
}
 0x129   : > { %27219 = dma.hbm_to_vmem [thread:$0]  (!%p35322_p9), %s35323_s9, 128, %s586_s28, [#allocation10]  }
 0x12a   : > { %s34788_s13 = sshll.u32 %s27862_s24, 13  ;;  %s762_s25 = scalar_lea.vmem [#allocation20], %s34787_s14 }
 0x12b   : > { %s769_s8 = sshll.u32 %s762_s25, 4  ;;  %s35324_s16 = sld [smem:[#allocation152_spill]]  ;;  %s28363_s8 = int_to_ptr.vmem [resolvable:$true] %s769_s8 }
 0x12c   : > { %p35325_p10 = scmp.ne.s32.totalorder %s35312_s23, 0 }
 0x131   : > { %s28361_s29 = scalar_lea.hbm %s35324_s16, %s34788_s13  ;;  %s27643_s12 = scalar_lea.hbm %s35324_s16, 16384 }
 0x132   : > { %s27638_s21 = scalar_lea.hbm %s28361_s29, 8192  ;;  %p27644_p3 = scmp.lt.u32.totalorder %s28361_s29, %s35324_s16 }
 0x133   : > { %p27639_p13 = scmp.ne.s32.totalorder %s28361_s29, %s27638_s21  ;;  %p27645_p12 = scmp.lt.u32.totalorder %s27643_s12, %s27638_s21 }
 0x134   : > { %p27647_p2 = scmp.lt.u32.totalorder %s27638_s21, %s28361_s29 }
 0x135   : > { %p27641_p7 = pnand %p27639_p13, %p35325_p10  ;;  %p27646_p1 = por %p27645_p12, %p27644_p3 }
 0x137   : > { %p27642_p8 = pneg %p27641_p7  ;;  %p27648_p4 = por %p27647_p2, %p27646_p1 }
 0x139   : > { %p27649_p5 = pnand %p27648_p4, %p27642_p8 }
 0x13b   : > { %27652 = shalt.err (!%p27649_p5)
}
 0x13c   : > { %s27653_s0 = scalar_lea.vmem %s28363_s8, 8192  ;;  %s27879_s30 = smov [#allocation20]  }
 0x13d   : > { %p27654_p11 = scmp.ne.s32.totalorder %s28363_s8, %s27653_s0  ;;  %s27658_s28 = sshll.u32 %s27879_s30, 4  ;;  %s27659_s28 = int_to_ptr.vmem [resolvable:$false] %s27658_s28 }
 0x13e   : > { %s27660_s17 = scalar_lea.vmem %s27659_s28, 16384  ;;  %p27661_p7 = scmp.lt.s32.totalorder %s28363_s8, %s27659_s28 }
 0x13f   : > { %p27656_p6 = pnand %p27654_p11, %p35325_p10  ;;  %p27662_p9 = scmp.lt.s32.totalorder %s27660_s17, %s27653_s0 }
 0x141   : > { %p27657_p13 = pneg %p27656_p6  ;;  %p27663_p3 = por %p27662_p9, %p27661_p7 }
 0x143   : > { %p27664_p12 = pnand %p27663_p3, %p27657_p13 }
 0x145   : > { %27667 = shalt.err (!%p27664_p12)
}
 0x146   : > { %s27880_s21 = smov 512   ;;  %s27881_s12 = smov 32  }
 0x147   : > { %p35326_p8 = scmp.ne.s32.totalorder %s35310_s7, 0  ;;  %s27882_s27 = smov [#allocation8]  }
 0x148   : > { %s574_s25 = sshll.u32 %s27882_s27, 4  ;;  %s27883_s14 = smov [#allocation11]   ;;  %s575_s25 = int_to_ptr.vmem [resolvable:$true] %s574_s25 }
 0x149   : > { %27247 = dma.hbm_to_vmem [thread:$0]  (!%p35326_p8), %s28361_s29, 8192, %s28363_s8, %s28108_s26, %s27880_s21, %s27880_s21, %s27881_s12  }
 0x14a   : > { %s596_s30 = sshll.u32 %s27883_s14, 4  ;;  %s35327_s17 = sld [smem:[#allocation141_spill]]  ;;  %s28387_s30 = int_to_ptr.vmem [resolvable:$true] %s596_s30 }
 0x150   : > { %s27668_s13 = scalar_lea.hbm %s35327_s17, 128 }
 0x151   : > { %p27669_p9 = scmp.ne.s32.totalorder %s35327_s17, %s27668_s13  ;;  %p27675_p4 = scmp.lt.u32.totalorder %s27668_s13, %s35327_s17 }
 0x153   : > { %p27671_p1 = pnand %p27669_p9, %p35321_p0 }
 0x155   : > { %p27672_p2 = pneg %p27671_p1 }
 0x157   : > { %p27677_p5 = pnand %p27675_p4, %p27672_p2 }
 0x159   : > { %27680 = shalt.err (!%p27677_p5)
}
 0x15a   : > { %s27681_s14 = scalar_lea.vmem %s575_s25, 128  ;;  %p27689_p7 = scmp.lt.s32.totalorder %s575_s25, %s575_s25 }
 0x15b   : > { %p27682_p11 = scmp.ne.s32.totalorder %s575_s25, %s27681_s14  ;;  %p27690_p3 = scmp.lt.s32.totalorder %s27681_s14, %s27681_s14 }
 0x15d   : > { %p27684_p6 = pnand %p27682_p11, %p35321_p0  ;;  %p27691_p12 = por %p27690_p3, %p27689_p7 }
 0x15f   : > { %p27685_p13 = pneg %p27684_p6 }
 0x161   : > { %p27692_p8 = pnand %p27691_p12, %p27685_p13 }
 0x163   : > { %27695 = shalt.err (!%p27692_p8)
}
 0x164   : > { %p35328_p9 = scmp.ne.s32.totalorder %s35303_s4, 0  ;;  %s27696_s29 = scalar_lea.hbm %s34741_s5, 128 }
 0x165   : > { %p27697_p1 = scmp.ne.s32.totalorder %s34741_s5, %s27696_s29  ;;  %p27703_p8 = scmp.lt.u32.totalorder %s27696_s29, %s34741_s5 }
 0x166   : > { %27216 = dma.hbm_to_vmem [thread:$0]  (!%p35328_p9), %s35327_s17, 128, %s575_s25, [#allocation7]  }
 0x167   : > { %p27699_p2 = pnand %p27697_p1, %p35321_p0 }
 0x169   : > { %p27700_p4 = pneg %p27699_p2 }
 0x16b   : > { %p27705_p5 = pnand %p27703_p8, %p27700_p4 }
 0x16d   : > { %27708 = shalt.err (!%p27705_p5)
}
 0x16e   : > { %s27709_s25 = scalar_lea.vmem %s28387_s30, 128  ;;  %p27717_p7 = scmp.lt.s32.totalorder %s28387_s30, %s28387_s30 }
 0x16f   : > { %p27710_p11 = scmp.ne.s32.totalorder %s28387_s30, %s27709_s25  ;;  %p27718_p3 = scmp.lt.s32.totalorder %s27709_s25, %s27709_s25 }
 0x171   : > { %p27712_p6 = pnand %p27710_p11, %p35321_p0  ;;  %p27719_p12 = por %p27718_p3, %p27717_p7 }
 0x173   : > { %p27713_p13 = pneg %p27712_p6 }
 0x175   : > { %p27720_p1 = pnand %p27719_p12, %p27713_p13 }
 0x177   : > { %27723 = shalt.err (!%p27720_p1)
}
 0x178   : > { %27222 = dma.hbm_to_vmem [thread:$0]  (!%p35328_p9), %s34741_s5, 128, %s28387_s30, [#allocation10]  }
 0x179   : > { %s27884_s14 = smov [#allocation12]   ;;  %s35329_s9 = sshll.u32 %s27862_s24, 13 }
 0x17a   : > { %s607_s15 = sshll.u32 %s27884_s14, 4  ;;  %s28435_s29 = scalar_lea.hbm %s34754_s18, %s35329_s9  ;;  %s608_s15 = int_to_ptr.vmem [resolvable:$true] %s607_s15 }
 0x17b   : > { %s35330_s21 = sshll.u32 %s28090_s1, 9  ;;  %s27724_s28 = scalar_lea.hbm %s34742_s6, 128 }
 0x17c   : > { %s790_s12 = scalar_lea.vmem [#allocation21], %s35330_s21  ;;  %p27725_p2 = scmp.ne.s32.totalorder %s34742_s6, %s27724_s28 }
 0x17d   : > { %s797_s27 = sshll.u32 %s790_s12, 4  ;;  %p27731_p5 = scmp.lt.u32.totalorder %s27724_s28, %s34742_s6  ;;  %s28457_s27 = int_to_ptr.vmem [resolvable:$true] %s797_s27 }
 0x17e   : > { %p27727_p4 = pnand %p27725_p2, %p35321_p0 }
 0x180   : > { %p27728_p8 = pneg %p27727_p4 }
 0x182   : > { %p27733_p11 = pnand %p27731_p5, %p27728_p8 }
 0x184   : > { %27736 = shalt.err (!%p27733_p11)
}
 0x185   : > { %s27737_s1 = scalar_lea.vmem %s608_s15, 128  ;;  %p27745_p3 = scmp.lt.s32.totalorder %s608_s15, %s608_s15 }
 0x186   : > { %p27738_p6 = scmp.ne.s32.totalorder %s608_s15, %s27737_s1  ;;  %p27746_p12 = scmp.lt.s32.totalorder %s27737_s1, %s27737_s1 }
 0x188   : > { %p27740_p13 = pnand %p27738_p6, %p35321_p0  ;;  %p27747_p1 = por %p27746_p12, %p27745_p3 }
 0x18a   : > { %p27741_p7 = pneg %p27740_p13 }
 0x18c   : > { %p27748_p10 = pnand %p27747_p1, %p27741_p7 }
 0x18e   : > { %27751 = shalt.err (!%p27748_p10)
}
 0x18f   : > { %27225 = dma.hbm_to_vmem [thread:$0]  (!%p35328_p9), %s34742_s6, 128, %s608_s15, [#allocation13]  }
 0x190   : > { %s27752_s19 = scalar_lea.hbm %s28435_s29, 8192  ;;  %p35331_p2 = scmp.ne.s32.totalorder %s35312_s23, 0 }
 0x191   : > { %p27753_p0 = scmp.ne.s32.totalorder %s28435_s29, %s27752_s19  ;;  %s27757_s4 = scalar_lea.hbm %s34754_s18, 16384 }
 0x192   : > { %p27758_p10 = scmp.lt.u32.totalorder %s28435_s29, %s34754_s18  ;;  %p27759_p5 = scmp.lt.u32.totalorder %s27757_s4, %s27752_s19 }
 0x193   : > { %p27755_p4 = pnand %p27753_p0, %p35331_p2  ;;  %p27761_p6 = scmp.lt.u32.totalorder %s27752_s19, %s28435_s29 }
 0x194   : > { %p27760_p11 = por %p27759_p5, %p27758_p10 }
 0x195   : > { %p27756_p8 = pneg %p27755_p4 }
 0x196   : > { %p27762_p13 = por %p27761_p6, %p27760_p11 }
 0x198   : > { %p27763_p9 = pnand %p27762_p13, %p27756_p8 }
 0x19a   : > { %27766 = shalt.err (!%p27763_p9)
}
 0x19b   : > { %s27767_s15 = scalar_lea.vmem %s28457_s27, 8192  ;;  %s27885_s12 = smov [#allocation21]  }
 0x19c   : > { %p27768_p7 = scmp.ne.s32.totalorder %s28457_s27, %s27767_s15  ;;  %s27772_s0 = sshll.u32 %s27885_s12, 4  ;;  %s27773_s0 = int_to_ptr.vmem [resolvable:$false] %s27772_s0 }
 0x19d   : > { %s27774_s25 = scalar_lea.vmem %s27773_s0, 16384  ;;  %p27775_p1 = scmp.lt.s32.totalorder %s28457_s27, %s27773_s0 }
 0x19e   : > { %p27770_p3 = pnand %p27768_p7, %p35331_p2  ;;  %p27776_p0 = scmp.lt.s32.totalorder %s27774_s25, %s27767_s15 }
 0x1a0   : > { %p27771_p12 = pneg %p27770_p3  ;;  %p27777_p4 = por %p27776_p0, %p27775_p1 }
 0x1a2   : > { %p27778_p10 = pnand %p27777_p4, %p27771_p12 }
 0x1a4   : > { %27781 = shalt.err (!%p27778_p10)
}
 0x1a5   : > { %p35332_p8 = scmp.ne.s32.totalorder %s35310_s7, 0  ;;  %p35333_p2 = scmp.ne.s32.totalorder %s35301_s3, 0 }
 0x1a7   : > { %27250 = dma.hbm_to_vmem [thread:$0]  (!%p35332_p8), %s28435_s29, 8192, %s28457_s27, %s28108_s26, %s35316_s10, %s35316_s10, %s35318_s11  }
 0x1a8   : > { %817 = sbr.rel (%p35333_p2) target bundleno = 5958 (0x1746), region = 100 }
 0x1af   : > { %p35334_p5 = scmp.eq.s32.totalorder %s28020_s2, 0 }
 0x1b1   : > { %27825 = dma.done.wait (%p35334_p5), [#allocation4], 128   ;;  %p35335_p11 = pmov %p35334_p5 }
 0x1b2   : > { %p35336_p6 = pmov %p35334_p5 }
 0x1b3   : > { %27827 = vsyncadd (%p35335_p11), [#allocation4], 4294967168 }
 0x1b4   : > { %27829 = dma.done.wait (%p35336_p6), [#allocation7], 256   ;;  %p35337_p13 = pmov %p35334_p5 }
 0x1b5   : > { %p35338_p9 = pmov %p35334_p5 }
 0x1b6   : > { %27831 = vsyncadd (%p35337_p13), [#allocation7], 4294967040 }
 0x1b7   : > { %27833 = dma.done.wait (%p35338_p9), [#allocation10], 256   ;;  %p35339_p7 = pmov %p35334_p5 }
 0x1b8   : > { %p35340_p3 = pmov %p35334_p5 }
 0x1b9   : > { %27835 = vsyncadd (%p35339_p7), [#allocation10], 4294967040 }
 0x1ba   : > { %27837 = dma.done.wait (%p35340_p3), [#allocation13], 128   ;;  %p35341_p12 = pmov %p35340_p3 }
 0x1bb   : > { %s35342_s23 = sld [smem:[#allocation30_spill]]  ;;  %s843_s3 = sand.u32 1, %s28020_s2  }
 0x1bc   : > { %27839 = vsyncadd (%p35341_p12), [#allocation13], 4294967168  ;;  %s845_s26 = sand.u32 1, %s27854_s22   ;;  %s844_s10 = scalar_lea.sflag [#allocation4], %s843_s3 }
 0x1bd   : > { %s27162_s7 = smul.u32 384, %s845_s26 }
 0x1bf   : > { %s28504_s11 = scalar_lea.vmem [#allocation14], %s27162_s7 }
 0x1c1   : > { %p35343_p1 = scmp.ne.s32.totalorder %s35342_s23, 0 }
 0x1c3   : > { %27841 = dma.done.wait (%p35343_p1), %s844_s10, 32896  }
 0x1c4   : > { %27843 = vsyncadd (%p35343_p1), %s844_s10, 4294934400  ;;  %s21542_s29 = sshll.u32 %s845_s26, 3  ;;  %s21543_s27 = sshll.u32 %s845_s26, 7 }
 0x1c5   : > { %s21545_s28 = sshll.u32 %s845_s26, 8  ;;  %s21547_s8 = sshll.u32 %s845_s26, 9 }
 0x1c6   : > { %p1011_p0 = scmp.lt.s32.totalorder %s28020_s2, 1  ;;  %s35344_s19 = sld [smem:[#allocation150_spill]] }
 0x1c7   : > { %s35345_s13 = sld [smem:[#allocation153_spill]]  ;;  %s35346_s25 = sld [smem:[#allocation154_spill]] }
 0x1c8   : > { %s1012_s24 = scalar_select %p1011_p0, %s28020_s2, 1 }
 0x1c9   : > { %s28527_s3 = scalar_lea.vmem [#allocation15], %s21542_s29  ;;  %s28529_s26 = scalar_lea.vmem [#allocation16], %s21543_s27 }
 0x1ca   : > { %s21592_s30 = sshll.u32 %s1012_s24, 3  ;;  %s21551_s1 = sshll.u32 %s1012_s24, 2 }
 0x1cb   : > { %s21593_s15 = sshll.u32 %s1012_s24, 4  ;;  %s28531_s7 = scalar_lea.vmem [#allocation17], %s21543_s27 }
 0x1cc   : > { %s28515_s9 = scalar_lea.vmem %s35344_s19, %s21592_s30  ;;  %s28533_s10 = scalar_lea.vmem [#allocation18], %s21545_s28 }
 0x1cd   : > { %s28520_s21 = scalar_lea.vmem %s35345_s13, %s21551_s1  ;;  %s28525_s23 = scalar_lea.vmem %s35346_s25, %s21593_s15 }
 0x1ce   : > { %s28535_s30 = scalar_lea.vmem [#allocation19], %s21543_s27  ;;  %s28537_s17 = scalar_lea.vmem [#allocation20], %s21547_s8 }
 0x1cf   : > { %s28539_s1 = scalar_lea.vmem [#allocation21], %s21547_s8  ;;  %p35347_p4 = scmp.ne.s32.totalorder %s28020_s2, 0 }
 0x1d0   : > { %v1029_v0 = vld [vmem:[#allocation3] sm:$0xff] (!%p35347_p4) }
 0x1d1   : > { %1028 = sbr.rel (%p35347_p4) target bundleno = 472 (0x1d8), region = 160  ;;  %1030 = vst [vmem:[#allocation2] sm:$0xff] (!%p35347_p4), %v1029_v0 }
 0x1d8 PF: > { %v1046_v1 = vld [vmem:[%s28504_s11 + $0x8] sm:$0xff]  ;;  %v1049_v2 = vld [vmem:[%s28504_s11 + $0x20] sm:$0xff]  ;;  %v1048_v6 = vld [vmem:[%s28504_s11 + $0x18] sm:$0xff]  ;;  %v34794_v10 = vmov 0.0   ;;  %vm27888_vm0 = vmmov 0   ;;  %s27890_s29 = smov 96  }
 0x1d9   : > { %v1045_v3 = vld [vmem:[%s28504_s11] sm:$0xff]  ;;  %v1093_v4 = vand.u32 4294901760, %v1046_v1  ;;  %v1097_v5 = vand.u32 4294901760, %v1049_v2  ;;  %v1052_v8 = vld [vmem:[%s28504_s11 + $0x38] sm:$0xff]  ;;  %v1055_v9 = vld [vmem:[%s28504_s11 + $0x50] sm:$0xff]  ;;  %1189 = vmatprep.mubr.f32.mxu0 %v34794_v10  ;;  %v1099_v11 = vand.u32 4294901760, %v1048_v6 }
 0x1da   : > { %v1095_v7 = vand.u32 4294901760, %v1045_v3  ;;  %v1101_v12 = vand.u32 4294901760, %v1052_v8  ;;  %v1105_v13 = vand.u32 4294901760, %v1055_v9  ;;  %v1051_v14 = vld [vmem:[%s28504_s11 + $0x30] sm:$0xff]  ;;  %v1054_v15 = vld [vmem:[%s28504_s11 + $0x48] sm:$0xff]  ;;  %v1061_v18 = vld [vmem:[%s28504_s11 + $0x80] sm:$0xff] }
 0x1db   : > { %v1058_v16 = vld [vmem:[%s28504_s11 + $0x68] sm:$0xff]  ;;  %v28553_v17 = vpack.c.bf16 %v1097_v5, %v1093_v4  ;;  %v1057_v19 = vld [vmem:[%s28504_s11 + $0x60] sm:$0xff]  ;;  %v1060_v20 = vld [vmem:[%s28504_s11 + $0x78] sm:$0xff]  ;;  %v1103_v24 = vand.u32 4294901760, %v1051_v14  ;;  %v1107_v25 = vand.u32 4294901760, %v1054_v15  ;;  %v1113_v27 = vand.u32 4294901760, %v1061_v18 }
 0x1dc   : > { %v28558_v21 = vpack.c.bf16 %v1099_v11, %v1095_v7  ;;  %v28560_v22 = vpack.c.bf16 %v1105_v13, %v1101_v12  ;;  %v1064_v23 = vld [vmem:[%s28504_s11 + $0x98] sm:$0xff]  ;;  %v1109_v26 = vand.u32 4294901760, %v1058_v16  ;;  %v1111_v28 = vand.u32 4294901760, %v1057_v19  ;;  %v1067_v30 = vld [vmem:[%s28504_s11 + $0xb0] sm:$0xff]  ;;  %v1066_v34 = vld [vmem:[%s28504_s11 + $0xa8] sm:$0xff]  ;;  %s27891_s27 = smov 64  }
 0x1dd   : > { %35348 = vst [vmem:[#allocation33_spill] sm:$0xff] %v28553_v17  ;;  %24859 = vmatprep.subr.bf16.mxu0 %v28553_v17  ;;  %v1115_v29 = vand.u32 4294901760, %v1060_v20  ;;  %v1063_v31 = vld [vmem:[%s28504_s11 + $0x90] sm:$0xff]  ;;  %v28568_v32 = vpack.c.bf16 %v1107_v25, %v1103_v24  ;;  %v1117_v33 = vand.u32 4294901760, %v1064_v23  ;;  %v1070_v35 = vld [vmem:[%s28504_s11 + $0xc8] sm:$0xff]  ;;  %v1073_v36 = vld [vmem:[%s28504_s11 + $0xe0] sm:$0xff]  ;;  %v28573_v37 = vsub.f32 %v1046_v1, %v1093_v4 }
 0x1de   : > { %35349 = vst [vmem:[#allocation34_spill] sm:$0xff] %v28558_v21  ;;  %35350 = vst [vmem:[#allocation35_spill] sm:$0xff] %v28560_v22  ;;  %24861 = vmatpush1.bf16.msra.mxu0 %v28558_v21  ;;  %v28575_v38 = vsub.f32 %v1049_v2, %v1097_v5  ;;  %v28577_v39 = vsub.f32 %v1045_v3, %v1095_v7  ;;  %v28579_v40 = vpack.c.bf16 %v1113_v27, %v1109_v26  ;;  %v1069_v49 = vld [vmem:[%s28504_s11 + $0xc0] sm:$0xff]  ;;  %v1072_v50 = vld [vmem:[%s28504_s11 + $0xd8] sm:$0xff]  ;;  %vm3183_vm1 = vcmask 261120   ;;  %s35469_s24 = sld [smem:[#allocation139_spill]] }
 0x1df   : > { %24863 = vmatprep.subr.bf16.mxu0 %v28560_v22  ;;  %35351 = vst [vmem:[#allocation36_spill] sm:$0xff] %v28568_v32  ;;  %v28581_v41 = vsub.f32 %v1048_v6, %v1099_v11  ;;  %v28583_v42 = vsub.f32 %v1052_v8, %v1101_v12  ;;  %v28585_v43 = vpack.c.bf16 %v1115_v29, %v1111_v28  ;;  %v1121_v44 = vand.u32 4294901760, %v1067_v30  ;;  %v1076_v55 = vld [vmem:[%s28504_s11 + $0xf8] sm:$0xff]  ;;  %v1079_v56 = vld [vmem:[%s28504_s11 + $0x110] sm:$0xff]  ;;  %v1078_v62 = vld [vmem:[%s28504_s11 + $0x108] sm:$0xff]  ;;  %s35529_s8 = sld [smem:[#allocation144_spill]] }
 0x1e0   : > { %35352 = vst [vmem:[#allocation37_spill] sm:$0xff] %v28579_v40  ;;  %v1119_v45 = vand.u32 4294901760, %v1063_v31  ;;  %v1123_v46 = vand.u32 4294901760, %v1066_v34  ;;  %v1125_v47 = vand.u32 4294901760, %v1070_v35  ;;  %v1129_v48 = vand.u32 4294901760, %v1073_v36  ;;  %v1075_v57 = vld [vmem:[%s28504_s11 + $0xf0] sm:$0xff] }
 0x1e1   : > { %35353 = vst [vmem:[#allocation38_spill] sm:$0xff] %v28585_v43  ;;  %v28590_v51 = vsub.f32 %v1055_v9, %v1105_v13  ;;  %v28592_v52 = vsub.f32 %v1051_v14, %v1103_v24  ;;  %v28594_v53 = vsub.f32 %v1054_v15, %v1107_v25  ;;  %v28597_v54 = vpack.c.bf16 %v1121_v44, %v1117_v33  ;;  %v1082_v63 = vld [vmem:[%s28504_s11 + $0x128] sm:$0xff]  ;;  %v1085_v0 = vld [vmem:[%s28504_s11 + $0x140] sm:$0xff]  ;;  %v1084_v11 = vld [vmem:[%s28504_s11 + $0x138] sm:$0xff]  ;;  %p21580_p10 = scmp.ne.s32.totalorder %s28020_s2, 1 }
 0x1e2   : > { %24865 = vmatpush1.bf16.msra.mxu0 %v28568_v32  ;;  %v28602_v58 = vsub.f32 %v1058_v16, %v1109_v26  ;;  %v28604_v59 = vsub.f32 %v1061_v18, %v1113_v27  ;;  %v28606_v60 = vsub.f32 %v1057_v19, %v1111_v28  ;;  %v28608_v61 = vsub.f32 %v1060_v20, %v1115_v29  ;;  %v1081_v9 = vld [vmem:[%s28504_s11 + $0x120] sm:$0xff]  ;;  %v1031_v27 = vld [vmem:[#allocation2] sm:$0xff] }
 0x1e3   : > { %24867 = vmatprep.subr.bf16.mxu0 %v28579_v40  ;;  %35354 = vst [vmem:[#allocation39_spill] sm:$0xff] %v28597_v54  ;;  %v28613_v1 = vsub.f32 %v1064_v23, %v1117_v33  ;;  %v28615_v2 = vsub.f32 %v1067_v30, %v1121_v44  ;;  %v1127_v3 = vand.u32 4294901760, %v1069_v49  ;;  %v1131_v4 = vand.u32 4294901760, %v1072_v50  ;;  %v1088_v44 = vld [vmem:[%s28504_s11 + $0x158] sm:$0xff] }
 0x1e4   : > { %v28618_v5 = vpack.c.bf16 %v1123_v46, %v1119_v45  ;;  %v28620_v6 = vpack.c.bf16 %v1129_v48, %v1125_v47  ;;  %v1133_v7 = vand.u32 4294901760, %v1076_v55  ;;  %v1137_v8 = vand.u32 4294901760, %v1079_v56  ;;  %s35470_s14 = smov %s35469_s24 }
 0x1e5   : > { %v1135_v12 = vand.u32 4294901760, %v1075_v57  ;;  %v1139_v13 = vand.u32 4294901760, %v1078_v62  ;;  %v1141_v14 = vand.u32 4294901760, %v1082_v63  ;;  %v1145_v15 = vand.u32 4294901760, %v1085_v0 }
 0x1e6   : > { %24869 = vmatpush1.bf16.msra.mxu0 %v28585_v43  ;;  %35355 = vst [vmem:[#allocation40_spill] sm:$0xff] %v28618_v5  ;;  %35356 = vst [vmem:[#allocation41_spill] sm:$0xff] %v28620_v6  ;;  %v28625_v16 = vsub.f32 %v1063_v31, %v1119_v45  ;;  %v28627_v18 = vsub.f32 %v1066_v34, %v1123_v46  ;;  %v28629_v19 = vsub.f32 %v1070_v35, %v1125_v47  ;;  %v1091_v46 = vld [vmem:[%s28504_s11 + $0x170] sm:$0xff]  ;;  %vm3188_vm2 = vcmask 523264  }
 0x1e7   : > { %24871 = vmatprep.subr.bf16.mxu0 %v28597_v54  ;;  %v28631_v20 = vsub.f32 %v1073_v36, %v1129_v48  ;;  %v28633_v23 = vpack.c.bf16 %v1131_v4, %v1127_v3  ;;  %v28635_v24 = vsub.f32 %v1069_v49, %v1127_v3  ;;  %v1143_v25 = vand.u32 4294901760, %v1081_v9 }
 0x1e8   : > { %v1147_v26 = vand.u32 4294901760, %v1084_v11  ;;  %v28638_v28 = vsub.f32 %v1072_v50, %v1131_v4  ;;  %v28640_v29 = vpack.c.bf16 %v1137_v8, %v1133_v7  ;;  %v28642_v30 = vsub.f32 %v1076_v55, %v1133_v7 }
 0x1e9   : > { %35357 = vst [vmem:[#allocation42_spill] sm:$0xff] %v28633_v23  ;;  %v28644_v31 = vsub.f32 %v1079_v56, %v1137_v8  ;;  %v28647_v33 = vpack.c.bf16 %v1139_v13, %v1135_v12  ;;  %v28649_v34 = vsub.f32 %v1075_v57, %v1135_v12  ;;  %v28651_v35 = vsub.f32 %v1078_v62, %v1139_v13  ;;  %v1087_v57 = vld [vmem:[%s28504_s11 + $0x150] sm:$0xff]  ;;  %v28671_v62 = vld [vmem:[%s28504_s11 + $0x168] sm:$0xff] }
 0x1ea   : > { %24873 = vmatpush1.bf16.msra.mxu0 %v28618_v5  ;;  %35358 = vst [vmem:[#allocation43_spill] sm:$0xff] %v28640_v29  ;;  %v28653_v36 = vpack.c.bf16 %v1145_v15, %v1141_v14  ;;  %v28656_v45 = vsub.f32 %v1082_v63, %v1141_v14  ;;  %v34792_v47 = vand.u32 4294901760, %v28573_v37  ;;  %v34793_v48 = vand.u32 4294901760, %v28575_v38 }
 0x1eb   : > { %24875 = vmatprep.subr.bf16.mxu0 %v28620_v6  ;;  %35359 = vst [vmem:[#allocation44_spill] sm:$0xff] %v28647_v33  ;;  %v28661_v49 = vand.u32 4294901760, %v1031_v27  ;;  %v28663_v50 = vsub.f32 %v1085_v0, %v1145_v15  ;;  %v28665_v55 = vpack.c.bf16 %v1147_v26, %v1143_v25  ;;  %v28667_v56 = vsub.f32 %v1081_v9, %v1143_v25 }
 0x1ec   : > { %35360 = vst [vmem:[#allocation45_spill] sm:$0xff] %v28653_v36  ;;  %v34796_v3 = vand.u32 4294901760, %v28577_v39  ;;  %v28675_v63 = vsub.f32 %v1084_v11, %v1147_v26  ;;  %v1149_v4 = vand.u32 4294901760, %v1088_v44  ;;  %v1204_v7 = vsub.f32 %v28573_v37, %v34792_v47 }
 0x1ed   : > { %35361 = vst [vmem:[#allocation46_spill] sm:$0xff] %v28663_v50  ;;  %35362 = vst [vmem:[#allocation47_spill] sm:$0xff] %v28665_v55  ;;  %v1216_v0 = vsub.f32 %v28575_v38, %v34793_v48  ;;  %v1153_v8 = vand.u32 4294901760, %v1091_v46  ;;  %v28685_v9 = vsub.f32 %v1031_v27, %v28661_v49  ;;  %v34799_v12 = vand.u32 4294901760, %v28581_v41 }
 0x1ee   : > { %35363 = vst [vmem:[#allocation48_spill] sm:$0xff] %v28667_v56  ;;  %24877 = vmatpush1.bf16.msra.mxu0 %v28633_v23  ;;  %35364 = vst [vmem:[#allocation49_spill] sm:$0xff] %v28675_v63  ;;  %v34804_v11 = vand.u32 4294901760, %v28583_v42  ;;  %v1151_v13 = vand.u32 4294901760, %v1087_v57  ;;  %v34805_v15 = vand.u32 4294901760, %v28590_v51  ;;  %v1205_v26 = vand.u32 4294901760, %v1204_v7 }
 0x1ef   : > { %24879 = vmatprep.subr.bf16.mxu0 %v28640_v29  ;;  %35365 = vst [vmem:[#allocation50_spill] sm:$0xff] %v28685_v9  ;;  %v1217_v47 = vand.u32 4294901760, %v1216_v0  ;;  %v28693_v48 = vand.u32 4294901760, %v28685_v9  ;;  %v1210_v27 = vsub.f32 %v28577_v39, %v34796_v3  ;;  %v1222_v10 = vsub.f32 %v28581_v41, %v34799_v12 }
 0x1f0   : > { %v1228_v14 = vsub.f32 %v28583_v42, %v34804_v11  ;;  %v1240_v7 = vsub.f32 %v28590_v51, %v34805_v15  ;;  %v34812_v0 = vand.u32 4294901760, %v28594_v53  ;;  %v28710_v25 = vpack.c.bf16 %v1153_v8, %v1149_v4 }
 0x1f1   : > { %35366 = vst [vmem:[#allocation51_spill] sm:$0xff] %v28693_v48  ;;  %v28712_v3 = vsub.f32 %v1088_v44, %v1149_v4  ;;  %v35368_v29 = vand.u32 4294901760, %v28671_v62  ;;  %v35370_v11 = vand.u32 4294901760, %v28592_v52  ;;  %v24890_v44 = vpack.c.bf16 %v1217_v47, %v1205_v26 }
 0x1f2   : > { %24881 = vmatpush1.bf16.msra.mxu0 %v28647_v33  ;;  %35367 = vst [vmem:[#allocation52_spill] sm:$0xff] %v28710_v25  ;;  %v28714_v33 = vsub.f32 %v1091_v46, %v1153_v8  ;;  %v1193_v46 = vsub.f32 %v28685_v9, %v28693_v48  ;;  %v1211_v4 = vand.u32 4294901760, %v1210_v27  ;;  %v1229_v12 = vand.u32 4294901760, %v1228_v14 }
 0x1f3   : > { %24883 = vmatprep.subr.bf16.mxu0 %v28653_v36  ;;  %v28719_v23 = vpack.c.bf16 %v35368_v29, %v1151_v13  ;;  %v1234_v15 = vsub.f32 %v28592_v52, %v35370_v11  ;;  %v1246_v36 = vsub.f32 %v28594_v53, %v34812_v0  ;;  %v1223_v29 = vand.u32 4294901760, %v1222_v10 }
 0x1f4   : > { %v1241_v5 = vand.u32 4294901760, %v1240_v7  ;;  %v34821_v11 = vand.u32 4294901760, %v28608_v61  ;;  %v35371_v0 = vand.u32 4294901760, %v28602_v58  ;;  %v35372_v47 = vand.u32 4294901760, %v28604_v59 }
 0x1f5   : > { %35369 = vst [vmem:[#allocation53_spill] sm:$0xff] %v28719_v23  ;;  %v34826_v27 = vand.u32 4294901760, %v28613_v1  ;;  %v34831_v8 = vand.u32 4294901760, %v28615_v2  ;;  %v1235_v48 = vand.u32 4294901760, %v1234_v15  ;;  %v1247_v10 = vand.u32 4294901760, %v1246_v36 }
 0x1f6   : > { %24885 = vmatpush1.bf16.msra.mxu0 %v28665_v55  ;;  %v1252_v6 = vsub.f32 %v28602_v58, %v35371_v0  ;;  %v1264_v26 = vsub.f32 %v28604_v59, %v35372_v47  ;;  %v35373_v14 = vand.u32 4294901760, %v28606_v60  ;;  %v28748_v55 = vand.u32 4294901760, %v1193_v46 }
 0x1f7   : > { %24887 = vmatprep.subr.bf16.mxu0 %v28710_v25  ;;  %v1270_v25 = vsub.f32 %v28608_v61, %v34821_v11  ;;  %v1276_v0 = vsub.f32 %v28613_v1, %v34826_v27  ;;  %v1288_v47 = vsub.f32 %v28615_v2, %v34831_v8  ;;  %v28758_v15 = vsub.f32 %v1087_v57, %v1151_v13 }
 0x1f8   : > { %v1258_v7 = vsub.f32 %v28606_v60, %v35373_v14  ;;  %35374 = vst [vmem:[#allocation54_spill] sm:$0xff] %v28748_v55  ;;  %v24892_v14 = vpack.c.bf16 %v1223_v29, %v1211_v4  ;;  %v34835_v54 = vand.u32 4294901760, %v28627_v18  ;;  %v34834_v46 = vand.u32 4294901760, %v28629_v19 }
 0x1f9   : > { %v24894_v11 = vpack.c.bf16 %v1241_v5, %v1229_v12  ;;  %v1253_v43 = vand.u32 4294901760, %v1252_v6  ;;  %v1265_v40 = vand.u32 4294901760, %v1264_v26  ;;  %v34833_v27 = vand.u32 4294901760, %v28631_v20 }
 0x1fa   : > { %24889 = vmatpush1.bf16.msra.mxu0 %v28719_v23  ;;  %v24896_v32 = vpack.c.bf16 %v1247_v10, %v1235_v48  ;;  %v1259_v22 = vand.u32 4294901760, %v1258_v7  ;;  %v1271_v8 = vand.u32 4294901760, %v1270_v25  ;;  %v34832_v36 = vand.u32 4294901760, %v28635_v24 }
 0x1fb   : > { %24891 = vmatprep.subr.bf16.mxu0 %v24890_v44  ;;  %v1277_v57 = vand.u32 4294901760, %v1276_v0  ;;  %v1289_v13 = vand.u32 4294901760, %v1288_v47  ;;  %v35375_v4 = vand.u32 4294901760, %v28625_v16  ;;  %v34836_v44 = vand.u32 4294901760, %v28638_v28 }
 0x1fc   : > { %v1294_v5 = vsub.f32 %v28627_v18, %v34835_v54  ;;  %v1300_v6 = vsub.f32 %v28629_v19, %v34834_v46  ;;  %v1312_v48 = vsub.f32 %v28631_v20, %v34833_v27  ;;  %v35376_v12 = vmov 0.0  }
 0x1fd   : > { %1195 = vmatmul.mubr.f32.vlgmr.msra.gmra.mrb[0].mxu0 %v28748_v55  ;;  %v1282_v29 = vsub.f32 %v28625_v16, %v35375_v4  ;;  %v24898_v25 = vpack.c.bf16 %v1265_v40, %v1253_v43  ;;  %v1306_v26 = vsub.f32 %v28635_v24, %v34832_v36  ;;  %v34838_v10 = vand.u32 4294901760, %v28642_v30 }
 0x1fe   : > { %24893 = vmatpush1.bf16.msra.mxu0 %v24892_v14  ;;  %1425 = vmatprep.mubr.f32.mxu0 %v35376_v12  ;;  %v35377_v0 = vand.u32 4294901760, %v28671_v62  ;;  %v1318_v14 = vsub.f32 %v28638_v28, %v34836_v44  ;;  %v34837_v40 = vand.u32 4294901760, %v28651_v35  ;;  %v24900_v43 = vpack.c.bf16 %v1271_v8, %v1259_v22 }
 0x1ff   : > { %24895 = vmatprep.subr.bf16.mxu0 %v24894_v11  ;;  %v24902_v4 = vpack.c.bf16 %v1289_v13, %v1277_v57  ;;  %v1283_v36 = vand.u32 4294901760, %v1282_v29  ;;  %v34844_v27 = vand.u32 4294901760, %v28656_v45  ;;  %v1295_v46 = vand.u32 4294901760, %v1294_v5 }
 0x200   : > { %v28787_v47 = vsub.f32 %v28671_v62, %v35377_v0  ;;  %v1301_v54 = vand.u32 4294901760, %v1300_v6  ;;  %v1313_v7 = vand.u32 4294901760, %v1312_v48  ;;  %v1359_v62 = vand.u32 4294901760, %v28663_v50 }
 0x201   : > { %v1307_v0 = vand.u32 4294901760, %v1306_v26  ;;  %v1324_v44 = vsub.f32 %v28642_v30, %v34838_v10  ;;  %v35378_v11 = vand.u32 4294901760, %v28644_v31  ;;  %v1353_v8 = vand.u32 4294901760, %v28667_v56 }
 0x202   : > { %24897 = vmatpush1.bf16.msra.mxu0 %v24896_v32  ;;  %v1319_v57 = vand.u32 4294901760, %v1318_v14  ;;  %v35379_v32 = vand.u32 4294901760, %v28649_v34  ;;  %v1342_v29 = vsub.f32 %v28651_v35, %v34837_v40  ;;  %v1365_v5 = vand.u32 4294901760, %v28675_v63 }
 0x203   : > { %24899 = vmatprep.subr.bf16.mxu0 %v24898_v25  ;;  %v1336_v22 = vsub.f32 %v28644_v31, %v35378_v11  ;;  %v1348_v6 = vsub.f32 %v28656_v45, %v34844_v27  ;;  %v1360_v48 = vsub.f32 %v28663_v50, %v1359_v62  ;;  %v1371_v25 = vand.u32 4294901760, %v28712_v3 }
 0x204   : > { %v1330_v13 = vsub.f32 %v28649_v34, %v35379_v32  ;;  %v1383_v26 = vand.u32 4294901760, %v28714_v33  ;;  %v24904_v14 = vpack.c.bf16 %v1295_v46, %v1283_v36  ;;  %v1354_v11 = vsub.f32 %v28667_v56, %v1353_v8 }
 0x205   : > { %v1366_v32 = vsub.f32 %v28675_v63, %v1365_v5  ;;  %v1377_v40 = vand.u32 4294901760, %v28758_v15  ;;  %v24906_v10 = vpack.c.bf16 %v1313_v7, %v1301_v54  ;;  %v1325_v23 = vand.u32 4294901760, %v1324_v44 }
 0x206   : > { %24901 = vmatpush1.bf16.msra.mxu0 %v24900_v43  ;;  %v1337_v55 = vand.u32 4294901760, %v1336_v22  ;;  %v24908_v21 = vpack.c.bf16 %v1319_v57, %v1307_v0  ;;  %v1331_v27 = vand.u32 4294901760, %v1330_v13  ;;  %v1343_v9 = vand.u32 4294901760, %v1342_v29 }
 0x207   : > { %24903 = vmatprep.subr.bf16.mxu0 %v24902_v4  ;;  %v1349_v17 = vand.u32 4294901760, %v1348_v6  ;;  %v1361_v50 = vand.u32 4294901760, %v1360_v48  ;;  %v1372_v12 = vsub.f32 %v28712_v3, %v1371_v25  ;;  %v1384_v43 = vsub.f32 %v28714_v33, %v1383_v26 }
 0x208   : > { %v1355_v36 = vand.u32 4294901760, %v1354_v11  ;;  %v1367_v46 = vand.u32 4294901760, %v1366_v32  ;;  %v1378_v63 = vsub.f32 %v28758_v15, %v1377_v40  ;;  %v1389_v56 = vand.u32 4294901760, %v28787_v47 }
 0x209   : > { %v24910_v54 = vpack.c.bf16 %v1337_v55, %v1325_v23  ;;  %v24912_v44 = vpack.c.bf16 %v1343_v9, %v1331_v27  ;;  %v24914_v7 = vpack.c.bf16 %v1361_v50, %v1349_v17  ;;  %v1373_v4 = vand.u32 4294901760, %v1372_v12 }
 0x20a   : > { %24905 = vmatpush1.bf16.msra.mxu0 %v24904_v14  ;;  %v1385_v0 = vand.u32 4294901760, %v1384_v43  ;;  %v24916_v22 = vpack.c.bf16 %v1367_v46, %v1355_v36  ;;  %v1379_v57 = vand.u32 4294901760, %v1378_v63  ;;  %v1390_v13 = vsub.f32 %v28787_v47, %v1389_v56 }
 0x20b   : > { %24907 = vmatprep.subr.bf16.mxu0 %v24906_v10  ;;  %v35380_v29 = vand.u32 4294901760, %v28573_v37  ;;  %v35381_v6 = vand.u32 4294901760, %v28575_v38  ;;  %v35382_v14 = vand.u32 4294901760, %v28577_v39  ;;  %v35383_v23 = vand.u32 4294901760, %v28581_v41 }
 0x20c   : > { %v35384_v17 = vand.u32 4294901760, %v28583_v42  ;;  %v35386_v63 = vand.u32 4294901760, %v28592_v52  ;;  %v35387_v9 = vand.u32 4294901760, %v28594_v53  ;;  %v35388_v12 = vand.u32 4294901760, %v28602_v58 }
 0x20d   : > { %v28828_v48 = vpack.c.bf16 %v35381_v6, %v35380_v29  ;;  %v28834_v55 = vpack.c.bf16 %v35383_v23, %v35382_v14  ;;  %v35389_v10 = vand.u32 4294901760, %v28604_v59  ;;  %v35390_v32 = vand.u32 4294901760, %v28606_v60 }
 0x20e   : > { %24909 = vmatpush1.bf16.msra.mxu0 %v24908_v21  ;;  %v35385_v21 = vand.u32 4294901760, %v28590_v51  ;;  %v28846_v27 = vpack.c.bf16 %v35387_v9, %v35386_v63  ;;  %v35391_v43 = vand.u32 4294901760, %v28608_v61  ;;  %v35392_v46 = vand.u32 4294901760, %v28613_v1 }
 0x20f   : > { %24911 = vmatprep.subr.bf16.mxu0 %v24910_v54  ;;  %v28852_v11 = vpack.c.bf16 %v35389_v10, %v35388_v12  ;;  %v35393_v54 = vand.u32 4294901760, %v28615_v2  ;;  %v35394_v6 = vand.u32 4294901760, %v28625_v16  ;;  %v35395_v14 = vand.u32 4294901760, %v28627_v18 }
 0x210   : > { %v28840_v50 = vpack.c.bf16 %v35385_v21, %v35384_v17  ;;  %v28858_v36 = vpack.c.bf16 %v35391_v43, %v35390_v32  ;;  %v35396_v17 = vand.u32 4294901760, %v28629_v19  ;;  %v35397_v21 = vand.u32 4294901760, %v28631_v20 }
 0x211   : > { %v28864_v29 = vpack.c.bf16 %v35393_v54, %v35392_v46  ;;  %v28870_v23 = vpack.c.bf16 %v35395_v14, %v35394_v6  ;;  %v35398_v9 = vand.u32 4294901760, %v28635_v24  ;;  %v35399_v12 = vand.u32 4294901760, %v28638_v28 }
 0x212   : > { %v28876_v63 = vpack.c.bf16 %v35397_v21, %v35396_v17  ;;  %v35401_v32 = vand.u32 4294901760, %v28642_v30  ;;  %v35402_v43 = vand.u32 4294901760, %v28644_v31  ;;  %v35403_v54 = vand.u32 4294901760, %v28649_v34  ;;  %24913 = vmatpush1.bf16.msra.mxu0 %v24912_v44 }
 0x213   : > { %v28882_v10 = vpack.c.bf16 %v35399_v12, %v35398_v9  ;;  %v35404_v6 = vand.u32 4294901760, %v28651_v35  ;;  %v35405_v17 = vand.u32 4294901760, %v28656_v45  ;;  %v1391_v9 = vand.u32 4294901760, %v1390_v13  ;;  %24915 = vmatprep.subr.bf16.mxu0 %v24914_v7  ;;  %v28939_v7 = vld [vmem:[%s28504_s11 + $0x88] sm:$0xff]  ;;  %v28958_v13 = vld [vmem:[%s28504_s11 + $0xa0] sm:$0xff] }
 0x214   : > { %v28888_v46 = vpack.c.bf16 %v35402_v43, %v35401_v32  ;;  %v28900_v12 = vpack.c.bf16 %v1365_v5, %v1353_v8  ;;  %v28904_v32 = vpack.c.bf16 %v1389_v56, %v1377_v40  ;;  %v24918_v43 = vpack.c.bf16 %v1385_v0, %v1373_v4  ;;  %v28914_v56 = vld [vmem:[%s28504_s11 + $0x10] sm:$0xff]  ;;  %v28917_v40 = vld [vmem:[%s28504_s11 + $0x28] sm:$0xff]  ;;  %v28920_v5 = vld [vmem:[%s28504_s11 + $0x40] sm:$0xff] }
 0x215   : > { %35400 = vst [vmem:[#allocation55_spill] sm:$0xff] %v28882_v10  ;;  %v28894_v14 = vpack.c.bf16 %v35404_v6, %v35403_v54  ;;  %v28898_v21 = vpack.c.bf16 %v1359_v62, %v35405_v17  ;;  %v28902_v10 = vpack.c.bf16 %v1383_v26, %v1371_v25  ;;  %v24920_v54 = vpack.c.bf16 %v1391_v9, %v1379_v57  ;;  %v28967_v6 = vld [vmem:[%s28504_s11 + $0x178] sm:$0xff] }
 0x216   : > { %24917 = vmatpush1.bf16.msra.mxu0 %v24916_v22  ;;  %v24922_v62 = vpack.c.bf16 %v28575_v38, %v28573_v37  ;;  %v24924_v44 = vpack.c.bf16 %v28581_v41, %v28577_v39  ;;  %v24926_v8 = vpack.c.bf16 %v28590_v51, %v28583_v42  ;;  %v24928_v37 = vpack.c.bf16 %v28594_v53, %v28592_v52  ;;  %v28928_v42 = vld [vmem:[%s28504_s11 + $0x58] sm:$0xff]  ;;  %v28936_v53 = vld [vmem:[%s28504_s11 + $0x70] sm:$0xff] }
 0x217   : > { %24919 = vmatprep.subr.bf16.mxu0 %v24918_v43  ;;  %v35406_v38 = vmov 0.0   ;;  %v1949_v39 = vand.u32 4294901760, %v28914_v56  ;;  %v1952_v41 = vand.u32 4294901760, %v28917_v40  ;;  %v34854_v51 = vand.u32 4294901760, %v28920_v5 }
 0x218   : > { %v24930_v25 = vpack.c.bf16 %v28604_v59, %v28602_v58  ;;  %v34862_v26 = vmov 0.0|0.0   ;;  %v1958_v52 = vand.u32 4294901760, %v28928_v42  ;;  %22946 = vmatprep.mubr.msk.f32.mxu1 %vm27888_vm0, %v35406_v38  ;;  %v24932_v58 = vpack.c.bf16 %v28608_v61, %v28606_v60  ;;  %v28961_v60 = vld [vmem:[%s28504_s11 + $0xb8] sm:$0xff]  ;;  %v28964_v61 = vld [vmem:[%s28504_s11 + $0x160] sm:$0xff] }
 0x219   : > { %25050 = vmatprep.subr.bf16.mxu1 %v34862_v26  ;;  %v28941_v4 = vpack.c.bf16 %v1952_v41, %v1949_v39  ;;  %v34853_v0 = vand.u32 4294901760, %v28936_v53  ;;  %v34852_v22 = vand.u32 4294901760, %v28939_v7  ;;  %v24934_v57 = vpack.c.bf16 %v28615_v2, %v28613_v1 }
 0x21a   : > { %24921 = vmatpush1.bf16.msra.mxu0 %v24920_v54  ;;  %v28950_v59 = vpack.c.bf16 %v1958_v52, %v34854_v51  ;;  %v24936_v17 = vpack.c.bf16 %v28627_v18, %v28625_v16  ;;  %v1967_v2 = vand.u32 4294901760, %v28958_v13  ;;  %v1970_v9 = vand.u32 4294901760, %v28961_v60  ;;  %v28985_v16 = vld [vmem:[%s28504_s11 + $0xd0] sm:$0xff]  ;;  %v28988_v18 = vld [vmem:[%s28504_s11 + $0xe8] sm:$0xff] }
 0x21b   : > { %24923 = vmatprep.subr.bf16.mxu0 %v24922_v62  ;;  %25052 = vmatpush3.bf16.msra.mxu1 %v28941_v4  ;;  %v28976_v1 = vpack.c.bf16 %v34852_v22, %v34853_v0  ;;  %v1991_v43 = vand.u32 4294901760, %v28964_v61  ;;  %v24938_v54 = vpack.c.bf16 %v28631_v20, %v28629_v19  ;;  %v1994_v62 = vand.u32 4294901760, %v28967_v6  ;;  %v35411_v22 = vld [vmem:[#allocation48_spill] sm:$0xff]  ;;  %v35412_v0 = vld [vmem:[#allocation49_spill] sm:$0xff] }
 0x21c   : > { %25053 = vmatprep.subr.bf16.mxu1 %v34862_v26  ;;  %v24940_v19 = vpack.c.bf16 %v28638_v28, %v28635_v24  ;;  %v29000_v20 = vpack.c.bf16 %v1970_v9, %v1967_v2  ;;  %v24944_v24 = vpack.c.bf16 %v28651_v35, %v28649_v34  ;;  %v29030_v34 = vld [vmem:[%s28504_s11 + $0x130] sm:$0xff]  ;;  %v29033_v35 = vld [vmem:[%s28504_s11 + $0x148] sm:$0xff]  ;;  %v24948_v51 = vpack.c.bf16 %v35412_v0, %v35411_v22 }
 0x21d   : > { %1427 = vmatmul.mubr.f32.vlgmr.msra.gmra.mrb[0].mxu0 %v28661_v49  ;;  %35407 = vst [vmem:[#allocation56_spill] sm:$0xff] %v28976_v1  ;;  %v24950_v0 = vpack.c.bf16 %v28714_v33, %v28712_v3  ;;  %v35416_v22 = vand.u32 4294901760, %v28936_v53  ;;  %vm3209_vm3 = vcmask 785408   ;;  %vm5018_vm4 = vcmask 64512  }
 0x21e   : > { %24925 = vmatpush1.bf16.msra.mxu0 %v24924_v44  ;;  %1561 = vmatprep.mubr.f32.mxu0 %v35406_v38  ;;  %v28992_v44 = vsub.f32 %v28964_v61, %v1991_v43  ;;  %35408 = vst [vmem:[#allocation57_spill] sm:$0xff] %v29000_v20  ;;  %v29011_v61 = vld [vmem:[%s28504_s11 + $0x118] sm:$0xff]  ;;  %vm13699_vm5 = vcmask 130048  }
 0x21f   : > { %24927 = vmatprep.subr.bf16.mxu0 %v24926_v8  ;;  %25055 = vmatpush3.bf16.msra.mxu1 %v28950_v59  ;;  %v28995_v8 = vsub.f32 %v28967_v6, %v1994_v62 }
 0x220   : > { %25056 = vmatprep.subr.bf16.mxu1 %v34862_v26 }
 0x222   : > { %24929 = vmatpush1.bf16.msra.mxu0 %v24928_v37  ;;  %v1973_v37 = vand.u32 4294901760, %v28985_v16 }
 0x223   : > { %24931 = vmatprep.subr.bf16.mxu0 %v24930_v25  ;;  %25058 = vmatpush3.bf16.msra.mxu1 %v28976_v1  ;;  %v1976_v25 = vand.u32 4294901760, %v28988_v18 }
 0x224   : > { %25059 = vmatprep.subr.bf16.mxu1 %v34862_v26 }
 0x225   : > { %v29016_v28 = vpack.c.bf16 %v1976_v25, %v1973_v37 }
 0x226   : > { %24933 = vmatpush1.bf16.msra.mxu0 %v24932_v58  ;;  %v24942_v58 = vpack.c.bf16 %v28644_v31, %v28642_v30  ;;  %v35410_v30 = vld [vmem:[#allocation46_spill] sm:$0xff] }
 0x227   : > { %24935 = vmatprep.subr.bf16.mxu0 %v24934_v57  ;;  %v29008_v57 = vld [vmem:[%s28504_s11 + $0x100] sm:$0xff]  ;;  %25061 = vmatpush3.bf16.msra.mxu1 %v29000_v20  ;;  %35409 = vst [vmem:[#allocation58_spill] sm:$0xff] %v29016_v28  ;;  %v24946_v31 = vpack.c.bf16 %v35410_v30, %v28656_v45  ;;  %v29043_v45 = vsub.f32 %v28928_v42, %v1958_v52  ;;  %s27889_s11 = smov 32  }
 0x228   : > { %v1979_v6 = vand.u32 4294901760, %v29008_v57  ;;  %25062 = vmatprep.subr.bf16.mxu1 %v34862_v26  ;;  %v24952_v52 = vpack.c.bf16 %v28787_v47, %v28758_v15 }
 0x229   : > { %v34855_v30 = vand.u32 4294901760, %v29043_v45 }
 0x22a   : > { %24937 = vmatpush1.bf16.msra.mxu0 %v24936_v17 }
 0x22b   : > { %24939 = vmatprep.subr.bf16.mxu0 %v24938_v54  ;;  %v29023_v54 = vsub.f32 %v28914_v56, %v1949_v39  ;;  %25064 = vmatpush3.bf16.msra.mxu1 %v29016_v28  ;;  %v35414_v56 = vand.u32 4294901760, %v29011_v61  ;;  %v1985_v39 = vand.u32 4294901760, %v29030_v34  ;;  %v35439_v28 = vld [vmem:[#allocation45_spill] sm:$0xff] }
 0x22c   : > { %25065 = vmatprep.subr.bf16.mxu1 %v34862_v26 }
 0x22e   : > { %24941 = vmatpush1.bf16.msra.mxu0 %v24940_v19  ;;  %v29026_v19 = vsub.f32 %v28917_v40, %v1952_v41  ;;  %v29048_v40 = vpack.c.bf16 %v35414_v56, %v1979_v6  ;;  %v34861_v41 = vand.u32 4294901760, %v29033_v35 }
 0x22f   : > { %24943 = vmatprep.subr.bf16.mxu0 %v24942_v58  ;;  %v35413_v58 = vand.u32 4294901760, %v28920_v5 }
 0x230   : > { %35415 = vst [vmem:[#allocation46_spill] sm:$0xff] %v29048_v40  ;;  %v34857_v42 = vand.u32 4294901760, %v29026_v19  ;;  %25067 = vmatpush3.bf16.msra.mxu1 %v29048_v40  ;;  %v29067_v33 = vpack.c.bf16 %v34861_v41, %v1985_v39  ;;  %v35438_v40 = vld [vmem:[#allocation44_spill] sm:$0xff] }
 0x231   : > { %v29040_v17 = vsub.f32 %v28920_v5, %v35413_v58  ;;  %v34858_v5 = vand.u32 4294901760, %v29023_v54  ;;  %25068 = vmatprep.subr.bf16.mxu1 %v34862_v26  ;;  %v29087_v58 = vsub.f32 %v28961_v60, %v1970_v9 }
 0x232   : > { %24945 = vmatpush1.bf16.msra.mxu0 %v24944_v24  ;;  %v29062_v24 = vsub.f32 %v28936_v53, %v35416_v22  ;;  %35417 = vst [vmem:[#allocation48_spill] sm:$0xff] %v29067_v33  ;;  %v29084_v53 = vsub.f32 %v28958_v13, %v1967_v2  ;;  %v35420_v22 = vld [vmem:[#allocation33_spill] sm:$0xff] }
 0x233   : > { %24947 = vmatprep.subr.bf16.mxu0 %v24946_v31  ;;  %v34856_v3 = vand.u32 4294901760, %v29040_v17  ;;  %v35418_v31 = vand.u32 4294901760, %v28939_v7  ;;  %v2043_v47 = vsub.f32 %v29023_v54, %v34858_v5 }
 0x234   : > { %25070 = vmatpush3.bf16.msra.mxu1 %v29067_v33  ;;  %v34860_v2 = vand.u32 4294901760, %v29062_v24 }
 0x235   : > { %v29074_v15 = vsub.f32 %v28939_v7, %v35418_v31  ;;  %v29090_v7 = vpack.c.bf16 %v1994_v62, %v1991_v43  ;;  %v2057_v56 = vsub.f32 %v29040_v17, %v34856_v3  ;;  %25071 = vmatprep.subr.bf16.mxu1 %v34862_v26  ;;  %v2044_v13 = vand.u32 4294901760, %v2043_v47  ;;  %v35421_v43 = vld [vmem:[#allocation50_spill] sm:$0xff]  ;;  %v35423_v3 = vld [vmem:[#allocation35_spill] sm:$0xff] }
 0x236   : > { %24949 = vmatpush1.bf16.msra.mxu0 %v24948_v51  ;;  %v2050_v51 = vsub.f32 %v29026_v19, %v34857_v42  ;;  %v29104_v62 = vsub.f32 %v28985_v16, %v1973_v37  ;;  %v29109_v31 = vsub.f32 %v28988_v18, %v1976_v25  ;;  %v34864_v47 = vand.u32 4294901760, %v29084_v53  ;;  %v35424_v25 = vld [vmem:[#allocation36_spill] sm:$0xff] }
 0x237   : > { %24951 = vmatprep.subr.bf16.mxu0 %v24950_v0  ;;  %35419 = vst [vmem:[#allocation49_spill] sm:$0xff] %v29090_v7  ;;  %v2064_v0 = vsub.f32 %v29043_v45, %v34855_v30  ;;  %v34859_v9 = vand.u32 4294901760, %v29074_v15  ;;  %v2058_v30 = vand.u32 4294901760, %v2057_v56  ;;  %v2071_v16 = vsub.f32 %v29062_v24, %v34860_v2 }
 0x238   : > { %v2051_v60 = vand.u32 4294901760, %v2050_v51  ;;  %v34865_v51 = vand.u32 4294901760, %v29087_v58  ;;  %25073 = vmatpush3.bf16.msra.mxu1 %v29090_v7  ;;  %v29123_v37 = vsub.f32 %v29008_v57, %v1979_v6  ;;  %v35425_v56 = vand.u32 4294901760, %v29011_v61  ;;  %v35427_v6 = vld [vmem:[#allocation37_spill] sm:$0xff] }
 0x239   : > { %v2065_v5 = vand.u32 4294901760, %v2064_v0  ;;  %v2078_v18 = vsub.f32 %v29074_v15, %v34859_v9  ;;  %25074 = vmatprep.subr.bf16.mxu1 %v34862_v26  ;;  %v35426_v0 = vld [vmem:[#allocation54_spill] sm:$0xff]  ;;  %v2072_v41 = vand.u32 4294901760, %v2071_v16 }
 0x23a   : > { %24953 = vmatpush1.bf16.msra.mxu0 %v24952_v52  ;;  %v35422_v52 = vld [vmem:[#allocation34_spill] sm:$0xff]  ;;  %v25075_v42 = vpack.c.bf16 %v2051_v60, %v2044_v13  ;;  %v29129_v13 = vsub.f32 %v29011_v61, %v35425_v56  ;;  %v2085_v60 = vsub.f32 %v29084_v53, %v34864_v47  ;;  %v2092_v9 = vsub.f32 %v29087_v58, %v34865_v51 }
 0x23b   : > { %24955 = vmatprep.subr.bf16.mxu0 %v35420_v22  ;;  %22947 = vmatmul.mubr.f32.vlgmr.msra.gmra.mrb[0].mxu1 %v35426_v0  ;;  %v25078_v2 = vpack.c.bf16 %v2065_v5, %v2058_v30  ;;  %v2079_v26 = vand.u32 4294901760, %v2078_v18  ;;  %v35428_v56 = vmov 0.0|0.0   ;;  %v29145_v0 = vsub.f32 %v29030_v34, %v1985_v39  ;;  %v35429_v47 = vld [vmem:[#allocation38_spill] sm:$0xff]  ;;  %v35432_v18 = vld [vmem:[#allocation39_spill] sm:$0xff] }
 0x23c   : > { %25076 = vmatpush3.bf16.msra.mxu1 %v25075_v42  ;;  %22981 = vmatprep.mubr.msk.f32.mxu1 %vm27888_vm0, %v35406_v38  ;;  %v35430_v51 = vand.u32 4294901760, %v29033_v35  ;;  %v2086_v5 = vand.u32 4294901760, %v2085_v60  ;;  %v2093_v42 = vand.u32 4294901760, %v2092_v9  ;;  %v35431_v30 = vand.u32 4294901760, %v29104_v62 }
 0x23d   : > { %1564 = vmatmul.mubr.f32.vlgmr.msra.gmra.mrb[0].mxu0 %v35421_v43  ;;  %25077 = vmatprep.subr.bf16.mxu1 %v35428_v56  ;;  %v25081_v61 = vpack.c.bf16 %v2079_v26, %v2072_v41  ;;  %v35433_v34 = vand.u32 4294901760, %v29109_v31  ;;  %v34870_v7 = vand.u32 4294901760, %v29123_v37  ;;  %v34871_v33 = vand.u32 4294901760, %v29129_v13 }
 0x23e   : > { %24957 = vmatpush1.bf16.msra.mxu0 %v35422_v52  ;;  %1666 = vmatprep.mubr.f32.mxu0 %v35406_v38  ;;  %v29151_v57 = vsub.f32 %v29033_v35, %v35430_v51  ;;  %v2099_v16 = vsub.f32 %v29104_v62, %v35431_v30  ;;  %v35434_v35 = vld [vmem:[#allocation40_spill] sm:$0xff]  ;;  %v25084_v9 = vpack.c.bf16 %v2093_v42, %v2086_v5  ;;  %v34880_v60 = vand.u32 4294901760, %v29145_v0  ;;  %v35435_v30 = vld [vmem:[#allocation41_spill] sm:$0xff]  ;;  %v35436_v5 = vld [vmem:[#allocation42_spill] sm:$0xff] }
 0x23f   : > { %24959 = vmatprep.subr.bf16.mxu0 %v35423_v3  ;;  %v2106_v39 = vsub.f32 %v29109_v31, %v35433_v34  ;;  %v2113_v41 = vsub.f32 %v29123_v37, %v34870_v7 }
 0x240   : > { %25079 = vmatpush3.bf16.msra.mxu1 %v25078_v2  ;;  %v2100_v51 = vand.u32 4294901760, %v2099_v16  ;;  %v2120_v2 = vsub.f32 %v29129_v13, %v34871_v33  ;;  %v2133_v34 = vand.u32 4294901760, %v29151_v57  ;;  %v2127_v42 = vsub.f32 %v29145_v0, %v34880_v60 }
 0x241   : > { %25080 = vmatprep.subr.bf16.mxu1 %v35428_v56  ;;  %v2107_v26 = vand.u32 4294901760, %v2106_v39  ;;  %v2114_v39 = vand.u32 4294901760, %v2113_v41  ;;  %v35442_v41 = vld [vmem:[#allocation53_spill] sm:$0xff] }
 0x242   : > { %24961 = vmatpush1.bf16.msra.mxu0 %v35424_v25  ;;  %v2121_v7 = vand.u32 4294901760, %v2120_v2  ;;  %v2134_v33 = vsub.f32 %v29151_v57, %v2133_v34  ;;  %v2128_v1 = vand.u32 4294901760, %v2127_v42 }
 0x243   : > { %24963 = vmatprep.subr.bf16.mxu0 %v35427_v6  ;;  %v25087_v16 = vpack.c.bf16 %v2107_v26, %v2100_v51  ;;  %v35441_v51 = vld [vmem:[#allocation52_spill] sm:$0xff] }
 0x244   : > { %25082 = vmatpush3.bf16.msra.mxu1 %v25081_v61  ;;  %v35437_v61 = vld [vmem:[#allocation43_spill] sm:$0xff]  ;;  %v25090_v20 = vpack.c.bf16 %v2121_v7, %v2114_v39  ;;  %v2135_v60 = vand.u32 4294901760, %v2134_v33  ;;  %v35449_v33 = vld [vmem:[#allocation48_spill] sm:$0xff] }
 0x245   : > { %25083 = vmatprep.subr.bf16.mxu1 %v35428_v56  ;;  %v35443_v7 = vld [vmem:[#allocation51_spill] sm:$0xff] }
 0x246   : > { %24965 = vmatpush1.bf16.msra.mxu0 %v35429_v47  ;;  %v25093_v26 = vpack.c.bf16 %v2135_v60, %v2128_v1  ;;  %v25114_v1 = vpack.c.bf16 %v29129_v13, %v29123_v37  ;;  %v35459_v60 = vand.u32 4294901760, %v29104_v62 }
 0x247   : > { %24967 = vmatprep.subr.bf16.mxu0 %v35432_v18 }
 0x248   : > { %25085 = vmatpush3.bf16.msra.mxu1 %v25084_v9  ;;  %v35440_v9 = vld [vmem:[#allocation47_spill] sm:$0xff] }
 0x249   : > { %25086 = vmatprep.subr.bf16.mxu1 %v35428_v56 }
 0x24a   : > { %24969 = vmatpush1.bf16.msra.mxu0 %v35434_v35 }
 0x24b   : > { %24971 = vmatprep.subr.bf16.mxu0 %v35435_v30 }
 0x24c   : > { %25088 = vmatpush3.bf16.msra.mxu1 %v25087_v16 }
 0x24d   : > { %25089 = vmatprep.subr.bf16.mxu1 %v35428_v56 }
 0x24e   : > { %24973 = vmatpush1.bf16.msra.mxu0 %v35436_v5 }
 0x24f   : > { %24975 = vmatprep.subr.bf16.mxu0 %v35437_v61 }
 0x250   : > { %25091 = vmatpush3.bf16.msra.mxu1 %v25090_v20  ;;  %v35446_v20 = vld [vmem:[#allocation57_spill] sm:$0xff] }
 0x251   : > { %25092 = vmatprep.subr.bf16.mxu1 %v35428_v56 }
 0x252   : > { %24977 = vmatpush1.bf16.msra.mxu0 %v35438_v40 }
 0x253   : > { %24979 = vmatprep.subr.bf16.mxu0 %v35439_v28 }
 0x254   : > { %25094 = vmatpush3.bf16.msra.mxu1 %v25093_v26  ;;  %v27894_v26 = vmov 1966171168  }
 0x255   : > { %25095 = vmatprep.subr.bf16.mxu1 %v35428_v56 }
 0x256   : > { %24981 = vmatpush1.bf16.msra.mxu0 %v35440_v9 }
 0x257   : > { %24983 = vmatprep.subr.bf16.mxu0 %v35441_v51 }
 0x25a   : > { %24985 = vmatpush1.bf16.msra.mxu0 %v35442_v41 }
 0x25b   : > { %24987 = vmatprep.subr.bf16.mxu0 %v28828_v48  ;;  %v35444_v48 = vld [vmem:[#allocation55_spill] sm:$0xff] }
 0x25d   : > { %1670 = vmatmul.mubr.f32.vlgmr.msra.gmra.mrb[0].mxu0 %v35443_v7 }
 0x25e   : > { %24989 = vmatpush1.bf16.msra.mxu0 %v28834_v55  ;;  %1836 = vmatprep.mubr.f32.mxu0 %v35406_v38  ;;  %v2140_v55 = vand.u32 4294901760, %v28992_v44 }
 0x25f   : > { %24991 = vmatprep.subr.bf16.mxu0 %v28840_v50  ;;  %v2147_v50 = vand.u32 4294901760, %v28995_v8 }
 0x262   : > { %24993 = vmatpush1.bf16.msra.mxu0 %v28846_v27  ;;  %v2141_v27 = vsub.f32 %v28992_v44, %v2140_v55 }
 0x263   : > { %24995 = vmatprep.subr.bf16.mxu0 %v28852_v11  ;;  %v2148_v11 = vsub.f32 %v28995_v8, %v2147_v50 }
 0x266   : > { %24997 = vmatpush1.bf16.msra.mxu0 %v28858_v36  ;;  %v2142_v36 = vand.u32 4294901760, %v2141_v27 }
 0x267   : > { %24999 = vmatprep.subr.bf16.mxu0 %v28864_v29  ;;  %v2149_v29 = vand.u32 4294901760, %v2148_v11 }
 0x26a   : > { %25001 = vmatpush1.bf16.msra.mxu0 %v28870_v23  ;;  %v25096_v23 = vpack.c.bf16 %v2149_v29, %v2142_v36 }
 0x26b   : > { %25003 = vmatprep.subr.bf16.mxu0 %v28876_v63  ;;  %v25099_v63 = vpack.c.bf16 %v29026_v19, %v29023_v54 }
 0x26c   : > { %25097 = vmatpush3.bf16.msra.mxu1 %v25096_v23 }
 0x26d   : > { %25098 = vmatprep.subr.bf16.mxu1 %v35428_v56 }
 0x26e   : > { %25005 = vmatpush1.bf16.msra.mxu0 %v35444_v48 }
 0x26f   : > { %25007 = vmatprep.subr.bf16.mxu0 %v28888_v46  ;;  %22982 = vmatmul.mubr.f32.vlgmr.msra.gmra.mrb[0].mxu1 %v28661_v49  ;;  %v25105_v46 = vpack.c.bf16 %v29074_v15, %v29062_v24 }
 0x270   : > { %25100 = vmatpush3.bf16.msra.mxu1 %v25099_v63  ;;  %23016 = vmatprep.mubr.msk.f32.mxu1 %vm27888_vm0, %v35406_v38 }
 0x271   : > { %25101 = vmatprep.subr.bf16.mxu1 %v35428_v56 }
 0x272   : > { %25009 = vmatpush1.bf16.msra.mxu0 %v28894_v14  ;;  %v25120_v14 = vpack.c.bf16 %v28995_v8, %v28992_v44  ;;  %v25117_v44 = vpack.c.bf16 %v29151_v57, %v29145_v0  ;;  %v35445_v8 = vld [vmem:[#allocation56_spill] sm:$0xff] }
 0x273   : > { %25011 = vmatprep.subr.bf16.mxu0 %v28898_v21  ;;  %v25108_v21 = vpack.c.bf16 %v29087_v58, %v29084_v53 }
 0x276   : > { %25013 = vmatpush1.bf16.msra.mxu0 %v28900_v12  ;;  %v25168_v12 = vpack.c.bf16 %v2147_v50, %v2140_v55 }
 0x277   : > { %25015 = vmatprep.subr.bf16.mxu0 %v28902_v10  ;;  %v25102_v10 = vpack.c.bf16 %v29043_v45, %v29040_v17 }
 0x279   : > { %25103 = vmatpush3.bf16.msra.mxu1 %v25102_v10 }
 0x27a   : > { %25017 = vmatpush1.bf16.msra.mxu0 %v28904_v32  ;;  %25104 = vmatprep.subr.bf16.mxu1 %v35428_v56  ;;  %v25111_v32 = vpack.c.bf16 %v29109_v31, %v29104_v62  ;;  %v27892_v62 = vmov 1983009808  }
 0x27b   : > { %25019 = vmatprep.subr.bf16.mxu0 %v35420_v22  ;;  %v35451_v22 = vand.u32 4294901760, %v29023_v54  ;;  %v35455_v54 = vand.u32 4294901760, %v29062_v24  ;;  %v35461_v24 = vand.u32 4294901760, %v29123_v37  ;;  %v2604_v37 = vlaneseq }
 0x27d   : > { %1838 = vmatmul.mubr.f32.vlgmr.msra.gmra.mrb[0].mxu0 %v28661_v49  ;;  %25106 = vmatpush3.bf16.msra.mxu1 %v25105_v46 }
 0x27e   : > { %25021 = vmatpush1.bf16.msra.mxu0 %v35422_v52  ;;  %1940 = vmatprep.mubr.f32.mxu0 %v35406_v38 }
 0x27f   : > { %25023 = vmatprep.subr.bf16.mxu0 %v35423_v3  ;;  %25107 = vmatprep.subr.bf16.mxu1 %v35428_v56  ;;  %v35450_v3 = vld [vmem:[#allocation49_spill] sm:$0xff] }
 0x281   : > { %25109 = vmatpush3.bf16.msra.mxu1 %v25108_v21 }
 0x282   : > { %25025 = vmatpush1.bf16.msra.mxu0 %v35424_v25  ;;  %25110 = vmatprep.subr.bf16.mxu1 %v35428_v56  ;;  %v35454_v25 = vand.u32 4294901760, %v29043_v45 }
 0x283   : > { %25027 = vmatprep.subr.bf16.mxu0 %v35427_v6 }
 0x285   : > { %25112 = vmatpush3.bf16.msra.mxu1 %v25111_v32 }
 0x286   : > { %25029 = vmatpush1.bf16.msra.mxu0 %v35429_v47  ;;  %25113 = vmatprep.subr.bf16.mxu1 %v35428_v56  ;;  %v35453_v47 = vand.u32 4294901760, %v29040_v17  ;;  %v35458_v17 = vand.u32 4294901760, %v29087_v58 }
 0x287   : > { %25031 = vmatprep.subr.bf16.mxu0 %v35432_v18 }
 0x288   : > { %v25150_v6 = vpack.c.bf16 %v35454_v25, %v35453_v47 }
 0x289   : > { %25115 = vmatpush3.bf16.msra.mxu1 %v25114_v1 }
 0x28a   : > { %25033 = vmatpush1.bf16.msra.mxu0 %v35434_v35  ;;  %25116 = vmatprep.subr.bf16.mxu1 %v35428_v56  ;;  %v35457_v35 = vand.u32 4294901760, %v29084_v53  ;;  %v35463_v53 = vand.u32 4294901760, %v29145_v0  ;;  %v29354_v0 = vshrl.u32 %v2604_v37, 7 }
 0x28b   : > { %25035 = vmatprep.subr.bf16.mxu0 %v35435_v30  ;;  %v35460_v30 = vand.u32 4294901760, %v29109_v31  ;;  %v2602_v31 = vunpack.c.l.s4 %v27892_v62 }
 0x28c   : > { %v25156_v45 = vpack.c.bf16 %v35458_v17, %v35457_v35  ;;  %v25165_v58 = vpack.c.bf16 %v2133_v34, %v35463_v53  ;;  %35464 = vst [vmem:[#allocation33_spill] sm:$0xff] %v29354_v0 }
 0x28d   : > { %25118 = vmatpush3.bf16.msra.mxu1 %v25117_v44  ;;  %v25159_v2 = vpack.c.bf16 %v35460_v30, %v35459_v60  ;;  %v2603_v57 = vunpack.c.0.s8 %v2602_v31  ;;  %v1037_v30 = vld [vmem:[#allocation8] sm:$0xff] }
 0x28e   : > { %25037 = vmatpush1.bf16.msra.mxu0 %v35436_v5  ;;  %25119 = vmatprep.subr.bf16.mxu1 %v35428_v56 }
 0x28f   : > { %25039 = vmatprep.subr.bf16.mxu0 %v35437_v61  ;;  %v29357_v16 = vsub.s32 %v2603_v57, %v29354_v0 }
 0x291   : > { %25121 = vmatpush3.bf16.msra.mxu1 %v25120_v14  ;;  %35465 = vst [vmem:[#allocation50_spill] sm:$0xff] %v29357_v16 }
 0x292   : > { %25041 = vmatpush1.bf16.msra.mxu0 %v35438_v40  ;;  %25122 = vmatprep.subr.bf16.mxu1 %v35428_v56  ;;  %v35448_v40 = vld [vmem:[#allocation46_spill] sm:$0xff] }
 0x293   : > { %25043 = vmatprep.subr.bf16.mxu0 %v35439_v28  ;;  %v35447_v28 = vld [vmem:[#allocation58_spill] sm:$0xff] }
 0x294   : > { %23017 = vmatmul.mubr.f32.vlgmr.msra.gmra.mrb[0].mxu1 %v35421_v43  ;;  %v35452_v43 = vand.u32 4294901760, %v29026_v19  ;;  %v35456_v19 = vand.u32 4294901760, %v29074_v15  ;;  %v35462_v15 = vand.u32 4294901760, %v29129_v13  ;;  %v27893_v13 = vmov 1934713408  }
 0x295   : > { %25124 = vmatpush3.bf16.msra.mxu1 %v28941_v4  ;;  %23051 = vmatprep.mubr.msk.f32.mxu1 %vm27888_vm0, %v35406_v38 }
 0x296   : > { %25045 = vmatpush1.bf16.msra.mxu0 %v35440_v9  ;;  %25125 = vmatprep.subr.bf16.mxu1 %v35428_v56  ;;  %v25147_v52 = vpack.c.bf16 %v35452_v43, %v35451_v22  ;;  %v25153_v18 = vpack.c.bf16 %v35456_v19, %v35455_v54  ;;  %v25162_v5 = vpack.c.bf16 %v35462_v15, %v35461_v24 }
 0x297   : > { %25047 = vmatprep.subr.bf16.mxu0 %v35441_v51 }
 0x299   : > { %25127 = vmatpush3.bf16.msra.mxu1 %v28950_v59 }
 0x29a   : > { %25049 = vmatpush1.bf16.msra.mxu0 %v35442_v41  ;;  %25128 = vmatprep.subr.bf16.mxu1 %v35428_v56  ;;  %v3055_v41 = vunpack.c.l.s4 %v27894_v26 }
 0x29b   : > { %23124 = vmatprep.subr.mxu0 %v35406_v38 }
 0x29c   : > { %v3056_v29 = vunpack.c.0.s8 %v3055_v41 }
 0x29d   : > { %1942 = vmatmul.mubr.f32.vlgmr.msra.gmra.mrb[0].mxu0 %v28661_v49  ;;  %25130 = vmatpush3.bf16.msra.mxu1 %v35445_v8 }
 0x29e   : > { %23126 = vmatprep.mubr.msk.f32.mxu0 %vm27888_vm0, %v35406_v38  ;;  %25131 = vmatprep.subr.bf16.mxu1 %v35428_v56  ;;  %v29371_v1 = vsub.s32 %v3056_v29, %v29354_v0 }
 0x2a0   : > { %35467 = vst [vmem:[#allocation35_spill] sm:$0xff] %v29371_v1 }
 0x2a1   : > { %25133 = vmatpush3.bf16.msra.mxu1 %v35446_v20 }
 0x2a2   : > { %25134 = vmatprep.subr.bf16.mxu1 %v35428_v56 }
 0x2a5   : > { %25136 = vmatpush3.bf16.msra.mxu1 %v35447_v28 }
 0x2a6   : > { %25137 = vmatprep.subr.bf16.mxu1 %v35428_v56 }
 0x2a9   : > { %25139 = vmatpush3.bf16.msra.mxu1 %v35448_v40 }
 0x2aa   : > { %25140 = vmatprep.subr.bf16.mxu1 %v35428_v56 }
 0x2ad   : > { %25142 = vmatpush3.bf16.msra.mxu1 %v35449_v33 }
 0x2ae   : > { %25143 = vmatprep.subr.bf16.mxu1 %v35428_v56 }
 0x2b1   : > { %25145 = vmatpush3.bf16.msra.mxu1 %v35450_v3 }
 0x2b2   : > { %25146 = vmatprep.subr.bf16.mxu1 %v35428_v56 }
 0x2b4   : > { %23052 = vmatmul.mubr.f32.vlgmr.msra.gmra.mrb[0].mxu1 %v35443_v7 }
 0x2b5   : > { %25148 = vmatpush3.bf16.msra.mxu1 %v25147_v52  ;;  %23086 = vmatprep.mubr.msk.f32.mxu1 %vm27888_vm0, %v35406_v38  ;;  %v21561_v52 = vld.sshfl [vmem:[%s28527_s3 + $0x4] sm:$0x33 pattern:$0x75316420] }
 0x2b6   : > { %25149 = vmatprep.subr.bf16.mxu1 %v35428_v56  ;;  %v3053_v54 = vcombine.high %v21561_v52, %v21561_v52 }
 0x2b8   : > { %v3067_v24 = vrot.slane %v3053_v54, %v29371_v1 }
 0x2b9   : > { %25151 = vmatpush3.bf16.msra.mxu1 %v25150_v6  ;;  %v3060_v6 = vrot.slane %v21561_v52, %v29371_v1 }
 0x2ba   : > { %25152 = vmatprep.subr.bf16.mxu1 %v35428_v56  ;;  %v3069_v57 = vcombine.high %v3067_v24, %v3067_v24 }
 0x2bd   : > { %25154 = vmatpush3.bf16.msra.mxu1 %v25153_v18 }
 0x2be   : > { %25155 = vmatprep.subr.bf16.mxu1 %v35428_v56 }
 0x2c1   : > { %25157 = vmatpush3.bf16.msra.mxu1 %v25156_v45 }
 0x2c2   : > { %25158 = vmatprep.subr.bf16.mxu1 %v35428_v56 }
 0x2c5   : > { %25160 = vmatpush3.bf16.msra.mxu1 %v25159_v2  ;;  %v1038_v2 = vld [vmem:[#allocation9] sm:$0xff] }
 0x2c6   : > { %25161 = vmatprep.subr.bf16.mxu1 %v35428_v56 }
 0x2c9   : > { %25163 = vmatpush3.bf16.msra.mxu1 %v25162_v5 }
 0x2ca   : > { %25164 = vmatprep.subr.bf16.mxu1 %v35428_v56 }
 0x2cd   : > { %25166 = vmatpush3.bf16.msra.mxu1 %v25165_v58  ;;  %v3068_v58 = vcombine.high %v3060_v6, %v3060_v6 }
 0x2ce   : > { %25167 = vmatprep.subr.bf16.mxu1 %v35428_v56 }
 0x2d1   : > { %25169 = vmatpush3.bf16.msra.mxu1 %v25168_v12 }
 0x2d2   : > { %25170 = vmatprep.subr.bf16.mxu1 %v35428_v56 }
 0x2d4   : > { %23087 = vmatmul.mubr.f32.vlgmr.msra.gmra.mrb[0].mxu1 %v28661_v49 }
 0x2d5   : > { %25172 = vmatpush3.bf16.msra.mxu1 %v28941_v4  ;;  %23121 = vmatprep.mubr.msk.f32.mxu1 %vm27888_vm0, %v35406_v38 }
 0x2d6   : > { %25173 = vmatprep.subr.bf16.mxu1 %v35428_v56 }
 0x2d9   : > { %25175 = vmatpush3.bf16.msra.mxu1 %v28950_v59 }
 0x2da   : > { %25176 = vmatprep.subr.bf16.mxu1 %v35428_v56 }
 0x2dd   : > { %25178 = vmatpush3.bf16.msra.mxu1 %v35445_v8 }
 0x2de   : > { %25179 = vmatprep.subr.bf16.mxu1 %v35428_v56 }
 0x2e1   : > { %25181 = vmatpush3.bf16.msra.mxu1 %v35446_v20 }
 0x2e2   : > { %25182 = vmatprep.subr.bf16.mxu1 %v35428_v56 }
 0x2e5   : > { %25184 = vmatpush3.bf16.msra.mxu1 %v35447_v28 }
 0x2e6   : > { %25185 = vmatprep.subr.bf16.mxu1 %v35428_v56 }
 0x2e9   : > { %25187 = vmatpush3.bf16.msra.mxu1 %v35448_v40  ;;  %v29374_v40 = vsub.s32 0, %v29354_v0 }
 0x2ea   : > { %25188 = vmatprep.subr.bf16.mxu1 %v35428_v56 }
 0x2eb   : > { %35468 = vst [vmem:[#allocation36_spill] sm:$0xff] %v29374_v40  ;;  %v3073_v35 = vrot.slane %v3060_v6, %v29374_v40  ;;  %v3077_v5 = vrot.slane %v3067_v24, %v29374_v40 }
 0x2ed   : > { %25190 = vmatpush3.bf16.msra.mxu1 %v35449_v33 }
 0x2ee   : > { %25191 = vmatprep.subr.bf16.mxu1 %v35428_v56 }
 0x2f1   : > { %25193 = vmatpush3.bf16.msra.mxu1 %v35450_v3 }
 0x2f2   : > { %23154 = vmatprep.subr.mxu1 %v35406_v38 }
 0x2f4   : > { %23122 = vmatmul.mubr.f32.vlgmr.msra.gmra.mrb[0].mxu1 %v28661_v49  ;;  %v2634_v49 = vunpack.c.l.s4 %v27893_v13  ;;  %v3027_v13 = vld [vmem:[#allocation11] sm:$0xff] }
 0x2f5   : > { %23156 = vmatprep.mubr.msk.f32.mxu1 %vm27888_vm0, %v35406_v38 }
 0x2f6   : > { %v2635_v61 = vunpack.c.0.s8 %v2634_v49  ;;  %v3028_v49 = vld [vmem:[#allocation12] sm:$0xff] }
 0x2f8   : > { %v29360_v55 = vsub.s32 %v2635_v61, %v29354_v0  ;;  %v3081_v61 = vrot.slane %v3068_v58, %v29374_v40 }
 0x2fa   : > { %35466 = vst [vmem:[#allocation34_spill] sm:$0xff] %v29360_v55 }
 0x370   : > { %v1943_v4 = vpop.f32.mrb[0].mxu0 }
 0x371   : > { %2596 = vrot.lane.b32.xlu1 %v1943_v4, %s27889_s11  ;;  %2590 = vrot.lane.b32.xlu0 %v1943_v4, %s27890_s29  ;;  %v29342_v59 = vpop.f32.mrb[1].mxu0 }
 0x375   : > { %2593 = vrot.lane.b32.xlu0 %v1943_v4, %s27891_s27  ;;  %2736 = vrot.lane.b32.xlu1 %v29342_v59, %s27890_s29 }
 0x379   : > { %2739 = vrot.lane.b32.xlu0 %v29342_v59, %s27891_s27  ;;  %2742 = vrot.lane.b32.xlu1 %v29342_v59, %s27889_s11 }
 0x3e3   : > { %v2597_v34 = vpop.permute.xlu1 %2596  ;;  %v2591_v42 = vpop.permute.xlu0 %2590 }
 0x3e4   : > { %v2615_v39 = vcombine.low %v2591_v42, %v2597_v34  ;;  %v2616_v9 = vcombine.high %v2591_v42, %v2597_v34 }
 0x3e6   : > { %v2623_v50 = vrot.slane %v2615_v39, %v29357_v16  ;;  %v2630_v27 = vrot.slane %v2616_v9, %v29357_v16  ;;  %v3085_v39 = vrot.slane %v3069_v57, %v29374_v40 }
 0x3e7   : > { %v2594_v51 = vpop.permute.xlu0 %2593 }
 0x3e8   : > { %v2599_v7 = vcombine.low %v1943_v4, %v2594_v51  ;;  %v2600_v48 = vcombine.high %v1943_v4, %v2594_v51 }
 0x3ea   : > { %v2607_v11 = vrot.slane %v2599_v7, %v29357_v16  ;;  %v2614_v36 = vrot.slane %v2600_v48, %v29357_v16 }
 0x3ec   : > { %v2631_v23 = vcombine.low %v2607_v11, %v2623_v50  ;;  %v2632_v63 = vcombine.high %v2607_v11, %v2623_v50  ;;  %v2647_v10 = vcombine.low %v2614_v36, %v2630_v27  ;;  %v2648_v46 = vcombine.high %v2614_v36, %v2630_v27  ;;  %v29413_v36 = vpop.f32.mrb[0].mxu1 }
 0x3ed   : > { %v23123_v29 = vpop.f32.mrb[1].mxu1 }
 0x3ee   : > { %v2639_v14 = vrot.slane %v2631_v23, %v29360_v55  ;;  %v2646_v21 = vrot.slane %v2632_v63, %v29360_v55  ;;  %v2655_v12 = vrot.slane %v2647_v10, %v29360_v55  ;;  %v2662_v32 = vrot.slane %v2648_v46, %v29360_v55  ;;  %v2737_v23 = vpop.permute.xlu1 %2736  ;;  %v2740_v63 = vpop.permute.xlu0 %2739 }
 0x3ef   : > { %v2745_v46 = vcombine.low %v29342_v59, %v2740_v63 }
 0x3f0   : > { %v2667_v44 = vcombine.low %v2639_v14, %v2646_v21  ;;  %v21555_v8 = vcombine.high %v2639_v14, %v2646_v21  ;;  %v2683_v20 = vcombine.low %v2655_v12, %v2662_v32  ;;  %v21556_v28 = vcombine.high %v2655_v12, %v2662_v32 }
 0x3f1   : > { %v2746_v14 = vcombine.high %v29342_v59, %v2740_v63  ;;  %v2753_v32 = vrot.slane %v2745_v46, %v29357_v16 }
 0x3f2   : > { %v2674_v33 = vrot.slane %v2667_v44, %v29357_v16  ;;  %v2682_v3 = vrot.slane %v21555_v8, %v29357_v16  ;;  %v2690_v22 = vrot.slane %v2683_v20, %v29357_v16  ;;  %v2698_v43 = vrot.slane %v21556_v28, %v29357_v16  ;;  %v2743_v10 = vpop.permute.xlu1 %2742 }
 0x3f3   : > { %v2761_v21 = vcombine.low %v2737_v23, %v2743_v10  ;;  %v2762_v12 = vcombine.high %v2737_v23, %v2743_v10  ;;  %v2760_v44 = vrot.slane %v2746_v14, %v29357_v16 }
 0x3f4   : > { %v2699_v47 = vcombine.low %v2674_v33, %v2682_v3  ;;  %v2715_v25 = vcombine.low %v2690_v22, %v2698_v43  ;;  %v2700_v17 = vcombine.high %v2674_v33, %v2682_v3  ;;  %v2716_v60 = vcombine.high %v2690_v22, %v2698_v43 }
 0x3f5   : > { %v2769_v8 = vrot.slane %v2761_v21, %v29357_v16  ;;  %v2776_v20 = vrot.slane %v2762_v12, %v29357_v16 }
 0x3f6   : > { %v2707_v19 = vrot.slane %v2699_v47, %v29360_v55  ;;  %v2723_v18 = vrot.slane %v2715_v25, %v29360_v55  ;;  %v2714_v53 = vrot.slane %v2700_v17, %v29360_v55  ;;  %v2730_v37 = vrot.slane %v2716_v60, %v29360_v55 }
 0x3f7   : > { %v2777_v28 = vcombine.low %v2753_v32, %v2769_v8  ;;  %v2778_v33 = vcombine.high %v2753_v32, %v2769_v8  ;;  %v2793_v3 = vcombine.low %v2760_v44, %v2776_v20  ;;  %v2794_v22 = vcombine.high %v2760_v44, %v2776_v20 }
 0x3f8   : > { %v29385_v45 = vcombine.low %v2707_v19, %v2723_v18  ;;  %v29391_v31 = vcombine.high %v2707_v19, %v2723_v18  ;;  %v29397_v42 = vcombine.low %v2714_v53, %v2730_v37  ;;  %v29404_v41 = vcombine.high %v2714_v53, %v2730_v37 }
 0x3f9   : > { %v2785_v43 = vrot.slane %v2777_v28, %v29360_v55  ;;  %v2792_v52 = vrot.slane %v2778_v33, %v29360_v55  ;;  %v2801_v59 = vrot.slane %v2793_v3, %v29360_v55  ;;  %v2808_v47 = vrot.slane %v2794_v22, %v29360_v55 }
 0x3fa   : > { %v3090_v15 = vadd.f32 %v3073_v35, %v29385_v45  ;;  %v3091_v34 = vadd.f32 %v3077_v5, %v29391_v31  ;;  %v3092_v26 = vadd.f32 %v3081_v61, %v29397_v42  ;;  %v3093_v50 = vadd.f32 %v3085_v39, %v29404_v41 }
 0x3fb   : > { %v2813_v25 = vcombine.low %v2785_v43, %v2792_v52  ;;  %v21557_v6 = vcombine.high %v2785_v43, %v2792_v52  ;;  %v2829_v54 = vcombine.low %v2801_v59, %v2808_v47  ;;  %v21558_v19 = vcombine.high %v2801_v59, %v2808_v47 }
 0x3fc   : > { %v3143_v4 = vmul.f32 %v3090_v15, %v1037_v30  ;;  %v3147_v62 = vmul.f32 %v3090_v15, %v1038_v2  ;;  %v3144_v9 = vmul.f32 %v3091_v34, %v1037_v30  ;;  %v3148_v51 = vmul.f32 %v3091_v34, %v1038_v2 }
 0x3fd   : > { %v3145_v7 = vmul.f32 %v3092_v26, %v1037_v30  ;;  %v3149_v48 = vmul.f32 %v3092_v26, %v1038_v2  ;;  %v3146_v27 = vmul.f32 %v3093_v50, %v1037_v30  ;;  %v3150_v11 = vmul.f32 %v3093_v50, %v1038_v2  ;;  %v21562_v30 = vld.sshfl [vmem:[%s28527_s3] sm:$0x33 pattern:$0x75316420]  ;;  %s35528_s3 = sld [smem:[#allocation143_spill]] }
 0x3fe   : > { %3155 = vrot.lane.b32.xlu0 %v3143_v4, %s27889_s11  ;;  %3171 = vrot.lane.b32.xlu1 %v3147_v62, %s27891_s27  ;;  %v29426_v18 = vrot.slane %v2813_v25, %v29357_v16  ;;  %v29429_v35 = vrot.slane %v21557_v6, %v29357_v16  ;;  %v29432_v17 = vrot.slane %v2829_v54, %v29357_v16 }
 0x3ff   : > { %v29435_v60 = vrot.slane %v21558_v19, %v29357_v16  ;;  %v29439_v2 = vrot.slane %v21562_v30, %v29371_v1  ;;  %v3102_v53 = vcombine.high %v21562_v30, %v21562_v30 }
 0x400   : > { %v2845_v24 = vcombine.low %v29426_v18, %v29429_v35 }
 0x401   : > { %v2861_v15 = vcombine.low %v29432_v17, %v29435_v60  ;;  %v3122_v5 = vrot.slane %v29439_v2, %v29374_v40  ;;  %v29452_v57 = vrot.slane %v3102_v53, %v29371_v1  ;;  %v2862_v53 = vcombine.high %v29432_v17, %v29435_v60 }
 0x402   : > { %3194 = vrot.lane.b32.xlu0 %v3027_v13, %s27889_s11  ;;  %3198 = vrot.lane.b32.xlu1 %v3028_v49, %s27891_s27  ;;  %v2853_v4 = vrot.slane %v2845_v24, %v29360_v55  ;;  %v3117_v24 = vcombine.high %v29439_v2, %v29439_v2 }
 0x403   : > { %v3139_v58 = vadd.f32 %v3122_v5, %v29385_v45  ;;  %v2869_v62 = vrot.slane %v2861_v15, %v29360_v55  ;;  %v3126_v45 = vrot.slane %v29452_v57, %v29374_v40  ;;  %v2846_v5 = vcombine.high %v29426_v18, %v29429_v35 }
 0x404   : > { %v2876_v35 = vrot.slane %v2862_v53, %v29360_v55  ;;  %v3118_v2 = vcombine.high %v29452_v57, %v29452_v57 }
 0x405   : > { %v2877_v39 = vcombine.low %v2853_v4, %v2869_v62  ;;  %v3140_v10 = vadd.f32 %v3126_v45, %v29391_v31  ;;  %v2860_v18 = vrot.slane %v2846_v5, %v29360_v55 }
 0x406   : > { %3157 = vrot.lane.b32.xlu0 %v3144_v9, %s27889_s11  ;;  %3173 = vrot.lane.b32.xlu1 %v3148_v51, %s27891_s27  ;;  %v2878_v9 = vcombine.high %v2853_v4, %v2869_v62 }
 0x407   : > { %v2879_v4 = vcombine.low %v2860_v18, %v2876_v35 }
 0x40a   : > { %3159 = vrot.lane.b32.xlu0 %v3145_v7, %s27889_s11  ;;  %3175 = vrot.lane.b32.xlu1 %v3149_v48, %s27891_s27 }
 0x40e   : > { %3161 = vrot.lane.b32.xlu0 %v3146_v27, %s27889_s11  ;;  %3177 = vrot.lane.b32.xlu1 %v3150_v11, %s27891_s27 }
 0x470   : > { %v3156_v37 = vpop.permute.xlu0 %3155  ;;  %v3172_v13 = vpop.permute.xlu1 %3171 }
 0x471   : > { %v3184_v49 = vsel %vm3183_vm1, %v3139_v58, %v3156_v37  ;;  %v3130_v58 = vrot.slane %v3117_v24, %v29374_v40 }
 0x472   : > { %v3189_v34 = vsel %vm3188_vm2, %v3184_v49, %v3172_v13 }
 0x473   : > { %v3211_v61 = vsel %vm3209_vm3, %v3189_v34, 0  ;;  %v3141_v60 = vadd.f32 %v3130_v58, %v29397_v42  ;;  %v3134_v42 = vrot.slane %v3118_v2, %v29374_v40 }
 0x474   : > { %v29458_v51 = vand.u32 4294901760, %v3211_v61  ;;  %v29460_v26 = vpop.permute.xlu0 %3194  ;;  %v29462_v7 = vpop.permute.xlu1 %3198 }
 0x475   : > { %v3201_v48 = vsel %vm3183_vm1, %v2877_v39, %v29460_v26  ;;  %v3202_v50 = vsel %vm3183_vm1, %v2878_v9, %v29460_v26  ;;  %v3203_v13 = vsel %vm3183_vm1, %v2879_v4, %v29460_v26  ;;  %v3142_v39 = vadd.f32 %v3134_v42, %v29404_v41 }
 0x476   : > { %v29469_v27 = vsub.f32 %v3211_v61, %v29458_v51  ;;  %v3205_v11 = vsel %vm3188_vm2, %v3201_v48, %v29462_v7  ;;  %v3206_v29 = vsel %vm3188_vm2, %v3202_v50, %v29462_v7  ;;  %v3207_v57 = vsel %vm3188_vm2, %v3203_v13, %v29462_v7 }
 0x477   : > { %v3214_v23 = vsel %vm3209_vm3, %v3205_v11, 0  ;;  %v3666_v63 = vsel %vm3209_vm3, %v3206_v29, 0  ;;  %v2880_v9 = vcombine.high %v2860_v18, %v2876_v35  ;;  %v4118_v45 = vsel %vm3209_vm3, %v3207_v57, 0 }
 0x478   : > { %v3284_v46 = vand.u32 4294901760, %v29469_v27  ;;  %v3158_v14 = vpop.permute.xlu0 %3157  ;;  %v3174_v21 = vpop.permute.xlu1 %3173  ;;  %v29479_v12 = vand.u32 4294901760, %v3214_v23  ;;  %v29481_v32 = vand.u32 4294901760, %v3666_v63  ;;  %v29567_v41 = vand.u32 4294901760, %v4118_v45 }
 0x479   : > { %v3185_v44 = vsel %vm3183_vm1, %v3140_v10, %v3158_v14  ;;  %v3204_v11 = vsel %vm3183_vm1, %v2880_v9, %v29460_v26 }
 0x47a   : > { %v3190_v8 = vsel %vm3188_vm2, %v3185_v44, %v3174_v21  ;;  %23125 = vmatpush3.xpose.msra.mxu0 %v29479_v12  ;;  %23155 = vmatpush3.xpose.msra.mxu1 %v29481_v32  ;;  %v3285_v31 = vsub.f32 %v29469_v27, %v3284_v46  ;;  %v3294_v20 = vsub.f32 %v3214_v23, %v29479_v12 }
 0x47b   : > { %v3663_v28 = vsel %vm3209_vm3, %v3190_v8, 0  ;;  %23129 = vmatprep.subr.mxu0 %v35406_v38  ;;  %23159 = vmatprep.subr.mxu1 %v35406_v38  ;;  %v29495_v33 = vsub.f32 %v3666_v63, %v29481_v32  ;;  %v3208_v23 = vsel %vm3188_vm2, %v3204_v11, %v29462_v7  ;;  %v4198_v10 = vsub.f32 %v4118_v45, %v29567_v41 }
 0x47c   : > { %v29497_v3 = vand.u32 4294901760, %v3663_v28  ;;  %v3286_v22 = vand.u32 4294901760, %v3285_v31  ;;  %v3295_v43 = vand.u32 4294901760, %v3294_v20  ;;  %v3160_v17 = vpop.permute.xlu0 %3159  ;;  %v3176_v37 = vpop.permute.xlu1 %3175 }
 0x47d   : > { %v3747_v52 = vand.u32 4294901760, %v29495_v33  ;;  %v3186_v62 = vsel %vm3183_vm1, %v3141_v60, %v3160_v17  ;;  %v4199_v21 = vand.u32 4294901760, %v4198_v10 }
 0x47e   : > { %v29501_v59 = vsub.f32 %v3663_v28, %v29497_v3  ;;  %23127 = vmatmul.mubr.f32.vlgmr.msra.gmra.mrb[2].mxu0 %v3286_v22  ;;  %v3296_v47 = vsub.f32 %v3294_v20, %v3295_v43  ;;  %v3191_v49 = vsel %vm3188_vm2, %v3186_v62, %v3176_v37 }
 0x47f   : > { %23131 = vmatprep.mubr.msk.f32.mxu0 %vm27888_vm0, %v35406_v38  ;;  %v3748_v54 = vsub.f32 %v29495_v33, %v3747_v52  ;;  %v4115_v61 = vsel %vm3209_vm3, %v3191_v49, 0  ;;  %v4200_v31 = vsub.f32 %v4198_v10, %v4199_v21 }
 0x480   : > { %v3736_v25 = vand.u32 4294901760, %v29501_v59  ;;  %v3297_v6 = vand.u32 4294901760, %v3296_v47  ;;  %v3162_v34 = vpop.permute.xlu0 %3161  ;;  %v3178_v50 = vpop.permute.xlu1 %3177  ;;  %v29559_v29 = vand.u32 4294901760, %v4115_v61 }
 0x481   : > { %v3749_v15 = vand.u32 4294901760, %v3748_v54  ;;  %v3187_v48 = vsel %vm3183_vm1, %v3142_v39, %v3162_v34  ;;  %v4201_v22 = vand.u32 4294901760, %v4200_v31 }
 0x482   : > { %23130 = vmatpush3.xpose.msra.mxu0 %v3297_v6  ;;  %v3737_v19 = vsub.f32 %v29501_v59, %v3736_v25  ;;  %v4187_v26 = vsub.f32 %v4115_v61, %v29559_v29 }
 0x483   : > { %23134 = vmatprep.subr.mxu0 %v35406_v38 }
 0x484   : > { %v3738_v30 = vand.u32 4294901760, %v3737_v19  ;;  %v4188_v14 = vand.u32 4294901760, %v4187_v26 }
 0x486   : > { %23132 = vmatmul.mubr.f32.vlgmr.msra.gmra.mrb[2].mxu0 %v29458_v51  ;;  %23157 = vmatmul.mubr.f32.vlgmr.msra.gmra.mrb[2].mxu1 %v3738_v30  ;;  %v4189_v8 = vsub.f32 %v4187_v26, %v4188_v14 }
 0x487   : > { %23135 = vmatpush3.xpose.msra.mxu0 %v3294_v20  ;;  %23160 = vmatpush3.xpose.msra.mxu1 %v3749_v15 }
 0x488   : > { %23136 = vmatprep.mubr.msk.f32.mxu0 %vm27888_vm0, %v35406_v38  ;;  %23139 = vmatprep.subr.mxu0 %v35406_v38 }
 0x489   : > { %23161 = vmatprep.mubr.msk.f32.mxu1 %vm27888_vm0, %v35406_v38  ;;  %23164 = vmatprep.subr.mxu1 %v35406_v38 }
 0x48e   : > { %23137 = vmatmul.mubr.f32.vlgmr.msra.gmra.mrb[2].mxu0 %v29469_v27  ;;  %23162 = vmatmul.mubr.f32.vlgmr.msra.gmra.mrb[2].mxu1 %v29497_v3  ;;  %v3192_v27 = vsel %vm3188_vm2, %v3187_v48, %v3178_v50 }
 0x48f   : > { %23140 = vmatpush3.xpose.msra.mxu0 %v29479_v12  ;;  %23165 = vmatpush3.xpose.msra.mxu1 %v29495_v33  ;;  %v4567_v63 = vsel %vm3209_vm3, %v3192_v27, 0  ;;  %v4190_v33 = vand.u32 4294901760, %v4189_v8 }
 0x490   : > { %23141 = vmatprep.mubr.msk.f32.mxu0 %vm27888_vm0, %v35406_v38  ;;  %23144 = vmatprep.subr.mxu0 %v35406_v38  ;;  %v29582_v7 = vand.u32 4294901760, %v4567_v63 }
 0x491   : > { %23166 = vmatprep.mubr.msk.f32.mxu1 %vm27888_vm0, %v35406_v38  ;;  %23169 = vmatprep.subr.mxu1 %v35406_v38 }
 0x496   : > { %23142 = vmatmul.mubr.f32.vlgmr.msra.gmra.mrb[2].mxu0 %v3284_v46  ;;  %23167 = vmatmul.mubr.f32.vlgmr.msra.gmra.mrb[2].mxu1 %v29501_v59  ;;  %v4570_v46 = vsel %vm3209_vm3, %v3208_v23, 0 }
 0x497   : > { %23145 = vmatpush3.xpose.msra.mxu0 %v3295_v43  ;;  %23170 = vmatpush3.xpose.msra.mxu1 %v29481_v32  ;;  %v4573_v44 = vand.u32 4294901760, %v4570_v46 }
 0x498   : > { %23146 = vmatprep.mubr.msk.f32.mxu0 %vm27888_vm0, %v35406_v38  ;;  %23149 = vmatprep.subr.mxu0 %v35406_v38 }
 0x499   : > { %23171 = vmatprep.mubr.msk.f32.mxu1 %vm27888_vm0, %v35406_v38  ;;  %23174 = vmatprep.subr.mxu1 %v35406_v38  ;;  %v4650_v20 = vsub.f32 %v4570_v46, %v4573_v44 }
 0x49e   : > { %23147 = vmatmul.mubr.f32.vlgmr.msra.gmra.mrb[2].mxu0 %v29458_v51  ;;  %23172 = vmatmul.mubr.f32.vlgmr.msra.gmra.mrb[2].mxu1 %v3736_v25 }
 0x49f   : > { %23150 = vmatpush3.xpose.msra.mxu0 %v29479_v12  ;;  %23175 = vmatpush3.xpose.msra.mxu1 %v3747_v52  ;;  %v4639_v12 = vsub.f32 %v4567_v63, %v29582_v7 }
 0x4a0   : > { %23151 = vmatprep.mubr.msk.f32.mxu0 %vm27888_vm0, %v35406_v38  ;;  %23176 = vmatprep.mubr.msk.f32.mxu1 %vm27888_vm0, %v35406_v38 }
 0x4a1   : > { %23179 = vmatprep.subr.mxu1 %v35406_v38  ;;  %23184 = vmatprep.subr.mxu0 %v35406_v38  ;;  %v4640_v28 = vand.u32 4294901760, %v4639_v12 }
 0x4a6   : > { %23152 = vmatmul.mubr.f32.vlgmr.msra.gmra.mrb[2].mxu0 %v29458_v51  ;;  %23177 = vmatmul.mubr.f32.vlgmr.msra.gmra.mrb[2].mxu1 %v29497_v3  ;;  %v4651_v51 = vand.u32 4294901760, %v4650_v20 }
 0x4a7   : > { %23180 = vmatpush3.xpose.msra.mxu1 %v29481_v32  ;;  %23185 = vmatpush3.xpose.msra.mxu0 %v29567_v41  ;;  %v4641_v32 = vsub.f32 %v4639_v12, %v4640_v28 }
 0x4a8   : > { %23186 = vmatprep.mubr.msk.f32.mxu0 %vm27888_vm0, %v35406_v38  ;;  %23189 = vmatprep.subr.mxu0 %v35406_v38  ;;  %v4652_v43 = vsub.f32 %v4650_v20, %v4651_v51 }
 0x4a9   : > { %23181 = vmatprep.mubr.msk.f32.mxu1 %vm27888_vm0, %v35406_v38  ;;  %23214 = vmatprep.subr.mxu1 %v35406_v38  ;;  %v4642_v52 = vand.u32 4294901760, %v4641_v32 }
 0x4aa   : > { %23187 = vmatmul.mubr.f32.vlgmr.msra.gmra.mrb[4].mxu0 %v4190_v33  ;;  %v4653_v59 = vand.u32 4294901760, %v4652_v43 }
 0x4ab   : > { %23190 = vmatpush3.xpose.msra.mxu0 %v4201_v22  ;;  %23191 = vmatprep.mubr.msk.f32.mxu0 %vm27888_vm0, %v35406_v38 }
 0x4ac   : > { %23194 = vmatprep.subr.mxu0 %v35406_v38 }
 0x4ae   : > { %23182 = vmatmul.mubr.f32.vlgmr.msra.gmra.mrb[2].mxu1 %v29497_v3  ;;  %v1036_v3 = vld [vmem:[#allocation6] sm:$0xff] }
 0x4af   : > { %23215 = vmatpush3.xpose.msra.mxu1 %v4573_v44  ;;  %23216 = vmatprep.mubr.msk.f32.mxu1 %vm27888_vm0, %v35406_v38 }
 0x4b0   : > { %23219 = vmatprep.subr.mxu1 %v35406_v38 }
 0x4b2   : > { %23192 = vmatmul.mubr.f32.vlgmr.msra.gmra.mrb[4].mxu0 %v29559_v29  ;;  %23217 = vmatmul.mubr.f32.vlgmr.msra.gmra.mrb[4].mxu1 %v4642_v52 }
 0x4b3   : > { %23195 = vmatpush3.xpose.msra.mxu0 %v4198_v10  ;;  %23220 = vmatpush3.xpose.msra.mxu1 %v4653_v59 }
 0x4b4   : > { %23196 = vmatprep.mubr.msk.f32.mxu0 %vm27888_vm0, %v35406_v38  ;;  %23199 = vmatprep.subr.mxu0 %v35406_v38 }
 0x4b5   : > { %23221 = vmatprep.mubr.msk.f32.mxu1 %vm27888_vm0, %v35406_v38  ;;  %23224 = vmatprep.subr.mxu1 %v35406_v38 }
 0x4ba   : > { %23197 = vmatmul.mubr.f32.vlgmr.msra.gmra.mrb[4].mxu0 %v4187_v26  ;;  %23222 = vmatmul.mubr.f32.vlgmr.msra.gmra.mrb[4].mxu1 %v29582_v7 }
 0x4bb   : > { %23200 = vmatpush3.xpose.msra.mxu0 %v29567_v41  ;;  %23225 = vmatpush3.xpose.msra.mxu1 %v4650_v20 }
 0x4bc   : > { %23201 = vmatprep.mubr.msk.f32.mxu0 %vm27888_vm0, %v35406_v38  ;;  %23204 = vmatprep.subr.mxu0 %v35406_v38 }
 0x4bd   : > { %23226 = vmatprep.mubr.msk.f32.mxu1 %vm27888_vm0, %v35406_v38  ;;  %23229 = vmatprep.subr.mxu1 %v35406_v38 }
 0x4c2   : > { %23202 = vmatmul.mubr.f32.vlgmr.msra.gmra.mrb[4].mxu0 %v4188_v14  ;;  %23227 = vmatmul.mubr.f32.vlgmr.msra.gmra.mrb[4].mxu1 %v4639_v12 }
 0x4c3   : > { %23205 = vmatpush3.xpose.msra.mxu0 %v4199_v21  ;;  %23230 = vmatpush3.xpose.msra.mxu1 %v4573_v44 }
 0x4c4   : > { %23206 = vmatprep.mubr.msk.f32.mxu0 %vm27888_vm0, %v35406_v38  ;;  %23209 = vmatprep.subr.mxu0 %v35406_v38 }
 0x4c5   : > { %23231 = vmatprep.mubr.msk.f32.mxu1 %vm27888_vm0, %v35406_v38  ;;  %23234 = vmatprep.subr.mxu1 %v35406_v38 }
 0x4ca   : > { %23207 = vmatmul.mubr.f32.vlgmr.msra.gmra.mrb[4].mxu0 %v29559_v29  ;;  %23232 = vmatmul.mubr.f32.vlgmr.msra.gmra.mrb[4].mxu1 %v4640_v28 }
 0x4cb   : > { %23210 = vmatpush3.xpose.msra.mxu0 %v29567_v41  ;;  %23235 = vmatpush3.xpose.msra.mxu1 %v4651_v51 }
 0x4cc   : > { %23211 = vmatprep.mubr.msk.f32.mxu0 %vm27888_vm0, %v35406_v38  ;;  %23236 = vmatprep.mubr.msk.f32.mxu1 %vm27888_vm0, %v35406_v38 }
 0x4cd   : > { %23239 = vmatprep.subr.mxu1 %v35406_v38  ;;  %23244 = vmatprep.subr.mxu0 %v35406_v38 }
 0x4d2   : > { %23212 = vmatmul.mubr.f32.vlgmr.msra.gmra.mrb[4].mxu0 %v29559_v29  ;;  %23237 = vmatmul.mubr.f32.vlgmr.msra.gmra.mrb[4].mxu1 %v29582_v7 }
 0x4d3   : > { %23240 = vmatpush3.xpose.msra.mxu1 %v4573_v44  ;;  %23241 = vmatprep.mubr.msk.f32.mxu1 %vm27888_vm0, %v35406_v38 }
 0x4d4   : > { %23274 = vmatprep.subr.mxu1 %v35406_v38  ;;  %23246 = vmatprep.mubr.msk.f32.mxu0 %vm27888_vm0, %v35406_v38 }
 0x4da   : > { %23242 = vmatmul.mubr.f32.vlgmr.msra.gmra.mrb[4].mxu1 %v29582_v7 }
 0x4db   : > { %23276 = vmatprep.mubr.msk.f32.mxu1 %vm27888_vm0, %v35406_v38 }
 0x579   : > { %v3658_v47 = vpop.f32.mrb[2].mxu0 }
 0x57a   : > { %v26922_v25 = vadd.f32 %v3658_v47, %v1036_v3  ;;  %v23153_v6 = vpop.f32.mrb[3].mxu0 }
 0x57c   : > { %v5019_v54 = vsel %vm5018_vm4, %v26922_v25, -inf }
 0x57d   : > { %5020 = vmax.xlane.f32.xlu0 %v5019_v54 }
 0x581   : > { %v4110_v19 = vpop.f32.mrb[2].mxu1 }
 0x582   : > { %v26923_v30 = vadd.f32 %v4110_v19, %v1036_v3  ;;  %v23183_v24 = vpop.f32.mrb[3].mxu1 }
 0x584   : > { %v5022_v15 = vsel %vm5018_vm4, %v26923_v30, -inf }
 0x585   : > { %5023 = vmax.xlane.f32.xlu1 %v5022_v15 }
 0x596   : > { %2885 = vrot.lane.b32.xlu1 %v29413_v36, %s27891_s27 }
 0x5a5   : > { %v4562_v5 = vpop.f32.mrb[4].mxu0 }
 0x5a6   : > { %v26924_v53 = vadd.f32 %v4562_v5, %v1036_v3  ;;  %v23213_v58 = vpop.f32.mrb[5].mxu0 }
 0x5a8   : > { %v5025_v18 = vsel %vm5018_vm4, %v26924_v53, -inf }
 0x5a9   : > { %5026 = vmax.xlane.f32.xlu0 %v5025_v18 }
 0x5ad   : > { %v5014_v35 = vpop.f32.mrb[4].mxu1 }
 0x5ae   : > { %v26925_v17 = vadd.f32 %v5014_v35, %v1036_v3  ;;  %v23243_v60 = vpop.f32.mrb[5].mxu1 }
 0x5b0   : > { %v5028_v2 = vsel %vm5018_vm4, %v26925_v17, -inf }
 0x5b1   : > { %5029 = vmax.xlane.f32.xlu0 %v5028_v2 }
 0x5c7   : > { %2882 = vrot.lane.b32.xlu0 %v29413_v36, %s27890_s29 }
 0x60a   : > { %v5021_v4 = vpop.xlane.xlu0 %5020 }
 0x60b   : > { %v5031_v62 = vsub.f32 %v26922_v25, %v5021_v4 }
 0x60d   : > { %v5035_v37 = vmul.f32 1.442695, %v5031_v62 }
 0x60f   : > { %27322 = vpow2.f32 %v5035_v37 }
 0x612   : > { %v5024_v13 = vpop.xlane.xlu1 %5023 }
 0x613   : > { %v5032_v42 = vsub.f32 %v26923_v30, %v5024_v13 }
 0x615   : > { %v5037_v49 = vmul.f32 1.442695, %v5032_v42 }
 0x616   : > { %v2886_v63 = vpop.permute.xlu1 %2885 }
 0x617   : > { %27324 = vpow2.f32 %v5037_v49  ;;  %v2891_v46 = vcombine.low %v29413_v36, %v2886_v63  ;;  %v2892_v14 = vcombine.high %v29413_v36, %v2886_v63 }
 0x619   : > { %v27323_v57 = vpop.eup %27322  ;;  %v2899_v8 = vrot.slane %v2891_v46, %v29357_v16  ;;  %v2906_v31 = vrot.slane %v2892_v14, %v29357_v16 }
 0x61a   : > { %v5043_v34 = vsel %vm5018_vm4, %v27323_v57, 0.0 }
 0x61b   : > { %5044 = vadd.xlane.f32.xlu1 %v5043_v34 }
 0x621   : > { %v27325_v61 = vpop.eup %27324 }
 0x622   : > { %v5046_v39 = vsel %vm5018_vm4, %v27325_v61, 0.0 }
 0x623   : > { %5047 = vadd.xlane.f32.xlu0 %v5046_v39 }
 0x62c   : > { %2888 = vrot.lane.b32.xlu1 %v29413_v36, %s27889_s11 }
 0x636   : > { %v5027_v9 = vpop.xlane.xlu0 %5026 }
 0x637   : > { %v5033_v45 = vsub.f32 %v26924_v53, %v5027_v9 }
 0x639   : > { %v5039_v48 = vmul.f32 1.442695, %v5033_v45 }
 0x63b   : > { %27326 = vpow2.f32 %v5039_v48 }
 0x63e   : > { %v5030_v50 = vpop.xlane.xlu0 %5029 }
 0x63f   : > { %v5034_v11 = vsub.f32 %v26925_v17, %v5030_v50 }
 0x641   : > { %v5041_v29 = vmul.f32 1.442695, %v5034_v11 }
 0x642   : > { %v2883_v7 = vpop.permute.xlu0 %2882 }
 0x643   : > { %27328 = vpow2.f32 %v5041_v29 }
 0x645   : > { %v29659_v41 = vpop.eup %27326 }
 0x646   : > { %v5049_v26 = vsel %vm5018_vm4, %v29659_v41, 0.0 }
 0x64d   : > { %v29661_v27 = vpop.eup %27328 }
 0x64e   : > { %v5052_v23 = vsel %vm5018_vm4, %v29661_v27, 0.0 }
 0x64f   : > { %5053 = vadd.xlane.f32.xlu0 %v5052_v23 }
 0x650   : > { %5050 = vadd.xlane.f32.xlu1 %v5049_v26 }
 0x6a8   : > { %v5045_v10 = vpop.xlane.xlu1 %5044 }
 0x6a9   : > { %27330 = vrcp.f32 %v5045_v10 }
 0x6ac   : > { %v2889_v21 = vpop.permute.xlu1 %2888 }
 0x6ad   : > { %v2907_v44 = vcombine.low %v2883_v7, %v2889_v21  ;;  %v2908_v12 = vcombine.high %v2883_v7, %v2889_v21 }
 0x6af   : > { %v2915_v20 = vrot.slane %v2907_v44, %v29357_v16  ;;  %v2922_v28 = vrot.slane %v2908_v12, %v29357_v16 }
 0x6b0   : > { %v5048_v33 = vpop.xlane.xlu0 %5047 }
 0x6b1   : > { %v2923_v22 = vcombine.low %v2899_v8, %v2915_v20  ;;  %v2924_v51 = vcombine.high %v2899_v8, %v2915_v20  ;;  %v2939_v32 = vcombine.low %v2906_v31, %v2922_v28  ;;  %v2940_v43 = vcombine.high %v2906_v31, %v2922_v28 }
 0x6b2   : > { %27332 = vrcp.f32 %v5048_v33 }
 0x6b3   : > { %v27331_v52 = vpop.eup %27330  ;;  %v2931_v36 = vrot.slane %v2923_v22, %v29360_v55  ;;  %v2938_v59 = vrot.slane %v2924_v51, %v29360_v55  ;;  %v2947_v3 = vrot.slane %v2939_v32, %v29360_v55  ;;  %v2954_v47 = vrot.slane %v2940_v43, %v29360_v55 }
 0x6b4   : > { %v5056_v25 = vmul.f32 %v27331_v52, %v27323_v57 }
 0x6b5   : > { %v2959_v6 = vcombine.low %v2931_v36, %v2938_v59  ;;  %v21559_v54 = vcombine.high %v2931_v36, %v2938_v59  ;;  %v2975_v19 = vcombine.low %v2947_v3, %v2954_v47  ;;  %v21560_v30 = vcombine.high %v2947_v3, %v2954_v47 }
 0x6b6   : > { %v5064_v24 = vsel %vm5018_vm4, %v5056_v25, 0 }
 0x6b7   : > { %v29679_v15 = vrot.slane %v2959_v6, %v29357_v16  ;;  %v29682_v5 = vrot.slane %v21559_v54, %v29357_v16  ;;  %v29685_v53 = vrot.slane %v2975_v19, %v29357_v16  ;;  %v29688_v58 = vrot.slane %v21560_v30, %v29357_v16 }
 0x6b8   : > { %v29690_v18 = vand.u32 4294901760, %v5064_v24 }
 0x6b9   : > { %v2991_v35 = vcombine.low %v29679_v15, %v29682_v5  ;;  %v3007_v17 = vcombine.low %v29685_v53, %v29688_v58  ;;  %v2992_v44 = vcombine.high %v29679_v15, %v29682_v5  ;;  %v3008_v12 = vcombine.high %v29685_v53, %v29688_v58 }
 0x6ba   : > { %v5133_v60 = vsub.f32 %v5064_v24, %v29690_v18 }
 0x6bb   : > { %v2999_v2 = vrot.slane %v2991_v35, %v29360_v55  ;;  %v3015_v4 = vrot.slane %v3007_v17, %v29360_v55  ;;  %v3006_v20 = vrot.slane %v2992_v44, %v29360_v55  ;;  %v3022_v28 = vrot.slane %v3008_v12, %v29360_v55 }
 0x6bc   : > { %v27333_v62 = vpop.eup %27332  ;;  %v5134_v37 = vand.u32 4294901760, %v5133_v60 }
 0x6bd   : > { %v5058_v13 = vmul.f32 %v27333_v62, %v27325_v61  ;;  %v3023_v42 = vcombine.low %v2999_v2, %v3015_v4  ;;  %v3024_v49 = vcombine.high %v2999_v2, %v3015_v4  ;;  %v3025_v33 = vcombine.low %v3006_v20, %v3022_v28  ;;  %v3029_v62 = vld [vmem:[%s28529_s26] sm:$0xff] }
 0x6be   : > { %v5135_v57 = vsub.f32 %v5133_v60, %v5134_v37  ;;  %v3026_v22 = vcombine.high %v3006_v20, %v3022_v28 }
 0x6bf   : > { %v5067_v34 = vand.u32 4294901760, %v3023_v42  ;;  %v29699_v39 = vand.u32 4294901760, %v3024_v49  ;;  %v5513_v9 = vsel %vm5018_vm4, %v5058_v13, 0  ;;  %v29746_v51 = vand.u32 4294901760, %v3025_v33 }
 0x6c0   : > { %v5136_v45 = vand.u32 4294901760, %v5135_v57  ;;  %v29702_v48 = vand.u32 4294901760, %v5513_v9  ;;  %v29748_v32 = vand.u32 4294901760, %v3026_v22  ;;  %v6863_v13 = vand.u32 4294901760, %v3029_v62 }
 0x6c1   : > { %23245 = vmatpush3.msra.mxu0 %v5067_v34  ;;  %v5144_v50 = vsub.f32 %v3023_v42, %v5067_v34  ;;  %23275 = vmatpush3.msra.mxu1 %v29699_v39  ;;  %v5593_v11 = vsub.f32 %v3024_v49, %v29699_v39  ;;  %v29753_v3 = vsub.f32 %v3025_v33, %v29746_v51 }
 0x6c2   : > { %23247 = vmatmul.mubr.f32.vlgmr.msra.gmra.mrb[6].mxu0 %v5136_v45  ;;  %23249 = vmatprep.subr.mxu0 %v35406_v38  ;;  %v5582_v61 = vsub.f32 %v5513_v9, %v29702_v48  ;;  %v29756_v47 = vsub.f32 %v3026_v22, %v29748_v32  ;;  %v29811_v49 = vsub.f32 %v3029_v62, %v6863_v13  ;;  %v29864_v22 = vld [vmem:[%s28529_s26 + $0x20] sm:$0xff] }
 0x6c3   : > { %23279 = vmatprep.subr.mxu1 %v35406_v38  ;;  %v5145_v29 = vand.u32 4294901760, %v5144_v50  ;;  %23251 = vmatprep.mubr.msk.f32.mxu0 %vm27888_vm0, %v35406_v38  ;;  %v5594_v23 = vand.u32 4294901760, %v5593_v11  ;;  %v6043_v30 = vand.u32 4294901760, %v29753_v3 }
 0x6c4   : > { %v5583_v26 = vand.u32 4294901760, %v5582_v61  ;;  %v6492_v19 = vand.u32 4294901760, %v29756_v47 }
 0x6c5   : > { %v5146_v63 = vsub.f32 %v5144_v50, %v5145_v29  ;;  %v5595_v10 = vsub.f32 %v5593_v11, %v5594_v23 }
 0x6c6   : > { %v5584_v46 = vsub.f32 %v5582_v61, %v5583_v26  ;;  %v6493_v58 = vsub.f32 %v29756_v47, %v6492_v19 }
 0x6c7   : > { %v5147_v14 = vand.u32 4294901760, %v5146_v63  ;;  %v5596_v7 = vand.u32 4294901760, %v5595_v10 }
 0x6c8   : > { %v5585_v21 = vand.u32 4294901760, %v5584_v46  ;;  %v6494_v2 = vand.u32 4294901760, %v6493_v58 }
 0x6c9   : > { %23250 = vmatpush3.msra.mxu0 %v5147_v14 }
 0x6ca   : > { %23277 = vmatmul.mubr.f32.vlgmr.msra.gmra.mrb[6].mxu1 %v5585_v21  ;;  %23252 = vmatmul.mubr.f32.vlgmr.msra.gmra.mrb[6].mxu0 %v29690_v18 }
 0x6cb   : > { %23280 = vmatpush3.msra.mxu1 %v5596_v7  ;;  %23254 = vmatprep.subr.mxu0 %v35406_v38 }
 0x6cc   : > { %23255 = vmatpush3.msra.mxu0 %v5144_v50  ;;  %23281 = vmatprep.mubr.msk.f32.mxu1 %vm27888_vm0, %v35406_v38 }
 0x6cd   : > { %23284 = vmatprep.subr.mxu1 %v35406_v38  ;;  %23256 = vmatprep.mubr.msk.f32.mxu0 %vm27888_vm0, %v35406_v38 }
 0x6ce   : > { %23259 = vmatprep.subr.mxu0 %v35406_v38 }
 0x6d2   : > { %23282 = vmatmul.mubr.f32.vlgmr.msra.gmra.mrb[6].mxu1 %v29702_v48  ;;  %23257 = vmatmul.mubr.f32.vlgmr.msra.gmra.mrb[6].mxu0 %v5133_v60 }
 0x6d3   : > { %23285 = vmatpush3.msra.mxu1 %v5593_v11  ;;  %23260 = vmatpush3.msra.mxu0 %v5067_v34 }
 0x6d4   : > { %23286 = vmatprep.mubr.msk.f32.mxu1 %vm27888_vm0, %v35406_v38  ;;  %23289 = vmatprep.subr.mxu1 %v35406_v38 }
 0x6d5   : > { %23261 = vmatprep.mubr.msk.f32.mxu0 %vm27888_vm0, %v35406_v38  ;;  %23264 = vmatprep.subr.mxu0 %v35406_v38 }
 0x6da   : > { %23287 = vmatmul.mubr.f32.vlgmr.msra.gmra.mrb[6].mxu1 %v5582_v61  ;;  %23262 = vmatmul.mubr.f32.vlgmr.msra.gmra.mrb[6].mxu0 %v5134_v37  ;;  %v3030_v37 = vld [vmem:[%s28529_s26 + $0x8] sm:$0xff]  ;;  %v3031_v61 = vld [vmem:[%s28529_s26 + $0x10] sm:$0xff] }
 0x6db   : > { %23290 = vmatpush3.msra.mxu1 %v29699_v39  ;;  %23265 = vmatpush3.msra.mxu0 %v5145_v29  ;;  %v6866_v42 = vand.u32 4294901760, %v3030_v37  ;;  %v3032_v29 = vld [vmem:[%s28529_s26 + $0x18] sm:$0xff] }
 0x6dc   : > { %v5054_v8 = vpop.xlane.xlu0 %5053  ;;  %23291 = vmatprep.mubr.msk.f32.mxu1 %vm27888_vm0, %v35406_v38  ;;  %23294 = vmatprep.subr.mxu1 %v35406_v38 }
 0x6dd   : > { %27334 = vrcp.f32 %v5054_v8  ;;  %v5051_v31 = vpop.xlane.xlu1 %5050  ;;  %23266 = vmatprep.mubr.msk.f32.mxu0 %vm27888_vm0, %v35406_v38  ;;  %23269 = vmatprep.subr.mxu0 %v35406_v38  ;;  %v29813_v57 = vsub.f32 %v3030_v37, %v6866_v42 }
 0x6de   : > { %27336 = vrcp.f32 %v5051_v31  ;;  %v25195_v31 = vpack.c.bf16 %v6866_v42, %v6863_v13 }
 0x6e2   : > { %23292 = vmatmul.mubr.f32.vlgmr.msra.gmra.mrb[6].mxu1 %v5583_v26  ;;  %23267 = vmatmul.mubr.f32.vlgmr.msra.gmra.mrb[6].mxu0 %v29690_v18  ;;  %v6872_v26 = vand.u32 4294901760, %v3032_v29 }
 0x6e3   : > { %23295 = vmatpush3.msra.mxu1 %v5594_v23  ;;  %23270 = vmatpush3.msra.mxu0 %v5067_v34  ;;  %v6944_v34 = vand.u32 4294901760, %v29811_v49  ;;  %v6869_v23 = vand.u32 4294901760, %v3031_v61 }
 0x6e4   : > { %23296 = vmatprep.mubr.msk.f32.mxu1 %vm27888_vm0, %v35406_v38  ;;  %23299 = vmatprep.subr.mxu1 %v35406_v38  ;;  %v29850_v10 = vsub.f32 %v3032_v29, %v6872_v26 }
 0x6e5   : > { %23271 = vmatprep.mubr.msk.f32.mxu0 %vm27888_vm0, %v35406_v38  ;;  %23304 = vmatprep.subr.mxu0 %v35406_v38  ;;  %v6945_v9 = vsub.f32 %v29811_v49, %v6944_v34  ;;  %v29848_v63 = vsub.f32 %v3031_v61, %v6869_v23  ;;  %v25198_v20 = vpack.c.bf16 %v6872_v26, %v6869_v23  ;;  %v29942_v26 = vld [vmem:[%s28529_s26 + $0x40] sm:$0xff] }
 0x6e6   : > { %v6965_v14 = vand.u32 4294901760, %v29850_v10 }
 0x6e7   : > { %v27335_v43 = vpop.eup %27334  ;;  %v6958_v46 = vand.u32 4294901760, %v29848_v63  ;;  %v25210_v28 = vpack.c.bf16 %v29850_v10, %v29848_v63 }
 0x6e8   : > { %v27337_v52 = vpop.eup %27336  ;;  %v5062_v36 = vmul.f32 %v27335_v43, %v29661_v27  ;;  %v6966_v21 = vsub.f32 %v29850_v10, %v6965_v14  ;;  %v29954_v10 = vld [vmem:[%s28529_s26 + $0x50] sm:$0xff] }
 0x6e9   : > { %v5060_v59 = vmul.f32 %v27337_v52, %v29659_v41  ;;  %v6959_v7 = vsub.f32 %v29848_v63, %v6958_v46  ;;  %v29861_v33 = vpack.c.bf16 %v6965_v14, %v6958_v46  ;;  %v29872_v52 = vld [vmem:[%s28529_s26 + $0x30] sm:$0xff]  ;;  %v29945_v63 = vld [vmem:[%s28529_s26 + $0x48] sm:$0xff]  ;;  %v29957_v46 = vld [vmem:[%s28529_s26 + $0x58] sm:$0xff] }
 0x6ea   : > { %23297 = vmatmul.mubr.f32.vlgmr.msra.gmra.mrb[6].mxu1 %v29702_v48  ;;  %23272 = vmatmul.mubr.f32.vlgmr.msra.gmra.mrb[6].mxu0 %v29690_v18  ;;  %v6411_v25 = vsel %vm5018_vm4, %v5062_v36, 0  ;;  %v6044_v18 = vsub.f32 %v29753_v3, %v6043_v30  ;;  %v6967_v12 = vand.u32 4294901760, %v6966_v21  ;;  %v29875_v36 = vld [vmem:[%s28529_s26 + $0x38] sm:$0xff] }
 0x6eb   : > { %23300 = vmatpush3.msra.mxu1 %v29699_v39  ;;  %23305 = vmatpush3.msra.mxu0 %v29746_v51  ;;  %v29763_v6 = vand.u32 4294901760, %v6411_v25  ;;  %v5962_v41 = vsel %vm5018_vm4, %v5060_v59, 0  ;;  %v6951_v39 = vand.u32 4294901760, %v29813_v57  ;;  %v6960_v44 = vand.u32 4294901760, %v6959_v7 }
 0x6ec   : > { %23301 = vmatprep.mubr.msk.f32.mxu1 %vm27888_vm0, %v35406_v38  ;;  %23334 = vmatprep.subr.mxu1 %v35406_v38  ;;  %v29769_v27 = vand.u32 4294901760, %v5962_v41  ;;  %v6045_v4 = vand.u32 4294901760, %v6044_v18 }
 0x6ed   : > { %23306 = vmatprep.mubr.msk.f32.mxu0 %vm27888_vm0, %v35406_v38  ;;  %23309 = vmatprep.subr.mxu0 %v35406_v38  ;;  %v6480_v54 = vsub.f32 %v6411_v25, %v29763_v6  ;;  %v6952_v45 = vsub.f32 %v29813_v57, %v6951_v39  ;;  %v25204_v8 = vpack.c.bf16 %v6967_v12, %v6960_v44  ;;  %v7845_v44 = vand.u32 4294901760, %v29954_v10 }
 0x6ee   : > { %v6031_v24 = vsub.f32 %v5962_v41, %v29769_v27  ;;  %v7357_v41 = vand.u32 4294901760, %v29872_v52  ;;  %v7848_v12 = vand.u32 4294901760, %v29957_v46 }
 0x6ef   : > { %v6481_v15 = vand.u32 4294901760, %v6480_v54  ;;  %v6953_v50 = vand.u32 4294901760, %v6952_v45 }
 0x6f0   : > { %v6032_v5 = vand.u32 4294901760, %v6031_v24 }
 0x6f1   : > { %v6482_v53 = vsub.f32 %v6480_v54, %v6481_v15 }
 0x6f2   : > { %23302 = vmatmul.mubr.f32.vlgmr.msra.gmra.mrb[6].mxu1 %v29702_v48  ;;  %v6033_v35 = vsub.f32 %v6031_v24, %v6032_v5  ;;  %v6946_v48 = vand.u32 4294901760, %v6945_v9 }
 0x6f3   : > { %23335 = vmatpush3.msra.mxu1 %v29748_v32  ;;  %23336 = vmatprep.mubr.msk.f32.mxu1 %vm27888_vm0, %v35406_v38  ;;  %v6483_v17 = vand.u32 4294901760, %v6482_v53 }
 0x6f4   : > { %23339 = vmatprep.subr.mxu1 %v35406_v38  ;;  %v6034_v60 = vand.u32 4294901760, %v6033_v35  ;;  %v25201_v11 = vpack.c.bf16 %v6953_v50, %v6946_v48  ;;  %v25207_v35 = vpack.c.bf16 %v29813_v57, %v29811_v49  ;;  %v25219_v50 = vpack.c.bf16 %v6951_v39, %v6944_v34 }
 0x6f5   : > { %v7839_v57 = vand.u32 4294901760, %v29942_v26  ;;  %v7842_v34 = vand.u32 4294901760, %v29945_v63 }
 0x6f6   : > { %23337 = vmatmul.mubr.f32.vlgmr.msra.gmra.mrb[8].mxu1 %v6483_v17  ;;  %23307 = vmatmul.mubr.f32.vlgmr.msra.gmra.mrb[8].mxu0 %v6034_v60 }
 0x6f7   : > { %23340 = vmatpush3.msra.mxu1 %v6494_v2  ;;  %23310 = vmatpush3.msra.mxu0 %v6045_v4  ;;  %v29971_v7 = vsub.f32 %v29942_v26, %v7839_v57  ;;  %v29976_v21 = vsub.f32 %v29945_v63, %v7842_v34 }
 0x6f8   : > { %23341 = vmatprep.mubr.msk.f32.mxu1 %vm27888_vm0, %v35406_v38  ;;  %23344 = vmatprep.subr.mxu1 %v35406_v38 }
 0x6f9   : > { %23311 = vmatprep.mubr.msk.f32.mxu0 %vm27888_vm0, %v35406_v38  ;;  %23314 = vmatprep.subr.mxu0 %v35406_v38 }
 0x6fe   : > { %23342 = vmatmul.mubr.f32.vlgmr.msra.gmra.mrb[8].mxu1 %v29763_v6  ;;  %23312 = vmatmul.mubr.f32.vlgmr.msra.gmra.mrb[8].mxu0 %v29769_v27 }
 0x6ff   : > { %23345 = vmatpush3.msra.mxu1 %v29756_v47  ;;  %23315 = vmatpush3.msra.mxu0 %v29753_v3 }
 0x700   : > { %23346 = vmatprep.mubr.msk.f32.mxu1 %vm27888_vm0, %v35406_v38  ;;  %23349 = vmatprep.subr.mxu1 %v35406_v38 }
 0x701   : > { %23316 = vmatprep.mubr.msk.f32.mxu0 %vm27888_vm0, %v35406_v38  ;;  %23319 = vmatprep.subr.mxu0 %v35406_v38 }
 0x706   : > { %23347 = vmatmul.mubr.f32.vlgmr.msra.gmra.mrb[8].mxu1 %v6480_v54  ;;  %23317 = vmatmul.mubr.f32.vlgmr.msra.gmra.mrb[8].mxu0 %v6031_v24 }
 0x707   : > { %23350 = vmatpush3.msra.mxu1 %v29748_v32  ;;  %23320 = vmatpush3.msra.mxu0 %v29746_v51 }
 0x708   : > { %23351 = vmatprep.mubr.msk.f32.mxu1 %vm27888_vm0, %v35406_v38  ;;  %23354 = vmatprep.subr.mxu1 %v35406_v38 }
 0x709   : > { %23321 = vmatprep.mubr.msk.f32.mxu0 %vm27888_vm0, %v35406_v38  ;;  %23324 = vmatprep.subr.mxu0 %v35406_v38 }
 0x70e   : > { %23352 = vmatmul.mubr.f32.vlgmr.msra.gmra.mrb[8].mxu1 %v6481_v15  ;;  %23322 = vmatmul.mubr.f32.vlgmr.msra.gmra.mrb[8].mxu0 %v6032_v5  ;;  %v29901_v15 = vsub.f32 %v29872_v52, %v7357_v41 }
 0x70f   : > { %23355 = vmatpush3.msra.mxu1 %v6492_v19  ;;  %23325 = vmatpush3.msra.mxu0 %v6043_v30 }
 0x710   : > { %23356 = vmatprep.mubr.msk.f32.mxu1 %vm27888_vm0, %v35406_v38  ;;  %23359 = vmatprep.subr.mxu1 %v35406_v38  ;;  %v7446_v4 = vand.u32 4294901760, %v29901_v15 }
 0x711   : > { %23326 = vmatprep.mubr.msk.f32.mxu0 %vm27888_vm0, %v35406_v38  ;;  %23329 = vmatprep.subr.mxu0 %v35406_v38 }
 0x712   : > { %v7447_v9 = vsub.f32 %v29901_v15, %v7446_v4 }
 0x714   : > { %v7448_v61 = vand.u32 4294901760, %v7447_v9 }
 0x716   : > { %23357 = vmatmul.mubr.f32.vlgmr.msra.gmra.mrb[8].mxu1 %v29763_v6  ;;  %23327 = vmatmul.mubr.f32.vlgmr.msra.gmra.mrb[8].mxu0 %v29769_v27 }
 0x717   : > { %23360 = vmatpush3.msra.mxu1 %v29748_v32  ;;  %23330 = vmatpush3.msra.mxu0 %v29746_v51  ;;  %v29867_v51 = vld [vmem:[%s28529_s26 + $0x28] sm:$0xff]  ;;  %v7351_v32 = vand.u32 4294901760, %v29864_v22 }
 0x718   : > { %23361 = vmatprep.mubr.msk.f32.mxu1 %vm27888_vm0, %v35406_v38  ;;  %23331 = vmatprep.mubr.msk.f32.mxu0 %vm27888_vm0, %v35406_v38  ;;  %v7354_v43 = vand.u32 4294901760, %v29867_v51 }
 0x719   : > { %25200 = vmatprep.subr.bf16.mxu1 %v35428_v56  ;;  %25194 = vmatprep.subr.bf16.mxu0 %v35428_v56  ;;  %v29880_v3 = vsub.f32 %v29864_v22, %v7351_v32  ;;  %v29998_v22 = vsub.f32 %v29957_v46, %v7848_v12 }
 0x71a   : > { %v25231_v14 = vpack.c.bf16 %v7354_v43, %v7351_v32 }
 0x71b   : > { %v7432_v30 = vand.u32 4294901760, %v29880_v3 }
 0x71d   : > { %v7433_v60 = vsub.f32 %v29880_v3, %v7432_v30 }
 0x71e   : > { %23362 = vmatmul.mubr.f32.vlgmr.msra.gmra.mrb[8].mxu1 %v29763_v6  ;;  %23332 = vmatmul.mubr.f32.vlgmr.msra.gmra.mrb[8].mxu0 %v29769_v27  ;;  %v29886_v6 = vsub.f32 %v29867_v51, %v7354_v43  ;;  %v7360_v27 = vand.u32 4294901760, %v29875_v36 }
 0x71f   : > { %25202 = vmatpush3.bf16.msra.mxu1 %v25201_v11  ;;  %23383 = vmatprep.mubr.msk.f32.mxu1 %vm27888_vm0, %v35406_v38  ;;  %v7434_v13 = vand.u32 4294901760, %v7433_v60  ;;  %v30064_v60 = vld [vmem:[%s28529_s26 + $0x70] sm:$0xff] }
 0x720   : > { %25203 = vmatprep.subr.bf16.mxu1 %v35428_v56  ;;  %23372 = vmatprep.mubr.msk.f32.mxu0 %vm27888_vm0, %v35406_v38  ;;  %v7439_v24 = vand.u32 4294901760, %v29886_v6  ;;  %v29906_v5 = vsub.f32 %v29875_v36, %v7360_v27  ;;  %v25243_v32 = vpack.c.bf16 %v29886_v6, %v29880_v3 }
 0x721   : > { %25196 = vmatpush3.bf16.msra.mxu0 %v25195_v31 }
 0x722   : > { %25197 = vmatprep.subr.bf16.mxu0 %v35428_v56  ;;  %v7440_v2 = vsub.f32 %v29886_v6, %v7439_v24  ;;  %v7453_v62 = vand.u32 4294901760, %v29906_v5 }
 0x723   : > { %25205 = vmatpush3.bf16.msra.mxu1 %v25204_v8 }
 0x724   : > { %25212 = vmatprep.subr.bf16.mxu1 %v35428_v56  ;;  %v7441_v42 = vand.u32 4294901760, %v7440_v2  ;;  %v7454_v45 = vsub.f32 %v29906_v5, %v7453_v62  ;;  %v25258_v3 = vpack.c.bf16 %v7453_v62, %v7446_v4  ;;  %v30067_v2 = vld [vmem:[%s28529_s26 + $0x78] sm:$0xff] }
 0x725   : > { %25199 = vmatpush3.bf16.msra.mxu0 %v25198_v20 }
 0x726   : > { %25206 = vmatprep.subr.bf16.mxu0 %v35428_v56  ;;  %v25237_v11 = vpack.c.bf16 %v7441_v42, %v7434_v13  ;;  %v7455_v29 = vand.u32 4294901760, %v7454_v45 }
 0x728   : > { %v25240_v49 = vpack.c.bf16 %v7455_v29, %v7448_v61 }
 0x7bd   : > { %v5508_v59 = vpop.f32.mrb[6].mxu0 }
 0x7be   : > { %v6860_v47 = vsel %vm3183_vm1, %v5508_v59, 0  ;;  %v23273_v25 = vpop.f32.mrb[7].mxu0  ;;  %v7941_v59 = vand.u32 4294901760, %v29998_v22 }
 0x7bf   : > { %v29890_v54 = vand.u32 4294901760, %v6860_v47  ;;  %v25246_v25 = vpack.c.bf16 %v29906_v5, %v29901_v15  ;;  %v25267_v5 = vpack.c.bf16 %v7842_v34, %v7839_v57 }
 0x7c1   : > { %v6932_v19 = vsub.f32 %v6860_v47, %v29890_v54  ;;  %23384 = vmatmul.mubr.f32.vlgmr.msra.gmra.mrb[10].mxu1 %v29890_v54 }
 0x7c2   : > { %25214 = vmatpush3.bf16.msra.mxu1 %v25195_v31  ;;  %23405 = vmatprep.mubr.msk.f32.mxu1 %vm27888_vm0, %v35406_v38 }
 0x7c3   : > { %v6933_v53 = vand.u32 4294901760, %v6932_v19  ;;  %25215 = vmatprep.subr.bf16.mxu1 %v35428_v56 }
 0x7c5   : > { %v6934_v58 = vsub.f32 %v6932_v19, %v6933_v53  ;;  %v5957_v18 = vpop.f32.mrb[6].mxu1 }
 0x7c6   : > { %v23303_v17 = vpop.f32.mrb[7].mxu1  ;;  %25217 = vmatpush3.bf16.msra.mxu1 %v25198_v20  ;;  %v7348_v48 = vsel %vm3183_vm1, %v5957_v18, 0 }
 0x7c7   : > { %v6935_v37 = vand.u32 4294901760, %v6934_v58  ;;  %25224 = vmatprep.subr.bf16.mxu1 %v35428_v56  ;;  %v29937_v23 = vand.u32 4294901760, %v7348_v48 }
 0x7c9   : > { %23406 = vmatmul.mubr.f32.vlgmr.msra.gmra.mrb[12].mxu1 %v6933_v53  ;;  %23373 = vmatmul.mubr.f32.vlgmr.msra.gmra.mrb[10].mxu0 %v6935_v37  ;;  %v7420_v39 = vsub.f32 %v7348_v48, %v29937_v23  ;;  %v25255_v53 = vpack.c.bf16 %v7439_v24, %v7432_v30  ;;  %v30044_v30 = vld [vmem:[%s28529_s26 + $0x60] sm:$0xff]  ;;  %v30050_v24 = vld [vmem:[%s28529_s26 + $0x68] sm:$0xff]  ;;  %v25270_v37 = vpack.c.bf16 %v7848_v12, %v7845_v44 }
 0x7ca   : > { %25208 = vmatpush3.bf16.msra.mxu0 %v25207_v35  ;;  %25226 = vmatpush3.bf16.msra.mxu1 %v25195_v31  ;;  %v25234_v31 = vpack.c.bf16 %v7360_v27, %v7357_v41  ;;  %v8327_v15 = vand.u32 4294901760, %v30044_v30  ;;  %v8330_v17 = vand.u32 4294901760, %v30050_v24 }
 0x7cb   : > { %25209 = vmatprep.subr.bf16.mxu0 %v35428_v56  ;;  %25227 = vmatprep.subr.bf16.mxu1 %v35428_v56  ;;  %v7421_v8 = vand.u32 4294901760, %v7420_v39 }
 0x7cc   : > { %23394 = vmatprep.mubr.msk.f32.mxu0 %vm27888_vm0, %v35406_v38  ;;  %23427 = vmatprep.mubr.msk.f32.mxu1 %vm27888_vm0, %v35406_v38  ;;  %v30077_v13 = vsub.f32 %v30044_v30, %v8327_v15  ;;  %v30085_v48 = vsub.f32 %v30050_v24, %v8330_v17 }
 0x7cd   : > { %v7422_v51 = vsub.f32 %v7420_v39, %v7421_v8 }
 0x7ce   : > { %25211 = vmatpush3.bf16.msra.mxu0 %v25210_v28  ;;  %25229 = vmatpush3.bf16.msra.mxu1 %v25198_v20  ;;  %v7920_v20 = vand.u32 4294901760, %v29971_v7  ;;  %v7927_v28 = vand.u32 4294901760, %v29976_v21  ;;  %v8415_v26 = vand.u32 4294901760, %v30085_v48 }
 0x7cf   : > { %25218 = vmatprep.subr.bf16.mxu0 %v35428_v56  ;;  %25236 = vmatprep.subr.bf16.mxu1 %v35428_v56  ;;  %v7423_v47 = vand.u32 4294901760, %v7422_v51 }
 0x7d0   : > { %v7921_v43 = vsub.f32 %v29971_v7, %v7920_v20  ;;  %v7928_v52 = vsub.f32 %v29976_v21, %v7927_v28  ;;  %v8416_v46 = vsub.f32 %v30085_v48, %v8415_v26 }
 0x7d1   : > { %23395 = vmatmul.mubr.f32.vlgmr.msra.gmra.mrb[12].mxu0 %v6932_v19  ;;  %23428 = vmatmul.mubr.f32.vlgmr.msra.gmra.mrb[14].mxu1 %v29890_v54  ;;  %v7942_v19 = vsub.f32 %v29998_v22, %v7941_v59 }
 0x7d2   : > { %25220 = vmatpush3.bf16.msra.mxu0 %v25219_v50  ;;  %25238 = vmatpush3.bf16.msra.mxu1 %v25237_v11  ;;  %v7922_v41 = vand.u32 4294901760, %v7921_v43  ;;  %v7929_v27 = vand.u32 4294901760, %v7928_v52  ;;  %v8333_v50 = vand.u32 4294901760, %v30064_v60  ;;  %v8336_v11 = vand.u32 4294901760, %v30067_v2 }
 0x7d3   : > { %25221 = vmatprep.subr.bf16.mxu0 %v35428_v56  ;;  %25239 = vmatprep.subr.bf16.mxu1 %v35428_v56  ;;  %v7943_v35 = vand.u32 4294901760, %v7942_v19  ;;  %v8417_v51 = vand.u32 4294901760, %v8416_v46 }
 0x7d4   : > { %23416 = vmatprep.mubr.msk.f32.mxu0 %vm27888_vm0, %v35406_v38  ;;  %23449 = vmatprep.mubr.msk.f32.mxu1 %vm27888_vm0, %v35406_v38  ;;  %v25273_v58 = vpack.c.bf16 %v7929_v27, %v7922_v41  ;;  %v30095_v63 = vsub.f32 %v30064_v60, %v8333_v50 }
 0x7d6   : > { %25223 = vmatpush3.bf16.msra.mxu0 %v29861_v33  ;;  %25241 = vmatpush3.bf16.msra.mxu1 %v25240_v49  ;;  %v29993_v33 = vsub.f32 %v29954_v10, %v7845_v44  ;;  %v30100_v49 = vsub.f32 %v30067_v2, %v8336_v11 }
 0x7d7   : > { %25230 = vmatprep.subr.bf16.mxu0 %v35428_v56  ;;  %25248 = vmatprep.subr.bf16.mxu1 %v35428_v56 }
 0x7d8   : > { %v7934_v36 = vand.u32 4294901760, %v29993_v33  ;;  %v8429_v44 = vand.u32 4294901760, %v30100_v49 }
 0x7d9   : > { %23417 = vmatmul.mubr.f32.vlgmr.msra.gmra.mrb[14].mxu0 %v29890_v54  ;;  %23450 = vmatmul.mubr.f32.vlgmr.msra.gmra.mrb[16].mxu1 %v29937_v23 }
 0x7da   : > { %25232 = vmatpush3.bf16.msra.mxu0 %v25231_v14  ;;  %25250 = vmatpush3.bf16.msra.mxu1 %v25231_v14  ;;  %v7935_v54 = vsub.f32 %v29993_v33, %v7934_v36  ;;  %v8430_v43 = vsub.f32 %v30100_v49, %v8429_v44 }
 0x7db   : > { %25233 = vmatprep.subr.bf16.mxu0 %v35428_v56  ;;  %25251 = vmatprep.subr.bf16.mxu1 %v35428_v56 }
 0x7dc   : > { %23438 = vmatprep.mubr.msk.f32.mxu0 %vm27888_vm0, %v35406_v38  ;;  %23471 = vmatprep.mubr.msk.f32.mxu1 %vm27888_vm0, %v35406_v38  ;;  %v7936_v18 = vand.u32 4294901760, %v7935_v54  ;;  %v8431_v27 = vand.u32 4294901760, %v8430_v43 }
 0x7de   : > { %25235 = vmatpush3.bf16.msra.mxu0 %v25234_v31  ;;  %25253 = vmatpush3.bf16.msra.mxu1 %v25234_v31  ;;  %v25276_v6 = vpack.c.bf16 %v7943_v35, %v7936_v18 }
 0x7df   : > { %25242 = vmatprep.subr.bf16.mxu0 %v35428_v56  ;;  %25260 = vmatprep.subr.bf16.mxu1 %v35428_v56 }
 0x7e1   : > { %23439 = vmatmul.mubr.f32.vlgmr.msra.gmra.mrb[16].mxu0 %v7423_v47  ;;  %23472 = vmatmul.mubr.f32.vlgmr.msra.gmra.mrb[18].mxu1 %v7421_v8  ;;  %v25282_v8 = vpack.c.bf16 %v29998_v22, %v29993_v33  ;;  %v25291_v47 = vpack.c.bf16 %v7927_v28, %v7920_v20  ;;  %v25303_v20 = vpack.c.bf16 %v8330_v17, %v8327_v15 }
 0x7e2   : > { %25244 = vmatpush3.bf16.msra.mxu0 %v25243_v32  ;;  %25262 = vmatpush3.bf16.msra.mxu1 %v25231_v14  ;;  %v8422_v14 = vand.u32 4294901760, %v30095_v63  ;;  %v25306_v33 = vpack.c.bf16 %v8336_v11, %v8333_v50 }
 0x7e3   : > { %25245 = vmatprep.subr.bf16.mxu0 %v35428_v56  ;;  %25263 = vmatprep.subr.bf16.mxu1 %v35428_v56 }
 0x7e4   : > { %23460 = vmatprep.mubr.msk.f32.mxu0 %vm27888_vm0, %v35406_v38  ;;  %23493 = vmatprep.mubr.msk.f32.mxu1 %vm27888_vm0, %v35406_v38  ;;  %v8423_v32 = vsub.f32 %v30095_v63, %v8422_v14  ;;  %v25330_v18 = vpack.c.bf16 %v8429_v44, %v8422_v14 }
 0x7e6   : > { %25247 = vmatpush3.bf16.msra.mxu0 %v25246_v25  ;;  %25265 = vmatpush3.bf16.msra.mxu1 %v25234_v31  ;;  %v8424_v41 = vand.u32 4294901760, %v8423_v32 }
 0x7e7   : > { %25254 = vmatprep.subr.bf16.mxu0 %v35428_v56  ;;  %25272 = vmatprep.subr.bf16.mxu1 %v35428_v56 }
 0x7e8   : > { %v25312_v19 = vpack.c.bf16 %v8431_v27, %v8424_v41 }
 0x7e9   : > { %23461 = vmatmul.mubr.f32.vlgmr.msra.gmra.mrb[18].mxu0 %v7420_v39  ;;  %23494 = vmatmul.mubr.f32.vlgmr.msra.gmra.mrb[20].mxu1 %v29937_v23  ;;  %v25279_v39 = vpack.c.bf16 %v29976_v21, %v29971_v7  ;;  %v25294_v7 = vpack.c.bf16 %v7941_v59, %v7934_v36  ;;  %v25315_v36 = vpack.c.bf16 %v30085_v48, %v30077_v13 }
 0x7ea   : > { %25256 = vmatpush3.bf16.msra.mxu0 %v25255_v53  ;;  %25274 = vmatpush3.bf16.msra.mxu1 %v25273_v58  ;;  %v25318_v53 = vpack.c.bf16 %v30100_v49, %v30095_v63 }
 0x7eb   : > { %25257 = vmatprep.subr.bf16.mxu0 %v35428_v56  ;;  %23482 = vmatprep.mubr.msk.f32.mxu0 %vm27888_vm0, %v35406_v38 }
 0x7ec   : > { %25275 = vmatprep.subr.bf16.mxu1 %v35428_v56  ;;  %23515 = vmatprep.mubr.msk.f32.mxu1 %vm27888_vm0, %v35406_v38 }
 0x7ee   : > { %25259 = vmatpush3.bf16.msra.mxu0 %v25258_v3  ;;  %25277 = vmatpush3.bf16.msra.mxu1 %v25276_v6 }
 0x7ef   : > { %25266 = vmatprep.subr.bf16.mxu0 %v35428_v56  ;;  %25284 = vmatprep.subr.bf16.mxu1 %v35428_v56 }
 0x7f1   : > { %v6855_v4 = vpop.f32.mrb[8].mxu1  ;;  %23483 = vmatmul.mubr.f32.vlgmr.msra.gmra.mrb[20].mxu0 %v29937_v23  ;;  %v6406_v62 = vpop.f32.mrb[8].mxu0  ;;  %v8408_v23 = vand.u32 4294901760, %v30077_v13 }
 0x7f2   : > { %v7836_v42 = vsel %vm3183_vm1, %v6406_v62, 0  ;;  %v23363_v9 = vpop.f32.mrb[9].mxu1  ;;  %v23333_v45 = vpop.f32.mrb[9].mxu0  ;;  %25268 = vmatpush3.bf16.msra.mxu0 %v25267_v5  ;;  %23504 = vmatprep.mubr.msk.f32.mxu0 %vm27888_vm0, %v35406_v38  ;;  %v8324_v52 = vsel %vm3183_vm1, %v6855_v4, 0 }
 0x7f3   : > { %v7907_v61 = vand.u32 4294901760, %v7836_v42  ;;  %25269 = vmatprep.subr.bf16.mxu0 %v35428_v56  ;;  %v8409_v10 = vsub.f32 %v30077_v13, %v8408_v23  ;;  %v8395_v54 = vand.u32 4294901760, %v8324_v52  ;;  %v25327_v58 = vpack.c.bf16 %v8415_v26, %v8408_v23 }
 0x7f5   : > { %v7908_v29 = vsub.f32 %v7836_v42, %v7907_v61  ;;  %23516 = vmatmul.mubr.f32.vlgmr.msra.gmra.mrb[22].mxu1 %v7907_v61  ;;  %v8410_v31 = vand.u32 4294901760, %v8409_v10  ;;  %v8396_v21 = vsub.f32 %v8324_v52, %v8395_v54 }
 0x7f6   : > { %25286 = vmatpush3.bf16.msra.mxu1 %v25267_v5  ;;  %25271 = vmatpush3.bf16.msra.mxu0 %v25270_v37 }
 0x7f7   : > { %v7909_v57 = vand.u32 4294901760, %v7908_v29  ;;  %25287 = vmatprep.subr.bf16.mxu1 %v35428_v56  ;;  %23537 = vmatprep.mubr.msk.f32.mxu1 %vm27888_vm0, %v35406_v38  ;;  %v25309_v25 = vpack.c.bf16 %v8417_v51, %v8410_v31  ;;  %v8397_v28 = vand.u32 4294901760, %v8396_v21 }
 0x7f8   : > { %25278 = vmatprep.subr.bf16.mxu0 %v35428_v56 }
 0x7f9   : > { %v7910_v34 = vsub.f32 %v7908_v29, %v7909_v57  ;;  %v8398_v22 = vsub.f32 %v8396_v21, %v8397_v28 }
 0x7fa   : > { %25289 = vmatpush3.bf16.msra.mxu1 %v25270_v37 }
 0x7fb   : > { %v7911_v12 = vand.u32 4294901760, %v7910_v34  ;;  %25296 = vmatprep.subr.bf16.mxu1 %v35428_v56  ;;  %v8399_v59 = vand.u32 4294901760, %v8398_v22 }
 0x7fd   : > { %23538 = vmatmul.mubr.f32.vlgmr.msra.gmra.mrb[24].mxu1 %v7909_v57  ;;  %23505 = vmatmul.mubr.f32.vlgmr.msra.gmra.mrb[22].mxu0 %v7911_v12 }
 0x7fe   : > { %25280 = vmatpush3.bf16.msra.mxu0 %v25279_v39  ;;  %25298 = vmatpush3.bf16.msra.mxu1 %v25267_v5 }
 0x7ff   : > { %25281 = vmatprep.subr.bf16.mxu0 %v35428_v56  ;;  %25299 = vmatprep.subr.bf16.mxu1 %v35428_v56 }
 0x800   : > { %23526 = vmatprep.mubr.msk.f32.mxu0 %vm27888_vm0, %v35406_v38  ;;  %23559 = vmatprep.mubr.msk.f32.mxu1 %vm27888_vm0, %v35406_v38 }
 0x802   : > { %25283 = vmatpush3.bf16.msra.mxu0 %v25282_v8  ;;  %25301 = vmatpush3.bf16.msra.mxu1 %v25270_v37 }
 0x803   : > { %25290 = vmatprep.subr.bf16.mxu0 %v35428_v56  ;;  %25308 = vmatprep.subr.bf16.mxu1 %v35428_v56 }
 0x805   : > { %23527 = vmatmul.mubr.f32.vlgmr.msra.gmra.mrb[24].mxu0 %v7908_v29  ;;  %23560 = vmatmul.mubr.f32.vlgmr.msra.gmra.mrb[26].mxu1 %v7907_v61 }
 0x806   : > { %25292 = vmatpush3.bf16.msra.mxu0 %v25291_v47  ;;  %25310 = vmatpush3.bf16.msra.mxu1 %v25309_v25 }
 0x807   : > { %25293 = vmatprep.subr.bf16.mxu0 %v35428_v56  ;;  %25311 = vmatprep.subr.bf16.mxu1 %v35428_v56 }
 0x808   : > { %23548 = vmatprep.mubr.msk.f32.mxu0 %vm27888_vm0, %v35406_v38  ;;  %23581 = vmatprep.mubr.msk.f32.mxu1 %vm27888_vm0, %v35406_v38 }
 0x80a   : > { %25295 = vmatpush3.bf16.msra.mxu0 %v25294_v7  ;;  %25313 = vmatpush3.bf16.msra.mxu1 %v25312_v19 }
 0x80b   : > { %25302 = vmatprep.subr.bf16.mxu0 %v35428_v56  ;;  %25320 = vmatprep.subr.bf16.mxu1 %v35428_v56 }
 0x80d   : > { %23549 = vmatmul.mubr.f32.vlgmr.msra.gmra.mrb[26].mxu0 %v7907_v61  ;;  %23582 = vmatmul.mubr.f32.vlgmr.msra.gmra.mrb[28].mxu1 %v8395_v54 }
 0x80e   : > { %25304 = vmatpush3.bf16.msra.mxu0 %v25303_v20  ;;  %25322 = vmatpush3.bf16.msra.mxu1 %v25303_v20 }
 0x80f   : > { %25305 = vmatprep.subr.bf16.mxu0 %v35428_v56  ;;  %25323 = vmatprep.subr.bf16.mxu1 %v35428_v56 }
 0x810   : > { %23570 = vmatprep.mubr.msk.f32.mxu0 %vm27888_vm0, %v35406_v38  ;;  %23603 = vmatprep.mubr.msk.f32.mxu1 %vm27888_vm0, %v35406_v38 }
 0x812   : > { %25307 = vmatpush3.bf16.msra.mxu0 %v25306_v33  ;;  %25325 = vmatpush3.bf16.msra.mxu1 %v25306_v33 }
 0x813   : > { %25314 = vmatprep.subr.bf16.mxu0 %v35428_v56  ;;  %25332 = vmatprep.subr.bf16.mxu1 %v35428_v56 }
 0x815   : > { %23571 = vmatmul.mubr.f32.vlgmr.msra.gmra.mrb[28].mxu0 %v8399_v59  ;;  %23604 = vmatmul.mubr.f32.vlgmr.msra.gmra.mrb[30].mxu1 %v8397_v28 }
 0x816   : > { %25316 = vmatpush3.bf16.msra.mxu0 %v25315_v36  ;;  %25334 = vmatpush3.bf16.msra.mxu1 %v25303_v20 }
 0x817   : > { %25317 = vmatprep.subr.bf16.mxu0 %v35428_v56  ;;  %25335 = vmatprep.subr.bf16.mxu1 %v35428_v56 }
 0x818   : > { %23592 = vmatprep.mubr.msk.f32.mxu0 %vm27888_vm0, %v35406_v38  ;;  %23625 = vmatprep.mubr.msk.f32.mxu1 %vm27888_vm0, %v35406_v38 }
 0x81a   : > { %25319 = vmatpush3.bf16.msra.mxu0 %v25318_v53  ;;  %25337 = vmatpush3.bf16.msra.mxu1 %v25306_v33 }
 0x81b   : > { %25326 = vmatprep.subr.bf16.mxu0 %v35428_v56 }
 0x81d   : > { %23593 = vmatmul.mubr.f32.vlgmr.msra.gmra.mrb[30].mxu0 %v8396_v21  ;;  %23626 = vmatmul.mubr.f32.vlgmr.msra.gmra.mrb[32].mxu1 %v8395_v54 }
 0x81e   : > { %25328 = vmatpush3.bf16.msra.mxu0 %v25327_v58  ;;  %23614 = vmatprep.mubr.msk.f32.mxu0 %vm27888_vm0, %v35406_v38 }
 0x81f   : > { %25329 = vmatprep.subr.bf16.mxu0 %v35428_v56 }
 0x822   : > { %25331 = vmatpush3.bf16.msra.mxu0 %v25330_v18 }
 0x823   : > { %25338 = vmatprep.subr.bf16.mxu0 %v35428_v56 }
 0x825   : > { %23615 = vmatmul.mubr.f32.vlgmr.msra.gmra.mrb[32].mxu0 %v8395_v54 }
 0x826   : > { %23660 = vmatprep.mubr.msk.f32.mxu0 %vm27888_vm0, %v35406_v38 }
 0x894   : > { %v7028_v35 = vpop.f32.mrb[10].mxu1 }
 0x895   : > { %v23385_v3 = vpop.f32.mrb[11].mxu1 }
 0x89c   : > { %v7185_v6 = vpop.f32.mrb[12].mxu1  ;;  %v6937_v30 = vpop.f32.mrb[10].mxu0 }
 0x89d   : > { %v7029_v24 = vadd.f32 %v7028_v35, %v6937_v30  ;;  %v23407_v15 = vpop.f32.mrb[13].mxu1  ;;  %v23374_v5 = vpop.f32.mrb[11].mxu0 }
 0x8a4   : > { %v7108_v17 = vpop.f32.mrb[12].mxu0  ;;  %v7343_v60 = vpop.f32.mrb[14].mxu1 }
 0x8a5   : > { %v7109_v2 = vadd.f32 %v7108_v17, %v7029_v24  ;;  %v23396_v4 = vpop.f32.mrb[13].mxu0  ;;  %v23429_v62 = vpop.f32.mrb[15].mxu1 }
 0x8a6   : > { %v30192_v4 = vld [vmem:[%s28525_s23] sm:$0xff] }
 0x8a7   : > { %v7186_v37 = vadd.f32 %v7185_v6, %v7109_v2 }
 0x8ac   : > { %v7268_v13 = vpop.f32.mrb[14].mxu0  ;;  %v7516_v42 = vpop.f32.mrb[16].mxu1 }
 0x8ad   : > { %v7269_v9 = vadd.f32 %v7268_v13, %v7186_v37  ;;  %v23418_v45 = vpop.f32.mrb[15].mxu0  ;;  %v23451_v48 = vpop.f32.mrb[17].mxu1 }
 0x8ae   : > { %v27368_v48 = vld [vmem:[#allocation2] sm:$0xff] }
 0x8af   : > { %v7344_v50 = vadd.f32 %v7343_v60, %v7269_v9 }
 0x8b4   : > { %v7425_v11 = vpop.f32.mrb[16].mxu0  ;;  %v7673_v61 = vpop.f32.mrb[18].mxu1 }
 0x8b5   : > { %v7517_v29 = vadd.f32 %v7516_v42, %v7425_v11  ;;  %v23440_v23 = vpop.f32.mrb[17].mxu0  ;;  %v23473_v26 = vpop.f32.mrb[19].mxu1  ;;  %v8817_v42 = vrot.slane %v30192_v4, %v29374_v40  ;;  %v9645_v11 = vld [vmem:[%s28533_s10] sm:$0xff] }
 0x8b6   : > { %v9678_v23 = vand.u32 4294901760, %v9645_v11 }
 0x8bc   : > { %v7596_v63 = vpop.f32.mrb[18].mxu0  ;;  %v7831_v49 = vpop.f32.mrb[20].mxu1 }
 0x8bd   : > { %v7597_v57 = vadd.f32 %v7596_v63, %v7517_v29  ;;  %v23462_v34 = vpop.f32.mrb[19].mxu0  ;;  %v23495_v39 = vpop.f32.mrb[21].mxu1  ;;  %v9647_v29 = vld [vmem:[%s28533_s10 + $0x10] sm:$0xff]  ;;  %v9648_v63 = vld [vmem:[%s28533_s10 + $0x18] sm:$0xff] }
 0x8be   : > { %v30207_v34 = vld [vmem:[%s28533_s10 + $0x28] sm:$0xff]  ;;  %v9687_v39 = vand.u32 4294901760, %v9648_v63 }
 0x8bf   : > { %v7674_v10 = vadd.f32 %v7673_v61, %v7597_v57  ;;  %v9646_v61 = vld [vmem:[%s28533_s10 + $0x8] sm:$0xff]  ;;  %v30204_v57 = vld [vmem:[%s28533_s10 + $0x20] sm:$0xff] }
 0x8c0   : > { %v9681_v26 = vand.u32 4294901760, %v9646_v61 }
 0x8c4   : > { %v7756_v46 = vpop.f32.mrb[20].mxu0 }
 0x8c5   : > { %v7757_v14 = vadd.f32 %v7756_v46, %v7674_v10  ;;  %v23484_v44 = vpop.f32.mrb[21].mxu0  ;;  %v30209_v10 = vpack.c.bf16 %v9681_v26, %v9678_v23  ;;  %v9690_v46 = vand.u32 4294901760, %v30204_v57 }
 0x8c7   : > { %v7832_v12 = vadd.f32 %v7831_v49, %v7757_v14  ;;  %v9684_v49 = vand.u32 4294901760, %v9647_v29  ;;  %v9693_v14 = vand.u32 4294901760, %v30207_v34  ;;  %25483 = vmatprep.subr.bf16.mxu1 %v30209_v10 }
 0x8c8   : > { %v8004_v8 = vpop.f32.mrb[22].mxu1  ;;  %25485 = vmatpush3.bf16.msra.mxu1 %v30209_v10 }
 0x8c9   : > { %v8811_v31 = vadd.f32 %v7832_v12, %v7344_v50  ;;  %v23517_v51 = vpop.f32.mrb[23].mxu1  ;;  %v30213_v44 = vpack.c.bf16 %v9687_v39, %v9684_v49  ;;  %v30216_v12 = vld [vmem:[%s28533_s10 + $0x30] sm:$0xff] }
 0x8cb   : > { %25487 = vmatprep.subr.bf16.mxu1 %v30213_v44 }
 0x8cc   : > { %25489 = vmatpush3.bf16.msra.mxu1 %v30213_v44 }
 0x8d0   : > { %v8161_v32 = vpop.f32.mrb[24].mxu1  ;;  %v7913_v43 = vpop.f32.mrb[22].mxu0 }
 0x8d1   : > { %v8005_v52 = vadd.f32 %v8004_v8, %v7913_v43  ;;  %v23539_v47 = vpop.f32.mrb[25].mxu1  ;;  %v23506_v25 = vpop.f32.mrb[23].mxu0  ;;  %v30219_v8 = vld [vmem:[%s28533_s10 + $0x38] sm:$0xff]  ;;  %v9696_v43 = vand.u32 4294901760, %v30216_v12 }
 0x8d2   : > { %v30238_v47 = vld [vmem:[%s28533_s10 + $0x40] sm:$0xff]  ;;  %v30241_v25 = vld [vmem:[%s28533_s10 + $0x48] sm:$0xff] }
 0x8d8   : > { %v8084_v41 = vpop.f32.mrb[24].mxu0  ;;  %v8319_v27 = vpop.f32.mrb[26].mxu1 }
 0x8d9   : > { %v8085_v54 = vadd.f32 %v8084_v41, %v8005_v52  ;;  %v23528_v7 = vpop.f32.mrb[25].mxu0  ;;  %v23561_v19 = vpop.f32.mrb[27].mxu1  ;;  %v9699_v52 = vand.u32 4294901760, %v30219_v8 }
 0x8da   : > { %v9702_v7 = vand.u32 4294901760, %v30238_v47  ;;  %v9705_v19 = vand.u32 4294901760, %v30241_v25 }
 0x8db   : > { %v8162_v21 = vadd.f32 %v8161_v32, %v8085_v54  ;;  %v30233_v32 = vpack.c.bf16 %v9693_v14, %v9690_v46  ;;  %v30253_v54 = vpack.c.bf16 %v9699_v52, %v9696_v43 }
 0x8dd   : > { %25491 = vmatprep.subr.bf16.mxu1 %v30233_v32 }
 0x8de   : > { %25493 = vmatpush3.bf16.msra.mxu1 %v30233_v32 }
 0x8df   : > { %25495 = vmatprep.subr.bf16.mxu1 %v30253_v54 }
 0x8e0   : > { %v8244_v20 = vpop.f32.mrb[26].mxu0  ;;  %v8492_v28 = vpop.f32.mrb[28].mxu1 }
 0x8e1   : > { %v8245_v33 = vadd.f32 %v8244_v20, %v8162_v21  ;;  %v23550_v22 = vpop.f32.mrb[27].mxu0  ;;  %v23583_v36 = vpop.f32.mrb[29].mxu1  ;;  %v30258_v21 = vld [vmem:[%s28533_s10 + $0x50] sm:$0xff]  ;;  %v30261_v20 = vld [vmem:[%s28533_s10 + $0x58] sm:$0xff] }
 0x8e2   : > { %v8842_v22 = vld [vmem:[%s28531_s7] sm:$0xff]  ;;  %v9708_v36 = vand.u32 4294901760, %v30258_v21  ;;  %25497 = vmatpush3.bf16.msra.mxu1 %v30253_v54 }
 0x8e3   : > { %v8320_v59 = vadd.f32 %v8319_v27, %v8245_v33  ;;  %v30267_v33 = vld [vmem:[%s28533_s10 + $0x60] sm:$0xff] }
 0x8e5   : > { %v8812_v53 = vadd.f32 %v8811_v31, %v8320_v59  ;;  %v1032_v31 = vld [vmem:[%s35469_s24] sm:$0xff]  ;;  %v9711_v59 = vand.u32 4294901760, %v30261_v20 }
 0x8e6   : > { %v30226_v51 = vand.u32 4294901760, %v1032_v31 }
 0x8e8   : > { %v8401_v58 = vpop.f32.mrb[28].mxu0  ;;  %v8649_v18 = vpop.f32.mrb[30].mxu1  ;;  %v30244_v41 = vsub.f32 %v1032_v31, %v30226_v51 }
 0x8e9   : > { %v8493_v35 = vadd.f32 %v8492_v28, %v8401_v58  ;;  %v23572_v3 = vpop.f32.mrb[29].mxu0  ;;  %v23605_v6 = vpop.f32.mrb[31].mxu1 }
 0x8ea   : > { %v34886_v27 = vand.u32 4294901760, %v30244_v41  ;;  %v8843_v3 = vld [vmem:[%s28531_s7 + $0x8] sm:$0xff]  ;;  %v30287_v6 = vpack.c.bf16 %v9705_v19, %v9702_v7 }
 0x8ec   : > { %v9761_v28 = vsub.f32 %v30244_v41, %v34886_v27  ;;  %25499 = vmatprep.subr.bf16.mxu1 %v30287_v6 }
 0x8ed   : > { %25501 = vmatpush3.bf16.msra.mxu1 %v30287_v6 }
 0x8ee   : > { %v9762_v58 = vand.u32 4294901760, %v9761_v28 }
 0x8f0   : > { %v8572_v30 = vpop.f32.mrb[30].mxu0  ;;  %v8807_v24 = vpop.f32.mrb[32].mxu1  ;;  %23870 = vmatprep.mubr.f32.mxu1 %v9762_v58 }
 0x8f1   : > { %v8573_v15 = vadd.f32 %v8572_v30, %v8493_v35  ;;  %v23594_v5 = vpop.f32.mrb[31].mxu0  ;;  %v23627_v17 = vpop.f32.mrb[33].mxu1  ;;  %v1033_v35 = vld [vmem:[%s35470_s14 + $0x8] sm:$0xff]  ;;  %v30289_v30 = vsub.f32 %v9646_v61, %v9681_v26 }
 0x8f2   : > { %v30293_v17 = vand.u32 4294901760, %v1033_v35 }
 0x8f3   : > { %v8650_v60 = vadd.f32 %v8649_v18, %v8573_v15  ;;  %v30276_v18 = vsub.f32 %v9645_v11, %v9678_v23  ;;  %v9714_v15 = vand.u32 4294901760, %v30267_v33 }
 0x8f4   : > { %v30324_v31 = vsub.f32 %v1033_v35, %v30293_v17 }
 0x8f8   : > { %v8732_v2 = vpop.f32.mrb[32].mxu0 }
 0x8f9   : > { %v8733_v62 = vadd.f32 %v8732_v2, %v8650_v60  ;;  %v23616_v37 = vpop.f32.mrb[33].mxu0  ;;  %v8862_v60 = vand.u32 4294901760, %v8843_v3  ;;  %v30300_v2 = vpack.c.bf16 %v9711_v59, %v9708_v36 }
 0x8fa   : > { %v30306_v37 = vld [vmem:[%s28533_s10 + $0x78] sm:$0xff] }
 0x8fb   : > { %v8808_v13 = vadd.f32 %v8807_v24, %v8733_v62  ;;  %v8859_v24 = vand.u32 4294901760, %v8842_v22  ;;  %v30303_v62 = vld [vmem:[%s28533_s10 + $0x70] sm:$0xff]  ;;  %v30319_v61 = vsub.f32 %v8843_v3, %v8862_v60  ;;  %v34887_v26 = vand.u32 4294901760, %v30306_v37  ;;  %25503 = vmatprep.subr.bf16.mxu1 %v30300_v2 }
 0x8fc   : > { %v9720_v23 = vand.u32 4294901760, %v30303_v62  ;;  %25505 = vmatpush3.bf16.msra.mxu1 %v30300_v2 }
 0x8fd   : > { %v8813_v9 = vadd.f32 %v8812_v53, %v8808_v13  ;;  %v30274_v53 = vld [vmem:[%s28533_s10 + $0x68] sm:$0xff]  ;;  %v34884_v13 = vand.u32 4294901760, %v30276_v18  ;;  %v30317_v11 = vpack.c.bf16 %v8862_v60, %v8859_v24 }
 0x8fe   : > { %v9717_v5 = vand.u32 4294901760, %v30274_v53 }
 0x8ff   : > { %v8818_v45 = vadd.f32 %v8817_v42, %v8813_v9  ;;  %v30309_v42 = vsub.f32 %v9647_v29, %v9684_v49  ;;  %v30311_v9 = vsub.f32 %v8842_v22, %v8859_v24  ;;  %35471 = vst [vmem:[#allocation54_spill] sm:$0xff] %v30317_v11  ;;  %25340 = vmatpush3.bf16.msra.mxu0 %v30317_v11 }
 0x900   : > { %v9782_v29 = vsub.f32 %v30276_v18, %v34884_v13  ;;  %v30335_v49 = vsub.f32 %v30204_v57, %v9690_v46  ;;  %25341 = vmatprep.subr.bf16.mxu0 %v35428_v56  ;;  %v30348_v28 = vpack.c.bf16 %v9717_v5, %v9714_v15 }
 0x901   : > { %v30196_v50 = vadd.f32 %v27368_v48, %v8818_v45  ;;  %v34881_v45 = vand.u32 4294901760, %v30289_v30  ;;  %v30315_v48 = vsub.f32 %v9648_v63, %v9687_v39  ;;  %v34882_v63 = vand.u32 4294901760, %v30309_v42 }
 0x902   : > { %v30340_v39 = vsub.f32 %v30207_v34, %v9693_v14  ;;  %v30358_v34 = vpack.c.bf16 %v34887_v26, %v9720_v23  ;;  %v34885_v14 = vand.u32 4294901760, %v30324_v31  ;;  %v9783_v22 = vand.u32 4294901760, %v9782_v29  ;;  %25507 = vmatprep.subr.bf16.mxu1 %v30348_v28 }
 0x903   : > { %8820 = vadd.xlane.f32.xlu0 %v30196_v50  ;;  %v9789_v57 = vsub.f32 %v30289_v30, %v34881_v45  ;;  %v34883_v46 = vand.u32 4294901760, %v30315_v48  ;;  %v9796_v58 = vsub.f32 %v30309_v42, %v34882_v63  ;;  %v34888_v35 = vand.u32 4294901760, %v30335_v49  ;;  %25509 = vmatpush3.bf16.msra.mxu1 %v30348_v28 }
 0x904   : > { %v34899_v3 = vand.u32 4294901760, %v30340_v39  ;;  %v30374_v45 = vsub.f32 %v30216_v12, %v9696_v43  ;;  %v30379_v29 = vsub.f32 %v30219_v8, %v9699_v52  ;;  %v9771_v63 = vsub.f32 %v30324_v31, %v34885_v14  ;;  %25511 = vmatprep.subr.bf16.mxu1 %v30358_v34 }
 0x905   : > { %v9790_v24 = vand.u32 4294901760, %v9789_v57  ;;  %v9803_v60 = vsub.f32 %v30315_v48, %v34883_v46  ;;  %v9797_v57 = vand.u32 4294901760, %v9796_v58  ;;  %v9810_v46 = vsub.f32 %v30335_v49, %v34888_v35 }
 0x906   : > { %v9817_v12 = vsub.f32 %v30340_v39, %v34899_v3  ;;  %v34896_v52 = vand.u32 4294901760, %v30374_v45  ;;  %v34895_v13 = vand.u32 4294901760, %v30379_v29  ;;  %v9772_v14 = vand.u32 4294901760, %v9771_v63  ;;  %v8850_v3 = vld [vmem:[%s28531_s7 + $0x40] sm:$0xff] }
 0x907   : > { %v25514_v43 = vpack.c.bf16 %v9790_v24, %v9783_v22  ;;  %v9804_v8 = vand.u32 4294901760, %v9803_v60  ;;  %25513 = vmatpush3.bf16.msra.mxu1 %v30358_v34  ;;  %v9811_v58 = vand.u32 4294901760, %v9810_v46 }
 0x908   : > { %v9818_v26 = vand.u32 4294901760, %v9817_v12  ;;  %v9824_v35 = vsub.f32 %v30374_v45, %v34896_v52  ;;  %v9831_v22 = vsub.f32 %v30379_v29, %v34895_v13 }
 0x909   : > { %25515 = vmatprep.subr.bf16.mxu1 %v25514_v43  ;;  %v25518_v27 = vpack.c.bf16 %v9804_v8, %v9797_v57 }
 0x90a   : > { %23871 = vmatmul.mubr.f32.vlgmr.msra.gmra.mrb[34].mxu1 %v9772_v14  ;;  %v25522_v63 = vpack.c.bf16 %v9818_v26, %v9811_v58  ;;  %v9825_v24 = vand.u32 4294901760, %v9824_v35  ;;  %v9832_v60 = vand.u32 4294901760, %v9831_v22  ;;  %v30410_v26 = vsub.f32 %v30238_v47, %v9702_v7 }
 0x90b   : > { %25517 = vmatpush3.bf16.msra.mxu1 %v25514_v43  ;;  %23905 = vmatprep.mubr.f32.mxu1 %v30226_v51  ;;  %v30428_v7 = vsub.f32 %v30258_v21, %v9708_v36  ;;  %v30451_v36 = vsub.f32 %v30274_v53, %v9717_v5  ;;  %v30463_v5 = vsub.f32 %v30303_v62, %v9720_v23 }
 0x90c   : > { %25519 = vmatprep.subr.bf16.mxu1 %v25518_v27  ;;  %v25526_v46 = vpack.c.bf16 %v9832_v60, %v9825_v24  ;;  %v34894_v35 = vand.u32 4294901760, %v30410_v26 }
 0x90d   : > { %v34892_v22 = vand.u32 4294901760, %v30428_v7  ;;  %v34898_v62 = vand.u32 4294901760, %v30463_v5 }
 0x90e   : > { %v9838_v43 = vsub.f32 %v30410_v26, %v34894_v35 }
 0x90f   : > { %25521 = vmatpush3.bf16.msra.mxu1 %v25518_v27  ;;  %v30415_v27 = vsub.f32 %v30241_v25, %v9705_v19  ;;  %v30433_v25 = vsub.f32 %v30261_v20, %v9711_v59  ;;  %v9852_v60 = vsub.f32 %v30428_v7, %v34892_v22  ;;  %v30446_v20 = vsub.f32 %v30267_v33, %v9714_v15  ;;  %v8844_v59 = vld [vmem:[%s28531_s7 + $0x10] sm:$0xff] }
 0x910   : > { %25523 = vmatprep.subr.bf16.mxu1 %v25522_v63  ;;  %v9839_v19 = vand.u32 4294901760, %v9838_v43  ;;  %v8865_v43 = vand.u32 4294901760, %v8844_v59  ;;  %v34890_v33 = vand.u32 4294901760, %v30451_v36 }
 0x912   : > { %v30505_v55 = vsub.f32 %v8844_v59, %v8865_v43  ;;  %v8857_v59 = vld [vmem:[%s28531_s7 + $0x78] sm:$0xff] }
 0x913   : > { %25525 = vmatpush3.bf16.msra.mxu1 %v25522_v63  ;;  %v34891_v63 = vand.u32 4294901760, %v30433_v25 }
 0x914   : > { %25527 = vmatprep.subr.bf16.mxu1 %v25526_v46 }
 0x915   : > { %v9859_v21 = vsub.f32 %v30433_v25, %v34891_v63 }
 0x917   : > { %25529 = vmatpush3.bf16.msra.mxu1 %v25526_v46  ;;  %v8845_v46 = vld [vmem:[%s28531_s7 + $0x18] sm:$0xff] }
 0x990   : > { %v8821_v57 = vpop.xlane.xlu0 %8820 }
 0x991   : > { %v8823_v12 = vmul.f32 0.0078125, %v8821_v57  ;;  %v9853_v57 = vand.u32 4294901760, %v9852_v60  ;;  %v9873_v60 = vsub.f32 %v30451_v36, %v34890_v33  ;;  %v9880_v33 = vsub.f32 %v30463_v5, %v34898_v62 }
 0x993   : > { %v30403_v8 = vsub.f32 %v30196_v50, %v8823_v12  ;;  %v34893_v50 = vand.u32 4294901760, %v30415_v27  ;;  %v9860_v12 = vand.u32 4294901760, %v9859_v21  ;;  %v8846_v21 = vld [vmem:[%s28531_s7 + $0x20] sm:$0xff]  ;;  %v9881_v35 = vand.u32 4294901760, %v9880_v33 }
 0x994   : > { %v8883_v33 = vand.u32 4294901760, %v8850_v3 }
 0x995   : > { %35472 = vst [vmem:[#allocation37_spill] sm:$0xff] %v30403_v8  ;;  %v8825_v14 = vmul.f32 %v30403_v8, %v30403_v8  ;;  %v9845_v47 = vsub.f32 %v30415_v27, %v34893_v50  ;;  %v25534_v15 = vpack.c.bf16 %v9860_v12, %v9853_v57  ;;  %v8847_v57 = vld [vmem:[%s28531_s7 + $0x28] sm:$0xff]  ;;  %v8848_v50 = vld [vmem:[%s28531_s7 + $0x30] sm:$0xff] }
 0x996   : > { %v30521_v38 = vsub.f32 %v8850_v3, %v8883_v33 }
 0x997   : > { %8826 = vadd.xlane.f32.xlu1 %v8825_v14  ;;  %v9846_v58 = vand.u32 4294901760, %v9845_v47  ;;  %v34889_v14 = vand.u32 4294901760, %v30446_v20  ;;  %v8868_v47 = vand.u32 4294901760, %v8845_v46 }
 0x999   : > { %v25530_v24 = vpack.c.bf16 %v9846_v58, %v9839_v19  ;;  %v9866_v53 = vsub.f32 %v30446_v20, %v34889_v14  ;;  %v35473_v19 = vand.u32 4294901760, %v30306_v37  ;;  %v9874_v14 = vand.u32 4294901760, %v9873_v60 }
 0x99a   : > { %v8877_v60 = vand.u32 4294901760, %v8848_v50  ;;  %v30507_v40 = vsub.f32 %v8845_v46, %v8868_v47 }
 0x99b   : > { %25531 = vmatprep.subr.bf16.mxu1 %v25530_v24  ;;  %v30468_v58 = vsub.f32 %v30306_v37, %v35473_v19  ;;  %v9867_v12 = vand.u32 4294901760, %v9866_v53  ;;  %v8871_v37 = vand.u32 4294901760, %v8846_v21  ;;  %v8874_v19 = vand.u32 4294901760, %v8847_v57 }
 0x99c   : > { %25533 = vmatpush3.bf16.msra.mxu1 %v25530_v24  ;;  %v30470_v24 = vpack.c.bf16 %v8868_v47, %v8865_v43  ;;  %v25550_v47 = vpack.c.bf16 %v30315_v48, %v30309_v42 }
 0x99d   : > { %25535 = vmatprep.subr.bf16.mxu1 %v25534_v15  ;;  %v34897_v23 = vand.u32 4294901760, %v30468_v58  ;;  %v30487_v63 = vpack.c.bf16 %v8874_v19, %v8871_v37  ;;  %v25538_v22 = vpack.c.bf16 %v9874_v14, %v9867_v12  ;;  %v8851_v14 = vld [vmem:[%s28531_s7 + $0x48] sm:$0xff]  ;;  %v30509_v16 = vsub.f32 %v8846_v21, %v8871_v37 }
 0x99e   : > { %35474 = vst [vmem:[#allocation38_spill] sm:$0xff] %v30470_v24  ;;  %25343 = vmatpush3.bf16.msra.mxu0 %v30470_v24  ;;  %v8886_v12 = vand.u32 4294901760, %v8851_v14  ;;  %v30511_v1 = vsub.f32 %v8847_v57, %v8874_v19  ;;  %v30517_v24 = vsub.f32 %v8848_v50, %v8877_v60  ;;  %v8904_v57 = vand.u32 4294901760, %v8857_v59 }
 0x99f   : > { %25344 = vmatprep.subr.bf16.mxu0 %v35428_v56  ;;  %v9887_v53 = vsub.f32 %v30468_v58, %v34897_v23  ;;  %35475 = vst [vmem:[#allocation39_spill] sm:$0xff] %v30487_v63 }
 0x9a0   : > { %25537 = vmatpush3.bf16.msra.mxu1 %v25534_v15  ;;  %v8849_v15 = vld [vmem:[%s28531_s7 + $0x38] sm:$0xff]  ;;  %v30523_v8 = vsub.f32 %v8851_v14, %v8886_v12 }
 0x9a1   : > { %v9888_v13 = vand.u32 4294901760, %v9887_v53  ;;  %25539 = vmatprep.subr.bf16.mxu1 %v25538_v22  ;;  %v8880_v52 = vand.u32 4294901760, %v8849_v15  ;;  %v25546_v53 = vpack.c.bf16 %v30289_v30, %v30276_v18 }
 0x9a2   : > { %25346 = vmatpush3.bf16.msra.mxu0 %v30487_v63  ;;  %v8856_v63 = vld [vmem:[%s28531_s7 + $0x70] sm:$0xff] }
 0x9a3   : > { %25347 = vmatprep.subr.bf16.mxu0 %v35428_v56  ;;  %v25542_v23 = vpack.c.bf16 %v9888_v13, %v9881_v35  ;;  %v30493_v62 = vpack.c.bf16 %v8880_v52, %v8877_v60  ;;  %v8852_v13 = vld [vmem:[%s28531_s7 + $0x50] sm:$0xff]  ;;  %v8853_v35 = vld [vmem:[%s28531_s7 + $0x58] sm:$0xff]  ;;  %v30519_v11 = vsub.f32 %v8849_v15, %v8880_v52  ;;  %v25554_v52 = vpack.c.bf16 %v30340_v39, %v30335_v49 }
 0x9a4   : > { %25541 = vmatpush3.bf16.msra.mxu1 %v25538_v22  ;;  %v30501_v22 = vpack.c.bf16 %v8886_v12, %v8883_v33  ;;  %v8889_v46 = vand.u32 4294901760, %v8852_v13  ;;  %v8892_v43 = vand.u32 4294901760, %v8853_v35  ;;  %v8901_v3 = vand.u32 4294901760, %v8856_v63 }
 0x9a5   : > { %35476 = vst [vmem:[#allocation40_spill] sm:$0xff] %v30493_v62  ;;  %25543 = vmatprep.subr.bf16.mxu1 %v25542_v23 }
 0x9a6   : > { %25349 = vmatpush3.bf16.msra.mxu0 %v30493_v62  ;;  %35477 = vst [vmem:[#allocation41_spill] sm:$0xff] %v30501_v22  ;;  %v8855_v62 = vld [vmem:[%s28531_s7 + $0x68] sm:$0xff]  ;;  %v30533_v37 = vpack.c.bf16 %v8892_v43, %v8889_v46  ;;  %v30535_v19 = vsub.f32 %v8852_v13, %v8889_v46  ;;  %v30537_v15 = vsub.f32 %v8853_v35, %v8892_v43  ;;  %v34919_v35 = vand.u32 4294901760, %v30311_v9 }
 0x9a7   : > { %25350 = vmatprep.subr.bf16.mxu0 %v35428_v56  ;;  %v8898_v50 = vand.u32 4294901760, %v8855_v62  ;;  %v30543_v33 = vsub.f32 %v8856_v63, %v8901_v3  ;;  %v25558_v13 = vpack.c.bf16 %v30379_v29, %v30374_v45  ;;  %v30556_v63 = vpack.c.bf16 %v8904_v57, %v8901_v3 }
 0x9a8   : > { %25545 = vmatpush3.bf16.msra.mxu1 %v25542_v23  ;;  %v8854_v23 = vld [vmem:[%s28531_s7 + $0x60] sm:$0xff]  ;;  %35478 = vst [vmem:[#allocation42_spill] sm:$0xff] %v30533_v37 }
 0x9a9   : > { %25547 = vmatprep.subr.bf16.mxu1 %v25546_v53  ;;  %v8895_v21 = vand.u32 4294901760, %v8854_v23  ;;  %v30541_v14 = vsub.f32 %v8855_v62, %v8898_v50  ;;  %v34918_v62 = vand.u32 4294901760, %v30319_v61  ;;  %35480 = vst [vmem:[#allocation44_spill] sm:$0xff] %v30556_v63 }
 0x9aa   : > { %25352 = vmatpush3.bf16.msra.mxu0 %v30501_v22 }
 0x9ab   : > { %25353 = vmatprep.subr.bf16.mxu0 %v35428_v56  ;;  %23906 = vmatmul.mubr.f32.vlgmr.msra.gmra.mrb[34].mxu1 %v30293_v17  ;;  %v30539_v60 = vsub.f32 %v8854_v23, %v8895_v21  ;;  %v30546_v12 = vpack.c.bf16 %v8898_v50, %v8895_v21  ;;  %v8953_v23 = vsub.f32 %v30311_v9, %v34919_v35  ;;  %v34921_v21 = vand.u32 4294901760, %v30507_v40 }
 0x9ac   : > { %25549 = vmatpush3.bf16.msra.mxu1 %v25546_v53  ;;  %23940 = vmatprep.mubr.f32.mxu1 %v30244_v41  ;;  %v30548_v53 = vsub.f32 %v8857_v59, %v8904_v57  ;;  %v8960_v59 = vsub.f32 %v30319_v61, %v34918_v62  ;;  %v25562_v50 = vpack.c.bf16 %v30415_v27, %v30410_v26  ;;  %v34924_v62 = vand.u32 4294901760, %v30509_v16 }
 0x9ad   : > { %25551 = vmatprep.subr.bf16.mxu1 %v25550_v47  ;;  %35479 = vst [vmem:[#allocation43_spill] sm:$0xff] %v30546_v12  ;;  %v8954_v46 = vand.u32 4294901760, %v8953_v23  ;;  %v34925_v35 = vand.u32 4294901760, %v30511_v1 }
 0x9ae   : > { %25355 = vmatpush3.bf16.msra.mxu0 %v30533_v37  ;;  %v8961_v43 = vand.u32 4294901760, %v8960_v59  ;;  %v34935_v37 = vand.u32 4294901760, %v30537_v15 }
 0x9af   : > { %25356 = vmatprep.subr.bf16.mxu0 %v35428_v56 }
 0x9b0   : > { %25553 = vmatpush3.bf16.msra.mxu1 %v25550_v47  ;;  %v34920_v47 = vand.u32 4294901760, %v30505_v55  ;;  %v30570_v3 = vpack.c.bf16 %v8961_v43, %v8954_v46  ;;  %v25566_v46 = vpack.c.bf16 %v30433_v25, %v30428_v7 }
 0x9b1   : > { %25555 = vmatprep.subr.bf16.mxu1 %v25554_v52 }
 0x9b2   : > { %25358 = vmatpush3.bf16.msra.mxu0 %v30546_v12  ;;  %v8967_v57 = vsub.f32 %v30505_v55, %v34920_v47  ;;  %v8981_v47 = vsub.f32 %v30509_v16, %v34924_v62  ;;  %v34934_v12 = vand.u32 4294901760, %v30523_v8 }
 0x9b3   : > { %25359 = vmatprep.subr.bf16.mxu0 %v35428_v56 }
 0x9b4   : > { %25557 = vmatpush3.bf16.msra.mxu1 %v25554_v52  ;;  %v8974_v52 = vsub.f32 %v30507_v40, %v34921_v21  ;;  %v8968_v23 = vand.u32 4294901760, %v8967_v57  ;;  %v8982_v57 = vand.u32 4294901760, %v8981_v47  ;;  %v34928_v21 = vand.u32 4294901760, %v30517_v24 }
 0x9b5   : > { %25559 = vmatprep.subr.bf16.mxu1 %v25558_v13 }
 0x9b6   : > { %25361 = vmatpush3.bf16.msra.mxu0 %v30556_v63  ;;  %v8975_v59 = vand.u32 4294901760, %v8974_v52  ;;  %v34929_v63 = vand.u32 4294901760, %v30519_v11  ;;  %v8995_v62 = vsub.f32 %v30517_v24, %v34928_v21 }
 0x9b7   : > { %25362 = vmatprep.subr.bf16.mxu0 %v35428_v56 }
 0x9b8   : > { %25561 = vmatpush3.bf16.msra.mxu1 %v25558_v13  ;;  %v30583_v43 = vpack.c.bf16 %v8975_v59, %v8968_v23  ;;  %v8988_v13 = vsub.f32 %v30511_v1, %v34925_v35  ;;  %v25570_v23 = vpack.c.bf16 %v30451_v36, %v30446_v20  ;;  %v8996_v47 = vand.u32 4294901760, %v8995_v62 }
 0x9b9   : > { %25563 = vmatprep.subr.bf16.mxu1 %v25562_v50  ;;  %v34941_v35 = vand.u32 4294901760, %v30521_v38 }
 0x9ba   : > { %v8989_v52 = vand.u32 4294901760, %v8988_v13 }
 0x9bb   : > { %v9009_v21 = vsub.f32 %v30521_v38, %v34941_v35  ;;  %v35484_v35 = vand.u32 4294901760, %v30309_v42  ;;  %v25408_v42 = vpack.c.bf16 %v30548_v53, %v30543_v33 }
 0x9bc   : > { %25565 = vmatpush3.bf16.msra.mxu1 %v25562_v50  ;;  %v30595_v59 = vpack.c.bf16 %v8989_v52, %v8982_v57  ;;  %v9002_v50 = vsub.f32 %v30519_v11, %v34929_v63  ;;  %v25574_v57 = vpack.c.bf16 %v30468_v58, %v30463_v5  ;;  %v34936_v63 = vand.u32 4294901760, %v30535_v19 }
 0x9bd   : > { %25567 = vmatprep.subr.bf16.mxu1 %v25566_v46  ;;  %v9010_v62 = vand.u32 4294901760, %v9009_v21 }
 0x9be   : > { %v9003_v13 = vand.u32 4294901760, %v9002_v50 }
 0x9c0   : > { %25569 = vmatpush3.bf16.msra.mxu1 %v25566_v46  ;;  %v30607_v52 = vpack.c.bf16 %v9003_v13, %v8996_v47  ;;  %v9016_v46 = vsub.f32 %v30523_v8, %v34934_v12  ;;  %v9023_v47 = vsub.f32 %v30535_v19, %v34936_v63  ;;  %v9030_v13 = vsub.f32 %v30537_v15, %v34935_v37 }
 0x9c1   : > { %25571 = vmatprep.subr.bf16.mxu1 %v25570_v23  ;;  %v34938_v12 = vand.u32 4294901760, %v30541_v14 }
 0x9c2   : > { %v9017_v50 = vand.u32 4294901760, %v9016_v46  ;;  %v9031_v21 = vand.u32 4294901760, %v9030_v13  ;;  %v34937_v46 = vand.u32 4294901760, %v30539_v60 }
 0x9c4   : > { %25573 = vmatpush3.bf16.msra.mxu1 %v25570_v23  ;;  %v30617_v22 = vpack.c.bf16 %v9017_v50, %v9010_v62  ;;  %v9024_v23 = vand.u32 4294901760, %v9023_v47  ;;  %v9037_v50 = vsub.f32 %v30539_v60, %v34937_v46  ;;  %v35481_v47 = vand.u32 4294901760, %v30244_v41 }
 0x9c5   : > { %25575 = vmatprep.subr.bf16.mxu1 %v25574_v57 }
 0x9c6   : > { %v30629_v62 = vpack.c.bf16 %v9031_v21, %v9024_v23  ;;  %v9038_v13 = vand.u32 4294901760, %v9037_v50  ;;  %v34940_v23 = vand.u32 4294901760, %v30543_v33  ;;  %v34939_v21 = vand.u32 4294901760, %v30548_v53 }
 0x9c8   : > { %25577 = vmatpush3.bf16.msra.mxu1 %v25574_v57  ;;  %v9044_v57 = vsub.f32 %v30541_v14, %v34938_v12  ;;  %v9051_v46 = vsub.f32 %v30543_v33, %v34940_v23  ;;  %v9058_v12 = vsub.f32 %v30548_v53, %v34939_v21  ;;  %v25402_v23 = vpack.c.bf16 %v30537_v15, %v30535_v19 }
 0x9c9   : > { %25579 = vmatprep.subr.bf16.mxu1 %v30209_v10 }
 0x9ca   : > { %v9045_v37 = vand.u32 4294901760, %v9044_v57  ;;  %v9052_v41 = vand.u32 4294901760, %v9051_v46  ;;  %v9059_v50 = vand.u32 4294901760, %v9058_v12  ;;  %v35485_v12 = vand.u32 4294901760, %v30315_v48 }
 0x9cb   : > { %23941 = vmatmul.mubr.f32.vlgmr.msra.gmra.mrb[34].mxu1 %v30324_v31  ;;  %v35486_v46 = vand.u32 4294901760, %v30324_v31  ;;  %v35489_v48 = vand.u32 4294901760, %v30374_v45  ;;  %v35490_v31 = vand.u32 4294901760, %v30379_v29  ;;  %v35495_v45 = vand.u32 4294901760, %v30446_v20 }
 0x9cc   : > { %25581 = vmatpush3.bf16.msra.mxu1 %v30209_v10  ;;  %23975 = vmatprep.mubr.f32.mxu1 %v35481_v47  ;;  %v30643_v63 = vpack.c.bf16 %v9045_v37, %v9038_v13  ;;  %v30653_v57 = vpack.c.bf16 %v9059_v50, %v9052_v41  ;;  %v25387_v37 = vpack.c.bf16 %v30319_v61, %v30311_v9  ;;  %v35482_v41 = vand.u32 4294901760, %v30276_v18 }
 0x9cd   : > { %25583 = vmatprep.subr.bf16.mxu1 %v30213_v44  ;;  %v25390_v47 = vpack.c.bf16 %v30507_v40, %v30505_v55  ;;  %v35483_v50 = vand.u32 4294901760, %v30289_v30  ;;  %v25614_v13 = vpack.c.bf16 %v35485_v12, %v35484_v35  ;;  %v25405_v18 = vpack.c.bf16 %v30541_v14, %v30539_v60 }
 0x9ce   : > { %v35487_v30 = vand.u32 4294901760, %v30335_v49  ;;  %v25622_v35 = vpack.c.bf16 %v35490_v31, %v35489_v48  ;;  %v35494_v12 = vand.u32 4294901760, %v30433_v25  ;;  %v35496_v29 = vand.u32 4294901760, %v30451_v36 }
 0x9cf   : > { %v25610_v21 = vpack.c.bf16 %v35483_v50, %v35482_v41  ;;  %v35488_v41 = vand.u32 4294901760, %v30340_v39  ;;  %v35493_v39 = vand.u32 4294901760, %v30428_v7 }
 0x9d0   : > { %25585 = vmatpush3.bf16.msra.mxu1 %v30213_v44 }
 0x9d1   : > { %25587 = vmatprep.subr.bf16.mxu1 %v30233_v32  ;;  %v25618_v50 = vpack.c.bf16 %v35488_v41, %v35487_v30  ;;  %v25634_v30 = vpack.c.bf16 %v35496_v29, %v35495_v45 }
 0x9d4   : > { %25589 = vmatpush3.bf16.msra.mxu1 %v30233_v32 }
 0x9d5   : > { %25591 = vmatprep.subr.bf16.mxu1 %v30253_v54 }
 0x9d8   : > { %25593 = vmatpush3.bf16.msra.mxu1 %v30253_v54 }
 0x9d9   : > { %25595 = vmatprep.subr.bf16.mxu1 %v30287_v6 }
 0x9dc   : > { %25597 = vmatpush3.bf16.msra.mxu1 %v30287_v6 }
 0x9dd   : > { %25599 = vmatprep.subr.bf16.mxu1 %v30300_v2 }
 0x9e0   : > { %25601 = vmatpush3.bf16.msra.mxu1 %v30300_v2 }
 0x9e1   : > { %25603 = vmatprep.subr.bf16.mxu1 %v30348_v28 }
 0x9e4   : > { %25605 = vmatpush3.bf16.msra.mxu1 %v30348_v28 }
 0x9e5   : > { %25607 = vmatprep.subr.bf16.mxu1 %v30358_v34 }
 0x9e8   : > { %25609 = vmatpush3.bf16.msra.mxu1 %v30358_v34 }
 0x9e9   : > { %25611 = vmatprep.subr.bf16.mxu1 %v25610_v21 }
 0x9eb   : > { %23976 = vmatmul.mubr.f32.vlgmr.msra.gmra.mrb[34].mxu1 %v35486_v46  ;;  %v35492_v46 = vand.u32 4294901760, %v30415_v27  ;;  %v35498_v27 = vand.u32 4294901760, %v30468_v58 }
 0x9ec   : > { %25613 = vmatpush3.bf16.msra.mxu1 %v25610_v21  ;;  %24010 = vmatprep.mubr.f32.mxu1 %v30226_v51  ;;  %v35491_v21 = vand.u32 4294901760, %v30410_v26  ;;  %v35497_v26 = vand.u32 4294901760, %v30463_v5 }
 0x9ed   : > { %25615 = vmatprep.subr.bf16.mxu1 %v25614_v13 }
 0x9ee   : > { %v25626_v49 = vpack.c.bf16 %v35492_v46, %v35491_v21  ;;  %v25638_v41 = vpack.c.bf16 %v35498_v27, %v35497_v26  ;;  %v9663_v26 = vld [vmem:[%s28533_s10 + $0x90] sm:$0xff]  ;;  %v9664_v27 = vld [vmem:[%s28533_s10 + $0x98] sm:$0xff] }
 0x9f0   : > { %25617 = vmatpush3.bf16.msra.mxu1 %v25614_v13  ;;  %v25630_v13 = vpack.c.bf16 %v35494_v12, %v35493_v39  ;;  %v35520_v39 = vand.u32 4294901760, %v30521_v38  ;;  %v35521_v12 = vand.u32 4294901760, %v30523_v8 }
 0x9f1   : > { %25619 = vmatprep.subr.bf16.mxu1 %v25618_v50 }
 0x9f4   : > { %25621 = vmatpush3.bf16.msra.mxu1 %v25618_v50  ;;  %v35500_v50 = vmov 0.0  }
 0x9f5   : > { %25623 = vmatprep.subr.bf16.mxu1 %v25622_v35 }
 0x9f8   : > { %25625 = vmatpush3.bf16.msra.mxu1 %v25622_v35  ;;  %v35515_v35 = vand.u32 4294901760, %v30507_v40 }
 0x9f9   : > { %25627 = vmatprep.subr.bf16.mxu1 %v25626_v49 }
 0x9fc   : > { %25629 = vmatpush3.bf16.msra.mxu1 %v25626_v49  ;;  %v35518_v49 = vand.u32 4294901760, %v30517_v24 }
 0x9fd   : > { %25631 = vmatprep.subr.bf16.mxu1 %v25630_v13 }
 0xa00   : > { %25633 = vmatpush3.bf16.msra.mxu1 %v25630_v13  ;;  %v25447_v13 = vpack.c.bf16 %v35521_v12, %v35520_v39  ;;  %v30978_v39 = vld [vmem:[%s28533_s10 + $0xf0] sm:$0xff]  ;;  %v30981_v12 = vld [vmem:[%s28533_s10 + $0xf8] sm:$0xff] }
 0xa01   : > { %25635 = vmatprep.subr.bf16.mxu1 %v25634_v30 }
 0xa04   : > { %25637 = vmatpush3.bf16.msra.mxu1 %v25634_v30 }
 0xa05   : > { %25639 = vmatprep.subr.bf16.mxu1 %v25638_v41 }
 0xa08   : > { %25641 = vmatpush3.bf16.msra.mxu1 %v25638_v41  ;;  %v10368_v41 = vand.u32 4294901760, %v9663_v26 }
 0xa09   : > { %25643 = vmatprep.subr.bf16.mxu1 %v30209_v10 }
 0xa0b   : > { %24011 = vmatmul.mubr.f32.vlgmr.msra.gmra.mrb[34].mxu1 %v30293_v17 }
 0xa0c   : > { %25645 = vmatpush3.bf16.msra.mxu1 %v30209_v10  ;;  %24045 = vmatprep.mubr.f32.mxu1 %v30226_v51  ;;  %v34942_v10 = vsub.s32 3, %v29354_v0 }
 0xa0d   : > { %25647 = vmatprep.subr.bf16.mxu1 %v30213_v44 }
 0xa0e   : > { %v8835_v51 = vrot.slane %v30192_v4, %v34942_v10 }
 0xa10   : > { %25649 = vmatpush3.bf16.msra.mxu1 %v30213_v44  ;;  %v8839_v44 = vsub.s32 4, %v29354_v0 }
 0xa11   : > { %25651 = vmatprep.subr.bf16.mxu1 %v30233_v32 }
 0xa14   : > { %25653 = vmatpush3.bf16.msra.mxu1 %v30233_v32 }
 0xa15   : > { %25655 = vmatprep.subr.bf16.mxu1 %v30253_v54 }
 0xa18   : > { %25657 = vmatpush3.bf16.msra.mxu1 %v30253_v54  ;;  %v8840_v54 = vrot.slane %v30192_v4, %v8839_v44  ;;  %v9665_v44 = vld [vmem:[%s28533_s10 + $0xa0] sm:$0xff] }
 0xa19   : > { %25659 = vmatprep.subr.bf16.mxu1 %v30287_v6 }
 0xa1c   : > { %25661 = vmatpush3.bf16.msra.mxu1 %v30287_v6  ;;  %v35499_v6 = vld [vmem:[#allocation37_spill] sm:$0xff] }
 0xa1d   : > { %25663 = vmatprep.subr.bf16.mxu1 %v30300_v2 }
 0xa20   : > { %25665 = vmatpush3.bf16.msra.mxu1 %v30300_v2 }
 0xa21   : > { %25667 = vmatprep.subr.bf16.mxu1 %v30348_v28 }
 0xa24   : > { %v8827_v7 = vpop.xlane.xlu1 %8826  ;;  %25669 = vmatpush3.bf16.msra.mxu1 %v30348_v28 }
 0xa25   : > { %v8828_v25 = vmul.f32 0.0078125, %v8827_v7  ;;  %25671 = vmatprep.subr.bf16.mxu1 %v30358_v34  ;;  %v10371_v7 = vand.u32 4294901760, %v9664_v27 }
 0xa27   : > { %v8829_v20 = vadd.f32 1e-05, %v8828_v25 }
 0xa28   : > { %25673 = vmatpush3.bf16.msra.mxu1 %v30358_v34  ;;  %v35502_v34 = vpack.c.bf16 %v30519_v11, %v30517_v24  ;;  %v35525_v24 = vand.u32 4294901760, %v30541_v14  ;;  %v9662_v14 = vld [vmem:[%s28533_s10 + $0x88] sm:$0xff] }
 0xa29   : > { %27338 = vrsqrt.f32 %v8829_v20  ;;  %25866 = vmatprep.subr.bf16.mxu1 %v35428_v56  ;;  %v30895_v20 = vpack.c.bf16 %v10371_v7, %v10368_v41 }
 0xa2b   : > { %24046 = vmatmul.mubr.f32.vlgmr.msra.gmra.mrb[34].mxu1 %v30293_v17  ;;  %v35501_v17 = vpack.c.bf16 %v30511_v1, %v30509_v16 }
 0xa2c   : > { %24262 = vmatprep.mubr.msk.f32.mxu1 %vm27888_vm0, %v35500_v50 }
 0xa33   : > { %v27339_v32 = vpop.eup %27338 }
 0xa34   : > { %v8831_v36 = vmul.f32 %v27339_v32, %v35499_v6  ;;  %v10374_v32 = vand.u32 4294901760, %v9665_v44 }
 0xa36   : > { %v8836_v5 = vmul.f32 %v8835_v51, %v8831_v36  ;;  %v9666_v51 = vld [vmem:[%s28533_s10 + $0xa8] sm:$0xff]  ;;  %v30905_v36 = vld [vmem:[%s28533_s10 + $0xb0] sm:$0xff] }
 0xa38   : > { %v30742_v2 = vadd.f32 %v8840_v54, %v8836_v5  ;;  %v10377_v54 = vand.u32 4294901760, %v9666_v51  ;;  %v30908_v5 = vld [vmem:[%s28533_s10 + $0xb8] sm:$0xff] }
 0xa3a   : > { %v30746_v58 = vand.u32 4294901760, %v30742_v2  ;;  %v30902_v6 = vpack.c.bf16 %v10377_v54, %v10374_v32 }
 0xa3c   : > { %v8940_v4 = vsub.f32 %v30742_v2, %v30746_v58 }
 0xa3e   : > { %v8941_v28 = vand.u32 4294901760, %v8940_v4 }
 0xa40   : > { %v8942_v48 = vsub.f32 %v8940_v4, %v8941_v28 }
 0xa42   : > { %v8943_v31 = vand.u32 4294901760, %v8942_v48  ;;  %v30916_v48 = vld [vmem:[%s28533_s10 + $0xc8] sm:$0xff] }
 0xa44   : > { %23661 = vmatmul.mubr.f32.vlgmr.msra.gmra.mrb[34].mxu0 %v8943_v31 }
 0xa45   : > { %25364 = vmatpush3.bf16.msra.mxu0 %v30570_v3  ;;  %23695 = vmatprep.mubr.msk.f32.mxu0 %vm27888_vm0, %v35500_v50  ;;  %v35505_v3 = vld [vmem:[#allocation38_spill] sm:$0xff] }
 0xa46   : > { %25365 = vmatprep.subr.bf16.mxu0 %v35428_v56 }
 0xa49   : > { %25367 = vmatpush3.bf16.msra.mxu0 %v30583_v43  ;;  %v35506_v43 = vld [vmem:[#allocation39_spill] sm:$0xff] }
 0xa4a   : > { %25368 = vmatprep.subr.bf16.mxu0 %v35428_v56 }
 0xa4d   : > { %25370 = vmatpush3.bf16.msra.mxu0 %v30595_v59  ;;  %v35507_v59 = vld [vmem:[#allocation40_spill] sm:$0xff] }
 0xa4e   : > { %25371 = vmatprep.subr.bf16.mxu0 %v35428_v56 }
 0xa51   : > { %25373 = vmatpush3.bf16.msra.mxu0 %v30607_v52  ;;  %v35508_v52 = vld [vmem:[#allocation41_spill] sm:$0xff] }
 0xa52   : > { %25374 = vmatprep.subr.bf16.mxu0 %v35428_v56 }
 0xa55   : > { %25376 = vmatpush3.bf16.msra.mxu0 %v30617_v22  ;;  %v35503_v22 = vpack.c.bf16 %v30523_v8, %v30521_v38  ;;  %v35526_v38 = vand.u32 4294901760, %v30543_v33  ;;  %v35527_v8 = vand.u32 4294901760, %v30548_v53  ;;  %v10365_v53 = vand.u32 4294901760, %v9662_v14 }
 0xa56   : > { %25377 = vmatprep.subr.bf16.mxu0 %v35428_v56 }
 0xa57   : > { %v25456_v30 = vpack.c.bf16 %v35527_v8, %v35526_v38  ;;  %v10407_v38 = vand.u32 4294901760, %v30981_v12 }
 0xa59   : > { %25379 = vmatpush3.bf16.msra.mxu0 %v30629_v62  ;;  %v35509_v62 = vld [vmem:[#allocation42_spill] sm:$0xff] }
 0xa5a   : > { %25380 = vmatprep.subr.bf16.mxu0 %v35428_v56 }
 0xa5d   : > { %25382 = vmatpush3.bf16.msra.mxu0 %v30643_v63  ;;  %v35504_v63 = vld [vmem:[#allocation54_spill] sm:$0xff] }
 0xa5e   : > { %25383 = vmatprep.subr.bf16.mxu0 %v35428_v56 }
 0xa61   : > { %25385 = vmatpush3.bf16.msra.mxu0 %v30653_v57  ;;  %v35511_v57 = vld [vmem:[#allocation44_spill] sm:$0xff] }
 0xa62   : > { %25386 = vmatprep.subr.bf16.mxu0 %v35428_v56 }
 0xa64   : > { %23696 = vmatmul.mubr.f32.vlgmr.msra.gmra.mrb[34].mxu0 %v30746_v58 }
 0xa65   : > { %25388 = vmatpush3.bf16.msra.mxu0 %v25387_v37  ;;  %23730 = vmatprep.mubr.msk.f32.mxu0 %vm27888_vm0, %v35500_v50  ;;  %v35512_v37 = vand.u32 4294901760, %v30311_v9  ;;  %v35516_v9 = vand.u32 4294901760, %v30509_v16  ;;  %v35522_v16 = vand.u32 4294901760, %v30535_v19 }
 0xa66   : > { %25389 = vmatprep.subr.bf16.mxu0 %v35428_v56 }
 0xa69   : > { %25391 = vmatpush3.bf16.msra.mxu0 %v25390_v47  ;;  %v35513_v47 = vand.u32 4294901760, %v30319_v61  ;;  %v35517_v61 = vand.u32 4294901760, %v30511_v1  ;;  %v35523_v1 = vand.u32 4294901760, %v30537_v15 }
 0xa6a   : > { %25392 = vmatprep.subr.bf16.mxu0 %v35428_v56 }
 0xa6b   : > { %v25441_v46 = vpack.c.bf16 %v35517_v61, %v35516_v9  ;;  %v25450_v45 = vpack.c.bf16 %v35523_v1, %v35522_v16 }
 0xa6d   : > { %25394 = vmatpush3.bf16.msra.mxu0 %v35501_v17 }
 0xa6e   : > { %25395 = vmatprep.subr.bf16.mxu0 %v35428_v56 }
 0xa71   : > { %25397 = vmatpush3.bf16.msra.mxu0 %v35502_v34  ;;  %v10389_v34 = vand.u32 4294901760, %v30916_v48 }
 0xa72   : > { %25398 = vmatprep.subr.bf16.mxu0 %v35428_v56 }
 0xa75   : > { %25400 = vmatpush3.bf16.msra.mxu0 %v35503_v22  ;;  %v1034_v22 = vld [vmem:[%s35470_s14 + $0x10] sm:$0xff] }
 0xa76   : > { %25401 = vmatprep.subr.bf16.mxu0 %v35428_v56 }
 0xa79   : > { %25403 = vmatpush3.bf16.msra.mxu0 %v25402_v23  ;;  %v35510_v23 = vld [vmem:[#allocation43_spill] sm:$0xff] }
 0xa7a   : > { %25404 = vmatprep.subr.bf16.mxu0 %v35428_v56 }
 0xa7d   : > { %25406 = vmatpush3.bf16.msra.mxu0 %v25405_v18  ;;  %v25435_v18 = vpack.c.bf16 %v35513_v47, %v35512_v37  ;;  %v30954_v47 = vld [vmem:[%s28533_s10 + $0xe0] sm:$0xff] }
 0xa7e   : > { %25407 = vmatprep.subr.bf16.mxu0 %v35428_v56  ;;  %v10398_v9 = vand.u32 4294901760, %v30954_v47 }
 0xa81   : > { %25409 = vmatpush3.bf16.msra.mxu0 %v25408_v42  ;;  %v35514_v42 = vand.u32 4294901760, %v30505_v55  ;;  %v35519_v55 = vand.u32 4294901760, %v30519_v11  ;;  %v35524_v11 = vand.u32 4294901760, %v30539_v60  ;;  %v9661_v60 = vld [vmem:[%s28533_s10 + $0x80] sm:$0xff] }
 0xa82   : > { %25410 = vmatprep.subr.bf16.mxu0 %v35428_v56  ;;  %v10362_v33 = vand.u32 4294901760, %v9661_v60 }
 0xa83   : > { %v25438_v21 = vpack.c.bf16 %v35515_v35, %v35514_v42  ;;  %v25444_v40 = vpack.c.bf16 %v35519_v55, %v35518_v49  ;;  %v25453_v29 = vpack.c.bf16 %v35525_v24, %v35524_v11  ;;  %v30959_v42 = vld [vmem:[%s28533_s10 + $0xe8] sm:$0xff]  ;;  %v30971_v49 = vsub.f32 %v9664_v27, %v10371_v7 }
 0xa84   : > { %23731 = vmatmul.mubr.f32.vlgmr.msra.gmra.mrb[34].mxu0 %v8940_v4  ;;  %v30893_v25 = vpack.c.bf16 %v10365_v53, %v10362_v33  ;;  %v10380_v4 = vand.u32 4294901760, %v30905_v36  ;;  %v30988_v11 = vsub.f32 %v9665_v44, %v10374_v32  ;;  %v30990_v24 = vsub.f32 %v9666_v51, %v10377_v54 }
 0xa85   : > { %25412 = vmatpush3.bf16.msra.mxu0 %v35504_v63  ;;  %23765 = vmatprep.mubr.msk.f32.mxu0 %vm27888_vm0, %v35500_v50 }
 0xa86   : > { %25413 = vmatprep.subr.bf16.mxu0 %v35428_v56  ;;  %v34943_v44 = vand.u32 4294901760, %v30990_v24  ;;  %v31024_v54 = vsub.f32 %v30905_v36, %v10380_v4 }
 0xa88   : > { %v10501_v36 = vsub.f32 %v30990_v24, %v34943_v44 }
 0xa89   : > { %25415 = vmatpush3.bf16.msra.mxu0 %v35505_v3 }
 0xa8a   : > { %25416 = vmatprep.subr.bf16.mxu0 %v35428_v56 }
 0xa8d   : > { %25418 = vmatpush3.bf16.msra.mxu0 %v35506_v43 }
 0xa8e   : > { %25419 = vmatprep.subr.bf16.mxu0 %v35428_v56 }
 0xa91   : > { %25421 = vmatpush3.bf16.msra.mxu0 %v35507_v59 }
 0xa92   : > { %25422 = vmatprep.subr.bf16.mxu0 %v35428_v56 }
 0xa95   : > { %25424 = vmatpush3.bf16.msra.mxu0 %v35508_v52 }
 0xa96   : > { %25425 = vmatprep.subr.bf16.mxu0 %v35428_v56 }
 0xa99   : > { %25427 = vmatpush3.bf16.msra.mxu0 %v35509_v62 }
 0xa9a   : > { %25428 = vmatprep.subr.bf16.mxu0 %v35428_v56 }
 0xa9d   : > { %25430 = vmatpush3.bf16.msra.mxu0 %v35510_v23 }
 0xa9e   : > { %25431 = vmatprep.subr.bf16.mxu0 %v35428_v56 }
 0xaa1   : > { %25433 = vmatpush3.bf16.msra.mxu0 %v35511_v57 }
 0xaa2   : > { %25434 = vmatprep.subr.bf16.mxu0 %v35428_v56 }
 0xaa4   : > { %23766 = vmatmul.mubr.f32.vlgmr.msra.gmra.mrb[34].mxu0 %v8941_v28  ;;  %v10383_v28 = vand.u32 4294901760, %v30908_v5 }
 0xaa5   : > { %25436 = vmatpush3.bf16.msra.mxu0 %v25435_v18  ;;  %23800 = vmatprep.mubr.msk.f32.mxu0 %vm27888_vm0, %v35500_v50  ;;  %v30956_v18 = vsub.f32 %v9662_v14, %v10365_v53 }
 0xaa6   : > { %25437 = vmatprep.subr.bf16.mxu0 %v35428_v56  ;;  %v30920_v31 = vpack.c.bf16 %v10383_v28, %v10380_v4 }
 0xaa7   : > { %v10472_v16 = vand.u32 4294901760, %v30956_v18 }
 0xaa9   : > { %25439 = vmatpush3.bf16.msra.mxu0 %v25438_v21 }
 0xaaa   : > { %25440 = vmatprep.subr.bf16.mxu0 %v35428_v56 }
 0xaad   : > { %25442 = vmatpush3.bf16.msra.mxu0 %v25441_v46  ;;  %v30969_v46 = vsub.f32 %v9663_v26, %v10368_v41  ;;  %v10493_v26 = vand.u32 4294901760, %v30988_v11 }
 0xaae   : > { %25443 = vmatprep.subr.bf16.mxu0 %v35428_v56 }
 0xaaf   : > { %v10479_v8 = vand.u32 4294901760, %v30969_v46 }
 0xab1   : > { %25445 = vmatpush3.bf16.msra.mxu0 %v25444_v40  ;;  %v10401_v40 = vand.u32 4294901760, %v30959_v42  ;;  %v10480_v41 = vsub.f32 %v30969_v46, %v10479_v8 }
 0xab2   : > { %25446 = vmatprep.subr.bf16.mxu0 %v35428_v56 }
 0xab5   : > { %25448 = vmatpush3.bf16.msra.mxu0 %v25447_v13 }
 0xab6   : > { %25449 = vmatprep.subr.bf16.mxu0 %v35428_v56 }
 0xab9   : > { %25451 = vmatpush3.bf16.msra.mxu0 %v25450_v45 }
 0xaba   : > { %25452 = vmatprep.subr.bf16.mxu0 %v35428_v56 }
 0xabd   : > { %25454 = vmatpush3.bf16.msra.mxu0 %v25453_v29  ;;  %v10404_v29 = vand.u32 4294901760, %v30978_v39 }
 0xabe   : > { %25455 = vmatprep.subr.bf16.mxu0 %v35428_v56 }
 0xabf   : > { %v31013_v27 = vpack.c.bf16 %v10407_v38, %v10404_v29 }
 0xac1   : > { %25457 = vmatpush3.bf16.msra.mxu0 %v25456_v30  ;;  %v10486_v30 = vand.u32 4294901760, %v30971_v49 }
 0xac2   : > { %25458 = vmatprep.subr.bf16.mxu0 %v35428_v56 }
 0xac3   : > { %v10487_v7 = vsub.f32 %v30971_v49, %v10486_v30 }
 0xac4   : > { %23801 = vmatmul.mubr.f32.vlgmr.msra.gmra.mrb[34].mxu0 %v30746_v58 }
 0xac5   : > { %25460 = vmatpush3.bf16.msra.mxu0 %v35504_v63  ;;  %23835 = vmatprep.mubr.msk.f32.mxu0 %vm27888_vm0, %v35500_v50  ;;  %v30928_v63 = vld [vmem:[%s28533_s10 + $0xd0] sm:$0xff]  ;;  %v10488_v10 = vand.u32 4294901760, %v10487_v7 }
 0xac6   : > { %25461 = vmatprep.subr.bf16.mxu0 %v35428_v56 }
 0xac9   : > { %25463 = vmatpush3.bf16.msra.mxu0 %v35505_v3  ;;  %v30931_v3 = vld [vmem:[%s28533_s10 + $0xd8] sm:$0xff] }
 0xaca   : > { %25464 = vmatprep.subr.bf16.mxu0 %v35428_v56  ;;  %v10395_v37 = vand.u32 4294901760, %v30931_v3 }
 0xacd   : > { %25466 = vmatpush3.bf16.msra.mxu0 %v35506_v43  ;;  %v30933_v43 = vand.u32 4294901760, %v1034_v22 }
 0xace   : > { %25467 = vmatprep.subr.bf16.mxu0 %v35428_v56 }
 0xad1   : > { %25469 = vmatpush3.bf16.msra.mxu0 %v35507_v59  ;;  %v30937_v59 = vsub.f32 %v1034_v22, %v30933_v43  ;;  %v31027_v22 = vsub.f32 %v30908_v5, %v10383_v28  ;;  %v10507_v28 = vand.u32 4294901760, %v31024_v54 }
 0xad2   : > { %25470 = vmatprep.subr.bf16.mxu0 %v35428_v56 }
 0xad3   : > { %v10444_v35 = vand.u32 4294901760, %v30937_v59 }
 0xad5   : > { %25472 = vmatpush3.bf16.msra.mxu0 %v35508_v52  ;;  %v30939_v52 = vsub.f32 %v9661_v60, %v10362_v33  ;;  %v10445_v61 = vsub.f32 %v30937_v59, %v10444_v35  ;;  %v30998_v60 = vpack.c.bf16 %v10401_v40, %v10398_v9  ;;  %v10473_v33 = vsub.f32 %v30956_v18, %v10472_v16 }
 0xad6   : > { %25473 = vmatprep.subr.bf16.mxu0 %v35428_v56 }
 0xad7   : > { %v10465_v13 = vand.u32 4294901760, %v30939_v52  ;;  %v10446_v1 = vand.u32 4294901760, %v10445_v61  ;;  %v10474_v32 = vand.u32 4294901760, %v10473_v33  ;;  %v10494_v61 = vsub.f32 %v30988_v11, %v10493_v26 }
 0xad8   : > { %v31050_v33 = vsub.f32 %v30916_v48, %v10389_v34  ;;  %v10508_v48 = vsub.f32 %v31024_v54, %v10507_v28 }
 0xad9   : > { %25475 = vmatpush3.bf16.msra.mxu0 %v35509_v62  ;;  %v1035_v62 = vld [vmem:[%s35470_s14 + $0x18] sm:$0xff]  ;;  %v10466_v14 = vsub.f32 %v30939_v52, %v10465_v13  ;;  %v10495_v7 = vand.u32 4294901760, %v10494_v61 }
 0xada   : > { %25476 = vmatprep.subr.bf16.mxu0 %v35428_v56  ;;  %v30962_v21 = vand.u32 4294901760, %v1035_v62 }
 0xadb   : > { %v10467_v51 = vand.u32 4294901760, %v10466_v14  ;;  %v10514_v14 = vand.u32 4294901760, %v31027_v22 }
 0xadc   : > { %v30986_v45 = vsub.f32 %v1035_v62, %v30962_v21 }
 0xadd   : > { %25478 = vmatpush3.bf16.msra.mxu0 %v35510_v23  ;;  %v25706_v4 = vpack.c.bf16 %v10474_v32, %v10467_v51  ;;  %v31058_v51 = vsub.f32 %v30931_v3, %v10395_v37  ;;  %v10502_v32 = vand.u32 4294901760, %v10501_v36 }
 0xade   : > { %25479 = vmatprep.subr.bf16.mxu0 %v35428_v56  ;;  %v10454_v53 = vand.u32 4294901760, %v30986_v45 }
 0xadf   : > { %v25714_v61 = vpack.c.bf16 %v10502_v32, %v10495_v7 }
 0xae0   : > { %v10455_v62 = vsub.f32 %v30986_v45, %v10454_v53 }
 0xae1   : > { %25481 = vmatpush3.bf16.msra.mxu0 %v35511_v57  ;;  %v10392_v57 = vand.u32 4294901760, %v30928_v63 }
 0xae2   : > { %25675 = vmatprep.subr.bf16.mxu0 %v30893_v25 }
 0xae3   : > { %v30974_v55 = vpack.c.bf16 %v10395_v37, %v10392_v57  ;;  %v31076_v37 = vsub.f32 %v30959_v42, %v10401_v40 }
 0xae4   : > { %23836 = vmatmul.mubr.f32.vlgmr.msra.gmra.mrb[34].mxu0 %v30746_v58  ;;  %v30911_v58 = vld [vmem:[%s28533_s10 + $0xc0] sm:$0xff] }
 0xae5   : > { %25677 = vmatpush3.bf16.msra.mxu0 %v30893_v25  ;;  %v10386_v17 = vand.u32 4294901760, %v30911_v58  ;;  %24080 = vmatprep.mubr.f32.mxu0 %v10446_v1  ;;  %v10481_v1 = vand.u32 4294901760, %v10480_v41  ;;  %v10456_v41 = vand.u32 4294901760, %v10455_v62  ;;  %v31068_v62 = vsub.f32 %v30954_v47, %v10398_v9 }
 0xae6   : > { %25679 = vmatprep.subr.bf16.mxu0 %v30895_v20  ;;  %v10556_v40 = vand.u32 4294901760, %v31076_v37 }
 0xae7   : > { %v30949_v23 = vpack.c.bf16 %v10389_v34, %v10386_v17  ;;  %v31042_v5 = vsub.f32 %v30911_v58, %v10386_v17  ;;  %v25710_v44 = vpack.c.bf16 %v10488_v10, %v10481_v1  ;;  %v31055_v17 = vsub.f32 %v30928_v63, %v10392_v57 }
 0xae8   : > { %v10515_v34 = vsub.f32 %v31027_v22, %v10514_v14  ;;  %v10528_v10 = vand.u32 4294901760, %v31050_v33  ;;  %v34944_v57 = vand.u32 4294901760, %v31058_v51  ;;  %v10509_v1 = vand.u32 4294901760, %v10508_v48 }
 0xae9   : > { %25681 = vmatpush3.bf16.msra.mxu0 %v30895_v20  ;;  %v10521_v58 = vand.u32 4294901760, %v31042_v5  ;;  %v10535_v3 = vand.u32 4294901760, %v31055_v17  ;;  %v10549_v9 = vand.u32 4294901760, %v31068_v62  ;;  %v31093_v48 = vsub.f32 %v30978_v39, %v10404_v29 }
 0xaea   : > { %25683 = vmatprep.subr.bf16.mxu0 %v30902_v6  ;;  %v10516_v36 = vand.u32 4294901760, %v10515_v34  ;;  %v10529_v47 = vsub.f32 %v31050_v33, %v10528_v10  ;;  %v10543_v42 = vsub.f32 %v31058_v51, %v34944_v57 }
 0xaeb   : > { %v10522_v63 = vsub.f32 %v31042_v5, %v10521_v58  ;;  %v10550_v57 = vsub.f32 %v31068_v62, %v10549_v9  ;;  %v10563_v39 = vand.u32 4294901760, %v31093_v48 }
 0xaec   : > { %v25718_v7 = vpack.c.bf16 %v10516_v36, %v10509_v1  ;;  %v10530_v32 = vand.u32 4294901760, %v10529_v47  ;;  %v10557_v36 = vsub.f32 %v31076_v37, %v10556_v40 }
 0xaed   : > { %25685 = vmatpush3.bf16.msra.mxu0 %v30902_v6  ;;  %v10564_v47 = vsub.f32 %v31093_v48, %v10563_v39 }
 0xaee   : > { %25687 = vmatprep.subr.bf16.mxu0 %v30920_v31 }
 0xaf1   : > { %25689 = vmatpush3.bf16.msra.mxu0 %v30920_v31 }
 0xaf2   : > { %25691 = vmatprep.subr.bf16.mxu0 %v30949_v23 }
 0xaf5   : > { %25693 = vmatpush3.bf16.msra.mxu0 %v30949_v23 }
 0xaf6   : > { %25695 = vmatprep.subr.bf16.mxu0 %v30974_v55 }
 0xaf9   : > { %25697 = vmatpush3.bf16.msra.mxu0 %v30974_v55 }
 0xafa   : > { %25699 = vmatprep.subr.bf16.mxu0 %v30998_v60 }
 0xafd   : > { %25701 = vmatpush3.bf16.msra.mxu0 %v30998_v60 }
 0xafe   : > { %v30885_v19 = vpop.f32.mrb[34].mxu1  ;;  %25703 = vmatprep.subr.bf16.mxu0 %v31013_v27 }
 0xaff   : > { %v30887_v15 = vpop.f32.mrb[35].mxu1 }
 0xb01   : > { %25705 = vmatpush3.bf16.msra.mxu0 %v31013_v27 }
 0xb02   : > { %25707 = vmatprep.subr.bf16.mxu0 %v25706_v4 }
 0xb04   : > { %24081 = vmatmul.mubr.f32.vlgmr.msra.gmra.mrb[36].mxu0 %v10456_v41  ;;  %v10536_v41 = vsub.f32 %v31055_v17, %v10535_v3 }
 0xb05   : > { %25709 = vmatpush3.bf16.msra.mxu0 %v25706_v4  ;;  %24115 = vmatprep.mubr.f32.mxu0 %v30933_v43  ;;  %v10523_v4 = vand.u32 4294901760, %v10522_v63  ;;  %v10544_v63 = vand.u32 4294901760, %v10543_v42  ;;  %v10565_v42 = vand.u32 4294901760, %v10564_v47 }
 0xb06   : > { %25711 = vmatprep.subr.bf16.mxu0 %v25710_v44  ;;  %v10537_v34 = vand.u32 4294901760, %v10536_v41 }
 0xb07   : > { %v25722_v1 = vpack.c.bf16 %v10530_v32, %v10523_v4 }
 0xb09   : > { %25713 = vmatpush3.bf16.msra.mxu0 %v25710_v44  ;;  %v31098_v44 = vsub.f32 %v30981_v12, %v10407_v38  ;;  %v10551_v12 = vand.u32 4294901760, %v10550_v57  ;;  %v25726_v38 = vpack.c.bf16 %v10544_v63, %v10537_v34  ;;  %v25738_v57 = vpack.c.bf16 %v30956_v18, %v30939_v52 }
 0xb0a   : > { %25715 = vmatprep.subr.bf16.mxu0 %v25714_v61  ;;  %v25742_v34 = vpack.c.bf16 %v30971_v49, %v30969_v46  ;;  %v25746_v63 = vpack.c.bf16 %v30990_v24, %v30988_v11  ;;  %v25814_v52 = vpack.c.bf16 %v10514_v14, %v10507_v28  ;;  %v25818_v18 = vpack.c.bf16 %v10528_v10, %v10521_v58 }
 0xb0b   : > { %v10570_v29 = vand.u32 4294901760, %v31098_v44  ;;  %v35531_v46 = vand.u32 4294901760, %v31058_v51 }
 0xb0d   : > { %25717 = vmatpush3.bf16.msra.mxu0 %v25714_v61  ;;  %v10558_v61 = vand.u32 4294901760, %v10557_v36  ;;  %v10571_v4 = vsub.f32 %v31098_v44, %v10570_v29  ;;  %v25754_v36 = vpack.c.bf16 %v31050_v33, %v31042_v5  ;;  %v25822_v49 = vpack.c.bf16 %v35531_v46, %v10535_v3 }
 0xb0e   : > { %25719 = vmatprep.subr.bf16.mxu0 %v25718_v7 }
 0xb0f   : > { %v25730_v41 = vpack.c.bf16 %v10558_v61, %v10551_v12  ;;  %v10572_v32 = vand.u32 4294901760, %v10571_v4  ;;  %v25758_v12 = vpack.c.bf16 %v31058_v51, %v31055_v17  ;;  %v25766_v61 = vpack.c.bf16 %v31098_v44, %v31093_v48  ;;  %v35534_v51 = vld [vmem:[#allocation36_spill] sm:$0xff] }
 0xb11   : > { %25721 = vmatpush3.bf16.msra.mxu0 %v25718_v7  ;;  %v25734_v7 = vpack.c.bf16 %v10572_v32, %v10565_v42  ;;  %v11632_v42 = vld [vmem:[%s35529_s8 + $0x8] sm:$0xff]  ;;  %v25802_v32 = vpack.c.bf16 %v10472_v16, %v10465_v13  ;;  %v25826_v13 = vpack.c.bf16 %v10556_v40, %v10549_v9  ;;  %v25830_v16 = vpack.c.bf16 %v10570_v29, %v10563_v39 }
 0xb12   : > { %25723 = vmatprep.subr.bf16.mxu0 %v25722_v1 }
 0xb15   : > { %25725 = vmatpush3.bf16.msra.mxu0 %v25722_v1  ;;  %v25750_v1 = vpack.c.bf16 %v31027_v22, %v31024_v54  ;;  %v35533_v22 = vld [vmem:[#allocation50_spill] sm:$0xff] }
 0xb16   : > { %25727 = vmatprep.subr.bf16.mxu0 %v25726_v38 }
 0xb19   : > { %25729 = vmatpush3.bf16.msra.mxu0 %v25726_v38  ;;  %v25762_v38 = vpack.c.bf16 %v31076_v37, %v31068_v62 }
 0xb1a   : > { %25731 = vmatprep.subr.bf16.mxu0 %v25730_v41 }
 0xb1d   : > { %25733 = vmatpush3.bf16.msra.mxu0 %v25730_v41  ;;  %v11631_v41 = vld [vmem:[%s35529_s8] sm:$0xff] }
 0xb1e   : > { %25735 = vmatprep.subr.bf16.mxu0 %v25734_v7 }
 0xb21   : > { %25737 = vmatpush3.bf16.msra.mxu0 %v25734_v7  ;;  %v25806_v7 = vpack.c.bf16 %v10486_v30, %v10479_v8  ;;  %v35532_v30 = vld [vmem:[#allocation35_spill] sm:$0xff] }
 0xb22   : > { %25739 = vmatprep.subr.bf16.mxu0 %v25738_v57 }
 0xb24   : > { %24116 = vmatmul.mubr.f32.vlgmr.msra.gmra.mrb[36].mxu0 %v30962_v21 }
 0xb25   : > { %25741 = vmatpush3.bf16.msra.mxu0 %v25738_v57  ;;  %24150 = vmatprep.mubr.f32.mxu0 %v30937_v59  ;;  %v11629_v59 = vld [vmem:[%s35528_s3] sm:$0xff]  ;;  %v35530_v57 = vand.u32 4294901760, %v30990_v24 }
 0xb26   : > { %25743 = vmatprep.subr.bf16.mxu0 %v25742_v34 }
 0xb29   : > { %25745 = vmatpush3.bf16.msra.mxu0 %v25742_v34 }
 0xb2a   : > { %25747 = vmatprep.subr.bf16.mxu0 %v25746_v63 }
 0xb2d   : > { %25749 = vmatpush3.bf16.msra.mxu0 %v25746_v63 }
 0xb2e   : > { %25751 = vmatprep.subr.bf16.mxu0 %v25750_v1 }
 0xb31   : > { %25753 = vmatpush3.bf16.msra.mxu0 %v25750_v1  ;;  %v35535_v1 = vld [vmem:[#allocation34_spill] sm:$0xff] }
 0xb32   : > { %25755 = vmatprep.subr.bf16.mxu0 %v25754_v36 }
 0xb35   : > { %25757 = vmatpush3.bf16.msra.mxu0 %v25754_v36 }
 0xb36   : > { %25759 = vmatprep.subr.bf16.mxu0 %v25758_v12 }
 0xb39   : > { %25761 = vmatpush3.bf16.msra.mxu0 %v25758_v12 }
 0xb3a   : > { %25763 = vmatprep.subr.bf16.mxu0 %v25762_v38 }
 0xb3d   : > { %25765 = vmatpush3.bf16.msra.mxu0 %v25762_v38 }
 0xb3e   : > { %25767 = vmatprep.subr.bf16.mxu0 %v25766_v61 }
 0xb41   : > { %25769 = vmatpush3.bf16.msra.mxu0 %v25766_v61 }
 0xb42   : > { %25771 = vmatprep.subr.bf16.mxu0 %v30893_v25 }
 0xb44   : > { %24151 = vmatmul.mubr.f32.vlgmr.msra.gmra.mrb[36].mxu0 %v30986_v45  ;;  %v25810_v45 = vpack.c.bf16 %v35530_v57, %v10493_v26 }
 0xb45   : > { %25773 = vmatpush3.bf16.msra.mxu0 %v30893_v25  ;;  %24185 = vmatprep.mubr.f32.mxu0 %v10444_v35  ;;  %v11630_v35 = vld [vmem:[%s35528_s3 + $0x8] sm:$0xff] }
 0xb46   : > { %25775 = vmatprep.subr.bf16.mxu0 %v30895_v20 }
 0xb49   : > { %25777 = vmatpush3.bf16.msra.mxu0 %v30895_v20 }
 0xb4a   : > { %25779 = vmatprep.subr.bf16.mxu0 %v30902_v6 }
 0xb4d   : > { %25781 = vmatpush3.bf16.msra.mxu0 %v30902_v6 }
 0xb4e   : > { %25783 = vmatprep.subr.bf16.mxu0 %v30920_v31 }
 0xb51   : > { %25785 = vmatpush3.bf16.msra.mxu0 %v30920_v31 }
 0xb52   : > { %25787 = vmatprep.subr.bf16.mxu0 %v30949_v23 }
 0xb55   : > { %25789 = vmatpush3.bf16.msra.mxu0 %v30949_v23 }
 0xb56   : > { %25791 = vmatprep.subr.bf16.mxu0 %v30974_v55 }
 0xb59   : > { %25793 = vmatpush3.bf16.msra.mxu0 %v30974_v55 }
 0xb5a   : > { %25795 = vmatprep.subr.bf16.mxu0 %v30998_v60 }
 0xb5d   : > { %25797 = vmatpush3.bf16.msra.mxu0 %v30998_v60 }
 0xb5e   : > { %25799 = vmatprep.subr.bf16.mxu0 %v31013_v27 }
 0xb61   : > { %25801 = vmatpush3.bf16.msra.mxu0 %v31013_v27 }
 0xb62   : > { %25803 = vmatprep.subr.bf16.mxu0 %v25802_v32 }
 0xb64   : > { %24186 = vmatmul.mubr.f32.vlgmr.msra.gmra.mrb[36].mxu0 %v10454_v53 }
 0xb65   : > { %24220 = vmatprep.mubr.f32.mxu0 %v30933_v43  ;;  %25805 = vmatpush3.bf16.msra.mxu0 %v25802_v32 }
 0xb66   : > { %25807 = vmatprep.subr.bf16.mxu0 %v25806_v7 }
 0xb69   : > { %25809 = vmatpush3.bf16.msra.mxu0 %v25806_v7 }
 0xb6a   : > { %25811 = vmatprep.subr.bf16.mxu0 %v25810_v45 }
 0xb6d   : > { %25813 = vmatpush3.bf16.msra.mxu0 %v25810_v45 }
 0xb6e   : > { %25815 = vmatprep.subr.bf16.mxu0 %v25814_v52 }
 0xb71   : > { %25817 = vmatpush3.bf16.msra.mxu0 %v25814_v52 }
 0xb72   : > { %25819 = vmatprep.subr.bf16.mxu0 %v25818_v18 }
 0xb75   : > { %25821 = vmatpush3.bf16.msra.mxu0 %v25818_v18 }
 0xb76   : > { %25823 = vmatprep.subr.bf16.mxu0 %v25822_v49 }
 0xb79   : > { %25825 = vmatpush3.bf16.msra.mxu0 %v25822_v49 }
 0xb7a   : > { %25827 = vmatprep.subr.bf16.mxu0 %v25826_v13 }
 0xb7d   : > { %25829 = vmatpush3.bf16.msra.mxu0 %v25826_v13 }
 0xb7e   : > { %25831 = vmatprep.subr.bf16.mxu0 %v25830_v16 }
 0xb81   : > { %25833 = vmatpush3.bf16.msra.mxu0 %v25830_v16 }
 0xb82   : > { %25835 = vmatprep.subr.bf16.mxu0 %v30893_v25 }
 0xb84   : > { %24221 = vmatmul.mubr.f32.vlgmr.msra.gmra.mrb[36].mxu0 %v30962_v21 }
 0xb85   : > { %25837 = vmatpush3.bf16.msra.mxu0 %v30893_v25  ;;  %24255 = vmatprep.mubr.f32.mxu0 %v30933_v43  ;;  %v21573_v25 = vld.sshfl [vmem:[%s28515_s9 + $0x4] sm:$0x33 pattern:$0x75316420] }
 0xb86   : > { %25839 = vmatprep.subr.bf16.mxu0 %v30895_v20  ;;  %v11657_v43 = vcombine.high %v21573_v25, %v21573_v25 }
 0xb89   : > { %25841 = vmatpush3.bf16.msra.mxu0 %v30895_v20  ;;  %v21574_v20 = vld.sshfl [vmem:[%s28515_s9] sm:$0x33 pattern:$0x75316420] }
 0xb8a   : > { %25843 = vmatprep.subr.bf16.mxu0 %v30902_v6 }
 0xb8d   : > { %25845 = vmatpush3.bf16.msra.mxu0 %v30902_v6 }
 0xb8e   : > { %25847 = vmatprep.subr.bf16.mxu0 %v30920_v31 }
 0xb91   : > { %25849 = vmatpush3.bf16.msra.mxu0 %v30920_v31 }
 0xb92   : > { %25851 = vmatprep.subr.bf16.mxu0 %v30949_v23 }
 0xb95   : > { %25853 = vmatpush3.bf16.msra.mxu0 %v30949_v23  ;;  %v11706_v23 = vcombine.high %v21574_v20, %v21574_v20 }
 0xb96   : > { %25855 = vmatprep.subr.bf16.mxu0 %v30974_v55 }
 0xb97   : > { %v31258_v54 = vrot.slane %v11706_v23, %v35532_v30 }
 0xb99   : > { %25857 = vmatpush3.bf16.msra.mxu0 %v30974_v55  ;;  %v11722_v63 = vcombine.high %v31258_v54, %v31258_v54 }
 0xb9a   : > { %25859 = vmatprep.subr.bf16.mxu0 %v30998_v60 }
 0xb9d   : > { %25861 = vmatpush3.bf16.msra.mxu0 %v30998_v60  ;;  %v31249_v60 = vrot.slane %v21573_v25, %v35532_v30 }
 0xb9e   : > { %25863 = vmatprep.subr.bf16.mxu0 %v31013_v27 }
 0xb9f   : > { %v11677_v10 = vrot.slane %v31249_v60, %v35534_v51  ;;  %v11672_v3 = vcombine.high %v31249_v60, %v31249_v60 }
 0xba1   : > { %25865 = vmatpush3.bf16.msra.mxu0 %v31013_v27  ;;  %v31255_v27 = vrot.slane %v21574_v20, %v35532_v30 }
 0xba2   : > { %25938 = vmatprep.subr.bf16.mxu0 %v35428_v56 }
 0xba3   : > { %v11721_v34 = vcombine.high %v31255_v27, %v31255_v27 }
 0xba4   : > { %24256 = vmatmul.mubr.f32.vlgmr.msra.gmra.mrb[36].mxu0 %v30962_v21  ;;  %v31252_v21 = vrot.slane %v11657_v43, %v35532_v30 }
 0xba5   : > { %24430 = vmatprep.mubr.msk.f32.mxu0 %vm27888_vm0, %v35500_v50 }
 0xba6   : > { %v11681_v62 = vrot.slane %v31252_v21, %v35534_v51  ;;  %v11673_v37 = vcombine.high %v31252_v21, %v31252_v21 }
 0xbb7   : > { %v31140_v47 = vpop.f32.mrb[34].mxu0 }
 0xbb8   : > { %9503 = vrot.lane.b32.xlu1 %v31140_v47, %s27891_s27  ;;  %9500 = vrot.lane.b32.xlu0 %v31140_v47, %s27890_s29  ;;  %v23837_v4 = vpop.f32.mrb[35].mxu0 }
 0xbbc   : > { %9506 = vrot.lane.b32.xlu1 %v31140_v47, %s27889_s11  ;;  %11047 = vrot.lane.b32.xlu0 %v30887_v15, %s27890_s29 }
 0xbc0   : > { %11049 = vrot.lane.b32.xlu1 %v30885_v19, %s27890_s29  ;;  %11053 = vrot.lane.b32.xlu0 %v30887_v15, %s27891_s27 }
 0xbc4   : > { %11055 = vrot.lane.b32.xlu1 %v30885_v19, %s27891_s27  ;;  %11059 = vrot.lane.b32.xlu0 %v30887_v15, %s27889_s11 }
 0xbc8   : > { %11061 = vrot.lane.b32.xlu1 %v30885_v19, %s27889_s11  ;;  %11797 = vrot.lane.b32.xlu0 %v11629_v59, %s27889_s11 }
 0xbcc   : > { %11799 = vrot.lane.b32.xlu1 %v11630_v35, %s27889_s11  ;;  %11805 = vrot.lane.b32.xlu0 %v11631_v41, %s27891_s27  ;;  %v31285_v35 = vrot.slane %v11672_v3, %v35534_v51  ;;  %v31288_v41 = vrot.slane %v11673_v37, %v35534_v51 }
 0xbd0   : > { %11807 = vrot.lane.b32.xlu1 %v11632_v42, %s27891_s27 }
 0xc2a   : > { %v9504_v6 = vpop.permute.xlu1 %9503  ;;  %v9501_v31 = vpop.permute.xlu0 %9500 }
 0xc2b   : > { %v9509_v55 = vcombine.low %v31140_v47, %v9504_v6  ;;  %v9510_v11 = vcombine.high %v31140_v47, %v9504_v6 }
 0xc2d   : > { %v9517_v5 = vrot.slane %v9509_v55, %v35533_v22  ;;  %v9524_v28 = vrot.slane %v9510_v11, %v35533_v22 }
 0xc2e   : > { %v9507_v24 = vpop.permute.xlu1 %9506  ;;  %v11048_v8 = vpop.permute.xlu0 %11047 }
 0xc2f   : > { %v9525_v53 = vcombine.low %v9501_v31, %v9507_v24  ;;  %v9526_v26 = vcombine.high %v9501_v31, %v9507_v24 }
 0xc31   : > { %v9533_v14 = vrot.slane %v9525_v53, %v35533_v22  ;;  %v9540_v33 = vrot.slane %v9526_v26, %v35533_v22 }
 0xc32   : > { %v11050_v58 = vpop.permute.xlu1 %11049  ;;  %v11054_v17 = vpop.permute.xlu0 %11053 }
 0xc33   : > { %v9541_v9 = vcombine.low %v9517_v5, %v9533_v14  ;;  %v9542_v40 = vcombine.high %v9517_v5, %v9533_v14  ;;  %v9557_v48 = vcombine.low %v9524_v28, %v9540_v33  ;;  %v9558_v44 = vcombine.high %v9524_v28, %v9540_v33 }
 0xc34   : > { %v11065_v39 = vcombine.low %v30887_v15, %v11054_v17  ;;  %v11066_v29 = vcombine.high %v30887_v15, %v11054_v17 }
 0xc35   : > { %v9549_v36 = vrot.slane %v9541_v9, %v35535_v1  ;;  %v9556_v12 = vrot.slane %v9542_v40, %v35535_v1  ;;  %v9565_v38 = vrot.slane %v9557_v48, %v35535_v1  ;;  %v9572_v61 = vrot.slane %v9558_v44, %v35535_v1 }
 0xc36   : > { %v11073_v47 = vrot.slane %v11065_v39, %v35533_v22  ;;  %v11080_v4 = vrot.slane %v11066_v29, %v35533_v22  ;;  %v11056_v59 = vpop.permute.xlu1 %11055  ;;  %v11060_v15 = vpop.permute.xlu0 %11059 }
 0xc37   : > { %v9577_v42 = vcombine.low %v9549_v36, %v9556_v12  ;;  %v21563_v32 = vcombine.high %v9549_v36, %v9556_v12  ;;  %v9593_v7 = vcombine.low %v9565_v38, %v9572_v61  ;;  %v21564_v57 = vcombine.high %v9565_v38, %v9572_v61 }
 0xc38   : > { %v11133_v45 = vcombine.low %v30885_v19, %v11056_v59  ;;  %v11134_v52 = vcombine.high %v30885_v19, %v11056_v59  ;;  %v11081_v18 = vcombine.low %v11048_v8, %v11060_v15  ;;  %v11082_v46 = vcombine.high %v11048_v8, %v11060_v15 }
 0xc39   : > { %v31293_v49 = vrot.slane %v9577_v42, %v35533_v22  ;;  %v31296_v13 = vrot.slane %v21563_v32, %v35533_v22  ;;  %v31299_v16 = vrot.slane %v9593_v7, %v35533_v22  ;;  %v31302_v25 = vrot.slane %v21564_v57, %v35533_v22 }
 0xc3a   : > { %v11141_v20 = vrot.slane %v11133_v45, %v35533_v22  ;;  %v11148_v6 = vrot.slane %v11134_v52, %v35533_v22  ;;  %v11089_v19 = vrot.slane %v11081_v18, %v35533_v22  ;;  %v11096_v31 = vrot.slane %v11082_v46, %v35533_v22  ;;  %v11062_v43 = vpop.permute.xlu1 %11061 }
 0xc3b   : > { %v11149_v23 = vcombine.low %v11050_v58, %v11062_v43  ;;  %v11150_v55 = vcombine.high %v11050_v58, %v11062_v43  ;;  %v9609_v11 = vcombine.low %v31293_v49, %v31296_v13  ;;  %v9625_v24 = vcombine.low %v31299_v16, %v31302_v25 }
 0xc3c   : > { %v11097_v8 = vcombine.low %v11073_v47, %v11089_v19  ;;  %v11098_v30 = vcombine.high %v11073_v47, %v11089_v19  ;;  %v11113_v53 = vcombine.low %v11080_v4, %v11096_v31  ;;  %v11114_v26 = vcombine.high %v11080_v4, %v11096_v31 }
 0xc3d   : > { %v11157_v5 = vrot.slane %v11149_v23, %v35533_v22  ;;  %v11164_v28 = vrot.slane %v11150_v55, %v35533_v22  ;;  %v31315_v14 = vrot.slane %v9609_v11, %v35535_v1  ;;  %v31318_v33 = vrot.slane %v9625_v24, %v35535_v1  ;;  %v11798_v55 = vpop.permute.xlu0 %11797 }
 0xc3e   : > { %v11105_v58 = vrot.slane %v11097_v8, %v35535_v1  ;;  %v11112_v17 = vrot.slane %v11098_v30, %v35535_v1  ;;  %v11121_v3 = vrot.slane %v11113_v53, %v35535_v1  ;;  %v11128_v37 = vrot.slane %v11114_v26, %v35535_v1 }
 0xc3f   : > { %v11165_v9 = vcombine.low %v11141_v20, %v11157_v5  ;;  %v11166_v40 = vcombine.high %v11141_v20, %v11157_v5  ;;  %v11181_v48 = vcombine.low %v11148_v6, %v11164_v28  ;;  %v11182_v44 = vcombine.high %v11148_v6, %v11164_v28 }
 0xc40   : > { %v11201_v39 = vcombine.low %v11105_v58, %v11112_v17  ;;  %v21565_v29 = vcombine.high %v11105_v58, %v11112_v17  ;;  %v11217_v36 = vcombine.low %v11121_v3, %v11128_v37  ;;  %v21566_v12 = vcombine.high %v11121_v3, %v11128_v37 }
 0xc41   : > { %v11173_v38 = vrot.slane %v11165_v9, %v35535_v1  ;;  %v11180_v61 = vrot.slane %v11166_v40, %v35535_v1  ;;  %v11189_v47 = vrot.slane %v11181_v48, %v35535_v1  ;;  %v11196_v4 = vrot.slane %v11182_v44, %v35535_v1 }
 0xc42   : > { %v11208_v59 = vrot.slane %v11201_v39, %v35533_v22  ;;  %v11216_v15 = vrot.slane %v21565_v29, %v35533_v22  ;;  %v11224_v42 = vrot.slane %v11217_v36, %v35533_v22  ;;  %v11232_v32 = vrot.slane %v21566_v12, %v35533_v22  ;;  %v11800_v39 = vpop.permute.xlu1 %11799  ;;  %v31352_v29 = vld [vmem:[#allocation9] sm:$0xff]  ;;  %v31355_v12 = vld [vmem:[#allocation8] sm:$0xff] }
 0xc43   : > { %v11269_v7 = vcombine.low %v11173_v38, %v11180_v61  ;;  %v21567_v57 = vcombine.high %v11173_v38, %v11180_v61  ;;  %v11285_v45 = vcombine.low %v11189_v47, %v11196_v4  ;;  %v21568_v52 = vcombine.high %v11189_v47, %v11196_v4 }
 0xc44   : > { %v11233_v18 = vcombine.low %v11208_v59, %v11216_v15  ;;  %v11234_v46 = vcombine.high %v11208_v59, %v11216_v15  ;;  %v11249_v20 = vcombine.low %v11224_v42, %v11232_v32  ;;  %v11250_v6 = vcombine.high %v11224_v42, %v11232_v32  ;;  %v11806_v15 = vpop.permute.xlu0 %11805 }
 0xc45   : > { %v11276_v19 = vrot.slane %v11269_v7, %v35533_v22  ;;  %v11284_v31 = vrot.slane %v21567_v57, %v35533_v22  ;;  %v11292_v43 = vrot.slane %v11285_v45, %v35533_v22  ;;  %v11300_v23 = vrot.slane %v21568_v52, %v35533_v22 }
 0xc46   : > { %v31338_v11 = vcombine.low %v31315_v14, %v31318_v33  ;;  %v11241_v24 = vrot.slane %v11233_v18, %v35535_v1  ;;  %v11248_v8 = vrot.slane %v11234_v46, %v35535_v1  ;;  %v11257_v30 = vrot.slane %v11249_v20, %v35535_v1 }
 0xc47   : > { %v11301_v53 = vcombine.low %v11276_v19, %v11284_v31  ;;  %v11302_v26 = vcombine.high %v11276_v19, %v11284_v31  ;;  %v11317_v5 = vcombine.low %v11292_v43, %v11300_v23  ;;  %v11318_v28 = vcombine.high %v11292_v43, %v11300_v23 }
 0xc48   : > { %v11694_v58 = vadd.f32 %v11677_v10, %v31338_v11  ;;  %v11264_v17 = vrot.slane %v11250_v6, %v35535_v1  ;;  %v11265_v3 = vcombine.low %v11241_v24, %v11257_v30  ;;  %v11266_v37 = vcombine.high %v11241_v24, %v11257_v30 }
 0xc49   : > { %v11309_v9 = vrot.slane %v11301_v53, %v35535_v1  ;;  %v11316_v40 = vrot.slane %v11302_v26, %v35535_v1  ;;  %v11325_v48 = vrot.slane %v11317_v5, %v35535_v1  ;;  %v11332_v44 = vrot.slane %v11318_v28, %v35535_v1 }
 0xc4a   : > { %v11751_v36 = vmul.f32 %v31352_v29, %v11694_v58  ;;  %v11747_v60 = vmul.f32 %v31355_v12, %v11694_v58  ;;  %v11267_v10 = vcombine.low %v11248_v8, %v11264_v17  ;;  %v11268_v38 = vcombine.high %v11248_v8, %v11264_v17 }
 0xc4b   : > { %v11811_v61 = vsel %vm3183_vm1, %v11265_v3, %v11798_v55  ;;  %v11813_v47 = vsel %vm3183_vm1, %v11266_v37, %v11798_v55  ;;  %v11333_v4 = vcombine.low %v11309_v9, %v11325_v48  ;;  %v11334_v59 = vcombine.high %v11309_v9, %v11325_v48 }
 0xc4c   : > { %11775 = vrot.lane.b32.xlu1 %v11751_v36, %s27891_s27  ;;  %11759 = vrot.lane.b32.xlu0 %v11747_v60, %s27889_s11  ;;  %v11815_v42 = vsel %vm3183_vm1, %v11267_v10, %v11798_v55  ;;  %v11817_v32 = vsel %vm3183_vm1, %v11268_v38, %v11798_v55  ;;  %v11335_v7 = vcombine.low %v11316_v40, %v11332_v44 }
 0xc4d   : > { %v11336_v57 = vcombine.high %v11316_v40, %v11332_v44  ;;  %v11812_v45 = vsel %vm3183_vm1, %v11333_v4, %v11800_v39  ;;  %v11814_v52 = vsel %vm3183_vm1, %v11334_v59, %v11800_v39  ;;  %v31368_v18 = vcombine.high %v31315_v14, %v31318_v33  ;;  %v11808_v33 = vpop.permute.xlu1 %11807 }
 0xc4e   : > { %v11816_v46 = vsel %vm3183_vm1, %v11335_v7, %v11800_v39  ;;  %v11819_v20 = vsel %vm3188_vm2, %v11811_v61, %v11806_v15  ;;  %v11821_v6 = vsel %vm3188_vm2, %v11813_v47, %v11806_v15  ;;  %v11823_v19 = vsel %vm3188_vm2, %v11815_v42, %v11806_v15 }
 0xc4f   : > { %v11818_v31 = vsel %vm3183_vm1, %v11336_v57, %v11800_v39  ;;  %v11695_v43 = vadd.f32 %v11681_v62, %v31368_v18  ;;  %v11825_v23 = vsel %vm3188_vm2, %v11817_v32, %v11806_v15  ;;  %v11831_v14 = vsel %vm3209_vm3, %v11819_v20, 0 }
 0xc50   : > { %v11837_v55 = vand.u32 4294901760, %v11831_v14  ;;  %v12299_v24 = vsel %vm3209_vm3, %v11821_v6, 0  ;;  %v31383_v8 = vsel %vm3209_vm3, %v11823_v19, 0  ;;  %v31386_v30 = vsel %vm3209_vm3, %v11825_v23, 0 }
 0xc51   : > { %v11752_v53 = vmul.f32 %v31352_v29, %v11695_v43  ;;  %v11748_v26 = vmul.f32 %v31355_v12, %v11695_v43  ;;  %v12305_v21 = vand.u32 4294901760, %v12299_v24  ;;  %v11734_v62 = vrot.slane %v11721_v34, %v35534_v51 }
 0xc52   : > { %v31394_v5 = vsub.f32 %v11831_v14, %v11837_v55  ;;  %v11820_v28 = vsel %vm3188_vm2, %v11812_v45, %v11808_v33  ;;  %v11822_v58 = vsel %vm3188_vm2, %v11814_v52, %v11808_v33  ;;  %v11738_v17 = vrot.slane %v11722_v63, %v35534_v51 }
 0xc53   : > { %11777 = vrot.lane.b32.xlu1 %v11752_v53, %s27891_s27  ;;  %11761 = vrot.lane.b32.xlu0 %v11748_v26, %s27889_s11  ;;  %v12773_v3 = vand.u32 4294901760, %v31383_v8  ;;  %v13241_v37 = vand.u32 4294901760, %v31386_v30  ;;  %v11824_v34 = vsel %vm3188_vm2, %v11816_v46, %v11808_v33  ;;  %v11834_v9 = vsel %vm3209_vm3, %v11820_v28, 0 }
 0xc54   : > { %v31408_v40 = vsub.f32 %v12299_v24, %v12305_v21  ;;  %v11826_v48 = vsel %vm3188_vm2, %v11818_v31, %v11808_v33  ;;  %v11840_v44 = vand.u32 4294901760, %v11834_v9  ;;  %v12302_v39 = vsel %vm3209_vm3, %v11822_v58, 0 }
 0xc55   : > { %v12308_v63 = vand.u32 4294901760, %v12302_v39  ;;  %v12770_v36 = vsel %vm3209_vm3, %v11824_v34, 0  ;;  %v13238_v60 = vsel %vm3209_vm3, %v11826_v48, 0  ;;  %v9610_v10 = vcombine.high %v31293_v49, %v31296_v13 }
 0xc56   : > { %v31416_v38 = vsub.f32 %v11834_v9, %v11840_v44  ;;  %v12776_v61 = vand.u32 4294901760, %v12770_v36  ;;  %v13244_v47 = vand.u32 4294901760, %v13238_v60  ;;  %v9626_v4 = vcombine.high %v31299_v16, %v31302_v25 }
 0xc57   : > { %v31421_v59 = vsub.f32 %v31383_v8, %v12773_v3  ;;  %v31423_v15 = vsub.f32 %v12302_v39, %v12308_v63  ;;  %v9624_v42 = vrot.slane %v9610_v10, %v35535_v1  ;;  %v31426_v32 = vpack.c.bf16 %v11840_v44, %v11837_v55 }
 0xc58   : > { %v31429_v7 = vsub.f32 %v31386_v30, %v13241_v37  ;;  %v31431_v49 = vsub.f32 %v12770_v36, %v12776_v61  ;;  %v31433_v13 = vsub.f32 %v13238_v60, %v13244_v47  ;;  %v9640_v57 = vrot.slane %v9626_v4, %v35535_v1 }
 0xc59   : > { %25868 = vmatpush3.bf16.xpose.msra.mxu1 %v31426_v32  ;;  %v11916_v16 = vand.u32 4294901760, %v31394_v5  ;;  %v11923_v25 = vand.u32 4294901760, %v31416_v38  ;;  %v25873_v45 = vpack.c.bf16 %v31416_v38, %v31394_v5  ;;  %v31441_v52 = vpack.c.bf16 %v12308_v63, %v12305_v21 }
 0xc5a   : > { %v9643_v46 = vcombine.low %v9624_v42, %v9640_v57  ;;  %v9644_v20 = vcombine.high %v9624_v42, %v9640_v57  ;;  %25869 = vmatprep.subr.bf16.mxu1 %v35428_v56  ;;  %v12384_v6 = vand.u32 4294901760, %v31408_v40  ;;  %v12391_v19 = vand.u32 4294901760, %v31423_v15 }
 0xc5b   : > { %v11917_v31 = vsub.f32 %v31394_v5, %v11916_v16  ;;  %v11924_v43 = vsub.f32 %v31416_v38, %v11923_v25  ;;  %v31448_v23 = vpack.c.bf16 %v11923_v25, %v11916_v16  ;;  %v25891_v14 = vpack.c.bf16 %v31423_v15, %v31408_v40 }
 0xc5c   : > { %v11696_v33 = vadd.f32 %v31285_v35, %v9643_v46  ;;  %v11697_v55 = vadd.f32 %v31288_v41, %v9644_v20  ;;  %v31454_v24 = vadd.f32 %v11734_v62, %v9643_v46  ;;  %v31456_v8 = vadd.f32 %v11738_v17, %v9644_v20 }
 0xc5d   : > { %v11918_v30 = vand.u32 4294901760, %v11917_v31  ;;  %v11925_v53 = vand.u32 4294901760, %v11924_v43  ;;  %v12385_v26 = vsub.f32 %v31408_v40, %v12384_v6  ;;  %v12392_v21 = vsub.f32 %v31423_v15, %v12391_v19 }
 0xc5e   : > { %v11753_v28 = vmul.f32 %v31352_v29, %v11696_v33  ;;  %v11749_v58 = vmul.f32 %v31355_v12, %v11696_v33  ;;  %v11754_v34 = vmul.f32 %v31352_v29, %v11697_v55  ;;  %v11750_v35 = vmul.f32 %v31355_v12, %v11697_v55 }
 0xc5f   : > { %v25870_v9 = vpack.c.bf16 %v11925_v53, %v11918_v30  ;;  %v12386_v41 = vand.u32 4294901760, %v12385_v26  ;;  %v12393_v62 = vand.u32 4294901760, %v12392_v21  ;;  %v31464_v48 = vpack.c.bf16 %v12391_v19, %v12384_v6 }
 0xc60   : > { %11779 = vrot.lane.b32.xlu1 %v11753_v28, %s27891_s27  ;;  %11763 = vrot.lane.b32.xlu0 %v11749_v58, %s27889_s11  ;;  %v31468_v17 = vpack.c.bf16 %v12776_v61, %v12773_v3  ;;  %v12852_v44 = vand.u32 4294901760, %v31421_v59  ;;  %v12859_v39 = vand.u32 4294901760, %v31431_v49  ;;  %v25909_v29 = vpack.c.bf16 %v31431_v49, %v31421_v59 }
 0xc61   : > { %v31474_v63 = vpack.c.bf16 %v12393_v62, %v12386_v41  ;;  %v31476_v12 = vpack.c.bf16 %v13244_v47, %v13241_v37  ;;  %v13320_v36 = vand.u32 4294901760, %v31429_v7  ;;  %v13327_v60 = vand.u32 4294901760, %v31433_v13 }
 0xc62   : > { %v12853_v10 = vsub.f32 %v31421_v59, %v12852_v44  ;;  %v12860_v3 = vsub.f32 %v31431_v49, %v12859_v39  ;;  %v31482_v61 = vpack.c.bf16 %v12859_v39, %v12852_v44  ;;  %v25927_v4 = vpack.c.bf16 %v31433_v13, %v31429_v7 }
 0xc63   : > { %v13321_v42 = vsub.f32 %v31429_v7, %v13320_v36  ;;  %v13328_v57 = vsub.f32 %v31433_v13, %v13327_v60  ;;  %v31488_v16 = vpack.c.bf16 %v13327_v60, %v13320_v36  ;;  %v11726_v19 = vrot.slane %v31255_v27, %v35534_v51 }
 0xc64   : > { %11781 = vrot.lane.b32.xlu1 %v11754_v34, %s27891_s27  ;;  %11765 = vrot.lane.b32.xlu0 %v11750_v35, %s27889_s11  ;;  %v12854_v37 = vand.u32 4294901760, %v12853_v10  ;;  %v12861_v47 = vand.u32 4294901760, %v12860_v3  ;;  %v11730_v27 = vrot.slane %v31258_v54, %v35534_v51  ;;  %v17613_v51 = vld [vmem:[%s28537_s17 + $0x138] sm:$0xff] }
 0xc65   : > { %v13322_v25 = vand.u32 4294901760, %v13321_v42  ;;  %v13329_v46 = vand.u32 4294901760, %v13328_v57  ;;  %v11743_v31 = vadd.f32 %v11726_v19, %v31338_v11 }
 0xc66   : > { %v31492_v20 = vpack.c.bf16 %v12861_v47, %v12854_v37  ;;  %v11744_v5 = vadd.f32 %v11730_v27, %v31368_v18 }
 0xc67   : > { %v31494_v6 = vpack.c.bf16 %v13329_v46, %v13322_v25 }
 0xcbe   : > { %v11776_v43 = vpop.permute.xlu1 %11775  ;;  %v11760_v33 = vpop.permute.xlu0 %11759 }
 0xcbf   : > { %v11787_v55 = vsel %vm3183_vm1, %v11743_v31, %v11760_v33 }
 0xcc0   : > { %v11791_v30 = vsel %vm3188_vm2, %v11787_v55, %v11776_v43 }
 0xcc1   : > { %v11828_v53 = vsel %vm3209_vm3, %v11791_v30, 0 }
 0xcc2   : > { %v11903_v26 = vand.u32 4294901760, %v11828_v53 }
 0xcc4   : > { %v11904_v21 = vsub.f32 %v11828_v53, %v11903_v26 }
 0xcc5   : > { %v11762_v11 = vpop.permute.xlu0 %11761  ;;  %v11778_v38 = vpop.permute.xlu1 %11777 }
 0xcc6   : > { %v11905_v28 = vand.u32 4294901760, %v11904_v21 }
 0xcc8   : > { %v11906_v58 = vsub.f32 %v11904_v21, %v11905_v28 }
 0xcca   : > { %v11907_v34 = vand.u32 4294901760, %v11906_v58 }
 0xccc   : > { %24263 = vmatmul.mubr.f32.vlgmr.msra.gmra.mrb[36].mxu1 %v11907_v34 }
 0xccd   : > { %25871 = vmatpush3.bf16.xpose.msra.mxu1 %v25870_v9  ;;  %24269 = vmatprep.mubr.msk.f32.mxu1 %vm27888_vm0, %v35500_v50 }
 0xcce   : > { %25872 = vmatprep.subr.bf16.mxu1 %v35428_v56 }
 0xcd2   : > { %v11764_v39 = vpop.permute.xlu0 %11763 }
 0xcd3   : > { %v11789_v36 = vsel %vm3183_vm1, %v31454_v24, %v11764_v39 }
 0xcd4   : > { %24270 = vmatmul.mubr.f32.vlgmr.msra.gmra.mrb[36].mxu1 %v11903_v26 }
 0xcd5   : > { %25874 = vmatpush3.bf16.xpose.msra.mxu1 %v25873_v45  ;;  %24276 = vmatprep.mubr.msk.f32.mxu1 %vm27888_vm0, %v35500_v50  ;;  %v11788_v45 = vsel %vm3183_vm1, %v11744_v5, %v11762_v11 }
 0xcd6   : > { %25875 = vmatprep.subr.bf16.mxu1 %v35428_v56  ;;  %v11792_v35 = vsel %vm3188_vm2, %v11788_v45, %v11778_v38 }
 0xcd7   : > { %v12296_v54 = vsel %vm3209_vm3, %v11792_v35, 0 }
 0xcd8   : > { %v12371_v9 = vand.u32 4294901760, %v12296_v54 }
 0xcda   : > { %v12372_v18 = vsub.f32 %v12296_v54, %v12371_v9 }
 0xcdc   : > { %24277 = vmatmul.mubr.f32.vlgmr.msra.gmra.mrb[36].mxu1 %v11904_v21  ;;  %v12373_v41 = vand.u32 4294901760, %v12372_v18 }
 0xcdd   : > { %25877 = vmatpush3.bf16.xpose.msra.mxu1 %v31426_v32  ;;  %24283 = vmatprep.mubr.msk.f32.mxu1 %vm27888_vm0, %v35500_v50 }
 0xcde   : > { %25878 = vmatprep.subr.bf16.mxu1 %v35428_v56  ;;  %v12374_v62 = vsub.f32 %v12372_v18, %v12373_v41 }
 0xce4   : > { %24284 = vmatmul.mubr.f32.vlgmr.msra.gmra.mrb[36].mxu1 %v11905_v28 }
 0xce5   : > { %25880 = vmatpush3.bf16.xpose.msra.mxu1 %v31448_v23  ;;  %24290 = vmatprep.mubr.msk.f32.mxu1 %vm27888_vm0, %v35500_v50  ;;  %v31532_v23 = vpop.f32.mrb[36].mxu0 }
 0xce6   : > { %25881 = vmatprep.subr.bf16.mxu1 %v35428_v56  ;;  %v31535_v44 = vpop.f32.mrb[37].mxu0  ;;  %11341 = vrot.lane.b32.xlu1 %v31532_v23, %s27890_s29 }
 0xcec   : > { %24291 = vmatmul.mubr.f32.vlgmr.msra.gmra.mrb[36].mxu1 %v11903_v26 }
 0xced   : > { %25883 = vmatpush3.bf16.xpose.msra.mxu1 %v31426_v32  ;;  %24297 = vmatprep.mubr.msk.f32.mxu1 %vm27888_vm0, %v35500_v50  ;;  %v12375_v32 = vand.u32 4294901760, %v12374_v62 }
 0xcee   : > { %25884 = vmatprep.subr.bf16.mxu1 %v35428_v56 }
 0xcf4   : > { %24298 = vmatmul.mubr.f32.vlgmr.msra.gmra.mrb[36].mxu1 %v11903_v26 }
 0xcf5   : > { %25886 = vmatpush3.bf16.xpose.msra.mxu1 %v31441_v52  ;;  %24304 = vmatprep.mubr.msk.f32.mxu1 %vm27888_vm0, %v35500_v50 }
 0xcf6   : > { %25887 = vmatprep.subr.bf16.mxu1 %v35428_v56 }
 0xcfc   : > { %24305 = vmatmul.mubr.f32.vlgmr.msra.gmra.mrb[38].mxu1 %v12375_v32 }
 0xcfd   : > { %25889 = vmatpush3.bf16.xpose.msra.mxu1 %v31474_v63  ;;  %24311 = vmatprep.mubr.msk.f32.mxu1 %vm27888_vm0, %v35500_v50  ;;  %v11780_v63 = vpop.permute.xlu1 %11779 }
 0xcfe   : > { %25890 = vmatprep.subr.bf16.mxu1 %v35428_v56  ;;  %v11793_v40 = vsel %vm3188_vm2, %v11789_v36, %v11780_v63 }
 0xcff   : > { %v12764_v15 = vsel %vm3209_vm3, %v11793_v40, 0 }
 0xd01   : > { %v11782_v3 = vpop.permute.xlu1 %11781 }
 0xd04   : > { %24312 = vmatmul.mubr.f32.vlgmr.msra.gmra.mrb[38].mxu1 %v12371_v9 }
 0xd05   : > { %25892 = vmatpush3.bf16.xpose.msra.mxu1 %v25891_v14  ;;  %24318 = vmatprep.mubr.msk.f32.mxu1 %vm27888_vm0, %v35500_v50  ;;  %v12839_v14 = vand.u32 4294901760, %v12764_v15 }
 0xd06   : > { %25893 = vmatprep.subr.bf16.mxu1 %v35428_v56 }
 0xd07   : > { %v12840_v24 = vsub.f32 %v12764_v15, %v12839_v14 }
 0xd09   : > { %v12841_v60 = vand.u32 4294901760, %v12840_v24 }
 0xd0c   : > { %24319 = vmatmul.mubr.f32.vlgmr.msra.gmra.mrb[38].mxu1 %v12372_v18 }
 0xd0d   : > { %25895 = vmatpush3.bf16.xpose.msra.mxu1 %v31441_v52  ;;  %24325 = vmatprep.mubr.msk.f32.mxu1 %vm27888_vm0, %v35500_v50 }
 0xd0e   : > { %25896 = vmatprep.subr.bf16.mxu1 %v35428_v56 }
 0xd14   : > { %24326 = vmatmul.mubr.f32.vlgmr.msra.gmra.mrb[38].mxu1 %v12373_v41 }
 0xd15   : > { %25898 = vmatpush3.bf16.xpose.msra.mxu1 %v31464_v48  ;;  %24332 = vmatprep.mubr.msk.f32.mxu1 %vm27888_vm0, %v35500_v50  ;;  %v12842_v48 = vsub.f32 %v12840_v24, %v12841_v60 }
 0xd16   : > { %25899 = vmatprep.subr.bf16.mxu1 %v35428_v56 }
 0xd17   : > { %v12843_v10 = vand.u32 4294901760, %v12842_v48 }
 0xd1c   : > { %24333 = vmatmul.mubr.f32.vlgmr.msra.gmra.mrb[38].mxu1 %v12371_v9 }
 0xd1d   : > { %25901 = vmatpush3.bf16.xpose.msra.mxu1 %v31441_v52  ;;  %24339 = vmatprep.mubr.msk.f32.mxu1 %vm27888_vm0, %v35500_v50  ;;  %v11766_v52 = vpop.permute.xlu0 %11765 }
 0xd1e   : > { %25902 = vmatprep.subr.bf16.mxu1 %v35428_v56  ;;  %v11790_v42 = vsel %vm3183_vm1, %v31456_v8, %v11766_v52 }
 0xd1f   : > { %v11794_v59 = vsel %vm3188_vm2, %v11790_v42, %v11782_v3 }
 0xd20   : > { %v13232_v49 = vsel %vm3209_vm3, %v11794_v59, 0 }
 0xd24   : > { %24340 = vmatmul.mubr.f32.vlgmr.msra.gmra.mrb[38].mxu1 %v12371_v9 }
 0xd25   : > { %25904 = vmatpush3.bf16.xpose.msra.mxu1 %v31468_v17  ;;  %24346 = vmatprep.mubr.msk.f32.mxu1 %vm27888_vm0, %v35500_v50 }
 0xd26   : > { %25905 = vmatprep.subr.bf16.mxu1 %v35428_v56 }
 0xd2c   : > { %24347 = vmatmul.mubr.f32.vlgmr.msra.gmra.mrb[40].mxu1 %v12843_v10 }
 0xd2d   : > { %25907 = vmatpush3.bf16.xpose.msra.mxu1 %v31492_v20  ;;  %24353 = vmatprep.mubr.msk.f32.mxu1 %vm27888_vm0, %v35500_v50 }
 0xd2e   : > { %25908 = vmatprep.subr.bf16.mxu1 %v35428_v56 }
 0xd34   : > { %24354 = vmatmul.mubr.f32.vlgmr.msra.gmra.mrb[40].mxu1 %v12839_v14 }
 0xd35   : > { %25910 = vmatpush3.bf16.xpose.msra.mxu1 %v25909_v29  ;;  %24360 = vmatprep.mubr.msk.f32.mxu1 %vm27888_vm0, %v35500_v50  ;;  %v13307_v29 = vand.u32 4294901760, %v13232_v49 }
 0xd36   : > { %25911 = vmatprep.subr.bf16.mxu1 %v35428_v56 }
 0xd37   : > { %v13308_v8 = vsub.f32 %v13232_v49, %v13307_v29 }
 0xd39   : > { %v13309_v57 = vand.u32 4294901760, %v13308_v8 }
 0xd3c   : > { %24361 = vmatmul.mubr.f32.vlgmr.msra.gmra.mrb[40].mxu1 %v12840_v24 }
 0xd3d   : > { %25913 = vmatpush3.bf16.xpose.msra.mxu1 %v31468_v17  ;;  %24367 = vmatprep.mubr.msk.f32.mxu1 %vm27888_vm0, %v35500_v50 }
 0xd3e   : > { %25914 = vmatprep.subr.bf16.mxu1 %v35428_v56 }
 0xd44   : > { %24368 = vmatmul.mubr.f32.vlgmr.msra.gmra.mrb[40].mxu1 %v12841_v60 }
 0xd45   : > { %25916 = vmatpush3.bf16.xpose.msra.mxu1 %v31482_v61  ;;  %24374 = vmatprep.mubr.msk.f32.mxu1 %vm27888_vm0, %v35500_v50  ;;  %v13310_v61 = vsub.f32 %v13308_v8, %v13309_v57 }
 0xd46   : > { %25917 = vmatprep.subr.bf16.mxu1 %v35428_v56 }
 0xd47   : > { %v13311_v37 = vand.u32 4294901760, %v13310_v61 }
 0xd4c   : > { %24375 = vmatmul.mubr.f32.vlgmr.msra.gmra.mrb[40].mxu1 %v12839_v14 }
 0xd4d   : > { %25919 = vmatpush3.bf16.xpose.msra.mxu1 %v31468_v17  ;;  %24381 = vmatprep.mubr.msk.f32.mxu1 %vm27888_vm0, %v35500_v50 }
 0xd4e   : > { %25920 = vmatprep.subr.bf16.mxu1 %v35428_v56 }
 0xd54   : > { %24382 = vmatmul.mubr.f32.vlgmr.msra.gmra.mrb[40].mxu1 %v12839_v14 }
 0xd55   : > { %25922 = vmatpush3.bf16.xpose.msra.mxu1 %v31476_v12  ;;  %24388 = vmatprep.mubr.msk.f32.mxu1 %vm27888_vm0, %v35500_v50 }
 0xd56   : > { %25923 = vmatprep.subr.bf16.mxu1 %v35428_v56 }
 0xd58   : > { %v11342_v53 = vpop.permute.xlu1 %11341 }
 0xd5c   : > { %24389 = vmatmul.mubr.f32.vlgmr.msra.gmra.mrb[42].mxu1 %v13311_v37 }
 0xd5d   : > { %25925 = vmatpush3.bf16.xpose.msra.mxu1 %v31494_v6  ;;  %24395 = vmatprep.mubr.msk.f32.mxu1 %vm27888_vm0, %v35500_v50 }
 0xd5e   : > { %25926 = vmatprep.subr.bf16.mxu1 %v35428_v56 }
 0xd64   : > { %24396 = vmatmul.mubr.f32.vlgmr.msra.gmra.mrb[42].mxu1 %v13307_v29 }
 0xd65   : > { %25928 = vmatpush3.bf16.xpose.msra.mxu1 %v25927_v4  ;;  %24402 = vmatprep.mubr.msk.f32.mxu1 %vm27888_vm0, %v35500_v50 }
 0xd66   : > { %25929 = vmatprep.subr.bf16.mxu1 %v35428_v56 }
 0xd6c   : > { %24403 = vmatmul.mubr.f32.vlgmr.msra.gmra.mrb[42].mxu1 %v13308_v8 }
 0xd6d   : > { %25931 = vmatpush3.bf16.xpose.msra.mxu1 %v31476_v12  ;;  %24409 = vmatprep.mubr.msk.f32.mxu1 %vm27888_vm0, %v35500_v50 }
 0xd6e   : > { %25932 = vmatprep.subr.bf16.mxu1 %v35428_v56 }
 0xd74   : > { %24410 = vmatmul.mubr.f32.vlgmr.msra.gmra.mrb[42].mxu1 %v13309_v57 }
 0xd75   : > { %25934 = vmatpush3.bf16.xpose.msra.mxu1 %v31488_v16  ;;  %24416 = vmatprep.mubr.msk.f32.mxu1 %vm27888_vm0, %v35500_v50 }
 0xd76   : > { %25935 = vmatprep.subr.bf16.mxu1 %v35428_v56 }
 0xd7c   : > { %24417 = vmatmul.mubr.f32.vlgmr.msra.gmra.mrb[42].mxu1 %v13307_v29 }
 0xd7d   : > { %25937 = vmatpush3.bf16.xpose.msra.mxu1 %v31476_v12  ;;  %24423 = vmatprep.mubr.msk.f32.mxu1 %vm27888_vm0, %v35500_v50 }
 0xd7e   : > { %25956 = vmatprep.subr.bf16.mxu1 %v35428_v56 }
 0xd84   : > { %24424 = vmatmul.mubr.f32.vlgmr.msra.gmra.mrb[42].mxu1 %v13307_v29 }
 0xd85   : > { %24472 = vmatprep.mubr.msk.f32.mxu1 %vm27888_vm0, %v35500_v50 }
 0xdc7   : > { %v12291_v7 = vpop.f32.mrb[36].mxu1 }
 0xdc8   : > { %v24299_v13 = vpop.f32.mrb[37].mxu1  ;;  %v13700_v17 = vsel %vm13699_vm5, %v12291_v7, -inf }
 0xdc9   : > { %13701 = vmax.xlane.f32.xlu0 %v13700_v17 }
 0xddf   : > { %11339 = vrot.lane.b32.xlu0 %v31535_v44, %s27890_s29 }
 0xdf7   : > { %v12759_v4 = vpop.f32.mrb[38].mxu1 }
 0xdf8   : > { %v24341_v12 = vpop.f32.mrb[39].mxu1  ;;  %v13703_v16 = vsel %vm13699_vm5, %v12759_v4, -inf }
 0xdf9   : > { %13704 = vmax.xlane.f32.xlu1 %v13703_v16 }
 0xe0a   : > { %11345 = vrot.lane.b32.xlu1 %v31535_v44, %s27891_s27 }
 0xe27   : > { %v13227_v47 = vpop.f32.mrb[40].mxu1 }
 0xe28   : > { %v24383_v25 = vpop.f32.mrb[41].mxu1  ;;  %v13706_v46 = vsel %vm13699_vm5, %v13227_v47, -inf }
 0xe29   : > { %13707 = vmax.xlane.f32.xlu0 %v13706_v46 }
 0xe3f   : > { %11347 = vrot.lane.b32.xlu0 %v31532_v23, %s27891_s27 }
 0xe56   : > { %v13702_v20 = vpop.xlane.xlu0 %13701 }
 0xe57   : > { %v13695_v6 = vpop.f32.mrb[42].mxu1  ;;  %v13712_v19 = vsub.f32 %v12291_v7, %v13702_v20 }
 0xe58   : > { %v24425_v31 = vpop.f32.mrb[43].mxu1  ;;  %v13709_v33 = vsel %vm13699_vm5, %v13695_v6, -inf }
 0xe59   : > { %v13716_v43 = vmul.f32 1.442695, %v13712_v19 }
 0xe5a   : > { %v11340_v27 = vpop.permute.xlu0 %11339 }
 0xe5b   : > { %27340 = vpow2.f32 %v13716_v43 }
 0xe5e   : > { %13710 = vmax.xlane.f32.xlu0 %v13709_v33 }
 0xe65   : > { %v31633_v55 = vpop.eup %27340 }
 0xe66   : > { %v13724_v30 = vsel %vm13699_vm5, %v31633_v55, 0.0 }
 0xe67   : > { %13725 = vadd.xlane.f32.xlu1 %v13724_v30 }
 0xe74   : > { %11353 = vrot.lane.b32.xlu0 %v31532_v23, %s27889_s11 }
 0xe78   : > { %11351 = vrot.lane.b32.xlu1 %v31535_v44, %s27889_s11 }
 0xe86   : > { %v13705_v26 = vpop.xlane.xlu1 %13704 }
 0xe87   : > { %v13713_v21 = vsub.f32 %v12759_v4, %v13705_v26 }
 0xe89   : > { %v13718_v28 = vmul.f32 1.442695, %v13713_v21 }
 0xe8a   : > { %v11346_v63 = vpop.permute.xlu1 %11345 }
 0xe8b   : > { %27342 = vpow2.f32 %v13718_v28  ;;  %v11358_v57 = vcombine.high %v31535_v44, %v11346_v63 }
 0xe95   : > { %v31641_v58 = vpop.eup %27342 }
 0xe96   : > { %v13727_v34 = vsel %vm13699_vm5, %v31641_v58, 0.0 }
 0xe9c   : > { %13728 = vadd.xlane.f32.xlu1 %v13727_v34 }
 0xeb6   : > { %v13708_v11 = vpop.xlane.xlu0 %13707 }
 0xeb7   : > { %v13714_v5 = vsub.f32 %v13227_v47, %v13708_v11 }
 0xeb9   : > { %v13720_v38 = vmul.f32 1.442695, %v13714_v5 }
 0xeba   : > { %v11348_v54 = vpop.permute.xlu0 %11347 }
 0xebb   : > { %27344 = vpow2.f32 %v13720_v38  ;;  %v11425_v41 = vcombine.low %v31532_v23, %v11348_v54  ;;  %v11426_v62 = vcombine.high %v31532_v23, %v11348_v54  ;;  %v11357_v23 = vcombine.low %v31535_v44, %v11346_v63 }
 0xebc   : > { %v11372_v44 = vrot.slane %v11358_v57, %v35533_v22 }
 0xebd   : > { %v11433_v15 = vrot.slane %v11425_v41, %v35533_v22  ;;  %v11440_v14 = vrot.slane %v11426_v62, %v35533_v22  ;;  %v11365_v4 = vrot.slane %v11357_v23, %v35533_v22 }
 0xec5   : > { %v31645_v45 = vpop.eup %27344 }
 0xec6   : > { %v13730_v35 = vsel %vm13699_vm5, %v31645_v45, 0.0 }
 0xec7   : > { %13731 = vadd.xlane.f32.xlu0 %v13730_v35 }
 0xeeb   : > { %v13711_v9 = vpop.xlane.xlu0 %13710 }
 0xeec   : > { %v13715_v18 = vsub.f32 %v13695_v6, %v13711_v9 }
 0xeee   : > { %v13722_v32 = vmul.f32 1.442695, %v13715_v18 }
 0xeef   : > { %v11354_v39 = vpop.permute.xlu0 %11353 }
 0xef0   : > { %27346 = vpow2.f32 %v13722_v32  ;;  %v11441_v36 = vcombine.low %v11342_v53, %v11354_v39  ;;  %v11442_v40 = vcombine.high %v11342_v53, %v11354_v39 }
 0xef2   : > { %v11449_v24 = vrot.slane %v11441_v36, %v35533_v22  ;;  %v11456_v60 = vrot.slane %v11442_v40, %v35533_v22 }
 0xef4   : > { %v11457_v48 = vcombine.low %v11433_v15, %v11449_v24  ;;  %v11458_v10 = vcombine.high %v11433_v15, %v11449_v24  ;;  %v11473_v52 = vcombine.low %v11440_v14, %v11456_v60  ;;  %v11474_v3 = vcombine.high %v11440_v14, %v11456_v60  ;;  %v13726_v42 = vpop.xlane.xlu1 %13725 }
 0xef5   : > { %27348 = vrcp.f32 %v13726_v42 }
 0xef6   : > { %v11465_v59 = vrot.slane %v11457_v48, %v35535_v1  ;;  %v11472_v49 = vrot.slane %v11458_v10, %v35535_v1  ;;  %v11481_v29 = vrot.slane %v11473_v52, %v35535_v1  ;;  %v11488_v8 = vrot.slane %v11474_v3, %v35535_v1 }
 0xef8   : > { %v11561_v61 = vcombine.low %v11465_v59, %v11472_v49  ;;  %v21571_v37 = vcombine.high %v11465_v59, %v11472_v49  ;;  %v11577_v7 = vcombine.low %v11481_v29, %v11488_v8  ;;  %v21572_v13 = vcombine.high %v11481_v29, %v11488_v8  ;;  %v11352_v17 = vpop.permute.xlu1 %11351 }
 0xef9   : > { %v11373_v12 = vcombine.low %v11340_v27, %v11352_v17  ;;  %v11374_v16 = vcombine.high %v11340_v27, %v11352_v17 }
 0xefa   : > { %v31662_v47 = vpop.eup %27346  ;;  %v11568_v25 = vrot.slane %v11561_v61, %v35533_v22  ;;  %v11576_v46 = vrot.slane %v21571_v37, %v35533_v22  ;;  %v11584_v20 = vrot.slane %v11577_v7, %v35533_v22  ;;  %v11592_v6 = vrot.slane %v21572_v13, %v35533_v22 }
 0xefb   : > { %v11381_v19 = vrot.slane %v11373_v12, %v35533_v22  ;;  %v11388_v31 = vrot.slane %v11374_v16, %v35533_v22  ;;  %v13733_v43 = vsel %vm13699_vm5, %v31662_v47, 0.0 }
 0xefc   : > { %v11593_v33 = vcombine.low %v11568_v25, %v11576_v46  ;;  %v11594_v30 = vcombine.high %v11568_v25, %v11576_v46  ;;  %v11609_v53 = vcombine.low %v11584_v20, %v11592_v6  ;;  %v11610_v26 = vcombine.high %v11584_v20, %v11592_v6  ;;  %13734 = vadd.xlane.f32.xlu0 %v13733_v43 }
 0xefd   : > { %v11389_v21 = vcombine.low %v11365_v4, %v11381_v19  ;;  %v11390_v28 = vcombine.high %v11365_v4, %v11381_v19  ;;  %v11405_v34 = vcombine.low %v11372_v44, %v11388_v31  ;;  %v11406_v27 = vcombine.high %v11372_v44, %v11388_v31 }
 0xefe   : > { %v11601_v11 = vrot.slane %v11593_v33, %v35535_v1  ;;  %v11617_v5 = vrot.slane %v11609_v53, %v35535_v1  ;;  %v11608_v38 = vrot.slane %v11594_v30, %v35535_v1  ;;  %v11624_v35 = vrot.slane %v11610_v26, %v35535_v1 }
 0xeff   : > { %v27349_v54 = vpop.eup %27348  ;;  %v11397_v9 = vrot.slane %v11389_v21, %v35535_v1  ;;  %v11404_v18 = vrot.slane %v11390_v28, %v35535_v1  ;;  %v11413_v41 = vrot.slane %v11405_v34, %v35535_v1  ;;  %v11420_v62 = vrot.slane %v11406_v27, %v35535_v1 }
 0xf00   : > { %v13737_v32 = vmul.f32 %v27349_v54, %v31633_v55  ;;  %v11625_v39 = vcombine.low %v11601_v11, %v11617_v5  ;;  %v11626_v63 = vcombine.high %v11601_v11, %v11617_v5  ;;  %v11627_v36 = vcombine.low %v11608_v38, %v11624_v35 }
 0xf01   : > { %v11493_v40 = vcombine.low %v11397_v9, %v11404_v18  ;;  %v21569_v15 = vcombine.high %v11397_v9, %v11404_v18  ;;  %v11509_v14 = vcombine.low %v11413_v41, %v11420_v62  ;;  %v21570_v24 = vcombine.high %v11413_v41, %v11420_v62 }
 0xf02   : > { %v13751_v60 = vand.u32 4294901760, %v11625_v39  ;;  %v14213_v48 = vand.u32 4294901760, %v11626_v63  ;;  %v13745_v10 = vsel %vm13699_vm5, %v13737_v32, 0  ;;  %v14675_v29 = vand.u32 4294901760, %v11627_v36 }
 0xf03   : > { %v11500_v52 = vrot.slane %v11493_v40, %v35533_v22  ;;  %v11508_v3 = vrot.slane %v21569_v15, %v35533_v22  ;;  %v11516_v42 = vrot.slane %v11509_v14, %v35533_v22  ;;  %v11524_v23 = vrot.slane %v21570_v24, %v35533_v22 }
 0xf04   : > { %v31687_v55 = vsub.f32 %v11625_v39, %v13751_v60  ;;  %v31689_v59 = vsub.f32 %v11626_v63, %v14213_v48  ;;  %v31691_v49 = vand.u32 4294901760, %v13745_v10  ;;  %v11628_v4 = vcombine.high %v11608_v38, %v11624_v35 }
 0xf05   : > { %v11525_v8 = vcombine.low %v11500_v52, %v11508_v3  ;;  %v11526_v57 = vcombine.high %v11500_v52, %v11508_v3  ;;  %v11541_v61 = vcombine.low %v11516_v42, %v11524_v23  ;;  %v11542_v37 = vcombine.high %v11516_v42, %v11524_v23 }
 0xf06   : > { %v31694_v7 = vsub.f32 %v13745_v10, %v31691_v49  ;;  %v13834_v13 = vand.u32 4294901760, %v31687_v55  ;;  %v14296_v17 = vand.u32 4294901760, %v31689_v59  ;;  %v31704_v6 = vsub.f32 %v11627_v36, %v14675_v29 }
 0xf07   : > { %v11533_v22 = vrot.slane %v11525_v8, %v35535_v1  ;;  %v11549_v12 = vrot.slane %v11541_v61, %v35535_v1  ;;  %v11540_v16 = vrot.slane %v11526_v57, %v35535_v1  ;;  %v11556_v25 = vrot.slane %v11542_v37, %v35535_v1 }
 0xf08   : > { %v13816_v46 = vand.u32 4294901760, %v31694_v7  ;;  %v13835_v20 = vsub.f32 %v31687_v55, %v13834_v13  ;;  %v15137_v44 = vand.u32 4294901760, %v11628_v4  ;;  %v14297_v53 = vsub.f32 %v31689_v59, %v14296_v17 }
 0xf09   : > { %v11557_v19 = vcombine.low %v11533_v22, %v11549_v12  ;;  %v11558_v31 = vcombine.high %v11533_v22, %v11549_v12  ;;  %v11559_v43 = vcombine.low %v11540_v16, %v11556_v25  ;;  %v11560_v33 = vcombine.high %v11540_v16, %v11556_v25 }
 0xf0a   : > { %v13817_v30 = vsub.f32 %v31694_v7, %v13816_v46  ;;  %v31710_v26 = vsub.f32 %v11628_v4, %v15137_v44  ;;  %v13836_v11 = vand.u32 4294901760, %v13835_v20  ;;  %v14758_v5 = vand.u32 4294901760, %v31704_v6 }
 0xf0b   : > { %v13748_v1 = vand.u32 4294901760, %v11557_v19  ;;  %v14210_v21 = vand.u32 4294901760, %v11558_v31  ;;  %v14672_v28 = vand.u32 4294901760, %v11559_v43  ;;  %v15134_v34 = vand.u32 4294901760, %v11560_v33 }
 0xf0c   : > { %v13818_v27 = vand.u32 4294901760, %v13817_v30  ;;  %v15220_v38 = vand.u32 4294901760, %v31710_v26  ;;  %v14759_v24 = vsub.f32 %v31704_v6, %v14758_v5  ;;  %v14298_v23 = vand.u32 4294901760, %v14297_v53 }
 0xf0d   : > { %v25939_v35 = vpack.c.bf16 %v13751_v60, %v13748_v1  ;;  %v13826_v54 = vsub.f32 %v11557_v19, %v13748_v1  ;;  %v31714_v9 = vpack.c.bf16 %v14213_v48, %v14210_v21  ;;  %v31716_v18 = vsub.f32 %v11558_v31, %v14210_v21 }
 0xf0e   : > { %v31718_v41 = vpack.c.bf16 %v14675_v29, %v14672_v28  ;;  %v31720_v62 = vsub.f32 %v11559_v43, %v14672_v28  ;;  %v31722_v32 = vpack.c.bf16 %v15137_v44, %v15134_v34  ;;  %v31724_v39 = vsub.f32 %v11560_v33, %v15134_v34 }
 0xf0f   : > { %25940 = vmatpush3.bf16.msra.mxu0 %v25939_v35  ;;  %25958 = vmatpush3.bf16.msra.mxu1 %v31714_v9  ;;  %v13827_v63 = vand.u32 4294901760, %v13826_v54  ;;  %v25945_v36 = vpack.c.bf16 %v31687_v55, %v13826_v54  ;;  %v14289_v40 = vand.u32 4294901760, %v31716_v18  ;;  %v25963_v15 = vpack.c.bf16 %v31689_v59, %v31716_v18 }
 0xf10   : > { %25941 = vmatprep.subr.bf16.mxu0 %v35428_v56  ;;  %25959 = vmatprep.subr.bf16.mxu1 %v35428_v56  ;;  %v14751_v14 = vand.u32 4294901760, %v31720_v62  ;;  %v25981_v60 = vpack.c.bf16 %v31704_v6, %v31720_v62  ;;  %v15213_v48 = vand.u32 4294901760, %v31724_v39  ;;  %v15221_v37 = vsub.f32 %v31710_v26, %v15220_v38  ;;  %v11633_v6 = vld [vmem:[%s28535_s30] sm:$0xff] }
 0xf11   : > { %v13828_v10 = vsub.f32 %v13826_v54, %v13827_v63  ;;  %v25951_v52 = vpack.c.bf16 %v13834_v13, %v13827_v63  ;;  %v14290_v3 = vsub.f32 %v31716_v18, %v14289_v40  ;;  %v31739_v42 = vpack.c.bf16 %v14296_v17, %v14289_v40  ;;  %v11635_v18 = vld [vmem:[%s28535_s30 + $0x10] sm:$0xff] }
 0xf12   : > { %24431 = vmatmul.mubr.f32.vlgmr.msra.gmra.mrb[38].mxu0 %v13818_v27  ;;  %v14752_v55 = vsub.f32 %v31720_v62, %v14751_v14  ;;  %v31742_v29 = vpack.c.bf16 %v14758_v5, %v14751_v14  ;;  %v15214_v8 = vsub.f32 %v31724_v39, %v15213_v48  ;;  %v25999_v13 = vpack.c.bf16 %v31710_v26, %v31724_v39  ;;  %v11636_v62 = vld [vmem:[%s28535_s30 + $0x18] sm:$0xff] }
 0xf13   : > { %v13829_v57 = vand.u32 4294901760, %v13828_v10  ;;  %24437 = vmatprep.mubr.msk.f32.mxu0 %vm27888_vm0, %v35500_v50  ;;  %v14291_v61 = vand.u32 4294901760, %v14290_v3  ;;  %v14760_v4 = vand.u32 4294901760, %v14759_v24  ;;  %v31750_v12 = vpack.c.bf16 %v15220_v38, %v15213_v48 }
 0xf14   : > { %v14753_v17 = vand.u32 4294901760, %v14752_v55  ;;  %v15215_v22 = vand.u32 4294901760, %v15214_v8  ;;  %v15222_v20 = vand.u32 4294901760, %v15221_v37  ;;  %v15602_v40 = vand.u32 4294901760, %v11635_v18 }
 0xf15   : > { %v25942_v16 = vpack.c.bf16 %v13836_v11, %v13829_v57  ;;  %v25960_v25 = vpack.c.bf16 %v14298_v23, %v14291_v61 }
 0xf16   : > { %v31752_v44 = vpack.c.bf16 %v14760_v4, %v14753_v17  ;;  %v31754_v19 = vpack.c.bf16 %v15222_v20, %v15215_v22 }
 0xf17   : > { %25943 = vmatpush3.bf16.msra.mxu0 %v25942_v16 }
 0xf18   : > { %25944 = vmatprep.subr.bf16.mxu0 %v35428_v56 }
 0xf1a   : > { %24438 = vmatmul.mubr.f32.vlgmr.msra.gmra.mrb[38].mxu0 %v31691_v49 }
 0xf1b   : > { %25946 = vmatpush3.bf16.msra.mxu0 %v25945_v36  ;;  %24444 = vmatprep.mubr.msk.f32.mxu0 %vm27888_vm0, %v35500_v50 }
 0xf1c   : > { %25947 = vmatprep.subr.bf16.mxu0 %v35428_v56 }
 0xf22   : > { %24445 = vmatmul.mubr.f32.vlgmr.msra.gmra.mrb[38].mxu0 %v31694_v7 }
 0xf23   : > { %25949 = vmatpush3.bf16.msra.mxu0 %v25939_v35  ;;  %24451 = vmatprep.mubr.msk.f32.mxu0 %vm27888_vm0, %v35500_v50 }
 0xf24   : > { %25950 = vmatprep.subr.bf16.mxu0 %v35428_v56 }
 0xf29   : > { %v13729_v31 = vpop.xlane.xlu1 %13728 }
 0xf2a   : > { %27350 = vrcp.f32 %v13729_v31  ;;  %24452 = vmatmul.mubr.f32.vlgmr.msra.gmra.mrb[38].mxu0 %v13816_v46 }
 0xf2b   : > { %25952 = vmatpush3.bf16.msra.mxu0 %v25951_v52  ;;  %24458 = vmatprep.mubr.msk.f32.mxu0 %vm27888_vm0, %v35500_v50 }
 0xf2c   : > { %25953 = vmatprep.subr.bf16.mxu0 %v35428_v56 }
 0xf32   : > { %24459 = vmatmul.mubr.f32.vlgmr.msra.gmra.mrb[38].mxu0 %v31691_v49 }
 0xf33   : > { %25955 = vmatpush3.bf16.msra.mxu0 %v25939_v35  ;;  %24465 = vmatprep.mubr.msk.f32.mxu0 %vm27888_vm0, %v35500_v50  ;;  %v11634_v35 = vld [vmem:[%s28535_s30 + $0x8] sm:$0xff] }
 0xf34   : > { %v27351_v43 = vpop.eup %27350  ;;  %25974 = vmatprep.subr.bf16.mxu0 %v35428_v56  ;;  %v15599_v36 = vand.u32 4294901760, %v11634_v35 }
 0xf35   : > { %v13739_v33 = vmul.f32 %v27351_v43, %v31641_v58 }
 0xf36   : > { %v31872_v61 = vsub.f32 %v11634_v35, %v15599_v36 }
 0xf37   : > { %v14207_v7 = vsel %vm13699_vm5, %v13739_v33, 0  ;;  %v31905_v33 = vld [vmem:[%s28535_s30 + $0x30] sm:$0xff] }
 0xf38   : > { %v14276_v46 = vand.u32 4294901760, %v14207_v7  ;;  %v15684_v39 = vand.u32 4294901760, %v31872_v61 }
 0xf3a   : > { %24466 = vmatmul.mubr.f32.vlgmr.msra.gmra.mrb[38].mxu0 %v31691_v49  ;;  %v14277_v30 = vsub.f32 %v14207_v7, %v14276_v46  ;;  %v31908_v7 = vld [vmem:[%s28535_s30 + $0x38] sm:$0xff] }
 0xf3b   : > { %25976 = vmatpush3.bf16.msra.mxu0 %v31718_v41  ;;  %24514 = vmatprep.mubr.msk.f32.mxu0 %vm27888_vm0, %v35500_v50 }
 0xf3c   : > { %v14278_v53 = vand.u32 4294901760, %v14277_v30  ;;  %25977 = vmatprep.subr.bf16.mxu0 %v35428_v56 }
 0xf3e   : > { %v14279_v1 = vsub.f32 %v14277_v30, %v14278_v53 }
 0xf40   : > { %v14280_v21 = vand.u32 4294901760, %v14279_v1 }
 0xf42   : > { %24473 = vmatmul.mubr.f32.vlgmr.msra.gmra.mrb[44].mxu1 %v14280_v21 }
 0xf43   : > { %25961 = vmatpush3.bf16.msra.mxu1 %v25960_v25  ;;  %24479 = vmatprep.mubr.msk.f32.mxu1 %vm27888_vm0, %v35500_v50 }
 0xf44   : > { %25962 = vmatprep.subr.bf16.mxu1 %v35428_v56 }
 0xf4a   : > { %24480 = vmatmul.mubr.f32.vlgmr.msra.gmra.mrb[44].mxu1 %v14276_v46 }
 0xf4b   : > { %25964 = vmatpush3.bf16.msra.mxu1 %v25963_v15  ;;  %24486 = vmatprep.mubr.msk.f32.mxu1 %vm27888_vm0, %v35500_v50  ;;  %v15605_v15 = vand.u32 4294901760, %v11636_v62 }
 0xf4c   : > { %25965 = vmatprep.subr.bf16.mxu1 %v35428_v56 }
 0xf4d   : > { %v31842_v48 = vsub.f32 %v11636_v62, %v15605_v15  ;;  %v31845_v10 = vpack.c.bf16 %v15605_v15, %v15602_v40 }
 0xf52   : > { %24487 = vmatmul.mubr.f32.vlgmr.msra.gmra.mrb[44].mxu1 %v14277_v30 }
 0xf53   : > { %25967 = vmatpush3.bf16.msra.mxu1 %v31714_v9  ;;  %24493 = vmatprep.mubr.msk.f32.mxu1 %vm27888_vm0, %v35500_v50 }
 0xf54   : > { %v13732_v58 = vpop.xlane.xlu0 %13731  ;;  %25968 = vmatprep.subr.bf16.mxu1 %v35428_v56 }
 0xf55   : > { %27352 = vrcp.f32 %v13732_v58 }
 0xf5a   : > { %24494 = vmatmul.mubr.f32.vlgmr.msra.gmra.mrb[44].mxu1 %v14278_v53 }
 0xf5b   : > { %25970 = vmatpush3.bf16.msra.mxu1 %v31739_v42  ;;  %24500 = vmatprep.mubr.msk.f32.mxu1 %vm27888_vm0, %v35500_v50 }
 0xf5c   : > { %25971 = vmatprep.subr.bf16.mxu1 %v35428_v56 }
 0xf5f   : > { %v27353_v59 = vpop.eup %27352 }
 0xf60   : > { %v13741_v49 = vmul.f32 %v27353_v59, %v31645_v45  ;;  %v16090_v59 = vand.u32 4294901760, %v31905_v33 }
 0xf62   : > { %24501 = vmatmul.mubr.f32.vlgmr.msra.gmra.mrb[44].mxu1 %v14276_v46  ;;  %v14669_v28 = vsel %vm13699_vm5, %v13741_v49, 0  ;;  %v16093_v49 = vand.u32 4294901760, %v31908_v7 }
 0xf63   : > { %25973 = vmatpush3.bf16.msra.mxu1 %v31714_v9  ;;  %24507 = vmatprep.mubr.msk.f32.mxu1 %vm27888_vm0, %v35500_v50  ;;  %v14738_v34 = vand.u32 4294901760, %v14669_v28  ;;  %v15596_v9 = vand.u32 4294901760, %v11633_v6 }
 0xf64   : > { %25992 = vmatprep.subr.bf16.mxu1 %v35428_v56 }
 0xf65   : > { %v14739_v27 = vsub.f32 %v14669_v28, %v14738_v34  ;;  %v31838_v14 = vpack.c.bf16 %v15599_v36, %v15596_v9  ;;  %v31870_v57 = vsub.f32 %v11633_v6, %v15596_v9 }
 0xf67   : > { %v14740_v11 = vand.u32 4294901760, %v14739_v27  ;;  %v15677_v26 = vand.u32 4294901760, %v31870_v57  ;;  %v26023_v6 = vpack.c.bf16 %v31872_v61, %v31870_v57 }
 0xf69   : > { %v14741_v5 = vsub.f32 %v14739_v27, %v14740_v11  ;;  %v15678_v37 = vsub.f32 %v31870_v57, %v15677_v26 }
 0xf6a   : > { %24508 = vmatmul.mubr.f32.vlgmr.msra.gmra.mrb[44].mxu1 %v14276_v46 }
 0xf6b   : > { %25994 = vmatpush3.bf16.msra.mxu1 %v31722_v32  ;;  %v14742_v38 = vand.u32 4294901760, %v14741_v5  ;;  %24556 = vmatprep.mubr.msk.f32.mxu1 %vm27888_vm0, %v35500_v50  ;;  %v15679_v17 = vand.u32 4294901760, %v15678_v37  ;;  %v31926_v5 = vsub.f32 %v31905_v33, %v16090_v59 }
 0xf6c   : > { %25995 = vmatprep.subr.bf16.mxu1 %v35428_v56 }
 0xf6d   : > { %24515 = vmatmul.mubr.f32.vlgmr.msra.gmra.mrb[40].mxu0 %v14742_v38  ;;  %v31929_v38 = vsub.f32 %v31908_v7, %v16093_v49 }
 0xf6e   : > { %25979 = vmatpush3.bf16.msra.mxu0 %v31752_v44  ;;  %24521 = vmatprep.mubr.msk.f32.mxu0 %vm27888_vm0, %v35500_v50  ;;  %v31897_v44 = vld [vmem:[%s28535_s30 + $0x20] sm:$0xff] }
 0xf6f   : > { %25980 = vmatprep.subr.bf16.mxu0 %v35428_v56  ;;  %v16084_v31 = vand.u32 4294901760, %v31897_v44  ;;  %v16186_v62 = vand.u32 4294901760, %v31929_v38 }
 0xf71   : > { %v31912_v1 = vsub.f32 %v31897_v44, %v16084_v31  ;;  %v16187_v15 = vsub.f32 %v31929_v38, %v16186_v62 }
 0xf75   : > { %24522 = vmatmul.mubr.f32.vlgmr.msra.gmra.mrb[40].mxu0 %v14738_v34 }
 0xf76   : > { %25982 = vmatpush3.bf16.msra.mxu0 %v25981_v60  ;;  %24528 = vmatprep.mubr.msk.f32.mxu0 %vm27888_vm0, %v35500_v50  ;;  %v31840_v60 = vsub.f32 %v11635_v18, %v15602_v40  ;;  %v16179_v18 = vand.u32 4294901760, %v31926_v5 }
 0xf77   : > { %25983 = vmatprep.subr.bf16.mxu0 %v35428_v56 }
 0xf78   : > { %v26026_v52 = vpack.c.bf16 %v31842_v48, %v31840_v60  ;;  %v15691_v55 = vand.u32 4294901760, %v31840_v60  ;;  %v16180_v40 = vsub.f32 %v31926_v5, %v16179_v18 }
 0xf7a   : > { %v15692_v22 = vsub.f32 %v31840_v60, %v15691_v55 }
 0xf7c   : > { %v15693_v25 = vand.u32 4294901760, %v15692_v22 }
 0xf7d   : > { %24529 = vmatmul.mubr.f32.vlgmr.msra.gmra.mrb[40].mxu0 %v14739_v27 }
 0xf7e   : > { %25985 = vmatpush3.bf16.msra.mxu0 %v31718_v41  ;;  %24535 = vmatprep.mubr.msk.f32.mxu0 %vm27888_vm0, %v35500_v50 }
 0xf7f   : > { %25986 = vmatprep.subr.bf16.mxu0 %v35428_v56 }
 0xf85   : > { %24536 = vmatmul.mubr.f32.vlgmr.msra.gmra.mrb[40].mxu0 %v14740_v11 }
 0xf86   : > { %25988 = vmatpush3.bf16.msra.mxu0 %v31742_v29  ;;  %24542 = vmatprep.mubr.msk.f32.mxu0 %vm27888_vm0, %v35500_v50  ;;  %v15698_v29 = vand.u32 4294901760, %v31842_v48 }
 0xf87   : > { %25989 = vmatprep.subr.bf16.mxu0 %v35428_v56 }
 0xf88   : > { %v31857_v8 = vpack.c.bf16 %v15698_v29, %v15691_v55  ;;  %v31988_v55 = vld [vmem:[%s28535_s30 + $0x50] sm:$0xff] }
 0xf89   : > { %v13735_v45 = vpop.xlane.xlu0 %13734 }
 0xf8a   : > { %27354 = vrcp.f32 %v13735_v45 }
 0xf8d   : > { %24543 = vmatmul.mubr.f32.vlgmr.msra.gmra.mrb[40].mxu0 %v14738_v34 }
 0xf8e   : > { %25991 = vmatpush3.bf16.msra.mxu0 %v31718_v41  ;;  %24549 = vmatprep.mubr.msk.f32.mxu0 %vm27888_vm0, %v35500_v50 }
 0xf8f   : > { %26010 = vmatprep.subr.bf16.mxu0 %v35428_v56 }
 0xf94   : > { %v27355_v54 = vpop.eup %27354 }
 0xf95   : > { %v13743_v63 = vmul.f32 %v27355_v54, %v31662_v47  ;;  %24550 = vmatmul.mubr.f32.vlgmr.msra.gmra.mrb[40].mxu0 %v14738_v34  ;;  %v16165_v34 = vand.u32 4294901760, %v31912_v1 }
 0xf96   : > { %24602 = vmatprep.mubr.msk.f32.mxu0 %vm27888_vm0, %v35500_v50  ;;  %26012 = vmatpush3.bf16.msra.mxu0 %v31838_v14 }
 0xf97   : > { %v15131_v41 = vsel %vm13699_vm5, %v13743_v63, 0  ;;  %26013 = vmatprep.subr.bf16.mxu0 %v35428_v56  ;;  %v16166_v35 = vsub.f32 %v31912_v1, %v16165_v34 }
 0xf98   : > { %v15200_v24 = vand.u32 4294901760, %v15131_v41 }
 0xf99   : > { %v16167_v63 = vand.u32 4294901760, %v16166_v35 }
 0xf9a   : > { %v15201_v47 = vsub.f32 %v15131_v41, %v15200_v24  ;;  %26015 = vmatpush3.bf16.msra.mxu0 %v31845_v10  ;;  %v26035_v41 = vpack.c.bf16 %v15684_v39, %v15677_v26 }
 0xf9b   : > { %26022 = vmatprep.subr.bf16.mxu0 %v35428_v56 }
 0xf9c   : > { %v15202_v3 = vand.u32 4294901760, %v15201_v47 }
 0xf9e   : > { %v15203_v42 = vsub.f32 %v15201_v47, %v15202_v3 }
 0xfa0   : > { %v15204_v23 = vand.u32 4294901760, %v15203_v42 }
 0xfa2   : > { %24557 = vmatmul.mubr.f32.vlgmr.msra.gmra.mrb[46].mxu1 %v15204_v23 }
 0xfa3   : > { %25997 = vmatpush3.bf16.msra.mxu1 %v31754_v19  ;;  %24563 = vmatprep.mubr.msk.f32.mxu1 %vm27888_vm0, %v35500_v50  ;;  %v31900_v19 = vld [vmem:[%s28535_s30 + $0x28] sm:$0xff] }
 0xfa4   : > { %25998 = vmatprep.subr.bf16.mxu1 %v35428_v56  ;;  %v16087_v43 = vand.u32 4294901760, %v31900_v19 }
 0xfa6   : > { %v31915_v58 = vsub.f32 %v31900_v19, %v16087_v43 }
 0xfa8   : > { %v16172_v11 = vand.u32 4294901760, %v31915_v58  ;;  %v26059_v44 = vpack.c.bf16 %v31915_v58, %v31912_v1 }
 0xfaa   : > { %24564 = vmatmul.mubr.f32.vlgmr.msra.gmra.mrb[46].mxu1 %v15200_v24  ;;  %v16173_v9 = vsub.f32 %v31915_v58, %v16172_v11 }
 0xfab   : > { %26000 = vmatpush3.bf16.msra.mxu1 %v25999_v13  ;;  %24570 = vmatprep.mubr.msk.f32.mxu1 %vm27888_vm0, %v35500_v50  ;;  %v15685_v13 = vsub.f32 %v31872_v61, %v15684_v39 }
 0xfac   : > { %26001 = vmatprep.subr.bf16.mxu1 %v35428_v56  ;;  %v16174_v36 = vand.u32 4294901760, %v16173_v9  ;;  %v32076_v9 = vld [vmem:[%s28535_s30 + $0x78] sm:$0xff] }
 0xfad   : > { %v15686_v4 = vand.u32 4294901760, %v15685_v13  ;;  %v16578_v13 = vand.u32 4294901760, %v31988_v55 }
 0xfaf   : > { %v26017_v16 = vpack.c.bf16 %v15686_v4, %v15679_v17 }
 0xfb2   : > { %24571 = vmatmul.mubr.f32.vlgmr.msra.gmra.mrb[46].mxu1 %v15201_v47  ;;  %v16188_v47 = vand.u32 4294901760, %v16187_v15 }
 0xfb3   : > { %26003 = vmatpush3.bf16.msra.mxu1 %v31722_v32  ;;  %24577 = vmatprep.mubr.msk.f32.mxu1 %vm27888_vm0, %v35500_v50 }
 0xfb4   : > { %26004 = vmatprep.subr.bf16.mxu1 %v35428_v56 }
 0xfba   : > { %24578 = vmatmul.mubr.f32.vlgmr.msra.gmra.mrb[46].mxu1 %v15202_v3  ;;  %v31983_v3 = vld [vmem:[%s28535_s30 + $0x48] sm:$0xff] }
 0xfbb   : > { %26006 = vmatpush3.bf16.msra.mxu1 %v31750_v12  ;;  %24584 = vmatprep.mubr.msk.f32.mxu1 %vm27888_vm0, %v35500_v50  ;;  %v15699_v12 = vsub.f32 %v31842_v48, %v15698_v29  ;;  %v26047_v48 = vpack.c.bf16 %v16087_v43, %v16084_v31  ;;  %v16575_v23 = vand.u32 4294901760, %v31983_v3  ;;  %v31991_v29 = vld [vmem:[%s28535_s30 + $0x58] sm:$0xff] }
 0xfbc   : > { %26007 = vmatprep.subr.bf16.mxu1 %v35428_v56  ;;  %v16581_v17 = vand.u32 4294901760, %v31991_v29 }
 0xfbd   : > { %v15700_v20 = vand.u32 4294901760, %v15699_v12  ;;  %v32000_v37 = vsub.f32 %v31983_v3, %v16575_v23 }
 0xfc2   : > { %24585 = vmatmul.mubr.f32.vlgmr.msra.gmra.mrb[46].mxu1 %v15200_v24 }
 0xfc3   : > { %26009 = vmatpush3.bf16.msra.mxu1 %v31722_v32  ;;  %24591 = vmatprep.mubr.msk.f32.mxu1 %vm27888_vm0, %v35500_v50  ;;  %v26020_v32 = vpack.c.bf16 %v15700_v20, %v15693_v25  ;;  %v32010_v25 = vsub.f32 %v31988_v55, %v16578_v13  ;;  %v32013_v20 = vsub.f32 %v31991_v29, %v16581_v17 }
 0xfc4   : > { %26016 = vmatprep.subr.bf16.mxu1 %v35428_v56 }
 0xfc5   : > { %v16667_v33 = vand.u32 4294901760, %v32010_v25  ;;  %v16674_v7 = vand.u32 4294901760, %v32013_v20 }
 0xfca   : > { %24592 = vmatmul.mubr.f32.vlgmr.msra.gmra.mrb[46].mxu1 %v15200_v24  ;;  %v16181_v24 = vand.u32 4294901760, %v16180_v40 }
 0xfcb   : > { %26018 = vmatpush3.bf16.msra.mxu1 %v26017_v16  ;;  %24613 = vmatprep.mubr.msk.f32.mxu1 %vm27888_vm0, %v35500_v50  ;;  %v16660_v16 = vand.u32 4294901760, %v32000_v37 }
 0xfcc   : > { %26019 = vmatprep.subr.bf16.mxu1 %v35428_v56  ;;  %v26056_v60 = vpack.c.bf16 %v16188_v47, %v16181_v24 }
 0xfcd   : > { %v16661_v43 = vsub.f32 %v32000_v37, %v16660_v16 }
 0xfcf   : > { %26021 = vmatpush3.bf16.msra.mxu1 %v26020_v32 }
 0xfd0   : > { %26028 = vmatprep.subr.bf16.mxu1 %v35428_v56 }
0x100d   : > { %v14202_v46 = vpop.f32.mrb[38].mxu0 }
0x100e   : > { %v15593_v30 = vsel %vm3183_vm1, %v14202_v46, 0  ;;  %v24467_v53 = vpop.f32.mrb[39].mxu0  ;;  %v26062_v46 = vpack.c.bf16 %v31929_v38, %v31926_v5  ;;  %v32068_v5 = vld [vmem:[%s28535_s30 + $0x68] sm:$0xff] }
0x100f   : > { %v15664_v21 = vand.u32 4294901760, %v15593_v30  ;;  %v16662_v53 = vand.u32 4294901760, %v16661_v43  ;;  %v17063_v35 = vand.u32 4294901760, %v32068_v5 }
0x1011   : > { %v15665_v28 = vsub.f32 %v15593_v30, %v15664_v21  ;;  %24614 = vmatmul.mubr.f32.vlgmr.msra.gmra.mrb[48].mxu1 %v15664_v21  ;;  %v32085_v15 = vsub.f32 %v32068_v5, %v17063_v35 }
0x1012   : > { %26030 = vmatpush3.bf16.msra.mxu1 %v31838_v14  ;;  %24635 = vmatprep.mubr.msk.f32.mxu1 %vm27888_vm0, %v35500_v50 }
0x1013   : > { %v15666_v27 = vand.u32 4294901760, %v15665_v28  ;;  %26031 = vmatprep.subr.bf16.mxu1 %v35428_v56 }
0x1015   : > { %v15667_v45 = vsub.f32 %v15665_v28, %v15666_v27 }
0x1016   : > { %26033 = vmatpush3.bf16.msra.mxu1 %v31845_v10 }
0x1017   : > { %v15668_v54 = vand.u32 4294901760, %v15667_v45  ;;  %26040 = vmatprep.subr.bf16.mxu1 %v35428_v56 }
0x1019   : > { %24636 = vmatmul.mubr.f32.vlgmr.msra.gmra.mrb[50].mxu1 %v15666_v27  ;;  %24603 = vmatmul.mubr.f32.vlgmr.msra.gmra.mrb[42].mxu0 %v15668_v54  ;;  %v32073_v54 = vld [vmem:[%s28535_s30 + $0x70] sm:$0xff] }
0x101a   : > { %26024 = vmatpush3.bf16.msra.mxu0 %v26023_v6  ;;  %26042 = vmatpush3.bf16.msra.mxu1 %v31838_v14  ;;  %v26053_v14 = vpack.c.bf16 %v16174_v36, %v16167_v63  ;;  %v26074_v6 = vpack.c.bf16 %v16186_v62, %v16179_v18 }
0x101b   : > { %26025 = vmatprep.subr.bf16.mxu0 %v35428_v56  ;;  %26043 = vmatprep.subr.bf16.mxu1 %v35428_v56 }
0x101c   : > { %24624 = vmatprep.mubr.msk.f32.mxu0 %vm27888_vm0, %v35500_v50  ;;  %24657 = vmatprep.mubr.msk.f32.mxu1 %vm27888_vm0, %v35500_v50 }
0x101e   : > { %26027 = vmatpush3.bf16.msra.mxu0 %v26026_v52  ;;  %26045 = vmatpush3.bf16.msra.mxu1 %v31845_v10  ;;  %v26050_v10 = vpack.c.bf16 %v16093_v49, %v16090_v59  ;;  %v31980_v52 = vld [vmem:[%s28535_s30 + $0x40] sm:$0xff]  ;;  %v16675_v59 = vsub.f32 %v32013_v20, %v16674_v7  ;;  %v26071_v49 = vpack.c.bf16 %v16172_v11, %v16165_v34 }
0x101f   : > { %26034 = vmatprep.subr.bf16.mxu0 %v35428_v56  ;;  %26052 = vmatprep.subr.bf16.mxu1 %v35428_v56  ;;  %v16572_v42 = vand.u32 4294901760, %v31980_v52  ;;  %v26086_v34 = vpack.c.bf16 %v16581_v17, %v16578_v13  ;;  %v32065_v11 = vld [vmem:[%s28535_s30 + $0x60] sm:$0xff] }
0x1020   : > { %v16676_v45 = vand.u32 4294901760, %v16675_v59  ;;  %v17060_v38 = vand.u32 4294901760, %v32065_v11 }
0x1021   : > { %24625 = vmatmul.mubr.f32.vlgmr.msra.gmra.mrb[44].mxu0 %v15665_v28  ;;  %24658 = vmatmul.mubr.f32.vlgmr.msra.gmra.mrb[52].mxu1 %v15664_v21  ;;  %v31997_v26 = vsub.f32 %v31980_v52, %v16572_v42  ;;  %v26083_v58 = vpack.c.bf16 %v16575_v23, %v16572_v42 }
0x1022   : > { %26036 = vmatpush3.bf16.msra.mxu0 %v26035_v41  ;;  %24646 = vmatprep.mubr.msk.f32.mxu0 %vm27888_vm0, %v35500_v50  ;;  %v32082_v36 = vsub.f32 %v32065_v11, %v17060_v38  ;;  %v17066_v41 = vand.u32 4294901760, %v32073_v54 }
0x1023   : > { %26037 = vmatprep.subr.bf16.mxu0 %v35428_v56  ;;  %26054 = vmatpush3.bf16.msra.mxu1 %v26053_v14  ;;  %v16653_v22 = vand.u32 4294901760, %v31997_v26  ;;  %v17069_v14 = vand.u32 4294901760, %v32076_v9  ;;  %v26095_v42 = vpack.c.bf16 %v32000_v37, %v31997_v26  ;;  %v26119_v37 = vpack.c.bf16 %v17063_v35, %v17060_v38 }
0x1024   : > { %26055 = vmatprep.subr.bf16.mxu1 %v35428_v56  ;;  %24679 = vmatprep.mubr.msk.f32.mxu1 %vm27888_vm0, %v35500_v50  ;;  %v17141_v47 = vand.u32 4294901760, %v32082_v36 }
0x1025   : > { %v16654_v19 = vsub.f32 %v31997_v26, %v16653_v22  ;;  %v32098_v52 = vsub.f32 %v32076_v9, %v17069_v14 }
0x1026   : > { %26039 = vmatpush3.bf16.msra.mxu0 %v31857_v8  ;;  %v17142_v23 = vsub.f32 %v32082_v36, %v17141_v47 }
0x1027   : > { %26057 = vmatpush3.bf16.msra.mxu1 %v26056_v60  ;;  %26046 = vmatprep.subr.bf16.mxu0 %v35428_v56  ;;  %v16655_v30 = vand.u32 4294901760, %v16654_v19 }
0x1028   : > { %26064 = vmatprep.subr.bf16.mxu1 %v35428_v56 }
0x1029   : > { %24647 = vmatmul.mubr.f32.vlgmr.msra.gmra.mrb[46].mxu0 %v15664_v21  ;;  %v16668_v21 = vsub.f32 %v32010_v25, %v16667_v33  ;;  %v26089_v28 = vpack.c.bf16 %v16662_v53, %v16655_v30  ;;  %v26131_v30 = vpack.c.bf16 %v32085_v15, %v32082_v36 }
0x102a   : > { %26048 = vmatpush3.bf16.msra.mxu0 %v26047_v48  ;;  %24668 = vmatprep.mubr.msk.f32.mxu0 %vm27888_vm0, %v35500_v50 }
0x102b   : > { %26049 = vmatprep.subr.bf16.mxu0 %v35428_v56  ;;  %v16669_v27 = vand.u32 4294901760, %v16668_v21 }
0x102d   : > { %v26092_v1 = vpack.c.bf16 %v16676_v45, %v16669_v27 }
0x102e   : > { %26051 = vmatpush3.bf16.msra.mxu0 %v26050_v10 }
0x102f   : > { %26058 = vmatprep.subr.bf16.mxu0 %v35428_v56 }
0x103d   : > { %v14664_v8 = vpop.f32.mrb[44].mxu1 }
0x103e   : > { %v16081_v57 = vsel %vm3183_vm1, %v14664_v8, 0  ;;  %v24509_v61 = vpop.f32.mrb[45].mxu1 }
0x103f   : > { %v16152_v39 = vand.u32 4294901760, %v16081_v57  ;;  %v26098_v61 = vpack.c.bf16 %v32013_v20, %v32010_v25 }
0x1041   : > { %v16153_v4 = vsub.f32 %v16081_v57, %v16152_v39  ;;  %24680 = vmatmul.mubr.f32.vlgmr.msra.gmra.mrb[54].mxu1 %v16152_v39  ;;  %v17162_v57 = vand.u32 4294901760, %v32098_v52 }
0x1042   : > { %26066 = vmatpush3.bf16.msra.mxu1 %v26047_v48  ;;  %24701 = vmatprep.mubr.msk.f32.mxu1 %vm27888_vm0, %v35500_v50 }
0x1043   : > { %v16154_v12 = vand.u32 4294901760, %v16153_v4  ;;  %26067 = vmatprep.subr.bf16.mxu1 %v35428_v56 }
0x1045   : > { %v16155_v32 = vsub.f32 %v16153_v4, %v16154_v12 }
0x1046   : > { %26069 = vmatpush3.bf16.msra.mxu1 %v26050_v10 }
0x1047   : > { %v16156_v31 = vand.u32 4294901760, %v16155_v32  ;;  %26076 = vmatprep.subr.bf16.mxu1 %v35428_v56 }
0x1049   : > { %24702 = vmatmul.mubr.f32.vlgmr.msra.gmra.mrb[56].mxu1 %v16154_v12  ;;  %24669 = vmatmul.mubr.f32.vlgmr.msra.gmra.mrb[48].mxu0 %v16156_v31  ;;  %v26107_v12 = vpack.c.bf16 %v16660_v16, %v16653_v22  ;;  %v26110_v31 = vpack.c.bf16 %v16674_v7, %v16667_v33  ;;  %v26122_v22 = vpack.c.bf16 %v17069_v14, %v17066_v41 }
0x104a   : > { %26060 = vmatpush3.bf16.msra.mxu0 %v26059_v44  ;;  %26078 = vmatpush3.bf16.msra.mxu1 %v26047_v48  ;;  %v17148_v48 = vand.u32 4294901760, %v32085_v15 }
0x104b   : > { %26061 = vmatprep.subr.bf16.mxu0 %v35428_v56  ;;  %26079 = vmatprep.subr.bf16.mxu1 %v35428_v56 }
0x104c   : > { %24690 = vmatprep.mubr.msk.f32.mxu0 %vm27888_vm0, %v35500_v50  ;;  %24723 = vmatprep.mubr.msk.f32.mxu1 %vm27888_vm0, %v35500_v50  ;;  %v17149_v29 = vsub.f32 %v32085_v15, %v17148_v48  ;;  %v26143_v59 = vpack.c.bf16 %v17148_v48, %v17141_v47 }
0x104e   : > { %26063 = vmatpush3.bf16.msra.mxu0 %v26062_v46  ;;  %26081 = vmatpush3.bf16.msra.mxu1 %v26050_v10  ;;  %v32095_v10 = vsub.f32 %v32073_v54, %v17066_v41  ;;  %v17150_v13 = vand.u32 4294901760, %v17149_v29 }
0x104f   : > { %26070 = vmatprep.subr.bf16.mxu0 %v35428_v56  ;;  %26088 = vmatprep.subr.bf16.mxu1 %v35428_v56 }
0x1050   : > { %v17155_v8 = vand.u32 4294901760, %v32095_v10  ;;  %v26134_v21 = vpack.c.bf16 %v32098_v52, %v32095_v10 }
0x1051   : > { %24691 = vmatmul.mubr.f32.vlgmr.msra.gmra.mrb[50].mxu0 %v16153_v4  ;;  %24724 = vmatmul.mubr.f32.vlgmr.msra.gmra.mrb[58].mxu1 %v16152_v39  ;;  %v17163_v4 = vsub.f32 %v32098_v52, %v17162_v57 }
0x1052   : > { %26072 = vmatpush3.bf16.msra.mxu0 %v26071_v49  ;;  %24712 = vmatprep.mubr.msk.f32.mxu0 %vm27888_vm0, %v35500_v50  ;;  %v17156_v17 = vsub.f32 %v32095_v10, %v17155_v8  ;;  %v26146_v49 = vpack.c.bf16 %v17162_v57, %v17155_v8 }
0x1053   : > { %26073 = vmatprep.subr.bf16.mxu0 %v35428_v56  ;;  %26090 = vmatpush3.bf16.msra.mxu1 %v26089_v28  ;;  %v17164_v19 = vand.u32 4294901760, %v17163_v4 }
0x1054   : > { %26091 = vmatprep.subr.bf16.mxu1 %v35428_v56  ;;  %24745 = vmatprep.mubr.msk.f32.mxu1 %vm27888_vm0, %v35500_v50  ;;  %v17157_v44 = vand.u32 4294901760, %v17156_v17 }
0x1056   : > { %26075 = vmatpush3.bf16.msra.mxu0 %v26074_v6  ;;  %v26128_v26 = vpack.c.bf16 %v17164_v19, %v17157_v44 }
0x1057   : > { %26093 = vmatpush3.bf16.msra.mxu1 %v26092_v1  ;;  %26082 = vmatprep.subr.bf16.mxu0 %v35428_v56 }
0x1058   : > { %26100 = vmatprep.subr.bf16.mxu1 %v35428_v56 }
0x1059   : > { %24713 = vmatmul.mubr.f32.vlgmr.msra.gmra.mrb[52].mxu0 %v16152_v39  ;;  %v17143_v39 = vand.u32 4294901760, %v17142_v23 }
0x105a   : > { %26084 = vmatpush3.bf16.msra.mxu0 %v26083_v58  ;;  %24734 = vmatprep.mubr.msk.f32.mxu0 %vm27888_vm0, %v35500_v50 }
0x105b   : > { %26085 = vmatprep.subr.bf16.mxu0 %v35428_v56  ;;  %v26125_v32 = vpack.c.bf16 %v17150_v13, %v17143_v39 }
0x105e   : > { %26087 = vmatpush3.bf16.msra.mxu0 %v26086_v34 }
0x105f   : > { %26094 = vmatprep.subr.bf16.mxu0 %v35428_v56 }
0x1068   : > { %v15126_v18 = vpop.f32.mrb[40].mxu0 }
0x1069   : > { %v16569_v62 = vsel %vm3183_vm1, %v15126_v18, 0  ;;  %v24551_v63 = vpop.f32.mrb[41].mxu0 }
0x106a   : > { %v16640_v40 = vand.u32 4294901760, %v16569_v62 }
0x106c   : > { %v16641_v24 = vsub.f32 %v16569_v62, %v16640_v40  ;;  %24746 = vmatmul.mubr.f32.vlgmr.msra.gmra.mrb[60].mxu1 %v16640_v40 }
0x106d   : > { %26102 = vmatpush3.bf16.msra.mxu1 %v26083_v58  ;;  %24767 = vmatprep.mubr.msk.f32.mxu1 %vm27888_vm0, %v35500_v50 }
0x106e   : > { %v16642_v60 = vand.u32 4294901760, %v16641_v24  ;;  %26103 = vmatprep.subr.bf16.mxu1 %v35428_v56 }
0x1070   : > { %v16643_v3 = vsub.f32 %v16641_v24, %v16642_v60 }
0x1071   : > { %26105 = vmatpush3.bf16.msra.mxu1 %v26086_v34 }
0x1072   : > { %v16644_v55 = vand.u32 4294901760, %v16643_v3  ;;  %26112 = vmatprep.subr.bf16.mxu1 %v35428_v56 }
0x1074   : > { %24768 = vmatmul.mubr.f32.vlgmr.msra.gmra.mrb[62].mxu1 %v16642_v60  ;;  %24735 = vmatmul.mubr.f32.vlgmr.msra.gmra.mrb[54].mxu0 %v16644_v55 }
0x1075   : > { %26096 = vmatpush3.bf16.msra.mxu0 %v26095_v42  ;;  %26114 = vmatpush3.bf16.msra.mxu1 %v26083_v58 }
0x1076   : > { %26097 = vmatprep.subr.bf16.mxu0 %v35428_v56  ;;  %26115 = vmatprep.subr.bf16.mxu1 %v35428_v56 }
0x1077   : > { %24756 = vmatprep.mubr.msk.f32.mxu0 %vm27888_vm0, %v35500_v50  ;;  %24789 = vmatprep.mubr.msk.f32.mxu1 %vm27888_vm0, %v35500_v50 }
0x1079   : > { %26099 = vmatpush3.bf16.msra.mxu0 %v26098_v61  ;;  %26117 = vmatpush3.bf16.msra.mxu1 %v26086_v34 }
0x107a   : > { %26106 = vmatprep.subr.bf16.mxu0 %v35428_v56  ;;  %26124 = vmatprep.subr.bf16.mxu1 %v35428_v56 }
0x107c   : > { %24757 = vmatmul.mubr.f32.vlgmr.msra.gmra.mrb[56].mxu0 %v16641_v24  ;;  %24790 = vmatmul.mubr.f32.vlgmr.msra.gmra.mrb[64].mxu1 %v16640_v40 }
0x107d   : > { %26108 = vmatpush3.bf16.msra.mxu0 %v26107_v12  ;;  %24778 = vmatprep.mubr.msk.f32.mxu0 %vm27888_vm0, %v35500_v50 }
0x107e   : > { %26109 = vmatprep.subr.bf16.mxu0 %v35428_v56  ;;  %26126 = vmatpush3.bf16.msra.mxu1 %v26125_v32 }
0x107f   : > { %26127 = vmatprep.subr.bf16.mxu1 %v35428_v56  ;;  %24811 = vmatprep.mubr.msk.f32.mxu1 %vm27888_vm0, %v35500_v50 }
0x1081   : > { %26111 = vmatpush3.bf16.msra.mxu0 %v26110_v31 }
0x1082   : > { %26129 = vmatpush3.bf16.msra.mxu1 %v26128_v26  ;;  %26118 = vmatprep.subr.bf16.mxu0 %v35428_v56 }
0x1083   : > { %26136 = vmatprep.subr.bf16.mxu1 %v35428_v56 }
0x1084   : > { %24779 = vmatmul.mubr.f32.vlgmr.msra.gmra.mrb[58].mxu0 %v16640_v40 }
0x1085   : > { %26120 = vmatpush3.bf16.msra.mxu0 %v26119_v37  ;;  %24800 = vmatprep.mubr.msk.f32.mxu0 %vm27888_vm0, %v35500_v50 }
0x1086   : > { %26121 = vmatprep.subr.bf16.mxu0 %v35428_v56 }
0x1089   : > { %26123 = vmatpush3.bf16.msra.mxu0 %v26122_v22 }
0x108a   : > { %26130 = vmatprep.subr.bf16.mxu0 %v35428_v56 }
0x109d   : > { %v15588_v16 = vpop.f32.mrb[46].mxu1 }
0x109e   : > { %v17057_v25 = vsel %vm3183_vm1, %v15588_v16, 0  ;;  %v24593_v20 = vpop.f32.mrb[47].mxu1 }
0x109f   : > { %v17128_v43 = vand.u32 4294901760, %v17057_v25 }
0x10a1   : > { %v17129_v33 = vsub.f32 %v17057_v25, %v17128_v43  ;;  %24812 = vmatmul.mubr.f32.vlgmr.msra.gmra.mrb[66].mxu1 %v17128_v43 }
0x10a2   : > { %26138 = vmatpush3.bf16.msra.mxu1 %v26119_v37  ;;  %24833 = vmatprep.mubr.msk.f32.mxu1 %vm27888_vm0, %v35500_v50 }
0x10a3   : > { %v17130_v7 = vand.u32 4294901760, %v17129_v33  ;;  %26139 = vmatprep.subr.bf16.mxu1 %v35428_v56 }
0x10a5   : > { %v17131_v46 = vsub.f32 %v17129_v33, %v17130_v7 }
0x10a6   : > { %26141 = vmatpush3.bf16.msra.mxu1 %v26122_v22 }
0x10a7   : > { %v17132_v53 = vand.u32 4294901760, %v17131_v46  ;;  %26148 = vmatprep.subr.bf16.mxu1 %v35428_v56 }
0x10a9   : > { %24834 = vmatmul.mubr.f32.vlgmr.msra.gmra.mrb[68].mxu1 %v17130_v7  ;;  %24801 = vmatmul.mubr.f32.vlgmr.msra.gmra.mrb[60].mxu0 %v17132_v53 }
0x10aa   : > { %26132 = vmatpush3.bf16.msra.mxu0 %v26131_v30  ;;  %26150 = vmatpush3.bf16.msra.mxu1 %v26119_v37 }
0x10ab   : > { %26133 = vmatprep.subr.bf16.mxu0 %v35428_v56  ;;  %26151 = vmatprep.subr.bf16.mxu1 %v35428_v56 }
0x10ac   : > { %24822 = vmatprep.mubr.msk.f32.mxu0 %vm27888_vm0, %v35500_v50  ;;  %24855 = vmatprep.mubr.msk.f32.mxu1 %vm27888_vm0, %v35500_v50 }
0x10ae   : > { %26135 = vmatpush3.bf16.msra.mxu0 %v26134_v21  ;;  %26153 = vmatpush3.bf16.msra.mxu1 %v26122_v22 }
0x10af   : > { %26142 = vmatprep.subr.bf16.mxu0 %v35428_v56 }
0x10b1   : > { %24823 = vmatmul.mubr.f32.vlgmr.msra.gmra.mrb[62].mxu0 %v17129_v33  ;;  %24856 = vmatmul.mubr.f32.vlgmr.msra.gmra.mrb[70].mxu1 %v17128_v43 }
0x10b2   : > { %26144 = vmatpush3.bf16.msra.mxu0 %v26143_v59  ;;  %24844 = vmatprep.mubr.msk.f32.mxu0 %vm27888_vm0, %v35500_v50 }
0x10b3   : > { %26145 = vmatprep.subr.bf16.mxu0 %v35428_v56  ;;  %18611 = vmatprep.mubr.f32.mxu1 %v35500_v50 }
0x10b6   : > { %26147 = vmatpush3.bf16.msra.mxu0 %v26146_v49 }
0x10b9   : > { %24845 = vmatmul.mubr.f32.vlgmr.msra.gmra.mrb[64].mxu0 %v17128_v43 }
0x10ba   : > { %17756 = vmatprep.mubr.f32.mxu0 %v35500_v50 }
0x10e4   : > { %v15761_v28 = vpop.f32.mrb[48].mxu1 }
0x10e5   : > { %v24615_v27 = vpop.f32.mrb[49].mxu1 }
0x10ec   : > { %v15918_v45 = vpop.f32.mrb[50].mxu1  ;;  %v15670_v6 = vpop.f32.mrb[42].mxu0 }
0x10ed   : > { %v15762_v1 = vadd.f32 %v15761_v28, %v15670_v6  ;;  %v24637_v58 = vpop.f32.mrb[51].mxu1  ;;  %v24604_v34 = vpop.f32.mrb[43].mxu0 }
0x10ee   : > { %v34945_v34 = vsub.s32 1, %v29354_v0 }
0x10f4   : > { %v15841_v11 = vpop.f32.mrb[44].mxu0  ;;  %v16076_v5 = vpop.f32.mrb[52].mxu1 }
0x10f5   : > { %v15842_v38 = vadd.f32 %v15841_v11, %v15762_v1  ;;  %v24626_v35 = vpop.f32.mrb[45].mxu0  ;;  %v24659_v54 = vpop.f32.mrb[53].mxu1 }
0x10f6   : > { %v27371_v54 = vld [vmem:[%s28525_s23] sm:$0xff] }
0x10f7   : > { %v15919_v9 = vadd.f32 %v15918_v45, %v15842_v38 }
0x10fc   : > { %v16001_v56 = vpop.f32.mrb[46].mxu0 }
0x10fd   : > { %v16002_v18 = vadd.f32 %v16001_v56, %v15919_v9  ;;  %v24648_v62 = vpop.f32.mrb[47].mxu0  ;;  %v17550_v9 = vrot.slane %v27371_v54, %v34945_v34  ;;  %v17611_v34 = vld [vmem:[%s28537_s17 + $0x128] sm:$0xff] }
0x10ff   : > { %v16077_v63 = vadd.f32 %v16076_v5, %v16002_v18 }
0x1114   : > { %v16249_v36 = vpop.f32.mrb[54].mxu1 }
0x1115   : > { %v24681_v40 = vpop.f32.mrb[55].mxu1 }
0x1116   : > { %v17577_v40 = vld [vmem:[%s28537_s17 + $0x18] sm:$0xff] }
0x111c   : > { %v16406_v15 = vpop.f32.mrb[56].mxu1  ;;  %v16158_v41 = vpop.f32.mrb[48].mxu0 }
0x111d   : > { %v16250_v14 = vadd.f32 %v16249_v36, %v16158_v41  ;;  %v24703_v24 = vpop.f32.mrb[57].mxu1  ;;  %v24670_v47 = vpop.f32.mrb[49].mxu0  ;;  %v17579_v36 = vld [vmem:[%s28537_s17 + $0x28] sm:$0xff] }
0x111e   : > { %v17664_v41 = vand.u32 4294901760, %v17579_v36  ;;  %v18515_v24 = vand.u32 4294901760, %v17577_v40  ;;  %v17574_v47 = vld [vmem:[%s28537_s17] sm:$0xff] }
0x1124   : > { %v16329_v60 = vpop.f32.mrb[50].mxu0  ;;  %v16564_v48 = vpop.f32.mrb[58].mxu1 }
0x1125   : > { %v16330_v10 = vadd.f32 %v16329_v60, %v16250_v14  ;;  %v24692_v52 = vpop.f32.mrb[51].mxu0  ;;  %v24725_v3 = vpop.f32.mrb[59].mxu1  ;;  %v17581_v14 = vld [vmem:[%s28537_s17 + $0x38] sm:$0xff]  ;;  %v17578_v60 = vld [vmem:[%s28537_s17 + $0x20] sm:$0xff] }
0x1126   : > { %v17666_v52 = vand.u32 4294901760, %v17578_v60  ;;  %v17576_v3 = vld [vmem:[%s28537_s17 + $0x10] sm:$0xff] }
0x1127   : > { %v16407_v42 = vadd.f32 %v16406_v15, %v16330_v10  ;;  %v17662_v10 = vand.u32 4294901760, %v17574_v47 }
0x112c   : > { %v16489_v23 = vpop.f32.mrb[52].mxu0 }
0x112d   : > { %v16490_v55 = vadd.f32 %v16489_v23, %v16407_v42  ;;  %v24714_v29 = vpop.f32.mrb[53].mxu0  ;;  %v17580_v42 = vld [vmem:[%s28537_s17 + $0x30] sm:$0xff] }
0x112e   : > { %v32197_v29 = vsub.f32 %v17577_v40, %v18515_v24 }
0x112f   : > { %v16565_v8 = vadd.f32 %v16564_v48, %v16490_v55  ;;  %v18519_v48 = vand.u32 4294901760, %v17581_v14 }
0x1130   : > { %35538 = vst [vmem:[#allocation52_spill] sm:$0xff] %v32197_v29 }
0x1131   : > { %v17544_v57 = vadd.f32 %v16565_v8, %v16077_v63  ;;  %v17575_v63 = vld [vmem:[%s28537_s17 + $0x8] sm:$0xff]  ;;  %v32199_v8 = vpack.c.bf16 %v18519_v48, %v18515_v24 }
0x1132   : > { %v17660_v15 = vand.u32 4294901760, %v17575_v63 }
0x1133   : > { %35539 = vst [vmem:[#allocation53_spill] sm:$0xff] %v32199_v8  ;;  %26347 = vmatprep.subr.bf16.mxu1 %v32199_v8 }
0x1134   : > { %v32191_v23 = vpack.c.bf16 %v17664_v41, %v17660_v15  ;;  %v32193_v55 = vsub.f32 %v17575_v63, %v17660_v15  ;;  %v17590_v15 = vld [vmem:[%s28537_s17 + $0x80] sm:$0xff] }
0x1136   : > { %35536 = vst [vmem:[#allocation45_spill] sm:$0xff] %v32191_v23  ;;  %35537 = vst [vmem:[#allocation47_spill] sm:$0xff] %v32193_v55  ;;  %26155 = vmatprep.subr.bf16.mxu0 %v32191_v23  ;;  %v17616_v23 = vld [vmem:[%s28537_s17 + $0x150] sm:$0xff] }
0x113f   : > { %v16737_v61 = vpop.f32.mrb[60].mxu1 }
0x1140   : > { %v24747_v39 = vpop.f32.mrb[61].mxu1 }
0x1141   : > { %v32205_v39 = vsub.f32 %v17574_v47, %v17662_v10 }
0x1143   : > { %35542 = vst [vmem:[#allocation56_spill] sm:$0xff] %v32205_v39 }
0x1147   : > { %v16894_v13 = vpop.f32.mrb[62].mxu1  ;;  %v16646_v17 = vpop.f32.mrb[54].mxu0 }
0x1148   : > { %v16738_v4 = vadd.f32 %v16737_v61, %v16646_v17  ;;  %v24769_v12 = vpop.f32.mrb[63].mxu1  ;;  %v24736_v32 = vpop.f32.mrb[55].mxu0  ;;  %v32203_v61 = vpack.c.bf16 %v17666_v52, %v17662_v10  ;;  %v18517_v17 = vand.u32 4294901760, %v17576_v3  ;;  %v17596_v10 = vld [vmem:[%s28537_s17 + $0xb0] sm:$0xff] }
0x114a   : > { %35541 = vst [vmem:[#allocation55_spill] sm:$0xff] %v32203_v61  ;;  %26157 = vmatpush1.bf16.msra.mxu0 %v32203_v61  ;;  %v32214_v32 = vsub.f32 %v17576_v3, %v18517_v17  ;;  %v17621_v61 = vld [vmem:[%s28537_s17 + $0x178] sm:$0xff] }
0x114c   : > { %35544 = vst [vmem:[#allocation58_spill] sm:$0xff] %v32214_v32 }
0x114f   : > { %v16817_v44 = vpop.f32.mrb[56].mxu0  ;;  %v17052_v19 = vpop.f32.mrb[64].mxu1 }
0x1150   : > { %v16818_v31 = vadd.f32 %v16817_v44, %v16738_v4  ;;  %v24758_v26 = vpop.f32.mrb[57].mxu0  ;;  %v24791_v37 = vpop.f32.mrb[65].mxu1  ;;  %v18521_v4 = vand.u32 4294901760, %v17580_v42 }
0x1152   : > { %v16895_v22 = vadd.f32 %v16894_v13, %v16818_v31  ;;  %v32208_v13 = vsub.f32 %v17578_v60, %v17666_v52  ;;  %v32212_v12 = vpack.c.bf16 %v18521_v4, %v18517_v17  ;;  %v32216_v44 = vsub.f32 %v17580_v42, %v18521_v4  ;;  %v17599_v52 = vld [vmem:[%s28537_s17 + $0xc8] sm:$0xff] }
0x1154   : > { %35543 = vst [vmem:[#allocation57_spill] sm:$0xff] %v32212_v12  ;;  %26349 = vmatpush1.bf16.msra.mxu1 %v32212_v12  ;;  %v17619_v12 = vld [vmem:[%s28537_s17 + $0x168] sm:$0xff] }
0x1157   : > { %v16977_v16 = vpop.f32.mrb[58].mxu0 }
0x1158   : > { %v16978_v25 = vadd.f32 %v16977_v16, %v16895_v22  ;;  %v24780_v20 = vpop.f32.mrb[59].mxu0  ;;  %v17583_v22 = vld [vmem:[%s28537_s17 + $0x48] sm:$0xff] }
0x1159   : > { %v17587_v16 = vld [vmem:[%s28537_s17 + $0x68] sm:$0xff]  ;;  %v17668_v20 = vand.u32 4294901760, %v17583_v22 }
0x115a   : > { %v17053_v43 = vadd.f32 %v17052_v19, %v16978_v25  ;;  %v17585_v25 = vld [vmem:[%s28537_s17 + $0x58] sm:$0xff] }
0x115c   : > { %v17545_v33 = vadd.f32 %v17544_v57, %v17053_v43  ;;  %v32201_v57 = vsub.f32 %v17581_v14, %v18519_v48  ;;  %v17672_v43 = vand.u32 4294901760, %v17587_v16  ;;  %v17592_v48 = vld [vmem:[%s28537_s17 + $0x90] sm:$0xff] }
0x115e   : > { %35540 = vst [vmem:[#allocation51_spill] sm:$0xff] %v32201_v57  ;;  %v32246_v63 = vsub.f32 %v17587_v16, %v17672_v43 }
0x1160   : > { %35551 = vst [vmem:[#allocation39_spill] sm:$0xff] %v32246_v63 }
0x1174   : > { %v17225_v7 = vpop.f32.mrb[66].mxu1 }
0x1175   : > { %v24813_v46 = vpop.f32.mrb[67].mxu1 }
0x1176   : > { %v17582_v46 = vld [vmem:[%s28537_s17 + $0x40] sm:$0xff] }
0x117c   : > { %v17382_v30 = vpop.f32.mrb[68].mxu1  ;;  %v17134_v53 = vpop.f32.mrb[60].mxu0 }
0x117d   : > { %v17226_v21 = vadd.f32 %v17225_v7, %v17134_v53  ;;  %v24835_v59 = vpop.f32.mrb[69].mxu1  ;;  %v24802_v49 = vpop.f32.mrb[61].mxu0  ;;  %v18523_v7 = vand.u32 4294901760, %v17585_v25 }
0x117e   : > { %v17584_v49 = vld [vmem:[%s28537_s17 + $0x50] sm:$0xff] }
0x1184   : > { %v17305_v28 = vpop.f32.mrb[62].mxu0  ;;  %v17540_v27 = vpop.f32.mrb[70].mxu1 }
0x1185   : > { %v17306_v45 = vadd.f32 %v17305_v28, %v17226_v21  ;;  %v24824_v6 = vpop.f32.mrb[63].mxu0  ;;  %v24857_v1 = vpop.f32.mrb[71].mxu1  ;;  %v17670_v21 = vand.u32 4294901760, %v17582_v46  ;;  %v17588_v28 = vld [vmem:[%s28537_s17 + $0x70] sm:$0xff] }
0x1186   : > { %v18529_v6 = vand.u32 4294901760, %v17588_v28 }
0x1187   : > { %v17383_v58 = vadd.f32 %v17382_v30, %v17306_v45  ;;  %v17586_v30 = vld [vmem:[%s28537_s17 + $0x60] sm:$0xff]  ;;  %v18525_v45 = vand.u32 4294901760, %v17584_v49  ;;  %v32256_v14 = vsub.f32 %v17582_v46, %v17670_v21  ;;  %v17684_v46 = vand.u32 4294901760, %v17599_v52 }
0x1188   : > { %v17674_v59 = vand.u32 4294901760, %v17586_v30  ;;  %v32266_v3 = vsub.f32 %v17588_v28, %v18529_v6  ;;  %v17602_v28 = vld [vmem:[%s28537_s17 + $0xe0] sm:$0xff] }
0x1189   : > { %35554 = vst [vmem:[#allocation42_spill] sm:$0xff] %v32256_v14  ;;  %v32261_v47 = vsub.f32 %v17584_v49, %v18525_v45  ;;  %v17598_v49 = vld [vmem:[%s28537_s17 + $0xc0] sm:$0xff] }
0x118a   : > { %v32258_v24 = vsub.f32 %v17586_v30, %v17674_v59  ;;  %35557 = vst [vmem:[#allocation35_spill] sm:$0xff] %v32266_v3 }
0x118b   : > { %35556 = vst [vmem:[#allocation44_spill] sm:$0xff] %v32261_v47 }
0x118c   : > { %v17465_v11 = vpop.f32.mrb[64].mxu0  ;;  %35555 = vst [vmem:[#allocation43_spill] sm:$0xff] %v32258_v24 }
0x118d   : > { %v17466_v5 = vadd.f32 %v17465_v11, %v17383_v58  ;;  %v24846_v38 = vpop.f32.mrb[65].mxu0  ;;  %v32235_v58 = vpack.c.bf16 %v17674_v59, %v17670_v21  ;;  %v17591_v11 = vld [vmem:[%s28537_s17 + $0x88] sm:$0xff] }
0x118e   : > { %v17593_v38 = vld [vmem:[%s28537_s17 + $0x98] sm:$0xff]  ;;  %v17676_v54 = vand.u32 4294901760, %v17591_v11 }
0x118f   : > { %v17541_v35 = vadd.f32 %v17540_v27, %v17466_v5  ;;  %v32231_v27 = vpack.c.bf16 %v17672_v43, %v17668_v20  ;;  %35548 = vst [vmem:[#allocation37_spill] sm:$0xff] %v32235_v58  ;;  %v17595_v5 = vld [vmem:[%s28537_s17 + $0xa8] sm:$0xff] }
0x1190   : > { %v32270_v17 = vsub.f32 %v17591_v11, %v17676_v54 }
0x1191   : > { %v17546_v56 = vadd.f32 %v17545_v33, %v17541_v35  ;;  %v17589_v33 = vld [vmem:[%s28537_s17 + $0x78] sm:$0xff]  ;;  %35546 = vst [vmem:[#allocation48_spill] sm:$0xff] %v32231_v27  ;;  %26159 = vmatprep.subr.bf16.mxu0 %v32231_v27  ;;  %v32241_v35 = vpack.c.bf16 %v18529_v6, %v18525_v45 }
0x1192   : > { %v18527_v53 = vand.u32 4294901760, %v17589_v33  ;;  %26161 = vmatpush1.bf16.msra.mxu0 %v32235_v58  ;;  %35559 = vst [vmem:[#allocation34_spill] sm:$0xff] %v32270_v17 }
0x1193   : > { %v17551_v18 = vadd.f32 %v17550_v9, %v17546_v56  ;;  %35549 = vst [vmem:[#allocation54_spill] sm:$0xff] %v32241_v35  ;;  %v17680_v9 = vand.u32 4294901760, %v17595_v5  ;;  %v17597_v56 = vld [vmem:[%s28537_s17 + $0xb8] sm:$0xff] }
0x1194   : > { %v32233_v1 = vpack.c.bf16 %v18527_v53, %v18523_v7  ;;  %v32251_v40 = vsub.f32 %v17589_v33, %v18527_v53  ;;  %v18535_v60 = vand.u32 4294901760, %v17597_v56  ;;  %v18533_v33 = vand.u32 4294901760, %v17592_v48 }
0x1195   : > { %v17552_v62 = vadd.f32 %v17551_v18, %v30742_v2  ;;  %v32195_v2 = vsub.f32 %v17579_v36, %v17664_v41  ;;  %v18531_v18 = vand.u32 4294901760, %v17593_v38  ;;  %v32249_v36 = vsub.f32 %v17585_v25, %v18523_v7  ;;  %v17594_v41 = vld [vmem:[%s28537_s17 + $0xa0] sm:$0xff] }
0x1196   : > { %35547 = vst [vmem:[#allocation49_spill] sm:$0xff] %v32233_v1  ;;  %26351 = vmatprep.subr.bf16.mxu1 %v32233_v1  ;;  %35553 = vst [vmem:[#allocation41_spill] sm:$0xff] %v32251_v40  ;;  %v32268_v42 = vpack.c.bf16 %v17680_v9, %v17676_v54  ;;  %v32272_v4 = vsub.f32 %v17595_v5, %v17680_v9  ;;  %v32281_v25 = vsub.f32 %v17597_v56, %v18535_v60  ;;  %v17604_v54 = vld [vmem:[%s28537_s17 + $0xf0] sm:$0xff]  ;;  %v17607_v9 = vld [vmem:[%s28537_s17 + $0x108] sm:$0xff] }
0x1197   : > { %17553 = vadd.xlane.f32.xlu1 %v17552_v62  ;;  %35552 = vst [vmem:[#allocation40_spill] sm:$0xff] %v32249_v36  ;;  %26353 = vmatpush1.bf16.msra.mxu1 %v32241_v35  ;;  %v32279_v16 = vsub.f32 %v17593_v38, %v18531_v18  ;;  %v17682_v43 = vand.u32 4294901760, %v17594_v41  ;;  %v18537_v7 = vand.u32 4294901760, %v17596_v10  ;;  %v32295_v5 = vsub.f32 %v17592_v48, %v18533_v33  ;;  %v17600_v38 = vld [vmem:[%s28537_s17 + $0xd0] sm:$0xff] }
0x1198   : > { %35558 = vst [vmem:[#allocation50_spill] sm:$0xff] %v32268_v42  ;;  %35560 = vst [vmem:[#allocation59_spill] sm:$0xff] %v32272_v4  ;;  %26163 = vmatprep.subr.bf16.mxu0 %v32268_v42  ;;  %v17608_v42 = vld [vmem:[%s28537_s17 + $0x110] sm:$0xff] }
0x1199   : > { %35562 = vst [vmem:[#allocation61_spill] sm:$0xff] %v32279_v16  ;;  %35563 = vst [vmem:[#allocation62_spill] sm:$0xff] %v32281_v25  ;;  %v32291_v6 = vsub.f32 %v17594_v41, %v17682_v43  ;;  %v32293_v11 = vpack.c.bf16 %v18537_v7, %v18533_v33  ;;  %v32300_v56 = vsub.f32 %v17596_v10, %v18537_v7  ;;  %v18545_v33 = vand.u32 4294901760, %v17604_v54 }
0x119a   : > { %35567 = vst [vmem:[#allocation66_spill] sm:$0xff] %v32295_v5  ;;  %v17692_v7 = vand.u32 4294901760, %v17607_v9 }
0x119b   : > { %35566 = vst [vmem:[#allocation65_spill] sm:$0xff] %v32293_v11  ;;  %35568 = vst [vmem:[#allocation67_spill] sm:$0xff] %v32300_v56  ;;  %v32336_v35 = vsub.f32 %v17604_v54, %v18545_v33 }
0x119c   : > { %v32340_v1 = vsub.f32 %v17607_v9, %v17692_v7  ;;  %v18549_v9 = vand.u32 4294901760, %v17608_v42 }
0x119d   : > { %35576 = vst [vmem:[#allocation75_spill] sm:$0xff] %v32336_v35 }
0x119e   : > { %35578 = vst [vmem:[#allocation77_spill] sm:$0xff] %v32340_v1  ;;  %v32367_v8 = vsub.f32 %v17608_v42, %v18549_v9 }
0x11a0   : > { %35587 = vst [vmem:[#allocation86_spill] sm:$0xff] %v32367_v8  ;;  %v17635_v8 = vld [vmem:[%s28537_s17 + $0x1e8] sm:$0xff] }
0x1224   : > { %v17554_v19 = vpop.xlane.xlu1 %17553 }
0x1225   : > { %v17555_v31 = vmul.f32 0.0078125, %v17554_v19  ;;  %v17603_v19 = vld [vmem:[%s28537_s17 + $0xe8] sm:$0xff] }
0x1226   : > { %v17688_v53 = vand.u32 4294901760, %v17603_v19 }
0x1227   : > { %v32219_v26 = vsub.f32 %v17552_v62, %v17555_v31  ;;  %v32244_v62 = vsub.f32 %v17583_v22, %v17668_v20  ;;  %v17601_v31 = vld [vmem:[%s28537_s17 + $0xd8] sm:$0xff]  ;;  %v32277_v22 = vpack.c.bf16 %v18535_v60, %v18531_v18  ;;  %v17678_v20 = vand.u32 4294901760, %v17590_v15 }
0x1228   : > { %v18539_v21 = vand.u32 4294901760, %v17601_v31  ;;  %v32302_v18 = vpack.c.bf16 %v17688_v53, %v17684_v46  ;;  %v32306_v60 = vsub.f32 %v17603_v19, %v17688_v53  ;;  %v18541_v19 = vand.u32 4294901760, %v17600_v38 }
0x1229   : > { %35545 = vst [vmem:[#allocation46_spill] sm:$0xff] %v32219_v26  ;;  %v17557_v37 = vmul.f32 %v32219_v26, %v32219_v26  ;;  %35550 = vst [vmem:[#allocation38_spill] sm:$0xff] %v32244_v62  ;;  %26355 = vmatprep.subr.bf16.mxu1 %v32277_v22  ;;  %v32285_v30 = vsub.f32 %v17590_v15, %v17678_v20  ;;  %v32289_v45 = vpack.c.bf16 %v17682_v43, %v17678_v20  ;;  %v17609_v20 = vld [vmem:[%s28537_s17 + $0x118] sm:$0xff] }
0x122a   : > { %35561 = vst [vmem:[#allocation60_spill] sm:$0xff] %v32277_v22  ;;  %35569 = vst [vmem:[#allocation68_spill] sm:$0xff] %v32302_v18  ;;  %v32304_v15 = vsub.f32 %v17599_v52, %v17684_v46  ;;  %26357 = vmatpush1.bf16.msra.mxu1 %v32293_v11  ;;  %v32315_v48 = vsub.f32 %v17601_v31, %v18539_v21  ;;  %v17686_v43 = vand.u32 4294901760, %v17598_v49  ;;  %v17690_v52 = vand.u32 4294901760, %v17602_v28 }
0x122b   : > { %17558 = vadd.xlane.f32.xlu0 %v17557_v37  ;;  %v17605_v37 = vld [vmem:[%s28537_s17 + $0xf8] sm:$0xff]  ;;  %35564 = vst [vmem:[#allocation63_spill] sm:$0xff] %v32285_v30  ;;  %35565 = vst [vmem:[#allocation64_spill] sm:$0xff] %v32289_v45  ;;  %26165 = vmatpush1.bf16.msra.mxu0 %v32289_v45  ;;  %v17696_v53 = vand.u32 4294901760, %v17611_v34  ;;  %v18547_v31 = vand.u32 4294901760, %v17609_v20  ;;  %v32329_v45 = vpack.c.bf16 %v18545_v33, %v18541_v19 }
0x122c   : > { %v18543_v59 = vand.u32 4294901760, %v17605_v37  ;;  %35571 = vst [vmem:[#allocation70_spill] sm:$0xff] %v32315_v48  ;;  %26167 = vmatprep.subr.bf16.mxu0 %v32302_v18  ;;  %v32321_v46 = vsub.f32 %v17598_v49, %v17686_v43  ;;  %v32325_v18 = vpack.c.bf16 %v17690_v52, %v17686_v43  ;;  %v32327_v11 = vsub.f32 %v17602_v28, %v17690_v52  ;;  %v17615_v49 = vld [vmem:[%s28537_s17 + $0x148] sm:$0xff]  ;;  %v17617_v43 = vld [vmem:[%s28537_s17 + $0x158] sm:$0xff] }
0x122d   : > { %35574 = vst [vmem:[#allocation73_spill] sm:$0xff] %v32329_v45  ;;  %v32331_v22 = vsub.f32 %v17600_v38, %v18541_v19  ;;  %v32338_v58 = vpack.c.bf16 %v17696_v53, %v17692_v7  ;;  %v32342_v27 = vsub.f32 %v17611_v34, %v17696_v53  ;;  %v32351_v38 = vsub.f32 %v17609_v20, %v18547_v31 }
0x122e   : > { %v32313_v41 = vpack.c.bf16 %v18543_v59, %v18539_v21  ;;  %v32317_v10 = vsub.f32 %v17605_v37, %v18543_v59  ;;  %35572 = vst [vmem:[#allocation71_spill] sm:$0xff] %v32321_v46  ;;  %v18551_v37 = vand.u32 4294901760, %v17613_v51  ;;  %v17606_v21 = vld [vmem:[%s28537_s17 + $0x100] sm:$0xff]  ;;  %35573 = vst [vmem:[#allocation72_spill] sm:$0xff] %v32325_v18  ;;  %v17700_v33 = vand.u32 4294901760, %v17615_v49 }
0x122f   : > { %v17610_v59 = vld [vmem:[%s28537_s17 + $0x120] sm:$0xff]  ;;  %35575 = vst [vmem:[#allocation74_spill] sm:$0xff] %v32331_v22  ;;  %35577 = vst [vmem:[#allocation76_spill] sm:$0xff] %v32338_v58  ;;  %26169 = vmatpush1.bf16.msra.mxu0 %v32325_v18  ;;  %v17694_v52 = vand.u32 4294901760, %v17606_v21  ;;  %v17704_v53 = vand.u32 4294901760, %v17619_v12  ;;  %v18555_v20 = vand.u32 4294901760, %v17617_v43 }
0x1230   : > { %35570 = vst [vmem:[#allocation69_spill] sm:$0xff] %v32313_v41  ;;  %26359 = vmatprep.subr.bf16.mxu1 %v32313_v41  ;;  %v17612_v41 = vld [vmem:[%s28537_s17 + $0x130] sm:$0xff]  ;;  %35579 = vst [vmem:[#allocation78_spill] sm:$0xff] %v32342_v27  ;;  %v32349_v28 = vpack.c.bf16 %v18551_v37, %v18547_v31  ;;  %v32353_v54 = vsub.f32 %v17613_v51, %v18551_v37  ;;  %26171 = vmatprep.subr.bf16.mxu0 %v32338_v58  ;;  %v17698_v34 = vand.u32 4294901760, %v17610_v59  ;;  %v17614_v31 = vld [vmem:[%s28537_s17 + $0x140] sm:$0xff] }
0x1231   : > { %26361 = vmatpush1.bf16.msra.mxu1 %v32329_v45  ;;  %35581 = vst [vmem:[#allocation80_spill] sm:$0xff] %v32351_v38  ;;  %v18553_v19 = vand.u32 4294901760, %v17612_v41  ;;  %v32357_v7 = vsub.f32 %v17606_v21, %v17694_v52  ;;  %v18559_v51 = vand.u32 4294901760, %v17621_v61  ;;  %v17618_v37 = vld [vmem:[%s28537_s17 + $0x160] sm:$0xff]  ;;  %v17623_v21 = vld [vmem:[%s28537_s17 + $0x188] sm:$0xff]  ;;  %v32374_v26 = vpack.c.bf16 %v17704_v53, %v17700_v33  ;;  %v17629_v38 = vld [vmem:[%s28537_s17 + $0x1b8] sm:$0xff] }
0x1232   : > { %35580 = vst [vmem:[#allocation79_spill] sm:$0xff] %v32349_v28  ;;  %35582 = vst [vmem:[#allocation81_spill] sm:$0xff] %v32353_v54  ;;  %26363 = vmatprep.subr.bf16.mxu1 %v32349_v28  ;;  %v32361_v58 = vpack.c.bf16 %v17698_v34, %v17694_v52  ;;  %v32363_v45 = vsub.f32 %v17610_v59, %v17698_v34  ;;  %v17620_v28 = vld [vmem:[%s28537_s17 + $0x170] sm:$0xff]  ;;  %v32376_v0 = vsub.f32 %v17615_v49, %v17700_v33  ;;  %v17627_v54 = vld [vmem:[%s28537_s17 + $0x1a8] sm:$0xff] }
0x1233   : > { %35583 = vst [vmem:[#allocation82_spill] sm:$0xff] %v32357_v7  ;;  %v32365_v18 = vpack.c.bf16 %v18553_v19, %v18549_v9  ;;  %v32372_v50 = vsub.f32 %v17612_v41, %v18553_v19  ;;  %35589 = vst [vmem:[#allocation88_spill] sm:$0xff] %v32374_v26  ;;  %v32378_v7 = vsub.f32 %v17619_v12, %v17704_v53  ;;  %v17625_v52 = vld [vmem:[%s28537_s17 + $0x198] sm:$0xff]  ;;  %v17702_v34 = vand.u32 4294901760, %v17614_v31 }
0x1234   : > { %35584 = vst [vmem:[#allocation83_spill] sm:$0xff] %v32361_v58  ;;  %35585 = vst [vmem:[#allocation84_spill] sm:$0xff] %v32363_v45  ;;  %26173 = vmatpush1.bf16.msra.mxu0 %v32361_v58  ;;  %v32385_v42 = vpack.c.bf16 %v18559_v51, %v18555_v20  ;;  %v32387_v59 = vsub.f32 %v17617_v43, %v18555_v20  ;;  %v32389_v41 = vsub.f32 %v17621_v61, %v18559_v51  ;;  %v17622_v20 = vld [vmem:[%s28537_s17 + $0x180] sm:$0xff]  ;;  %v17637_v45 = vld [vmem:[%s28537_s17 + $0x1f8] sm:$0xff] }
0x1235   : > { %35586 = vst [vmem:[#allocation85_spill] sm:$0xff] %v32365_v18  ;;  %35588 = vst [vmem:[#allocation87_spill] sm:$0xff] %v32372_v50  ;;  %26365 = vmatpush1.bf16.msra.mxu1 %v32365_v18  ;;  %26175 = vmatprep.subr.bf16.mxu0 %v32374_v26  ;;  %v17706_v12 = vand.u32 4294901760, %v17618_v37  ;;  %v18557_v49 = vand.u32 4294901760, %v17616_v23  ;;  %v18561_v9 = vand.u32 4294901760, %v17620_v28  ;;  %v17708_v19 = vand.u32 4294901760, %v17623_v21 }
0x1236   : > { %35590 = vst [vmem:[#allocation89_spill] sm:$0xff] %v32376_v0  ;;  %35591 = vst [vmem:[#allocation90_spill] sm:$0xff] %v32378_v7  ;;  %26367 = vmatprep.subr.bf16.mxu1 %v32385_v42  ;;  %v32393_v33 = vsub.f32 %v17614_v31, %v17702_v34  ;;  %v17712_v53 = vand.u32 4294901760, %v17627_v54  ;;  %v18563_v43 = vand.u32 4294901760, %v17625_v52  ;;  %v18567_v61 = vand.u32 4294901760, %v17629_v38  ;;  %v17626_v51 = vld [vmem:[%s28537_s17 + $0x1a0] sm:$0xff] }
0x1237   : > { %35592 = vst [vmem:[#allocation91_spill] sm:$0xff] %v32385_v42  ;;  %35593 = vst [vmem:[#allocation92_spill] sm:$0xff] %v32387_v59  ;;  %v32397_v26 = vpack.c.bf16 %v17706_v12, %v17702_v34  ;;  %v32399_v18 = vsub.f32 %v17618_v37, %v17706_v12  ;;  %v32401_v58 = vpack.c.bf16 %v18561_v9, %v18557_v49  ;;  %v17624_v59 = vld [vmem:[%s28537_s17 + $0x190] sm:$0xff]  ;;  %v17631_v31 = vld [vmem:[%s28537_s17 + $0x1c8] sm:$0xff]  ;;  %v17710_v12 = vand.u32 4294901760, %v17622_v20 }
0x1238   : > { %35594 = vst [vmem:[#allocation93_spill] sm:$0xff] %v32389_v41  ;;  %35595 = vst [vmem:[#allocation94_spill] sm:$0xff] %v32393_v33  ;;  %v32403_v41 = vsub.f32 %v17616_v23, %v18557_v49  ;;  %v17628_v42 = vld [vmem:[%s28537_s17 + $0x1b0] sm:$0xff]  ;;  %v32408_v33 = vsub.f32 %v17620_v28, %v18561_v9  ;;  %v32410_v7 = vpack.c.bf16 %v17712_v53, %v17708_v19  ;;  %v17633_v34 = vld [vmem:[%s28537_s17 + $0x1d8] sm:$0xff]  ;;  %v17716_v9 = vand.u32 4294901760, %v17631_v31 }
0x1239   : > { %35596 = vst [vmem:[#allocation95_spill] sm:$0xff] %v32397_v26  ;;  %35597 = vst [vmem:[#allocation96_spill] sm:$0xff] %v32399_v18  ;;  %v32412_v0 = vsub.f32 %v17623_v21, %v17708_v19  ;;  %v32414_v50 = vsub.f32 %v17627_v54, %v17712_v53  ;;  %26177 = vmatpush1.bf16.msra.mxu0 %v32397_v26  ;;  %26369 = vmatpush1.bf16.msra.mxu1 %v32401_v58  ;;  %v17714_v54 = vand.u32 4294901760, %v17626_v51 }
0x123a   : > { %35598 = vst [vmem:[#allocation97_spill] sm:$0xff] %v32401_v58  ;;  %35599 = vst [vmem:[#allocation98_spill] sm:$0xff] %v32403_v41  ;;  %v32421_v23 = vpack.c.bf16 %v18567_v61, %v18563_v43  ;;  %v32423_v37 = vsub.f32 %v17625_v52, %v18563_v43  ;;  %v32425_v28 = vsub.f32 %v17629_v38, %v18567_v61  ;;  %26179 = vmatprep.subr.bf16.mxu0 %v32410_v7  ;;  %v17630_v43 = vld [vmem:[%s28537_s17 + $0x1c0] sm:$0xff] }
0x123b   : > { %35600 = vst [vmem:[#allocation99_spill] sm:$0xff] %v32410_v7  ;;  %35601 = vst [vmem:[#allocation100_spill] sm:$0xff] %v32412_v0  ;;  %v18565_v21 = vand.u32 4294901760, %v17624_v59  ;;  %v18569_v49 = vand.u32 4294901760, %v17628_v42  ;;  %v32429_v19 = vsub.f32 %v17622_v20, %v17710_v12  ;;  %v17720_v53 = vand.u32 4294901760, %v17635_v8 }
0x123c   : > { %35602 = vst [vmem:[#allocation101_spill] sm:$0xff] %v32414_v50  ;;  %35603 = vst [vmem:[#allocation102_spill] sm:$0xff] %v32421_v23  ;;  %26371 = vmatprep.subr.bf16.mxu1 %v32421_v23  ;;  %v18571_v58 = vand.u32 4294901760, %v17633_v34  ;;  %v18575_v52 = vand.u32 4294901760, %v17637_v45  ;;  %v32432_v38 = vpack.c.bf16 %v17714_v54, %v17710_v12  ;;  %v32434_v61 = vsub.f32 %v17626_v51, %v17714_v54  ;;  %v17636_v50 = vld [vmem:[%s28537_s17 + $0x1f0] sm:$0xff] }
0x123d   : > { %35604 = vst [vmem:[#allocation103_spill] sm:$0xff] %v32423_v37  ;;  %35605 = vst [vmem:[#allocation104_spill] sm:$0xff] %v32425_v28  ;;  %v32436_v26 = vpack.c.bf16 %v18569_v49, %v18565_v21  ;;  %v32438_v7 = vsub.f32 %v17624_v59, %v18565_v21  ;;  %v17634_v28 = vld [vmem:[%s28537_s17 + $0x1e0] sm:$0xff]  ;;  %v17632_v37 = vld [vmem:[%s28537_s17 + $0x1d0] sm:$0xff]  ;;  %v32443_v0 = vsub.f32 %v17628_v42, %v18569_v49  ;;  %v17718_v54 = vand.u32 4294901760, %v17630_v43 }
0x123e   : > { %35606 = vst [vmem:[#allocation105_spill] sm:$0xff] %v32429_v19  ;;  %35607 = vst [vmem:[#allocation106_spill] sm:$0xff] %v32432_v38  ;;  %v32445_v23 = vpack.c.bf16 %v17720_v53, %v17716_v9  ;;  %v32447_v20 = vsub.f32 %v17631_v31, %v17716_v9  ;;  %v32449_v19 = vsub.f32 %v17635_v8, %v17720_v53  ;;  %26181 = vmatpush1.bf16.msra.mxu0 %v32432_v38 }
0x123f   : > { %35608 = vst [vmem:[#allocation107_spill] sm:$0xff] %v32436_v26  ;;  %26373 = vmatpush1.bf16.msra.mxu1 %v32436_v26  ;;  %v32453_v51 = vpack.c.bf16 %v18575_v52, %v18571_v58  ;;  %v32455_v12 = vsub.f32 %v17633_v34, %v18571_v58  ;;  %v32457_v59 = vsub.f32 %v17637_v45, %v18575_v52  ;;  %v17722_v42 = vand.u32 4294901760, %v17634_v28 }
0x1240   : > { %35609 = vst [vmem:[#allocation108_spill] sm:$0xff] %v32445_v23  ;;  %26183 = vmatprep.subr.bf16.mxu0 %v32445_v23  ;;  %v18573_v21 = vand.u32 4294901760, %v17632_v37  ;;  %v18577_v49 = vand.u32 4294901760, %v17636_v50  ;;  %v35024_v31 = vand.u32 4294901760, %v32193_v55  ;;  %v32462_v8 = vsub.f32 %v17630_v43, %v17718_v54 }
0x1241   : > { %35610 = vst [vmem:[#allocation109_spill] sm:$0xff] %v32453_v51  ;;  %26375 = vmatprep.subr.bf16.mxu1 %v32453_v51  ;;  %v35023_v9 = vand.u32 4294901760, %v32195_v2  ;;  %v32467_v45 = vpack.c.bf16 %v17722_v42, %v17718_v54  ;;  %v32469_v34 = vsub.f32 %v17634_v28, %v17722_v42  ;;  %v35613_v58 = vand.u32 4294901760, %v32197_v29 }
0x1242   : > { %v32471_v52 = vpack.c.bf16 %v18577_v49, %v18573_v21  ;;  %v32473_v23 = vsub.f32 %v17632_v37, %v18573_v21  ;;  %v32475_v26 = vsub.f32 %v17636_v50, %v18577_v49  ;;  %v17771_v43 = vsub.f32 %v32193_v55, %v35024_v31 }
0x1243   : > { %35611 = vst [vmem:[#allocation110_spill] sm:$0xff] %v32467_v45  ;;  %v17783_v53 = vsub.f32 %v32195_v2, %v35023_v9  ;;  %v18626_v54 = vsub.f32 %v32197_v29, %v35613_v58  ;;  %26185 = vmatpush1.bf16.msra.mxu0 %v32467_v45  ;;  %v35614_v37 = vand.u32 4294901760, %v32201_v57  ;;  %v35035_v28 = vand.u32 4294901760, %v32205_v39 }
0x1244   : > { %35612 = vst [vmem:[#allocation111_spill] sm:$0xff] %v32471_v52  ;;  %26377 = vmatpush1.bf16.msra.mxu1 %v32471_v52  ;;  %v35040_v42 = vand.u32 4294901760, %v32208_v13  ;;  %v35048_v21 = vand.u32 4294901760, %v32214_v32  ;;  %v17772_v49 = vand.u32 4294901760, %v17771_v43  ;;  %v35041_v51 = vand.u32 4294901760, %v32216_v44 }
0x1245   : > { %v18638_v50 = vsub.f32 %v32201_v57, %v35614_v37  ;;  %v17784_v9 = vand.u32 4294901760, %v17783_v53  ;;  %v18627_v31 = vand.u32 4294901760, %v18626_v54  ;;  %v17777_v52 = vsub.f32 %v32205_v39, %v35035_v28 }
0x1246   : > { %v17789_v37 = vsub.f32 %v32208_v13, %v35040_v42  ;;  %v18632_v45 = vsub.f32 %v32214_v32, %v35048_v21  ;;  %v18644_v53 = vsub.f32 %v32216_v44, %v35041_v51  ;;  %v35044_v43 = vand.u32 4294901760, %v32244_v62 }
0x1247   : > { %v18639_v58 = vand.u32 4294901760, %v18638_v50  ;;  %v26186_v38 = vpack.c.bf16 %v17784_v9, %v17772_v49  ;;  %v35043_v54 = vand.u32 4294901760, %v32246_v63  ;;  %v17778_v57 = vand.u32 4294901760, %v17777_v52 }
0x1248   : > { %v17790_v28 = vand.u32 4294901760, %v17789_v37  ;;  %v18633_v39 = vand.u32 4294901760, %v18632_v45  ;;  %v18645_v29 = vand.u32 4294901760, %v18644_v53  ;;  %v17795_v42 = vsub.f32 %v32244_v62, %v35044_v43 }
0x1249   : > { %v26378_v50 = vpack.c.bf16 %v18639_v58, %v18627_v31  ;;  %26187 = vmatprep.subr.bf16.mxu0 %v26186_v38  ;;  %v17807_v9 = vsub.f32 %v32246_v63, %v35043_v54  ;;  %v35042_v49 = vand.u32 4294901760, %v32249_v36  ;;  %v35045_v31 = vand.u32 4294901760, %v32251_v40 }
0x124a   : > { %v32516_v51 = vpack.c.bf16 %v17790_v28, %v17778_v57  ;;  %v35046_v52 = vand.u32 4294901760, %v32256_v14  ;;  %v35047_v38 = vand.u32 4294901760, %v32258_v24  ;;  %v32521_v45 = vpack.c.bf16 %v18645_v29, %v18633_v39 }
0x124b   : > { %26379 = vmatprep.subr.bf16.mxu1 %v26378_v50  ;;  %v17796_v58 = vand.u32 4294901760, %v17795_v42  ;;  %v17808_v37 = vand.u32 4294901760, %v17807_v9  ;;  %v18650_v53 = vsub.f32 %v32249_v36, %v35042_v49  ;;  %v18662_v50 = vsub.f32 %v32251_v40, %v35045_v31 }
0x124c   : > { %35615 = vst [vmem:[#allocation112_spill] sm:$0xff] %v32516_v51  ;;  %35616 = vst [vmem:[#allocation113_spill] sm:$0xff] %v32521_v45  ;;  %v17801_v57 = vsub.f32 %v32256_v14, %v35046_v52  ;;  %v17813_v28 = vsub.f32 %v32258_v24, %v35047_v38  ;;  %v35049_v29 = vand.u32 4294901760, %v32261_v47  ;;  %v35050_v9 = vand.u32 4294901760, %v32266_v3  ;;  %v35673_v14 = vld [vmem:[#allocation103_spill] sm:$0xff] }
0x124d   : > { %v32536_v39 = vpack.c.bf16 %v17808_v37, %v17796_v58  ;;  %v18651_v42 = vand.u32 4294901760, %v18650_v53  ;;  %v35051_v49 = vand.u32 4294901760, %v32270_v17  ;;  %v18663_v54 = vand.u32 4294901760, %v18662_v50 }
0x124e   : > { %v17802_v43 = vand.u32 4294901760, %v17801_v57  ;;  %v17814_v31 = vand.u32 4294901760, %v17813_v28  ;;  %v18656_v52 = vsub.f32 %v32261_v47, %v35049_v29  ;;  %v18668_v38 = vsub.f32 %v32266_v3, %v35050_v9  ;;  %v35672_v3 = vld [vmem:[#allocation98_spill] sm:$0xff] }
0x124f   : > { %35617 = vst [vmem:[#allocation114_spill] sm:$0xff] %v32536_v39  ;;  %v17819_v58 = vsub.f32 %v32270_v17, %v35051_v49  ;;  %v35052_v37 = vand.u32 4294901760, %v32272_v4  ;;  %v35053_v53 = vand.u32 4294901760, %v32279_v16  ;;  %v32551_v21 = vpack.c.bf16 %v18663_v54, %v18651_v42 }
0x1250   : > { %v32553_v50 = vpack.c.bf16 %v17814_v31, %v17802_v43  ;;  %v18657_v57 = vand.u32 4294901760, %v18656_v52  ;;  %v35054_v28 = vand.u32 4294901760, %v32281_v25  ;;  %v18669_v29 = vand.u32 4294901760, %v18668_v38 }
0x1251   : > { %35618 = vst [vmem:[#allocation115_spill] sm:$0xff] %v32551_v21  ;;  %v17820_v39 = vand.u32 4294901760, %v17819_v58  ;;  %v17831_v9 = vsub.f32 %v32272_v4, %v35052_v37  ;;  %v18674_v49 = vsub.f32 %v32279_v16, %v35053_v53  ;;  %v35055_v43 = vand.u32 4294901760, %v32285_v30  ;;  %v35664_v16 = vld [vmem:[#allocation80_spill] sm:$0xff]  ;;  %v35670_v4 = vld [vmem:[#allocation94_spill] sm:$0xff] }
0x1252   : > { %35619 = vst [vmem:[#allocation116_spill] sm:$0xff] %v32553_v50  ;;  %v18686_v54 = vsub.f32 %v32281_v25, %v35054_v28  ;;  %v35056_v31 = vand.u32 4294901760, %v32291_v6  ;;  %v35057_v52 = vand.u32 4294901760, %v32295_v5  ;;  %v32568_v38 = vpack.c.bf16 %v18669_v29, %v18657_v57  ;;  %v35665_v25 = vld [vmem:[#allocation81_spill] sm:$0xff] }
0x1253   : > { %v17832_v42 = vand.u32 4294901760, %v17831_v9  ;;  %v18675_v58 = vand.u32 4294901760, %v18674_v49  ;;  %v35058_v37 = vand.u32 4294901760, %v32300_v56  ;;  %v17825_v53 = vsub.f32 %v32285_v30, %v35055_v43 }
0x1254   : > { %35620 = vst [vmem:[#allocation117_spill] sm:$0xff] %v32568_v38  ;;  %v18687_v50 = vand.u32 4294901760, %v18686_v54  ;;  %v17837_v28 = vsub.f32 %v32291_v6, %v35056_v31  ;;  %v18680_v21 = vsub.f32 %v32295_v5, %v35057_v52  ;;  %v35061_v29 = vand.u32 4294901760, %v32304_v15  ;;  %v35667_v5 = vld [vmem:[#allocation86_spill] sm:$0xff] }
0x1255   : > { %v32580_v45 = vpack.c.bf16 %v17832_v42, %v17820_v39  ;;  %v18692_v49 = vsub.f32 %v32300_v56, %v35058_v37  ;;  %v35059_v9 = vand.u32 4294901760, %v32306_v60  ;;  %v17826_v54 = vand.u32 4294901760, %v17825_v53 }
0x1256   : > { %v32587_v57 = vpack.c.bf16 %v18687_v50, %v18675_v58  ;;  %v17838_v43 = vand.u32 4294901760, %v17837_v28  ;;  %v18681_v38 = vand.u32 4294901760, %v18680_v21  ;;  %v17843_v52 = vsub.f32 %v32304_v15, %v35061_v29 }
0x1257   : > { %35621 = vst [vmem:[#allocation118_spill] sm:$0xff] %v32580_v45  ;;  %v18693_v31 = vand.u32 4294901760, %v18692_v49  ;;  %v17855_v39 = vsub.f32 %v32306_v60, %v35059_v9  ;;  %v35060_v42 = vand.u32 4294901760, %v32315_v48  ;;  %v35062_v45 = vand.u32 4294901760, %v32317_v10 }
0x1258   : > { %35622 = vst [vmem:[#allocation119_spill] sm:$0xff] %v32587_v57  ;;  %v32596_v37 = vpack.c.bf16 %v17838_v43, %v17826_v54  ;;  %v35063_v50 = vand.u32 4294901760, %v32321_v46  ;;  %v35064_v53 = vand.u32 4294901760, %v32327_v11  ;;  %v17844_v28 = vand.u32 4294901760, %v17843_v52 }
0x1259   : > { %v32601_v21 = vpack.c.bf16 %v18693_v31, %v18681_v38  ;;  %v17856_v58 = vand.u32 4294901760, %v17855_v39  ;;  %v18698_v49 = vsub.f32 %v32315_v48, %v35060_v42  ;;  %v18710_v9 = vsub.f32 %v32317_v10, %v35062_v45 }
0x125a   : > { %35623 = vst [vmem:[#allocation120_spill] sm:$0xff] %v32596_v37  ;;  %v17849_v43 = vsub.f32 %v32321_v46, %v35063_v50  ;;  %v17861_v54 = vsub.f32 %v32327_v11, %v35064_v53  ;;  %v35065_v31 = vand.u32 4294901760, %v32331_v22  ;;  %v35066_v39 = vand.u32 4294901760, %v32336_v35 }
0x125b   : > { %35624 = vst [vmem:[#allocation121_spill] sm:$0xff] %v32601_v21  ;;  %v32616_v52 = vpack.c.bf16 %v17856_v58, %v17844_v28  ;;  %v18699_v38 = vand.u32 4294901760, %v18698_v49  ;;  %v35067_v42 = vand.u32 4294901760, %v32340_v1  ;;  %v18711_v29 = vand.u32 4294901760, %v18710_v9  ;;  %v35626_v49 = vld [vmem:[#allocation80_spill] sm:$0xff] }
0x125c   : > { %v17850_v21 = vand.u32 4294901760, %v17849_v43  ;;  %v17862_v45 = vand.u32 4294901760, %v17861_v54  ;;  %v18704_v50 = vsub.f32 %v32331_v22, %v35065_v31  ;;  %v18716_v53 = vsub.f32 %v32336_v35, %v35066_v39  ;;  %v35629_v54 = vld [vmem:[#allocation81_spill] sm:$0xff]  ;;  %v35634_v35 = vld [vmem:[#allocation87_spill] sm:$0xff] }
0x125d   : > { %35625 = vst [vmem:[#allocation122_spill] sm:$0xff] %v32616_v52  ;;  %v17867_v28 = vsub.f32 %v32340_v1, %v35067_v42  ;;  %v35072_v58 = vand.u32 4294901760, %v32342_v27  ;;  %v35075_v52 = vand.u32 4294901760, %v35626_v49  ;;  %v32631_v37 = vpack.c.bf16 %v18711_v29, %v18699_v38  ;;  %v35630_v38 = vld [vmem:[#allocation82_spill] sm:$0xff] }
0x125e   : > { %v32633_v9 = vpack.c.bf16 %v17862_v45, %v17850_v21  ;;  %v18705_v43 = vand.u32 4294901760, %v18704_v50  ;;  %v35076_v57 = vand.u32 4294901760, %v35629_v54  ;;  %v18717_v31 = vand.u32 4294901760, %v18716_v53  ;;  %v35631_v21 = vld [vmem:[#allocation84_spill] sm:$0xff] }
0x125f   : > { %35627 = vst [vmem:[#allocation123_spill] sm:$0xff] %v32631_v37  ;;  %v17868_v51 = vand.u32 4294901760, %v17867_v28  ;;  %v17879_v39 = vsub.f32 %v32342_v27, %v35072_v58  ;;  %v18722_v42 = vsub.f32 %v35626_v49, %v35075_v52  ;;  %v35079_v45 = vand.u32 4294901760, %v35630_v38 }
0x1260   : > { %35628 = vst [vmem:[#allocation124_spill] sm:$0xff] %v32633_v9  ;;  %v18734_v29 = vsub.f32 %v35629_v54, %v35076_v57  ;;  %v35083_v50 = vand.u32 4294901760, %v35631_v21  ;;  %v35632_v9 = vld [vmem:[#allocation86_spill] sm:$0xff]  ;;  %v32648_v53 = vpack.c.bf16 %v18717_v31, %v18705_v43  ;;  %v35085_v58 = vand.u32 4294901760, %v35634_v35  ;;  %v35636_v31 = vld [vmem:[#allocation89_spill] sm:$0xff] }
0x1261   : > { %v35084_v37 = vand.u32 4294901760, %v35632_v9  ;;  %v17880_v28 = vand.u32 4294901760, %v17879_v39  ;;  %v18723_v1 = vand.u32 4294901760, %v18722_v42  ;;  %v17873_v52 = vsub.f32 %v35630_v38, %v35079_v45  ;;  %v35637_v43 = vld [vmem:[#allocation90_spill] sm:$0xff] }
0x1262   : > { %35633 = vst [vmem:[#allocation84_spill] sm:$0xff] %v32648_v53  ;;  %v18735_v27 = vand.u32 4294901760, %v18734_v29  ;;  %v17885_v57 = vsub.f32 %v35631_v21, %v35083_v50  ;;  %v18740_v42 = vsub.f32 %v35634_v35, %v35085_v58  ;;  %v35088_v39 = vand.u32 4294901760, %v35636_v31  ;;  %v35641_v35 = vld [vmem:[#allocation93_spill] sm:$0xff] }
0x1263   : > { %v18728_v54 = vsub.f32 %v35632_v9, %v35084_v37  ;;  %v32660_v49 = vpack.c.bf16 %v17880_v28, %v17868_v51  ;;  %v35089_v29 = vand.u32 4294901760, %v35637_v43  ;;  %v17874_v45 = vand.u32 4294901760, %v17873_v52  ;;  %v35639_v28 = vld [vmem:[#allocation92_spill] sm:$0xff] }
0x1264   : > { %v32667_v53 = vpack.c.bf16 %v18735_v27, %v18723_v1  ;;  %v17886_v38 = vand.u32 4294901760, %v17885_v57  ;;  %v18741_v50 = vand.u32 4294901760, %v18740_v42  ;;  %v17891_v37 = vsub.f32 %v35636_v31, %v35088_v39  ;;  %v35642_v27 = vld [vmem:[#allocation94_spill] sm:$0xff] }
0x1265   : > { %35635 = vst [vmem:[#allocation125_spill] sm:$0xff] %v32660_v49  ;;  %v18729_v22 = vand.u32 4294901760, %v18728_v54  ;;  %v17903_v51 = vsub.f32 %v35637_v43, %v35089_v29  ;;  %v35090_v58 = vand.u32 4294901760, %v35639_v28  ;;  %v35091_v9 = vand.u32 4294901760, %v35641_v35 }
0x1266   : > { %35638 = vst [vmem:[#allocation89_spill] sm:$0xff] %v32667_v53  ;;  %v32676_v49 = vpack.c.bf16 %v17886_v38, %v17874_v45  ;;  %v35092_v1 = vand.u32 4294901760, %v35642_v27  ;;  %v35093_v57 = vand.u32 4294901760, %v32399_v18  ;;  %v17892_v54 = vand.u32 4294901760, %v17891_v37 }
0x1267   : > { %v32681_v52 = vpack.c.bf16 %v18741_v50, %v18729_v22  ;;  %v17904_v42 = vand.u32 4294901760, %v17903_v51  ;;  %v18746_v39 = vsub.f32 %v35639_v28, %v35090_v58  ;;  %v18758_v29 = vsub.f32 %v35641_v35, %v35091_v9  ;;  %v35645_v58 = vld [vmem:[#allocation100_spill] sm:$0xff] }
0x1268   : > { %35640 = vst [vmem:[#allocation90_spill] sm:$0xff] %v32676_v49  ;;  %v17897_v38 = vsub.f32 %v35642_v27, %v35092_v1  ;;  %v17909_v45 = vsub.f32 %v32399_v18, %v35093_v57  ;;  %v35098_v22 = vand.u32 4294901760, %v32403_v41  ;;  %v35101_v51 = vand.u32 4294901760, %v32408_v33 }
0x1269   : > { %35643 = vst [vmem:[#allocation92_spill] sm:$0xff] %v32681_v52  ;;  %v32696_v37 = vpack.c.bf16 %v17904_v42, %v17892_v54  ;;  %v18747_v50 = vand.u32 4294901760, %v18746_v39  ;;  %v35102_v52 = vand.u32 4294901760, %v35645_v58  ;;  %v18759_v49 = vand.u32 4294901760, %v18758_v29  ;;  %v35646_v39 = vld [vmem:[#allocation101_spill] sm:$0xff] }
0x126a   : > { %v17898_v53 = vand.u32 4294901760, %v17897_v38  ;;  %v17910_v9 = vand.u32 4294901760, %v17909_v45  ;;  %v18752_v1 = vsub.f32 %v32403_v41, %v35098_v22  ;;  %v18764_v57 = vsub.f32 %v32408_v33, %v35101_v51  ;;  %v35650_v45 = vld [vmem:[#allocation104_spill] sm:$0xff] }
0x126b   : > { %35644 = vst [vmem:[#allocation126_spill] sm:$0xff] %v32696_v37  ;;  %v17915_v54 = vsub.f32 %v35645_v58, %v35102_v52  ;;  %v35103_v42 = vand.u32 4294901760, %v35646_v39  ;;  %v35647_v37 = vld [vmem:[#allocation103_spill] sm:$0xff]  ;;  %v32711_v27 = vpack.c.bf16 %v18759_v49, %v18747_v50  ;;  %v35105_v35 = vand.u32 4294901760, %v35650_v45  ;;  %v35651_v50 = vld [vmem:[#allocation105_spill] sm:$0xff] }
0x126c   : > { %v35104_v18 = vand.u32 4294901760, %v35647_v37  ;;  %v32713_v29 = vpack.c.bf16 %v17910_v9, %v17898_v53  ;;  %v18753_v38 = vand.u32 4294901760, %v18752_v1  ;;  %v18765_v22 = vand.u32 4294901760, %v18764_v57 }
0x126d   : > { %35648 = vst [vmem:[#allocation100_spill] sm:$0xff] %v32711_v27  ;;  %v17916_v41 = vand.u32 4294901760, %v17915_v54  ;;  %v17927_v51 = vsub.f32 %v35646_v39, %v35103_v42  ;;  %v18782_v49 = vsub.f32 %v35650_v45, %v35105_v35  ;;  %v35108_v9 = vand.u32 4294901760, %v35651_v50 }
0x126e   : > { %35649 = vst [vmem:[#allocation101_spill] sm:$0xff] %v32713_v29  ;;  %v18770_v52 = vsub.f32 %v35647_v37, %v35104_v18  ;;  %v35109_v53 = vand.u32 4294901760, %v32434_v61  ;;  %v35110_v1 = vand.u32 4294901760, %v32438_v7  ;;  %v32728_v57 = vpack.c.bf16 %v18765_v22, %v18753_v38 }
0x126f   : > { %v17928_v54 = vand.u32 4294901760, %v17927_v51  ;;  %v35111_v42 = vand.u32 4294901760, %v32443_v0  ;;  %v18783_v27 = vand.u32 4294901760, %v18782_v49  ;;  %v17921_v18 = vsub.f32 %v35651_v50, %v35108_v9 }
0x1270   : > { %35652 = vst [vmem:[#allocation105_spill] sm:$0xff] %v32728_v57  ;;  %v18771_v29 = vand.u32 4294901760, %v18770_v52  ;;  %v17933_v35 = vsub.f32 %v32434_v61, %v35109_v53  ;;  %v18776_v45 = vsub.f32 %v32438_v7, %v35110_v1  ;;  %v35114_v22 = vand.u32 4294901760, %v32447_v20 }
0x1271   : > { %v32740_v37 = vpack.c.bf16 %v17928_v54, %v17916_v41  ;;  %v18788_v52 = vsub.f32 %v32443_v0, %v35111_v42  ;;  %v35112_v51 = vand.u32 4294901760, %v32449_v19  ;;  %v17922_v49 = vand.u32 4294901760, %v17921_v18 }
0x1272   : > { %v32747_v38 = vpack.c.bf16 %v18783_v27, %v18771_v29  ;;  %v17934_v9 = vand.u32 4294901760, %v17933_v35  ;;  %v18777_v57 = vand.u32 4294901760, %v18776_v45  ;;  %v17939_v1 = vsub.f32 %v32447_v20, %v35114_v22 }
0x1273   : > { %35653 = vst [vmem:[#allocation127_spill] sm:$0xff] %v32740_v37  ;;  %v18789_v53 = vand.u32 4294901760, %v18788_v52  ;;  %v17951_v41 = vsub.f32 %v32449_v19, %v35112_v51  ;;  %v35113_v54 = vand.u32 4294901760, %v32455_v12  ;;  %v35115_v37 = vand.u32 4294901760, %v32457_v59 }
0x1274   : > { %v32756_v42 = vpack.c.bf16 %v17934_v9, %v17922_v49  ;;  %v35116_v27 = vand.u32 4294901760, %v32462_v8  ;;  %v35117_v35 = vand.u32 4294901760, %v32469_v34  ;;  %v17940_v29 = vand.u32 4294901760, %v17939_v1 }
0x1275   : > { %v32761_v18 = vpack.c.bf16 %v18789_v53, %v18777_v57  ;;  %v17952_v45 = vand.u32 4294901760, %v17951_v41  ;;  %v18794_v52 = vsub.f32 %v32455_v12, %v35113_v54  ;;  %v18806_v51 = vsub.f32 %v32457_v59, %v35115_v37  ;;  %v35663_v54 = vld [vmem:[#allocation78_spill] sm:$0xff] }
0x1276   : > { %35654 = vst [vmem:[#allocation128_spill] sm:$0xff] %v32756_v42  ;;  %v17945_v9 = vsub.f32 %v32462_v8, %v35116_v27  ;;  %v17957_v49 = vsub.f32 %v32469_v34, %v35117_v35  ;;  %v35118_v53 = vand.u32 4294901760, %v32473_v23  ;;  %v35121_v41 = vand.u32 4294901760, %v32475_v26  ;;  %v35657_v42 = vld [vmem:[#allocation52_spill] sm:$0xff] }
0x1277   : > { %35655 = vst [vmem:[#allocation129_spill] sm:$0xff] %v32761_v18  ;;  %v32776_v1 = vpack.c.bf16 %v17952_v45, %v17940_v29  ;;  %v18795_v57 = vand.u32 4294901760, %v18794_v52  ;;  %v18807_v22 = vand.u32 4294901760, %v18806_v51  ;;  %v35658_v29 = vld [vmem:[#allocation51_spill] sm:$0xff]  ;;  %v35659_v52 = vld [vmem:[#allocation56_spill] sm:$0xff]  ;;  %v35660_v45 = vld [vmem:[#allocation74_spill] sm:$0xff] }
0x1278   : > { %v17946_v37 = vand.u32 4294901760, %v17945_v9  ;;  %v17958_v18 = vand.u32 4294901760, %v17957_v49  ;;  %v18800_v27 = vsub.f32 %v32473_v23, %v35118_v53  ;;  %v18812_v35 = vsub.f32 %v32475_v26, %v35121_v41  ;;  %v35661_v41 = vld [vmem:[#allocation75_spill] sm:$0xff]  ;;  %v35662_v53 = vld [vmem:[#allocation77_spill] sm:$0xff] }
0x1279   : > { %35656 = vst [vmem:[#allocation130_spill] sm:$0xff] %v32776_v1  ;;  %v32793_v51 = vpack.c.bf16 %v18807_v22, %v18795_v57  ;;  %v35668_v57 = vld [vmem:[#allocation87_spill] sm:$0xff]  ;;  %v35669_v22 = vld [vmem:[#allocation93_spill] sm:$0xff]  ;;  %v35675_v56 = vand.u32 4294901760, %v32285_v30  ;;  %v35676_v1 = vand.u32 4294901760, %v32291_v6  ;;  %v35678_v17 = vand.u32 4294901760, %v32304_v15 }
0x127a   : > { %v32795_v9 = vpack.c.bf16 %v17958_v18, %v17946_v37  ;;  %v18801_v49 = vand.u32 4294901760, %v18800_v27  ;;  %v18813_v55 = vand.u32 4294901760, %v18812_v35  ;;  %v35671_v37 = vld [vmem:[#allocation96_spill] sm:$0xff]  ;;  %v35679_v47 = vand.u32 4294901760, %v32306_v60  ;;  %v35681_v27 = vld [vmem:[#allocation33_spill] sm:$0xff] }
0x127b   : > { %v32859_v62 = vpack.c.bf16 %v35676_v1, %v35675_v56  ;;  %v17566_v32 = vsub.s32 5, %v35681_v27  ;;  %v35682_v35 = vand.u32 4294901760, %v32315_v48  ;;  %v35686_v30 = vand.u32 4294901760, %v32327_v11 }
0x127c   : > { %v32813_v18 = vpack.c.bf16 %v18813_v55, %v18801_v49  ;;  %v35666_v55 = vld [vmem:[#allocation82_spill] sm:$0xff]  ;;  %v35674_v49 = vld [vmem:[#allocation104_spill] sm:$0xff]  ;;  %v32865_v63 = vpack.c.bf16 %v35679_v47, %v35678_v17  ;;  %v17571_v1 = vsub.s32 6, %v35681_v27  ;;  %v35689_v47 = vand.u32 4294901760, %v35661_v41 }
0x127d   : > { %35677 = vst [vmem:[#allocation52_spill] sm:$0xff] %v32859_v62  ;;  %v35688_v62 = vand.u32 4294901760, %v35660_v45  ;;  %v35692_v48 = vand.u32 4294901760, %v35663_v54  ;;  %v35697_v27 = vand.u32 4294901760, %v35666_v55 }
0x127e   : > { %35680 = vst [vmem:[#allocation51_spill] sm:$0xff] %v32865_v63  ;;  %v35691_v63 = vand.u32 4294901760, %v35662_v53  ;;  %v35700_v53 = vld [vmem:[#allocation46_spill] sm:$0xff] }
0x127f   : > { %v32885_v17 = vpack.c.bf16 %v35689_v47, %v35688_v62 }
0x1281   : > { %35690 = vst [vmem:[#allocation75_spill] sm:$0xff] %v32885_v17 }
0x12b8   : > { %v17559_v24 = vpop.xlane.xlu0 %17558 }
0x12b9   : > { %v17560_v36 = vmul.f32 0.0078125, %v17559_v24  ;;  %v35683_v24 = vand.u32 4294901760, %v32317_v10 }
0x12bb   : > { %v17561_v40 = vadd.f32 1e-05, %v17560_v36  ;;  %v32872_v36 = vpack.c.bf16 %v35683_v24, %v35682_v35  ;;  %v32891_v35 = vpack.c.bf16 %v35692_v48, %v35691_v63  ;;  %v27372_v24 = vld [vmem:[%s28525_s23] sm:$0xff]  ;;  %v35701_v63 = vand.u32 4294901760, %v35667_v5 }
0x12bc   : > { %v17572_v17 = vrot.slane %v27372_v24, %v17571_v1 }
0x12bd   : > { %27356 = vrsqrt.f32 %v17561_v40  ;;  %35684 = vst [vmem:[#allocation56_spill] sm:$0xff] %v32872_v36  ;;  %v35685_v40 = vand.u32 4294901760, %v32321_v46  ;;  %35693 = vst [vmem:[#allocation80_spill] sm:$0xff] %v32891_v35  ;;  %v17567_v36 = vrot.slane %v27372_v24, %v17566_v32  ;;  %v35694_v46 = vand.u32 4294901760, %v35664_v16 }
0x12be   : > { %v35702_v32 = vand.u32 4294901760, %v35668_v57  ;;  %v35704_v35 = vand.u32 4294901760, %v35636_v31  ;;  %v35711_v24 = vand.u32 4294901760, %v35671_v37 }
0x12bf   : > { %v32878_v56 = vpack.c.bf16 %v35686_v30, %v35685_v40  ;;  %v35695_v30 = vand.u32 4294901760, %v35665_v25 }
0x12c0   : > { %v32911_v48 = vpack.c.bf16 %v35702_v32, %v35701_v63  ;;  %v35714_v32 = vand.u32 4294901760, %v35672_v3 }
0x12c1   : > { %35687 = vst [vmem:[#allocation74_spill] sm:$0xff] %v32878_v56  ;;  %v32898_v40 = vpack.c.bf16 %v35695_v30, %v35694_v46  ;;  %v35698_v56 = vand.u32 4294901760, %v35631_v21  ;;  %v35705_v46 = vand.u32 4294901760, %v35637_v43 }
0x12c2   : > { %35703 = vst [vmem:[#allocation86_spill] sm:$0xff] %v32911_v48 }
0x12c3   : > { %35696 = vst [vmem:[#allocation81_spill] sm:$0xff] %v32898_v40  ;;  %v32904_v62 = vpack.c.bf16 %v35698_v56, %v35697_v27  ;;  %v32917_v30 = vpack.c.bf16 %v35705_v46, %v35704_v35  ;;  %v35707_v27 = vand.u32 4294901760, %v35639_v28  ;;  %v35708_v56 = vand.u32 4294901760, %v35669_v22 }
0x12c4   : > { %v35715_v35 = vand.u32 4294901760, %v32408_v33 }
0x12c5   : > { %35699 = vst [vmem:[#allocation82_spill] sm:$0xff] %v32904_v62  ;;  %35706 = vst [vmem:[#allocation87_spill] sm:$0xff] %v32917_v30  ;;  %v32923_v1 = vpack.c.bf16 %v35708_v56, %v35707_v27  ;;  %v35749_v30 = vld [vmem:[#allocation117_spill] sm:$0xff] }
0x12c6   : > { %v32937_v46 = vpack.c.bf16 %v35715_v35, %v35714_v32  ;;  %v35725_v32 = vand.u32 4294901760, %v32434_v61  ;;  %v35792_v62 = vld [vmem:[#allocation61_spill] sm:$0xff] }
0x12c7   : > { %v27357_v47 = vpop.eup %27356  ;;  %35709 = vst [vmem:[#allocation93_spill] sm:$0xff] %v32923_v1 }
0x12c8   : > { %v17563_v54 = vmul.f32 %v27357_v47, %v35700_v53  ;;  %v35710_v53 = vand.u32 4294901760, %v35670_v4  ;;  %35716 = vst [vmem:[#allocation98_spill] sm:$0xff] %v32937_v46 }
0x12ca   : > { %v17568_v40 = vmul.f32 %v17567_v36, %v17563_v54  ;;  %v32929_v47 = vpack.c.bf16 %v35711_v24, %v35710_v53  ;;  %v35717_v54 = vand.u32 4294901760, %v35645_v58  ;;  %v35718_v36 = vand.u32 4294901760, %v35646_v39 }
0x12cb   : > { %v35721_v53 = vand.u32 4294901760, %v35673_v14  ;;  %v35724_v24 = vand.u32 4294901760, %v35651_v50 }
0x12cc   : > { %35712 = vst [vmem:[#allocation94_spill] sm:$0xff] %v32929_v47  ;;  %v32931_v63 = vadd.f32 %v17572_v17, %v17568_v40  ;;  %v32943_v27 = vpack.c.bf16 %v35718_v36, %v35717_v54  ;;  %v35722_v17 = vand.u32 4294901760, %v35674_v49  ;;  %v35727_v54 = vand.u32 4294901760, %v32438_v7 }
0x12cd   : > { %v32958_v35 = vpack.c.bf16 %v35725_v32, %v35724_v24  ;;  %v35728_v36 = vand.u32 4294901760, %v32443_v0  ;;  %v35730_v47 = vand.u32 4294901760, %v32447_v20  ;;  %v35734_v24 = vand.u32 4294901760, %v32455_v12 }
0x12ce   : > { %35713 = vst [vmem:[#allocation96_spill] sm:$0xff] %v32931_v63  ;;  %35719 = vst [vmem:[#allocation103_spill] sm:$0xff] %v32943_v27  ;;  %v32946_v56 = vand.u32 4294901760, %v32931_v63  ;;  %v32952_v40 = vpack.c.bf16 %v35722_v17, %v35721_v53  ;;  %v35731_v53 = vand.u32 4294901760, %v32449_v19  ;;  %v35735_v32 = vand.u32 4294901760, %v32457_v59 }
0x12cf   : > { %35726 = vst [vmem:[#allocation131_spill] sm:$0xff] %v32958_v35  ;;  %v32968_v27 = vpack.c.bf16 %v35728_v36, %v35727_v54  ;;  %v35737_v35 = vand.u32 4294901760, %v32462_v8  ;;  %v35738_v54 = vand.u32 4294901760, %v32469_v34 }
0x12d0   : > { %35720 = vst [vmem:[#allocation104_spill] sm:$0xff] %v32946_v56  ;;  %35723 = vst [vmem:[#allocation46_spill] sm:$0xff] %v32952_v40  ;;  %v32962_v46 = vsub.f32 %v32931_v63, %v32946_v56  ;;  %v32974_v17 = vpack.c.bf16 %v35731_v53, %v35730_v47  ;;  %v32983_v63 = vpack.c.bf16 %v35735_v32, %v35734_v24  ;;  %v35740_v47 = vand.u32 4294901760, %v32473_v23  ;;  %v35743_v24 = vld [vmem:[#allocation112_spill] sm:$0xff]  ;;  %v35744_v32 = vld [vmem:[#allocation113_spill] sm:$0xff] }
0x12d1   : > { %35729 = vst [vmem:[#allocation132_spill] sm:$0xff] %v32968_v27  ;;  %v32989_v36 = vpack.c.bf16 %v35738_v54, %v35737_v35  ;;  %v35741_v53 = vand.u32 4294901760, %v32475_v26  ;;  %v35746_v35 = vld [vmem:[#allocation115_spill] sm:$0xff]  ;;  %v35747_v54 = vmov 0.0  }
0x12d2   : > { %35732 = vst [vmem:[#allocation133_spill] sm:$0xff] %v32974_v17  ;;  %v32977_v40 = vand.u32 4294901760, %v32962_v46  ;;  %35736 = vst [vmem:[#allocation135_spill] sm:$0xff] %v32983_v63  ;;  %v35745_v63 = vld [vmem:[#allocation114_spill] sm:$0xff] }
0x12d3   : > { %35739 = vst [vmem:[#allocation136_spill] sm:$0xff] %v32989_v36  ;;  %v32997_v17 = vpack.c.bf16 %v35741_v53, %v35740_v47  ;;  %v35748_v36 = vld [vmem:[#allocation116_spill] sm:$0xff]  ;;  %v35750_v47 = vld [vmem:[#allocation118_spill] sm:$0xff]  ;;  %v35753_v53 = vld [vmem:[#allocation121_spill] sm:$0xff] }
0x12d4   : > { %35733 = vst [vmem:[#allocation134_spill] sm:$0xff] %v32977_v40  ;;  %v17760_v27 = vsub.f32 %v32962_v46, %v32977_v40 }
0x12d5   : > { %35742 = vst [vmem:[#allocation137_spill] sm:$0xff] %v32997_v17  ;;  %v35758_v17 = vld [vmem:[#allocation125_spill] sm:$0xff] }
0x12d6   : > { %v17761_v1 = vand.u32 4294901760, %v17760_v27  ;;  %v35751_v27 = vld [vmem:[#allocation119_spill] sm:$0xff] }
0x12d8   : > { %17762 = vmatmul.mubr.f32.vlgmr.msra.gmra.mrb[66].mxu0 %v17761_v1  ;;  %18617 = vmatmul.mubr.f32.vlgmr.msra.gmra.mrb[72].mxu1 %v17761_v1  ;;  %v35752_v1 = vld [vmem:[#allocation120_spill] sm:$0xff] }
0x12d9   : > { %26189 = vmatpush1.bf16.msra.mxu0 %v35743_v24  ;;  %26381 = vmatpush1.bf16.msra.mxu1 %v35744_v32  ;;  %v35754_v24 = vld [vmem:[#allocation122_spill] sm:$0xff]  ;;  %v35756_v32 = vld [vmem:[#allocation124_spill] sm:$0xff] }
0x12da   : > { %26191 = vmatprep.subr.bf16.mxu0 %v35745_v63  ;;  %26383 = vmatprep.subr.bf16.mxu1 %v35746_v35  ;;  %v35755_v63 = vld [vmem:[#allocation123_spill] sm:$0xff]  ;;  %v35757_v35 = vld [vmem:[#allocation84_spill] sm:$0xff] }
0x12db   : > { %17992 = vmatprep.mubr.f32.mxu0 %v35747_v54  ;;  %18847 = vmatprep.mubr.f32.mxu1 %v35747_v54 }
0x12dd   : > { %26193 = vmatpush1.bf16.msra.mxu0 %v35748_v36  ;;  %26385 = vmatpush1.bf16.msra.mxu1 %v35749_v30  ;;  %v35759_v36 = vld [vmem:[#allocation89_spill] sm:$0xff]  ;;  %v35760_v30 = vld [vmem:[#allocation90_spill] sm:$0xff] }
0x12de   : > { %26195 = vmatprep.subr.bf16.mxu0 %v35750_v47  ;;  %26387 = vmatprep.subr.bf16.mxu1 %v35751_v27  ;;  %v35761_v47 = vld [vmem:[#allocation92_spill] sm:$0xff]  ;;  %v35762_v27 = vld [vmem:[#allocation126_spill] sm:$0xff] }
0x12e1   : > { %26197 = vmatpush1.bf16.msra.mxu0 %v35752_v1  ;;  %26389 = vmatpush1.bf16.msra.mxu1 %v35753_v53  ;;  %v35763_v1 = vld [vmem:[#allocation100_spill] sm:$0xff]  ;;  %v35764_v53 = vld [vmem:[#allocation101_spill] sm:$0xff] }
0x12e2   : > { %26199 = vmatprep.subr.bf16.mxu0 %v35754_v24  ;;  %26391 = vmatprep.subr.bf16.mxu1 %v35755_v63  ;;  %v35765_v24 = vld [vmem:[#allocation105_spill] sm:$0xff]  ;;  %v35766_v63 = vld [vmem:[#allocation127_spill] sm:$0xff] }
0x12e5   : > { %26201 = vmatpush1.bf16.msra.mxu0 %v35756_v32  ;;  %26393 = vmatpush1.bf16.msra.mxu1 %v35757_v35  ;;  %v35767_v32 = vld [vmem:[#allocation128_spill] sm:$0xff]  ;;  %v35769_v35 = vld [vmem:[#allocation130_spill] sm:$0xff] }
0x12e6   : > { %26203 = vmatprep.subr.bf16.mxu0 %v35758_v17  ;;  %26395 = vmatprep.subr.bf16.mxu1 %v35759_v36  ;;  %v35768_v17 = vld [vmem:[#allocation129_spill] sm:$0xff]  ;;  %v35770_v36 = vld [vmem:[#allocation47_spill] sm:$0xff] }
0x12e9   : > { %26205 = vmatpush1.bf16.msra.mxu0 %v35760_v30  ;;  %26397 = vmatpush1.bf16.msra.mxu1 %v35761_v47  ;;  %v35771_v30 = vpack.c.bf16 %v32195_v2, %v35770_v36  ;;  %v35772_v47 = vpack.c.bf16 %v35658_v29, %v35657_v42 }
0x12ea   : > { %26207 = vmatprep.subr.bf16.mxu0 %v35762_v27  ;;  %26399 = vmatprep.subr.bf16.mxu1 %v35763_v1  ;;  %v35777_v27 = vld [vmem:[#allocation38_spill] sm:$0xff] }
0x12ed   : > { %26209 = vmatpush1.bf16.msra.mxu0 %v35764_v53  ;;  %26401 = vmatpush1.bf16.msra.mxu1 %v35765_v24  ;;  %v35779_v53 = vld [vmem:[#allocation41_spill] sm:$0xff]  ;;  %v35780_v24 = vld [vmem:[#allocation40_spill] sm:$0xff] }
0x12ee   : > { %26211 = vmatprep.subr.bf16.mxu0 %v35766_v63  ;;  %26403 = vmatprep.subr.bf16.mxu1 %v32747_v38  ;;  %v35773_v38 = vpack.c.bf16 %v32208_v13, %v35659_v52  ;;  %v35781_v63 = vpack.c.bf16 %v35779_v53, %v35780_v24  ;;  %v35796_v24 = vld [vmem:[#allocation67_spill] sm:$0xff] }
0x12f1   : > { %26213 = vmatpush1.bf16.msra.mxu0 %v35767_v32  ;;  %26405 = vmatpush1.bf16.msra.mxu1 %v35768_v17  ;;  %v35782_v32 = vld [vmem:[#allocation43_spill] sm:$0xff]  ;;  %v35783_v17 = vld [vmem:[#allocation42_spill] sm:$0xff] }
0x12f2   : > { %26215 = vmatprep.subr.bf16.mxu0 %v35769_v35  ;;  %26407 = vmatprep.subr.bf16.mxu1 %v32793_v51  ;;  %v35774_v51 = vld [vmem:[#allocation58_spill] sm:$0xff]  ;;  %v35784_v35 = vpack.c.bf16 %v35782_v32, %v35783_v17 }
0x12f5   : > { %26217 = vmatpush1.bf16.msra.mxu0 %v32795_v9  ;;  %26409 = vmatpush1.bf16.msra.mxu1 %v32813_v18  ;;  %v35775_v9 = vpack.c.bf16 %v32216_v44, %v35774_v51  ;;  %v35776_v18 = vld [vmem:[#allocation39_spill] sm:$0xff] }
0x12f6   : > { %26219 = vmatprep.subr.bf16.mxu0 %v35771_v30  ;;  %26411 = vmatprep.subr.bf16.mxu1 %v35772_v47  ;;  %v35778_v1 = vpack.c.bf16 %v35776_v18, %v35777_v27  ;;  %v35785_v30 = vld [vmem:[#allocation35_spill] sm:$0xff]  ;;  %v35786_v47 = vld [vmem:[#allocation44_spill] sm:$0xff]  ;;  %v35797_v18 = vld [vmem:[#allocation66_spill] sm:$0xff] }
0x12f7   : > { %v35798_v32 = vpack.c.bf16 %v35796_v24, %v35797_v18 }
0x12f8   : > { %17994 = vmatmul.mubr.f32.vlgmr.msra.gmra.mrb[66].mxu0 %v32946_v56  ;;  %18849 = vmatmul.mubr.f32.vlgmr.msra.gmra.mrb[72].mxu1 %v32946_v56  ;;  %v35789_v56 = vld [vmem:[#allocation34_spill] sm:$0xff] }
0x12f9   : > { %26221 = vmatpush1.bf16.msra.mxu0 %v35773_v38  ;;  %26413 = vmatpush1.bf16.msra.mxu1 %v35775_v9  ;;  %v35787_v38 = vpack.c.bf16 %v35785_v30, %v35786_v47  ;;  %v35788_v9 = vld [vmem:[#allocation59_spill] sm:$0xff] }
0x12fa   : > { %26223 = vmatprep.subr.bf16.mxu0 %v35778_v1  ;;  %26415 = vmatprep.subr.bf16.mxu1 %v35781_v63  ;;  %v35790_v48 = vpack.c.bf16 %v35788_v9, %v35789_v56  ;;  %v35791_v1 = vld [vmem:[#allocation62_spill] sm:$0xff]  ;;  %v35794_v63 = vld [vmem:[#allocation63_spill] sm:$0xff] }
0x12fb   : > { %18128 = vmatprep.mubr.f32.mxu0 %v35747_v54  ;;  %18983 = vmatprep.mubr.f32.mxu1 %v35747_v54  ;;  %v35793_v40 = vpack.c.bf16 %v35791_v1, %v35792_v62  ;;  %v35795_v53 = vpack.c.bf16 %v32291_v6, %v35794_v63  ;;  %v35804_v6 = vpack.c.bf16 %v35661_v41, %v35660_v45  ;;  %v35838_v45 = vld [vmem:[#allocation73_spill] sm:$0xff] }
0x12fc   : > { %v35812_v41 = vpack.c.bf16 %v35669_v22, %v35639_v28  ;;  %v35835_v28 = vld [vmem:[#allocation68_spill] sm:$0xff] }
0x12fd   : > { %26225 = vmatpush1.bf16.msra.mxu0 %v35784_v35  ;;  %26417 = vmatpush1.bf16.msra.mxu1 %v35787_v38  ;;  %v35799_v35 = vpack.c.bf16 %v32306_v60, %v32304_v15  ;;  %v35800_v38 = vld [vmem:[#allocation70_spill] sm:$0xff]  ;;  %v35808_v15 = vpack.c.bf16 %v35665_v25, %v35664_v16  ;;  %v35809_v60 = vpack.c.bf16 %v35631_v21, %v35666_v55  ;;  %v35839_v22 = vld [vmem:[#allocation76_spill] sm:$0xff]  ;;  %v35842_v55 = vld [vmem:[#allocation85_spill] sm:$0xff] }
0x12fe   : > { %26227 = vmatprep.subr.bf16.mxu0 %v35790_v48  ;;  %26419 = vmatprep.subr.bf16.mxu1 %v35793_v40  ;;  %v35801_v9 = vpack.c.bf16 %v32317_v10, %v35800_v38  ;;  %v35802_v48 = vld [vmem:[#allocation71_spill] sm:$0xff]  ;;  %v35805_v40 = vld [vmem:[#allocation78_spill] sm:$0xff]  ;;  %v35811_v10 = vpack.c.bf16 %v35637_v43, %v35636_v31  ;;  %v35813_v16 = vpack.c.bf16 %v35671_v37, %v35670_v4  ;;  %v35834_v43 = vld [vmem:[#allocation65_spill] sm:$0xff] }
0x12ff   : > { %v35803_v1 = vpack.c.bf16 %v32327_v11, %v35802_v48  ;;  %v35810_v11 = vpack.c.bf16 %v35668_v57, %v35667_v5  ;;  %v35814_v25 = vpack.c.bf16 %v32408_v33, %v35672_v3  ;;  %v35815_v5 = vpack.c.bf16 %v35646_v39, %v35645_v58  ;;  %v35823_v58 = vld [vmem:[#allocation45_spill] sm:$0xff]  ;;  %v35840_v37 = vld [vmem:[#allocation79_spill] sm:$0xff]  ;;  %v35849_v38 = vld [vmem:[#allocation106_spill] sm:$0xff] }
0x1300   : > { %v35816_v21 = vpack.c.bf16 %v35674_v49, %v35673_v14  ;;  %v35817_v31 = vpack.c.bf16 %v32434_v61, %v35651_v50  ;;  %v35818_v4 = vpack.c.bf16 %v32443_v0, %v32438_v7  ;;  %v35819_v3 = vpack.c.bf16 %v32449_v19, %v32447_v20  ;;  %v35824_v0 = vld [vmem:[#allocation53_spill] sm:$0xff]  ;;  %v35825_v7 = vld [vmem:[#allocation55_spill] sm:$0xff]  ;;  %v35827_v20 = vld [vmem:[#allocation48_spill] sm:$0xff] }
0x1301   : > { %26229 = vmatpush1.bf16.msra.mxu0 %v35795_v53  ;;  %26421 = vmatpush1.bf16.msra.mxu1 %v35798_v32  ;;  %v35806_v53 = vld [vmem:[#allocation77_spill] sm:$0xff]  ;;  %v35820_v33 = vpack.c.bf16 %v32457_v59, %v32455_v12  ;;  %v35821_v14 = vpack.c.bf16 %v32469_v34, %v32462_v8  ;;  %v35822_v61 = vpack.c.bf16 %v32475_v26, %v32473_v23  ;;  %v35830_v23 = vld [vmem:[#allocation54_spill] sm:$0xff]  ;;  %v35832_v8 = vld [vmem:[#allocation60_spill] sm:$0xff] }
0x1302   : > { %26231 = vmatprep.subr.bf16.mxu0 %v35799_v35  ;;  %26423 = vmatprep.subr.bf16.mxu1 %v35801_v9  ;;  %v35807_v63 = vpack.c.bf16 %v35805_v40, %v35806_v53  ;;  %v35826_v19 = vld [vmem:[#allocation57_spill] sm:$0xff]  ;;  %v35831_v59 = vld [vmem:[#allocation50_spill] sm:$0xff]  ;;  %v35833_v34 = vld [vmem:[#allocation64_spill] sm:$0xff]  ;;  %v35853_v53 = vand.u32 4294901760, %v35770_v36  ;;  %v35862_v36 = vand.u32 4294901760, %v32216_v44 }
0x1303   : > { %v35828_v12 = vld [vmem:[#allocation49_spill] sm:$0xff]  ;;  %v35837_v50 = vld [vmem:[#allocation72_spill] sm:$0xff]  ;;  %v35841_v57 = vld [vmem:[#allocation83_spill] sm:$0xff] }
0x1304   : > { %v35829_v26 = vld [vmem:[#allocation37_spill] sm:$0xff]  ;;  %v35843_v49 = vld [vmem:[#allocation88_spill] sm:$0xff]  ;;  %v35845_v32 = vld [vmem:[#allocation95_spill] sm:$0xff] }
0x1305   : > { %26233 = vmatpush1.bf16.msra.mxu0 %v35803_v1  ;;  %26425 = vmatpush1.bf16.msra.mxu1 %v35804_v6  ;;  %v35836_v39 = vld [vmem:[#allocation69_spill] sm:$0xff]  ;;  %v35847_v1 = vld [vmem:[#allocation99_spill] sm:$0xff]  ;;  %v35848_v35 = vld [vmem:[#allocation102_spill] sm:$0xff] }
0x1306   : > { %26235 = vmatprep.subr.bf16.mxu0 %v35807_v63  ;;  %26427 = vmatprep.subr.bf16.mxu1 %v35808_v15  ;;  %v35846_v9 = vld [vmem:[#allocation97_spill] sm:$0xff]  ;;  %v35850_v48 = vld [vmem:[#allocation107_spill] sm:$0xff]  ;;  %v35851_v6 = vld [vmem:[#allocation108_spill] sm:$0xff]  ;;  %v35854_v63 = vand.u32 4294901760, %v32195_v2 }
0x1307   : > { %v35852_v40 = vld [vmem:[#allocation109_spill] sm:$0xff]  ;;  %v35872_v44 = vld [vmem:[#allocation43_spill] sm:$0xff] }
0x1308   : > { %v26282_v15 = vpack.c.bf16 %v35854_v63, %v35853_v53  ;;  %v35870_v63 = vld [vmem:[#allocation134_spill] sm:$0xff] }
0x1309   : > { %26237 = vmatpush1.bf16.msra.mxu0 %v35809_v60  ;;  %26429 = vmatpush1.bf16.msra.mxu1 %v35810_v11  ;;  %v35855_v60 = vand.u32 4294901760, %v35657_v42  ;;  %v35856_v11 = vand.u32 4294901760, %v35658_v29  ;;  %v35863_v42 = vand.u32 4294901760, %v35777_v27  ;;  %v35864_v29 = vld [vmem:[#allocation39_spill] sm:$0xff]  ;;  %v35874_v27 = vand.u32 4294901760, %v35786_v47 }
0x130a   : > { %26239 = vmatprep.subr.bf16.mxu0 %v35811_v10  ;;  %26431 = vmatprep.subr.bf16.mxu1 %v35812_v41  ;;  %v35857_v41 = vld [vmem:[#allocation110_spill] sm:$0xff]  ;;  %v35883_v47 = vand.u32 4294901760, %v35796_v24 }
0x130b   : > { %v26474_v10 = vpack.c.bf16 %v35856_v11, %v35855_v60  ;;  %v35875_v60 = vand.u32 4294901760, %v35785_v30  ;;  %v35882_v30 = vand.u32 4294901760, %v35797_v18  ;;  %v35891_v18 = vld [vmem:[#allocation82_spill] sm:$0xff] }
0x130c   : > { %v35892_v24 = vld [vmem:[#allocation86_spill] sm:$0xff] }
0x130d   : > { %26241 = vmatpush1.bf16.msra.mxu0 %v35813_v16  ;;  %26433 = vmatpush1.bf16.msra.mxu1 %v35814_v25  ;;  %v35858_v16 = vld [vmem:[#allocation111_spill] sm:$0xff]  ;;  %v35859_v25 = vand.u32 4294901760, %v35659_v52  ;;  %v26480_v11 = vpack.c.bf16 %v35875_v60, %v35874_v27  ;;  %v35901_v27 = vld [vmem:[#allocation133_spill] sm:$0xff] }
0x130e   : > { %26243 = vmatprep.subr.bf16.mxu0 %v35815_v5  ;;  %26435 = vmatprep.subr.bf16.mxu1 %v35816_v21  ;;  %v35860_v5 = vand.u32 4294901760, %v32208_v13  ;;  %v35871_v13 = vand.u32 4294901760, %v35783_v17  ;;  %v35902_v60 = vld [vmem:[#allocation135_spill] sm:$0xff] }
0x1310   : > { %v26284_v21 = vpack.c.bf16 %v35860_v5, %v35859_v25  ;;  %v35877_v25 = vld [vmem:[#allocation59_spill] sm:$0xff] }
0x1311   : > { %26245 = vmatpush1.bf16.msra.mxu0 %v35817_v31  ;;  %26437 = vmatpush1.bf16.msra.mxu1 %v35818_v4  ;;  %v35861_v31 = vand.u32 4294901760, %v35774_v51  ;;  %v35865_v4 = vand.u32 4294901760, %v35864_v29  ;;  %v35873_v51 = vand.u32 4294901760, %v35872_v44  ;;  %v35878_v5 = vand.u32 4294901760, %v35877_v25  ;;  %v35886_v29 = vld [vmem:[#allocation56_spill] sm:$0xff]  ;;  %v35898_v44 = vld [vmem:[#allocation46_spill] sm:$0xff] }
0x1312   : > { %26247 = vmatprep.subr.bf16.mxu0 %v35819_v3  ;;  %26439 = vmatprep.subr.bf16.mxu1 %v35820_v33  ;;  %v35866_v33 = vld [vmem:[#allocation40_spill] sm:$0xff] }
0x1313   : > { %v26476_v2 = vpack.c.bf16 %v35862_v36, %v35861_v31  ;;  %v26286_v3 = vpack.c.bf16 %v35865_v4, %v35863_v42  ;;  %v35880_v36 = vld [vmem:[#allocation62_spill] sm:$0xff]  ;;  %v26484_v42 = vpack.c.bf16 %v35883_v47, %v35882_v30  ;;  %v35905_v25 = vld [vmem:[#allocation104_spill] sm:$0xff] }
0x1314   : > { %v35887_v4 = vld [vmem:[#allocation74_spill] sm:$0xff] }
0x1315   : > { %26249 = vmatpush1.bf16.msra.mxu0 %v35821_v14  ;;  %26441 = vmatpush1.bf16.msra.mxu1 %v35822_v61  ;;  %v35867_v14 = vand.u32 4294901760, %v35866_v33  ;;  %v35868_v61 = vld [vmem:[#allocation41_spill] sm:$0xff]  ;;  %v35889_v33 = vld [vmem:[#allocation80_spill] sm:$0xff] }
0x1316   : > { %26251 = vmatprep.subr.bf16.mxu0 %v35823_v58  ;;  %26443 = vmatprep.subr.bf16.mxu1 %v35824_v0  ;;  %v35869_v53 = vand.u32 4294901760, %v35868_v61  ;;  %v35893_v61 = vld [vmem:[#allocation87_spill] sm:$0xff] }
0x1318   : > { %18131 = vmatmul.mubr.f32.vlgmr.msra.gmra.mrb[66].mxu0 %v32962_v46  ;;  %18986 = vmatmul.mubr.f32.vlgmr.msra.gmra.mrb[72].mxu1 %v32962_v46  ;;  %v35844_v46 = vld [vmem:[#allocation91_spill] sm:$0xff]  ;;  %v26478_v52 = vpack.c.bf16 %v35869_v53, %v35867_v14  ;;  %v35890_v14 = vld [vmem:[#allocation81_spill] sm:$0xff] }
0x1319   : > { %26253 = vmatpush1.bf16.msra.mxu0 %v35825_v7  ;;  %26445 = vmatpush1.bf16.msra.mxu1 %v35826_v19  ;;  %v35894_v53 = vld [vmem:[#allocation93_spill] sm:$0xff] }
0x131a   : > { %26255 = vmatprep.subr.bf16.mxu0 %v35827_v20  ;;  %26447 = vmatprep.subr.bf16.mxu1 %v35828_v12 }
0x131b   : > { %18233 = vmatprep.mubr.f32.mxu0 %v35747_v54  ;;  %19088 = vmatprep.mubr.f32.mxu1 %v35747_v54 }
0x131d   : > { %26257 = vmatpush1.bf16.msra.mxu0 %v35829_v26  ;;  %26449 = vmatpush1.bf16.msra.mxu1 %v35830_v23 }
0x131e   : > { %26259 = vmatprep.subr.bf16.mxu0 %v35831_v59  ;;  %26451 = vmatprep.subr.bf16.mxu1 %v35832_v8 }
0x1321   : > { %26261 = vmatpush1.bf16.msra.mxu0 %v35833_v34  ;;  %26453 = vmatpush1.bf16.msra.mxu1 %v35834_v43 }
0x1322   : > { %26263 = vmatprep.subr.bf16.mxu0 %v35835_v28  ;;  %26455 = vmatprep.subr.bf16.mxu1 %v35836_v39 }
0x1325   : > { %26265 = vmatpush1.bf16.msra.mxu0 %v35837_v50  ;;  %26457 = vmatpush1.bf16.msra.mxu1 %v35838_v45 }
0x1326   : > { %26267 = vmatprep.subr.bf16.mxu0 %v35839_v22  ;;  %26459 = vmatprep.subr.bf16.mxu1 %v35840_v37 }
0x1329   : > { %26269 = vmatpush1.bf16.msra.mxu0 %v35841_v57  ;;  %26461 = vmatpush1.bf16.msra.mxu1 %v35842_v55 }
0x132a   : > { %26271 = vmatprep.subr.bf16.mxu0 %v35843_v49  ;;  %26463 = vmatprep.subr.bf16.mxu1 %v35844_v46 }
0x132d   : > { %26273 = vmatpush1.bf16.msra.mxu0 %v35845_v32  ;;  %26465 = vmatpush1.bf16.msra.mxu1 %v35846_v9 }
0x132e   : > { %26275 = vmatprep.subr.bf16.mxu0 %v35847_v1  ;;  %26467 = vmatprep.subr.bf16.mxu1 %v35848_v35 }
0x1331   : > { %26277 = vmatpush1.bf16.msra.mxu0 %v35849_v38  ;;  %26469 = vmatpush1.bf16.msra.mxu1 %v35850_v48 }
0x1332   : > { %26279 = vmatprep.subr.bf16.mxu0 %v35851_v6  ;;  %26471 = vmatprep.subr.bf16.mxu1 %v35852_v40 }
0x1335   : > { %26281 = vmatpush1.bf16.msra.mxu0 %v35857_v41  ;;  %26473 = vmatpush1.bf16.msra.mxu1 %v35858_v16 }
0x1336   : > { %26283 = vmatprep.subr.bf16.mxu0 %v26282_v15  ;;  %26475 = vmatprep.subr.bf16.mxu1 %v26474_v10  ;;  %v26288_v15 = vpack.c.bf16 %v35873_v51, %v35871_v13  ;;  %v35876_v10 = vand.u32 4294901760, %v35789_v56  ;;  %v35884_v56 = vld [vmem:[#allocation52_spill] sm:$0xff]  ;;  %v35897_v13 = vld [vmem:[#allocation103_spill] sm:$0xff] }
0x1337   : > { %v35899_v51 = vld [vmem:[#allocation131_spill] sm:$0xff] }
0x1338   : > { %18237 = vmatmul.mubr.f32.vlgmr.msra.gmra.mrb[66].mxu0 %v35870_v63  ;;  %19092 = vmatmul.mubr.f32.vlgmr.msra.gmra.mrb[72].mxu1 %v35870_v63  ;;  %v26290_v31 = vpack.c.bf16 %v35878_v5, %v35876_v10  ;;  %v35896_v63 = vld [vmem:[#allocation98_spill] sm:$0xff]  ;;  %v35904_v10 = vld [vmem:[#allocation137_spill] sm:$0xff]  ;;  %v33268_v5 = vld [vmem:[%s28539_s1 + $0x98] sm:$0xff] }
0x1339   : > { %26285 = vmatpush1.bf16.msra.mxu0 %v26284_v21  ;;  %26477 = vmatpush1.bf16.msra.mxu1 %v26476_v2  ;;  %v35879_v21 = vand.u32 4294901760, %v35792_v62  ;;  %v35881_v2 = vand.u32 4294901760, %v35880_v36  ;;  %v35885_v62 = vld [vmem:[#allocation51_spill] sm:$0xff] }
0x133a   : > { %26287 = vmatprep.subr.bf16.mxu0 %v26286_v3  ;;  %26479 = vmatprep.subr.bf16.mxu1 %v26478_v52  ;;  %v35888_v3 = vld [vmem:[#allocation75_spill] sm:$0xff]  ;;  %v35895_v52 = vld [vmem:[#allocation94_spill] sm:$0xff] }
0x133b   : > { %v26482_v17 = vpack.c.bf16 %v35881_v2, %v35879_v21  ;;  %18403 = vmatprep.mubr.f32.mxu0 %v35747_v54  ;;  %19258 = vmatprep.mubr.f32.mxu1 %v35747_v54  ;;  %v33292_v21 = vld [vmem:[%s28539_s1 + $0x18] sm:$0xff] }
0x133c   : > { %v19472_v2 = vand.u32 4294901760, %v33292_v21 }
0x133d   : > { %26289 = vmatpush1.bf16.msra.mxu0 %v26288_v15  ;;  %26481 = vmatpush1.bf16.msra.mxu1 %v26480_v11  ;;  %v35900_v15 = vld [vmem:[#allocation132_spill] sm:$0xff] }
0x133e   : > { %26291 = vmatprep.subr.bf16.mxu0 %v26290_v31  ;;  %26483 = vmatprep.subr.bf16.mxu1 %v26482_v17  ;;  %v35903_v11 = vld [vmem:[#allocation136_spill] sm:$0xff]  ;;  %v33289_v31 = vld [vmem:[%s28539_s1 + $0x10] sm:$0xff] }
0x133f   : > { %v19469_v36 = vand.u32 4294901760, %v33289_v31 }
0x1341   : > { %26293 = vmatpush1.bf16.msra.mxu0 %v35884_v56  ;;  %26485 = vmatpush1.bf16.msra.mxu1 %v26484_v42  ;;  %v33329_v47 = vsub.f32 %v33289_v31, %v19469_v36  ;;  %v33334_v42 = vsub.f32 %v33292_v21, %v19472_v2 }
0x1342   : > { %26295 = vmatprep.subr.bf16.mxu0 %v35885_v62  ;;  %26487 = vmatprep.subr.bf16.mxu1 %v35886_v29 }
0x1343   : > { %35912 = vst [vmem:[#allocation118_spill] sm:$0xff] %v33329_v47  ;;  %35913 = vst [vmem:[#allocation119_spill] sm:$0xff] %v33334_v42  ;;  %v35164_v29 = vand.u32 4294901760, %v33329_v47 }
0x1345   : > { %26297 = vmatpush1.bf16.msra.mxu0 %v35887_v4  ;;  %26489 = vmatpush1.bf16.msra.mxu1 %v35888_v3  ;;  %v35163_v4 = vand.u32 4294901760, %v33334_v42 }
0x1346   : > { %26299 = vmatprep.subr.bf16.mxu0 %v35889_v33  ;;  %26491 = vmatprep.subr.bf16.mxu1 %v35890_v14 }
0x1349   : > { %26301 = vmatpush1.bf16.msra.mxu0 %v35891_v18  ;;  %26493 = vmatpush1.bf16.msra.mxu1 %v35892_v24 }
0x134a   : > { %26303 = vmatprep.subr.bf16.mxu0 %v35893_v61  ;;  %26495 = vmatprep.subr.bf16.mxu1 %v35894_v53 }
0x134d   : > { %26305 = vmatpush1.bf16.msra.mxu0 %v35895_v52  ;;  %26497 = vmatpush1.bf16.msra.mxu1 %v35896_v63 }
0x134e   : > { %26307 = vmatprep.subr.bf16.mxu0 %v35897_v13  ;;  %26499 = vmatprep.subr.bf16.mxu1 %v35898_v44  ;;  %v33387_v44 = vld [vmem:[%s28539_s1 + $0x20] sm:$0xff] }
0x1351   : > { %26309 = vmatpush1.bf16.msra.mxu0 %v35899_v51  ;;  %26501 = vmatpush1.bf16.msra.mxu1 %v35900_v15  ;;  %v33390_v51 = vld [vmem:[%s28539_s1 + $0x28] sm:$0xff]  ;;  %v19475_v15 = vand.u32 4294901760, %v33387_v44 }
0x1352   : > { %26311 = vmatprep.subr.bf16.mxu0 %v35901_v27  ;;  %26503 = vmatprep.subr.bf16.mxu1 %v35902_v60  ;;  %v19478_v27 = vand.u32 4294901760, %v33390_v51 }
0x1355   : > { %26313 = vmatpush1.bf16.msra.mxu0 %v35903_v11  ;;  %26505 = vmatpush1.bf16.msra.mxu1 %v35904_v10  ;;  %v33407_v10 = vsub.f32 %v33387_v44, %v19475_v15  ;;  %v19405_v44 = vld [vmem:[%s28539_s1 + $0x58] sm:$0xff] }
0x1356   : > { %26315 = vmatprep.subr.bf16.mxu0 %v35823_v58  ;;  %26507 = vmatprep.subr.bf16.mxu1 %v35824_v0  ;;  %v33247_v58 = vld [vmem:[%s28539_s1 + $0x80] sm:$0xff]  ;;  %v33250_v0 = vld [vmem:[%s28539_s1 + $0x88] sm:$0xff] }
0x1358   : > { %18405 = vmatmul.mubr.f32.vlgmr.msra.gmra.mrb[66].mxu0 %v35905_v25  ;;  %19260 = vmatmul.mubr.f32.vlgmr.msra.gmra.mrb[72].mxu1 %v35905_v25 }
0x1359   : > { %26317 = vmatpush1.bf16.msra.mxu0 %v35825_v7  ;;  %26509 = vmatpush1.bf16.msra.mxu1 %v35826_v19  ;;  %v19511_v7 = vand.u32 4294901760, %v33247_v58  ;;  %v19514_v19 = vand.u32 4294901760, %v33250_v0 }
0x135a   : > { %26319 = vmatprep.subr.bf16.mxu0 %v35827_v20  ;;  %26511 = vmatprep.subr.bf16.mxu1 %v35828_v12  ;;  %v33259_v20 = vld [vmem:[%s28539_s1] sm:$0xff]  ;;  %v33265_v12 = vld [vmem:[%s28539_s1 + $0x90] sm:$0xff] }
0x135b   : > { %18507 = vmatprep.mubr.f32.mxu0 %v35747_v54  ;;  %19362 = vmatprep.mubr.f32.mxu1 %v35747_v54  ;;  %v33262_v54 = vld [vmem:[%s28539_s1 + $0x8] sm:$0xff] }
0x135d   : > { %26321 = vmatpush1.bf16.msra.mxu0 %v35829_v26  ;;  %26513 = vmatpush1.bf16.msra.mxu1 %v35830_v23  ;;  %v19463_v26 = vand.u32 4294901760, %v33259_v20  ;;  %v19466_v23 = vand.u32 4294901760, %v33262_v54 }
0x135e   : > { %26323 = vmatprep.subr.bf16.mxu0 %v35831_v59  ;;  %26515 = vmatprep.subr.bf16.mxu1 %v35832_v8  ;;  %v33279_v59 = vsub.f32 %v33247_v58, %v19511_v7  ;;  %v33284_v8 = vsub.f32 %v33250_v0, %v19514_v19 }
0x135f   : > { %v33491_v58 = vpack.c.bf16 %v19466_v23, %v19463_v26 }
0x1360   : > { %35906 = vst [vmem:[#allocation112_spill] sm:$0xff] %v33279_v59  ;;  %35907 = vst [vmem:[#allocation113_spill] sm:$0xff] %v33284_v8 }
0x1361   : > { %26325 = vmatpush1.bf16.msra.mxu0 %v35833_v34  ;;  %26517 = vmatpush1.bf16.msra.mxu1 %v35834_v43  ;;  %v19517_v34 = vand.u32 4294901760, %v33265_v12  ;;  %v19520_v43 = vand.u32 4294901760, %v33268_v5 }
0x1362   : > { %26327 = vmatprep.subr.bf16.mxu0 %v35835_v28  ;;  %26519 = vmatprep.subr.bf16.mxu1 %v35836_v39  ;;  %v33299_v28 = vsub.f32 %v33259_v20, %v19463_v26  ;;  %v33304_v39 = vsub.f32 %v33262_v54, %v19466_v23 }
0x1363   : > { %v33315_v17 = vsub.f32 %v33265_v12, %v19517_v34  ;;  %v33320_v30 = vsub.f32 %v33268_v5, %v19520_v43 }
0x1364   : > { %35908 = vst [vmem:[#allocation114_spill] sm:$0xff] %v33299_v28  ;;  %35909 = vst [vmem:[#allocation115_spill] sm:$0xff] %v33304_v39 }
0x1365   : > { %26329 = vmatpush1.bf16.msra.mxu0 %v35837_v50  ;;  %26521 = vmatpush1.bf16.msra.mxu1 %v35838_v45  ;;  %v35170_v50 = vand.u32 4294901760, %v33279_v59  ;;  %v35169_v45 = vand.u32 4294901760, %v33284_v8  ;;  %35910 = vst [vmem:[#allocation116_spill] sm:$0xff] %v33315_v17  ;;  %35911 = vst [vmem:[#allocation117_spill] sm:$0xff] %v33320_v30  ;;  %v35166_v56 = vand.u32 4294901760, %v33315_v17  ;;  %v35165_v62 = vand.u32 4294901760, %v33320_v30 }
0x1366   : > { %26331 = vmatprep.subr.bf16.mxu0 %v35839_v22  ;;  %26523 = vmatprep.subr.bf16.mxu1 %v35840_v37  ;;  %v35168_v22 = vand.u32 4294901760, %v33299_v28  ;;  %v35167_v37 = vand.u32 4294901760, %v33304_v39 }
0x1367   : > { %v19711_v33 = vsub.f32 %v33320_v30, %v35165_v62 }
0x1369   : > { %26333 = vmatpush1.bf16.msra.mxu0 %v35841_v57  ;;  %26525 = vmatpush1.bf16.msra.mxu1 %v35842_v55  ;;  %v19690_v57 = vsub.f32 %v33279_v59, %v35170_v50  ;;  %v19697_v55 = vsub.f32 %v33284_v8, %v35169_v45 }
0x136a   : > { %26335 = vmatprep.subr.bf16.mxu0 %v35843_v49  ;;  %26527 = vmatprep.subr.bf16.mxu1 %v35844_v46  ;;  %v19578_v49 = vsub.f32 %v33299_v28, %v35168_v22  ;;  %v19585_v46 = vsub.f32 %v33304_v39, %v35167_v37 }
0x136b   : > { %v19691_v3 = vand.u32 4294901760, %v19690_v57  ;;  %v33415_v57 = vld [vmem:[%s28539_s1 + $0xb0] sm:$0xff] }
0x136c   : > { %v19579_v14 = vand.u32 4294901760, %v19578_v49  ;;  %v19586_v18 = vand.u32 4294901760, %v19585_v46 }
0x136d   : > { %26337 = vmatpush1.bf16.msra.mxu0 %v35845_v32  ;;  %26529 = vmatpush1.bf16.msra.mxu1 %v35846_v9  ;;  %v19698_v32 = vand.u32 4294901760, %v19697_v55  ;;  %v19704_v9 = vsub.f32 %v33315_v17, %v35166_v56  ;;  %v33418_v55 = vld [vmem:[%s28539_s1 + $0xb8] sm:$0xff] }
0x136e   : > { %26339 = vmatprep.subr.bf16.mxu0 %v35847_v1  ;;  %26531 = vmatprep.subr.bf16.mxu1 %v35848_v35  ;;  %v19592_v1 = vsub.f32 %v33329_v47, %v35164_v29  ;;  %v19599_v35 = vsub.f32 %v33334_v42, %v35163_v4 }
0x136f   : > { %v26570_v24 = vpack.c.bf16 %v19698_v32, %v19691_v3  ;;  %v19705_v61 = vand.u32 4294901760, %v19704_v9  ;;  %v19529_v3 = vand.u32 4294901760, %v33415_v57  ;;  %v19532_v32 = vand.u32 4294901760, %v33418_v55  ;;  %v33425_v9 = vld [vmem:[%s28539_s1 + $0x30] sm:$0xff] }
0x1370   : > { %v19593_v53 = vand.u32 4294901760, %v19592_v1  ;;  %v19600_v52 = vand.u32 4294901760, %v19599_v35  ;;  %v19481_v1 = vand.u32 4294901760, %v33425_v9 }
0x1371   : > { %26341 = vmatpush1.bf16.msra.mxu0 %v35849_v38  ;;  %26533 = vmatpush1.bf16.msra.mxu1 %v35850_v48  ;;  %v19712_v38 = vand.u32 4294901760, %v19711_v33  ;;  %v26572_v48 = vpack.c.bf16 %v19586_v18, %v19579_v14  ;;  %v33428_v33 = vld [vmem:[%s28539_s1 + $0x38] sm:$0xff]  ;;  %v35184_v14 = vand.u32 4294901760, %v33407_v10 }
0x1372   : > { %26343 = vmatprep.subr.bf16.mxu0 %v35851_v6  ;;  %26535 = vmatprep.subr.bf16.mxu1 %v35852_v40  ;;  %v26576_v6 = vpack.c.bf16 %v19600_v52, %v19593_v53  ;;  %v33379_v40 = vld [vmem:[%s28539_s1 + $0xa0] sm:$0xff]  ;;  %v19484_v35 = vand.u32 4294901760, %v33428_v33 }
0x1373   : > { %v26574_v63 = vpack.c.bf16 %v19712_v38, %v19705_v61  ;;  %v33443_v38 = vsub.f32 %v33415_v57, %v19529_v3  ;;  %v19606_v53 = vsub.f32 %v33407_v10, %v35184_v14 }
0x1374   : > { %v33467_v45 = vsub.f32 %v33428_v33, %v19484_v35  ;;  %v33619_v33 = vld [vmem:[%s28539_s1 + $0x60] sm:$0xff] }
0x1375   : > { %26345 = vmatpush1.bf16.msra.mxu0 %v35857_v41  ;;  %26537 = vmatpush1.bf16.msra.mxu1 %v35858_v16  ;;  %v33382_v41 = vld [vmem:[%s28539_s1 + $0xa8] sm:$0xff]  ;;  %v19523_v16 = vand.u32 4294901760, %v33379_v40  ;;  %v35181_v29 = vand.u32 4294901760, %v33443_v38  ;;  %v19607_v56 = vand.u32 4294901760, %v19606_v53 }
0x1376   : > { %26571 = vmatprep.subr.bf16.mxu1 %v26570_v24  ;;  %v19526_v13 = vand.u32 4294901760, %v33382_v41  ;;  %v35174_v26 = vand.u32 4294901760, %v33467_v45 }
0x1377   : > { %v33397_v60 = vsub.f32 %v33379_v40, %v19523_v16  ;;  %v19732_v50 = vsub.f32 %v33443_v38, %v35181_v29 }
0x1378   : > { %18509 = vmatmul.mubr.f32.vlgmr.msra.gmra.mrb[66].mxu0 %v35905_v25  ;;  %19364 = vmatmul.mubr.f32.vlgmr.msra.gmra.mrb[72].mxu1 %v35905_v25  ;;  %v33402_v11 = vsub.f32 %v33382_v41, %v19526_v13  ;;  %v33412_v25 = vsub.f32 %v33390_v51, %v19478_v27  ;;  %v19627_v12 = vsub.f32 %v33467_v45, %v35174_v26 }
0x1379   : > { %26573 = vmatpush3.bf16.msra.mxu1 %v26572_v48  ;;  %v35187_v49 = vand.u32 4294901760, %v33397_v60  ;;  %v33448_v48 = vsub.f32 %v33418_v55, %v19532_v32  ;;  %v19733_v20 = vand.u32 4294901760, %v19732_v50  ;;  %v33517_v50 = vpack.c.bf16 %v19520_v43, %v19517_v34 }
0x137a   : > { %26575 = vmatprep.subr.bf16.mxu1 %v26574_v63  ;;  %v35186_v46 = vand.u32 4294901760, %v33402_v11  ;;  %v35171_v18 = vand.u32 4294901760, %v33412_v25  ;;  %v33459_v63 = vsub.f32 %v33425_v9, %v19481_v1  ;;  %v33573_v41 = vpack.c.bf16 %v19478_v27, %v19475_v15 }
0x137b   : > { %v19718_v24 = vsub.f32 %v33397_v60, %v35187_v49  ;;  %v35173_v62 = vand.u32 4294901760, %v33448_v48  ;;  %35914 = vst [vmem:[#allocation120_spill] sm:$0xff] %v33517_v50  ;;  %v33592_v27 = vpack.c.bf16 %v19532_v32, %v19529_v3  ;;  %v19496_v3 = vand.u32 4294901760, %v19405_v44 }
0x137c   : > { %v19725_v61 = vsub.f32 %v33402_v11, %v35186_v46  ;;  %v19613_v52 = vsub.f32 %v33412_v25, %v35171_v18  ;;  %v35172_v22 = vand.u32 4294901760, %v33459_v63  ;;  %v33485_v18 = vld [vmem:[%s28539_s1 + $0xc8] sm:$0xff] }
0x137d   : > { %26577 = vmatpush3.bf16.msra.mxu1 %v26576_v6  ;;  %v19719_v6 = vand.u32 4294901760, %v19718_v24  ;;  %v33473_v24 = vpack.c.bf16 %v19514_v19, %v19511_v7  ;;  %v19739_v53 = vsub.f32 %v33448_v48, %v35173_v62  ;;  %v33497_v19 = vld [vmem:[%s28539_s1 + $0x40] sm:$0xff]  ;;  %v33528_v62 = vpack.c.bf16 %v19472_v2, %v19469_v36  ;;  %35917 = vst [vmem:[#allocation123_spill] sm:$0xff] %v33592_v27 }
0x137e   : > { %v19726_v4 = vand.u32 4294901760, %v19725_v61  ;;  %v19614_v37 = vand.u32 4294901760, %v19613_v52  ;;  %v33482_v52 = vld [vmem:[%s28539_s1 + $0xc0] sm:$0xff]  ;;  %v19620_v7 = vsub.f32 %v33459_v63, %v35172_v22  ;;  %v33511_v22 = vld [vmem:[%s28539_s1 + $0xd8] sm:$0xff]  ;;  %v19628_v2 = vand.u32 4294901760, %v19627_v12 }
0x137f   : > { %26539 = vmatprep.subr.bf16.mxu0 %v33473_v24  ;;  %v19535_v23 = vand.u32 4294901760, %v33482_v52  ;;  %35915 = vst [vmem:[#allocation121_spill] sm:$0xff] %v33528_v62  ;;  %v19544_v36 = vand.u32 4294901760, %v33511_v22 }
0x1380   : > { %v26578_v61 = vpack.c.bf16 %v19726_v4, %v19719_v6  ;;  %v26580_v0 = vpack.c.bf16 %v19614_v37, %v19607_v56  ;;  %v33500_v4 = vld [vmem:[%s28539_s1 + $0x48] sm:$0xff]  ;;  %v19740_v6 = vand.u32 4294901760, %v19739_v53  ;;  %26541 = vmatpush3.bf16.msra.mxu0 %v33491_v58  ;;  %v19621_v54 = vand.u32 4294901760, %v19620_v7  ;;  %v33508_v56 = vld [vmem:[%s28539_s1 + $0xd0] sm:$0xff] }
0x1381   : > { %v19538_v37 = vand.u32 4294901760, %v33485_v18  ;;  %v19487_v53 = vand.u32 4294901760, %v33497_v19  ;;  %v33522_v7 = vld [vmem:[%s28539_s1 + $0x50] sm:$0xff]  ;;  %v33534_v5 = vsub.f32 %v33482_v52, %v19535_v23  ;;  %26543 = vmatprep.subr.bf16.mxu0 %v33517_v50  ;;  %v19541_v21 = vand.u32 4294901760, %v33508_v56 }
0x1382   : > { %26579 = vmatprep.subr.bf16.mxu1 %v26578_v61  ;;  %v26582_v61 = vpack.c.bf16 %v19740_v6, %v19733_v20  ;;  %v19493_v20 = vand.u32 4294901760, %v33522_v7  ;;  %v26584_v12 = vpack.c.bf16 %v19628_v2, %v19621_v54  ;;  %v33601_v2 = vld [vmem:[%s28539_s1 + $0xe0] sm:$0xff] }
0x1383   : > { %26581 = vmatpush3.bf16.msra.mxu1 %v26580_v0  ;;  %v19490_v0 = vand.u32 4294901760, %v33500_v4  ;;  %v33537_v34 = vsub.f32 %v33485_v18, %v19538_v37  ;;  %v33541_v43 = vsub.f32 %v33497_v19, %v19487_v53  ;;  %v35180_v52 = vand.u32 4294901760, %v33534_v5 }
0x1384   : > { %26583 = vmatprep.subr.bf16.mxu1 %v26582_v61  ;;  %26545 = vmatpush3.bf16.msra.mxu0 %v33528_v62  ;;  %v33556_v19 = vpack.c.bf16 %v19526_v13, %v19523_v16  ;;  %v33561_v61 = vsub.f32 %v33508_v56, %v19541_v21  ;;  %v33584_v56 = vsub.f32 %v33511_v22, %v19544_v36 }
0x1385   : > { %v33544_v31 = vsub.f32 %v33500_v4, %v19490_v0  ;;  %v35179_v18 = vand.u32 4294901760, %v33537_v34  ;;  %v35178_v4 = vand.u32 4294901760, %v33541_v43  ;;  %v19746_v26 = vsub.f32 %v33534_v5, %v35180_v52 }
0x1386   : > { %35916 = vst [vmem:[#allocation122_spill] sm:$0xff] %v33556_v19  ;;  %26547 = vmatprep.subr.bf16.mxu0 %v33556_v19  ;;  %v35176_v54 = vand.u32 4294901760, %v33561_v61  ;;  %v33598_v22 = vpack.c.bf16 %v19484_v35, %v19481_v1  ;;  %v35177_v57 = vand.u32 4294901760, %v33584_v56  ;;  %v33614_v32 = vsub.f32 %v33522_v7, %v19493_v20  ;;  %v33622_v1 = vld [vmem:[%s28539_s1 + $0x68] sm:$0xff] }
0x1387   : > { %v35175_v6 = vand.u32 4294901760, %v33544_v31  ;;  %v19753_v40 = vsub.f32 %v33537_v34, %v35179_v18  ;;  %v19634_v16 = vsub.f32 %v33541_v43, %v35178_v4  ;;  %26585 = vmatpush3.bf16.msra.mxu1 %v26584_v12  ;;  %v19747_v51 = vand.u32 4294901760, %v19746_v26 }
0x1388   : > { %26549 = vmatpush3.bf16.msra.mxu0 %v33573_v41  ;;  %35918 = vst [vmem:[#allocation124_spill] sm:$0xff] %v33598_v22  ;;  %v33616_v9 = vpack.c.bf16 %v19538_v37, %v19535_v23  ;;  %v35182_v23 = vand.u32 4294901760, %v33614_v32  ;;  %v33630_v37 = vsub.f32 %v19405_v44, %v19496_v3 }
0x1389   : > { %v19641_v13 = vsub.f32 %v33544_v31, %v35175_v6  ;;  %v19754_v15 = vand.u32 4294901760, %v19753_v40  ;;  %v19635_v26 = vand.u32 4294901760, %v19634_v16  ;;  %v19760_v40 = vsub.f32 %v33561_v61, %v35176_v54  ;;  %v33608_v6 = vld [vmem:[%s28539_s1 + $0xe8] sm:$0xff]  ;;  %26551 = vmatprep.subr.bf16.mxu0 %v33592_v27 }
0x138a   : > { %35919 = vst [vmem:[#allocation84_spill] sm:$0xff] %v33616_v9  ;;  %v33633_v54 = vpack.c.bf16 %v19490_v0, %v19487_v53  ;;  %v19648_v44 = vsub.f32 %v33614_v32, %v35182_v23  ;;  %v35183_v4 = vand.u32 4294901760, %v33630_v37  ;;  %v33649_v0 = vpack.c.bf16 %v19544_v36, %v19541_v21 }
0x138b   : > { %v19642_v12 = vand.u32 4294901760, %v19641_v13  ;;  %v26586_v55 = vpack.c.bf16 %v19754_v15, %v19747_v51  ;;  %v19761_v16 = vand.u32 4294901760, %v19760_v40  ;;  %v19767_v13 = vsub.f32 %v33584_v56, %v35177_v57  ;;  %v19424_v57 = vld [vmem:[%s28539_s1 + $0xf0] sm:$0xff] }
0x138c   : > { %v19547_v51 = vand.u32 4294901760, %v33601_v2  ;;  %26553 = vmatpush3.bf16.msra.mxu0 %v33598_v22  ;;  %v19550_v15 = vand.u32 4294901760, %v33608_v6  ;;  %35920 = vst [vmem:[#allocation125_spill] sm:$0xff] %v33633_v54  ;;  %v19499_v40 = vand.u32 4294901760, %v33619_v33  ;;  %35921 = vst [vmem:[#allocation89_spill] sm:$0xff] %v33649_v0  ;;  %v19649_v29 = vand.u32 4294901760, %v19648_v44 }
0x138d   : > { %v26588_v35 = vpack.c.bf16 %v19642_v12, %v19635_v26  ;;  %26587 = vmatprep.subr.bf16.mxu1 %v26586_v55  ;;  %v19768_v26 = vand.u32 4294901760, %v19767_v13  ;;  %26555 = vmatprep.subr.bf16.mxu0 %v33616_v9  ;;  %v19502_v55 = vand.u32 4294901760, %v33622_v1  ;;  %v19553_v36 = vand.u32 4294901760, %v19424_v57  ;;  %v19408_v44 = vld [vmem:[%s28539_s1 + $0x70] sm:$0xff] }
0x138e   : > { %v33637_v12 = vsub.f32 %v33601_v2, %v19547_v51  ;;  %v33647_v53 = vsub.f32 %v33608_v6, %v19550_v15  ;;  %v33654_v18 = vsub.f32 %v33619_v33, %v19499_v40  ;;  %v19655_v6 = vsub.f32 %v33630_v37, %v35183_v4 }
0x138f   : > { %26589 = vmatpush3.bf16.msra.mxu1 %v26588_v35  ;;  %v19425_v35 = vld [vmem:[%s28539_s1 + $0xf8] sm:$0xff]  ;;  %v26590_v2 = vpack.c.bf16 %v19768_v26, %v19761_v16  ;;  %v33657_v52 = vsub.f32 %v33622_v1, %v19502_v55  ;;  %v33674_v14 = vsub.f32 %v19424_v57, %v19553_v36  ;;  %v19505_v7 = vand.u32 4294901760, %v19408_v44 }
0x1390   : > { %v35185_v13 = vand.u32 4294901760, %v33637_v12  ;;  %v35192_v21 = vand.u32 4294901760, %v33647_v53  ;;  %26557 = vmatpush3.bf16.msra.mxu0 %v33633_v54  ;;  %v35195_v16 = vand.u32 4294901760, %v33654_v18  ;;  %v19556_v26 = vand.u32 4294901760, %v19425_v35 }
0x1391   : > { %26591 = vmatprep.subr.bf16.mxu1 %v26590_v2  ;;  %v35200_v1 = vand.u32 4294901760, %v33657_v52  ;;  %26559 = vmatprep.subr.bf16.mxu0 %v33649_v0  ;;  %v19656_v23 = vand.u32 4294901760, %v19655_v6  ;;  %35922 = vst [vmem:[#allocation90_spill] sm:$0xff] %v33674_v14  ;;  %v33678_v2 = vpack.c.bf16 %v19496_v3, %v19493_v20  ;;  %v19787_v57 = vand.u32 4294901760, %v33674_v14 }
0x1392   : > { %v19774_v33 = vsub.f32 %v33637_v12, %v35185_v13  ;;  %v19781_v4 = vsub.f32 %v33647_v53, %v35192_v21  ;;  %v19409_v13 = vld [vmem:[%s28539_s1 + $0x78] sm:$0xff]  ;;  %v19662_v49 = vsub.f32 %v33654_v18, %v35195_v16  ;;  %v33687_v0 = vsub.f32 %v19425_v35, %v19556_v26 }
0x1393   : > { %v19669_v6 = vsub.f32 %v33657_v52, %v35200_v1  ;;  %v26592_v54 = vpack.c.bf16 %v19656_v23, %v19649_v29  ;;  %v19508_v9 = vand.u32 4294901760, %v19409_v13  ;;  %v19788_v22 = vsub.f32 %v33674_v14, %v19787_v57 }
0x1394   : > { %v19775_v46 = vand.u32 4294901760, %v19774_v33  ;;  %35923 = vst [vmem:[#allocation92_spill] sm:$0xff] %v33687_v0  ;;  %v19782_v21 = vand.u32 4294901760, %v19781_v4  ;;  %26561 = vmatpush3.bf16.msra.mxu0 %v33678_v2  ;;  %v19663_v20 = vand.u32 4294901760, %v19662_v49  ;;  %v19794_v33 = vand.u32 4294901760, %v33687_v0 }
0x1395   : > { %v19670_v3 = vand.u32 4294901760, %v19669_v6  ;;  %26593 = vmatpush3.bf16.msra.mxu1 %v26592_v54  ;;  %v33693_v27 = vsub.f32 %v19408_v44, %v19505_v7  ;;  %v33695_v35 = vpack.c.bf16 %v19550_v15, %v19547_v51  ;;  %v33698_v23 = vsub.f32 %v19409_v13, %v19508_v9 }
0x1396   : > { %v26594_v16 = vpack.c.bf16 %v19782_v21, %v19775_v46  ;;  %v19795_v4 = vsub.f32 %v33687_v0, %v19794_v33  ;;  %v33700_v1 = vpack.c.bf16 %v19502_v55, %v19499_v40  ;;  %v19789_v49 = vand.u32 4294901760, %v19788_v22 }
0x1397   : > { %35924 = vst [vmem:[#allocation126_spill] sm:$0xff] %v33693_v27  ;;  %v26596_v29 = vpack.c.bf16 %v19670_v3, %v19663_v20  ;;  %35925 = vst [vmem:[#allocation100_spill] sm:$0xff] %v33698_v23  ;;  %v19675_v6 = vand.u32 4294901760, %v33693_v27  ;;  %26563 = vmatprep.subr.bf16.mxu0 %v33695_v35  ;;  %v33704_v46 = vpack.c.bf16 %v19556_v26, %v19553_v36  ;;  %v19682_v21 = vand.u32 4294901760, %v33698_v23 }
0x1398   : > { %26595 = vmatprep.subr.bf16.mxu1 %v26594_v16  ;;  %v19796_v54 = vand.u32 4294901760, %v19795_v4  ;;  %26565 = vmatpush3.bf16.msra.mxu0 %v33700_v1  ;;  %v33708_v51 = vpack.c.bf16 %v19508_v9, %v19505_v7  ;;  %v26602_v22 = vpack.c.bf16 %v33284_v8, %v33279_v59  ;;  %v35933_v4 = vand.u32 4294901760, %v33448_v48 }
0x1399   : > { %26597 = vmatpush3.bf16.msra.mxu1 %v26596_v29  ;;  %v19676_v15 = vsub.f32 %v33693_v27, %v19675_v6  ;;  %26567 = vmatprep.subr.bf16.mxu0 %v33704_v46  ;;  %v19683_v55 = vsub.f32 %v33698_v23, %v19682_v21  ;;  %v35936_v29 = vand.u32 4294901760, %v33467_v45  ;;  %v33863_v27 = vld [vmem:[%s28539_s1 + $0x1a8] sm:$0xff] }
0x139a   : > { %v26598_v40 = vpack.c.bf16 %v19796_v54, %v19789_v49  ;;  %v35932_v54 = vand.u32 4294901760, %v33443_v38  ;;  %35972 = vst [vmem:[#allocation55_spill] sm:$0xff] %v33863_v27 }
0x139b   : > { %v19677_v16 = vand.u32 4294901760, %v19676_v15  ;;  %v19684_v44 = vand.u32 4294901760, %v19683_v55  ;;  %v35927_v55 = vand.u32 4294901760, %v33402_v11 }
0x139c   : > { %26599 = vmatprep.subr.bf16.mxu1 %v26598_v40  ;;  %26569 = vmatpush3.bf16.msra.mxu0 %v33708_v51  ;;  %v35926_v40 = vand.u32 4294901760, %v33397_v60  ;;  %v33757_v15 = vpack.c.bf16 %v35933_v4, %v35932_v54  ;;  %v35944_v4 = vand.u32 4294901760, %v33561_v61  ;;  %v35945_v54 = vand.u32 4294901760, %v33584_v56 }
0x139d   : > { %26603 = vmatprep.subr.bf16.mxu0 %v26602_v22  ;;  %v26600_v3 = vpack.c.bf16 %v19684_v44, %v19677_v16  ;;  %v35929_v44 = vand.u32 4294901760, %v33407_v10  ;;  %v35935_v22 = vand.u32 4294901760, %v33459_v63 }
0x139e   : > { %v33745_v16 = vpack.c.bf16 %v35927_v55, %v35926_v40  ;;  %35934 = vst [vmem:[#allocation127_spill] sm:$0xff] %v33757_v15  ;;  %v35938_v40 = vand.u32 4294901760, %v33534_v5  ;;  %v35939_v55 = vand.u32 4294901760, %v33537_v34  ;;  %v33781_v9 = vpack.c.bf16 %v35945_v54, %v35944_v4  ;;  %v33835_v15 = vld [vmem:[%s28539_s1 + $0x190] sm:$0xff] }
0x139f   : > { %26601 = vmatpush3.bf16.msra.mxu1 %v26600_v3  ;;  %v35930_v3 = vand.u32 4294901760, %v33412_v25  ;;  %v33763_v20 = vpack.c.bf16 %v35936_v29, %v35935_v22  ;;  %v35947_v29 = vand.u32 4294901760, %v33614_v32  ;;  %v35948_v22 = vand.u32 4294901760, %v33630_v37  ;;  %35967 = vst [vmem:[#allocation71_spill] sm:$0xff] %v33835_v15 }
0x13a0   : > { %26635 = vmatprep.subr.bf16.mxu1 %v33473_v24  ;;  %35928 = vst [vmem:[#allocation101_spill] sm:$0xff] %v33745_v16  ;;  %v33769_v7 = vpack.c.bf16 %v35939_v55, %v35938_v40  ;;  %35946 = vst [vmem:[#allocation47_spill] sm:$0xff] %v33781_v9  ;;  %v35950_v40 = vand.u32 4294901760, %v33637_v12  ;;  %v35951_v55 = vand.u32 4294901760, %v33647_v53  ;;  %v33801_v4 = vpack.c.bf16 %v19794_v33, %v19787_v57  ;;  %v33806_v9 = vld [vmem:[%s28520_s21] sm:$0xf] }
0x13a1   : > { %v33751_v49 = vpack.c.bf16 %v35930_v3, %v35929_v44  ;;  %35937 = vst [vmem:[#allocation128_spill] sm:$0xff] %v33763_v20  ;;  %v35941_v44 = vand.u32 4294901760, %v33541_v43  ;;  %v35942_v3 = vand.u32 4294901760, %v33544_v31  ;;  %v33787_v36 = vpack.c.bf16 %v35948_v22, %v35947_v29  ;;  %v35958_v29 = vld [vmem:[#allocation36_spill] sm:$0xff] }
0x13a2   : > { %35940 = vst [vmem:[#allocation129_spill] sm:$0xff] %v33769_v7  ;;  %v33793_v13 = vpack.c.bf16 %v35951_v55, %v35950_v40  ;;  %35956 = vst [vmem:[#allocation35_spill] sm:$0xff] %v33801_v4  ;;  %v33803_v54 = vpack.c.bf16 %v19682_v21, %v19675_v6  ;;  %v17643_v22 = vrot.slane %v33806_v9, %v35958_v29  ;;  %v33860_v16 = vld [vmem:[%s28539_s1 + $0x1a0] sm:$0xff] }
0x13a3   : > { %35931 = vst [vmem:[#allocation105_spill] sm:$0xff] %v33751_v49  ;;  %v33775_v26 = vpack.c.bf16 %v35942_v3, %v35941_v44  ;;  %35949 = vst [vmem:[#allocation58_spill] sm:$0xff] %v33787_v36  ;;  %v35953_v44 = vand.u32 4294901760, %v33654_v18  ;;  %v35954_v3 = vand.u32 4294901760, %v33657_v52  ;;  %v35959_v36 = vld [vmem:[#allocation33_spill] sm:$0xff]  ;;  %v33838_v49 = vld [vmem:[%s28539_s1 + $0x198] sm:$0xff] }
0x13a4   : > { %35952 = vst [vmem:[#allocation38_spill] sm:$0xff] %v33793_v13  ;;  %35957 = vst [vmem:[#allocation44_spill] sm:$0xff] %v33803_v54  ;;  %v35960_v7 = vsub.s32 1, %v35959_v36 }
0x13a5   : > { %35943 = vst [vmem:[#allocation130_spill] sm:$0xff] %v33775_v26  ;;  %v33799_v26 = vpack.c.bf16 %v35954_v3, %v35953_v44  ;;  %35968 = vst [vmem:[#allocation78_spill] sm:$0xff] %v33838_v49 }
0x13a6   : > { %v17647_v40 = vrot.slane %v33806_v9, %v35960_v7  ;;  %35971 = vst [vmem:[#allocation53_spill] sm:$0xff] %v33860_v16 }
0x13a7   : > { %35955 = vst [vmem:[#allocation42_spill] sm:$0xff] %v33799_v26 }
0x144b   : > { %v18510_v55 = vpop.f32.mrb[66].mxu0  ;;  %v33813_v13 = vpop.f32.mrb[72].mxu1 }
0x144c   : > { %35961 = vst [vmem:[#allocation34_spill] sm:$0xff] %v33813_v13  ;;  %v26926_v44 = vadd.f32 %v18510_v55, %v17643_v22  ;;  %v18512_v57 = vpop.f32.mrb[67].mxu0  ;;  %v33815_v33 = vpop.f32.mrb[73].mxu1  ;;  %v33818_v13 = vld [vmem:[%s28539_s1 + $0x180] sm:$0xff]  ;;  %v33821_v22 = vld [vmem:[%s28539_s1 + $0x188] sm:$0xff] }
0x144d   : > { %v26927_v6 = vadd.f32 %v18512_v57, %v17647_v40  ;;  %35962 = vst [vmem:[#allocation61_spill] sm:$0xff] %v33818_v13  ;;  %35963 = vst [vmem:[#allocation63_spill] sm:$0xff] %v33821_v22  ;;  %v33824_v55 = vld [vmem:[%s28539_s1 + $0x100] sm:$0xff]  ;;  %v35974_v23 = vand.u32 4294901760, %v33821_v22 }
0x144e   : > { %v19374_v21 = vmin.f32 %v26926_v44, 0.0  ;;  %vm19370_vm6 = vcmp.gt.f32.partialorder %v26926_v44, 0.0  ;;  %35964 = vst [vmem:[#allocation67_spill] sm:$0xff] %v33824_v55 }
0x144f   : > { %v19375_v3 = vmin.f32 %v26927_v6, 0.0  ;;  %vm19371_vm7 = vcmp.gt.f32.partialorder %v26927_v6, 0.0  ;;  %v33874_v20 = vsub.f32 %v33821_v22, %v35974_v23  ;;  %v33904_v23 = vld [vmem:[%s28539_s1 + $0x128] sm:$0xff] }
0x1450   : > { %v19378_v54 = vmul.f32 1.442695, %v19374_v21  ;;  %35979 = vst [vmem:[#allocation48_spill] sm:$0xff] %v33904_v23 }
0x1451   : > { %v19380_v29 = vmul.f32 1.442695, %v19375_v3 }
0x1452   : > { %27358 = vpow2.f32 %v19378_v54  ;;  %v33829_v54 = vld [vmem:[%s28539_s1 + $0x108] sm:$0xff] }
0x1453   : > { %27360 = vpow2.f32 %v19380_v29  ;;  %35966 = vst [vmem:[#allocation70_spill] sm:$0xff] %v33829_v54  ;;  %v35977_v8 = vand.u32 4294901760, %v33829_v54 }
0x145c   : > { %v27359_v4 = vpop.eup %27358 }
0x145d   : > { %v21575_v7 = vadd.f32 -1.0, %v27359_v4  ;;  %v27361_v26 = vpop.eup %27360 }
0x145e   : > { %v21576_v57 = vadd.f32 -1.0, %v27361_v26 }
0x145f   : > { %v19390_v40 = vsel %vm19370_vm6, %v26926_v44, %v21575_v7  ;;  %v33846_v7 = vld [vmem:[%s28539_s1 + $0x110] sm:$0xff] }
0x1460   : > { %v33826_v21 = vand.u32 4294901760, %v19390_v40  ;;  %v19391_v3 = vsel %vm19371_vm7, %v26927_v6, %v21576_v57  ;;  %35969 = vst [vmem:[#allocation77_spill] sm:$0xff] %v33846_v7  ;;  %v33850_v57 = vld [vmem:[%s28539_s1 + $0x118] sm:$0xff]  ;;  %v35973_v6 = vand.u32 4294901760, %v33818_v13  ;;  %v35984_v14 = vand.u32 4294901760, %v33846_v7 }
0x1461   : > { %v33843_v44 = vand.u32 4294901760, %v19391_v3  ;;  %35970 = vst [vmem:[#allocation45_spill] sm:$0xff] %v33850_v57 }
0x1462   : > { %35965 = vst [vmem:[#allocation66_spill] sm:$0xff] %v33826_v21  ;;  %v33841_v26 = vsub.f32 %v19390_v40, %v33826_v21  ;;  %v35975_v40 = vand.u32 4294901760, %v33824_v55 }
0x1463   : > { %v33853_v4 = vsub.f32 %v19391_v3, %v33843_v44  ;;  %19799 = vmatprep.mubr.f32.mxu1 %v33843_v44  ;;  %v33869_v3 = vsub.f32 %v33818_v13, %v35973_v6  ;;  %v26604_v6 = vpack.c.bf16 %v33304_v39, %v33299_v28  ;;  %v26606_v13 = vpack.c.bf16 %v33320_v30, %v33315_v17  ;;  %v33901_v30 = vld [vmem:[%s28539_s1 + $0x120] sm:$0xff] }
0x1464   : > { %19801 = vmatmul.mubr.f32.vlgmr.msra.gmra.mrb[74].mxu1 %v33826_v21  ;;  %v33879_v29 = vsub.f32 %v33824_v55, %v35975_v40  ;;  %v35976_v22 = vand.u32 4294901760, %v33841_v26  ;;  %v33896_v55 = vsub.f32 %v33829_v54, %v35977_v8  ;;  %35978 = vst [vmem:[#allocation57_spill] sm:$0xff] %v33901_v30  ;;  %v35982_v39 = vand.u32 4294901760, %v33838_v49 }
0x1465   : > { %26637 = vmatpush3.bf16.msra.mxu1 %v33491_v58  ;;  %v19560_v21 = vand.u32 4294901760, %v33853_v4 }
0x1466   : > { %26639 = vmatprep.subr.bf16.mxu1 %v33517_v50  ;;  %v19567_v40 = vsub.f32 %v33841_v26, %v35976_v22  ;;  %v26608_v22 = vpack.c.bf16 %v33334_v42, %v33329_v47  ;;  %v35980_v50 = vand.u32 4294901760, %v33835_v15  ;;  %v33917_v28 = vsub.f32 %v33838_v49, %v35982_v39  ;;  %v33928_v47 = vld [vmem:[%s28539_s1 + $0x1b0] sm:$0xff] }
0x1467   : > { %20043 = vmatprep.mubr.f32.mxu1 %v19560_v21  ;;  %v19561_v17 = vsub.f32 %v33853_v4, %v19560_v21  ;;  %v33925_v42 = vsub.f32 %v33846_v7, %v35984_v14  ;;  %35986 = vst [vmem:[#allocation50_spill] sm:$0xff] %v33928_v47  ;;  %v35988_v39 = vand.u32 4294901760, %v33850_v57  ;;  %v33942_v49 = vld [vmem:[%s28539_s1 + $0x130] sm:$0xff]  ;;  %v33945_v14 = vld [vmem:[%s28539_s1 + $0x138] sm:$0xff] }
0x1468   : > { %v33912_v8 = vsub.f32 %v33835_v15, %v35980_v50  ;;  %35983 = vst [vmem:[#allocation37_spill] sm:$0xff] %v33917_v28  ;;  %v33931_v50 = vld [vmem:[%s28539_s1 + $0x1b8] sm:$0xff]  ;;  %35989 = vst [vmem:[#allocation64_spill] sm:$0xff] %v33942_v49  ;;  %v19568_v7 = vand.u32 4294901760, %v19567_v40  ;;  %v36000_v40 = vand.u32 4294901760, %v33896_v55 }
0x1469   : > { %35985 = vst [vmem:[#allocation54_spill] sm:$0xff] %v33925_v42  ;;  %35987 = vst [vmem:[#allocation60_spill] sm:$0xff] %v33931_v50  ;;  %26641 = vmatpush3.bf16.msra.mxu1 %v33528_v62  ;;  %v19562_v15 = vand.u32 4294901760, %v19561_v17  ;;  %v33937_v54 = vsub.f32 %v33850_v57, %v35988_v39  ;;  %v35991_v17 = vand.u32 4294901760, %v33860_v16  ;;  %v35993_v39 = vand.u32 4294901760, %v33863_v27 }
0x146a   : > { %35981 = vst [vmem:[#allocation49_spill] sm:$0xff] %v33912_v8  ;;  %35990 = vst [vmem:[#allocation65_spill] sm:$0xff] %v33945_v14  ;;  %26643 = vmatprep.subr.bf16.mxu1 %v33556_v19  ;;  %v33966_v19 = vld [vmem:[%s28539_s1 + $0x1c0] sm:$0xff]  ;;  %v35999_v57 = vand.u32 4294901760, %v33879_v29 }
0x146b   : > { %v33952_v0 = vsub.f32 %v33860_v16, %v35991_v17  ;;  %v33957_v59 = vsub.f32 %v33863_v27, %v35993_v39  ;;  %19563 = vmatprep.mubr.f32.mxu0 %v19562_v15  ;;  %35995 = vst [vmem:[#allocation72_spill] sm:$0xff] %v33966_v19  ;;  %v35996_v15 = vand.u32 4294901760, %v33869_v3  ;;  %v35997_v39 = vand.u32 4294901760, %v33874_v20 }
0x146c   : > { %19569 = vmatmul.mubr.f32.vlgmr.msra.gmra.mrb[68].mxu0 %v19568_v7  ;;  %v33978_v62 = vpack.c.bf16 %v36000_v40, %v35999_v57  ;;  %v36002_v17 = vand.u32 4294901760, %v33901_v30  ;;  %v33994_v57 = vld [vmem:[%s28539_s1 + $0x1c8] sm:$0xff] }
0x146d   : > { %35992 = vst [vmem:[#allocation68_spill] sm:$0xff] %v33952_v0  ;;  %35994 = vst [vmem:[#allocation69_spill] sm:$0xff] %v33957_v59  ;;  %v33972_v21 = vpack.c.bf16 %v35997_v39, %v35996_v15  ;;  %26605 = vmatpush3.bf16.msra.mxu0 %v26604_v6  ;;  %26645 = vmatpush3.bf16.msra.mxu1 %v33573_v41  ;;  %v36003_v15 = vand.u32 4294901760, %v33904_v23  ;;  %v33997_v6 = vld [vmem:[%s28539_s1 + $0x140] sm:$0xff]  ;;  %v34003_v7 = vld [vmem:[%s28539_s1 + $0x148] sm:$0xff] }
0x146e   : > { %36001 = vst [vmem:[#allocation76_spill] sm:$0xff] %v33978_v62  ;;  %v33986_v27 = vsub.f32 %v33901_v30, %v36002_v17  ;;  %36005 = vst [vmem:[#allocation83_spill] sm:$0xff] %v33994_v57  ;;  %19936 = vmatprep.mubr.f32.mxu0 %v33853_v4  ;;  %26607 = vmatprep.subr.bf16.mxu0 %v26606_v13  ;;  %v34006_v17 = vld [vmem:[%s28539_s1 + $0x1d0] sm:$0xff]  ;;  %v36009_v62 = vand.u32 4294901760, %v33912_v8  ;;  %v36013_v30 = vand.u32 4294901760, %v33928_v47  ;;  %v36015_v4 = vand.u32 4294901760, %v33931_v50 }
0x146f   : > { %35998 = vst [vmem:[#allocation73_spill] sm:$0xff] %v33972_v21  ;;  %v33991_v39 = vsub.f32 %v33904_v23, %v36003_v15  ;;  %36006 = vst [vmem:[#allocation85_spill] sm:$0xff] %v33997_v6  ;;  %v36010_v15 = vand.u32 4294901760, %v33917_v28  ;;  %v36012_v23 = vld [vmem:[#allocation123_spill] sm:$0xff]  ;;  %v34058_v28 = vld [vmem:[%s28539_s1 + $0x150] sm:$0xff] }
0x1470   : > { %36007 = vst [vmem:[#allocation88_spill] sm:$0xff] %v34003_v7  ;;  %36008 = vst [vmem:[#allocation91_spill] sm:$0xff] %v34006_v17  ;;  %26647 = vmatprep.subr.bf16.mxu1 %v36012_v23  ;;  %v34018_v13 = vsub.f32 %v33928_v47, %v36013_v30  ;;  %v34023_v16 = vsub.f32 %v33931_v50, %v36015_v4  ;;  %v34027_v8 = vld [vmem:[%s28539_s1 + $0x1d8] sm:$0xff]  ;;  %v36021_v30 = vand.u32 4294901760, %v33942_v49  ;;  %v36022_v4 = vand.u32 4294901760, %v33945_v14 }
0x1471   : > { %36004 = vst [vmem:[#allocation79_spill] sm:$0xff] %v33991_v39  ;;  %v34012_v21 = vpack.c.bf16 %v36010_v15, %v36009_v62  ;;  %36017 = vst [vmem:[#allocation102_spill] sm:$0xff] %v34027_v8  ;;  %v36018_v62 = vand.u32 4294901760, %v33925_v42  ;;  %v36019_v15 = vand.u32 4294901760, %v33937_v54  ;;  %26609 = vmatpush3.bf16.msra.mxu0 %v26608_v22  ;;  %v36024_v42 = vld [vmem:[#allocation124_spill] sm:$0xff]  ;;  %v34061_v22 = vld [vmem:[%s28539_s1 + $0x158] sm:$0xff] }
0x1472   : > { %36014 = vst [vmem:[#allocation97_spill] sm:$0xff] %v34018_v13  ;;  %36016 = vst [vmem:[#allocation99_spill] sm:$0xff] %v34023_v16  ;;  %v34038_v47 = vsub.f32 %v33942_v49, %v36021_v30  ;;  %v34043_v50 = vsub.f32 %v33945_v14, %v36022_v4  ;;  %26649 = vmatpush3.bf16.msra.mxu1 %v36024_v42  ;;  %v36025_v49 = vpack.c.bf16 %v33402_v11, %v33397_v60  ;;  %v36026_v4 = vld [vmem:[#allocation84_spill] sm:$0xff] }
0x1473   : > { %36011 = vst [vmem:[#allocation95_spill] sm:$0xff] %v34012_v21  ;;  %v34033_v21 = vpack.c.bf16 %v36019_v15, %v36018_v62  ;;  %26651 = vmatprep.subr.bf16.mxu1 %v36026_v4  ;;  %36027 = vst [vmem:[#allocation108_spill] sm:$0xff] %v34058_v28  ;;  %v36029_v62 = vand.u32 4294901760, %v33952_v0  ;;  %v36030_v15 = vand.u32 4294901760, %v33957_v59  ;;  %v36032_v11 = vand.u32 4294901760, %v33966_v19 }
0x1474   : > { %36023 = vst [vmem:[#allocation107_spill] sm:$0xff] %v34043_v50  ;;  %26611 = vmatprep.subr.bf16.mxu0 %v36025_v49  ;;  %36028 = vst [vmem:[#allocation109_spill] sm:$0xff] %v34061_v22  ;;  %v36034_v40 = vand.u32 4294901760, %v33986_v27  ;;  %v36035_v14 = vand.u32 4294901760, %v33991_v39  ;;  %v36039_v60 = vand.u32 4294901760, %v33997_v6 }
0x1475   : > { %36020 = vst [vmem:[#allocation106_spill] sm:$0xff] %v34033_v21  ;;  %v34067_v21 = vpack.c.bf16 %v36030_v15, %v36029_v62  ;;  %v34074_v49 = vsub.f32 %v33966_v19, %v36032_v11  ;;  %v36037_v15 = vand.u32 4294901760, %v33994_v57  ;;  %v34152_v19 = vld [vmem:[%s28539_s1 + $0x1f0] sm:$0xff] }
0x1476   : > { %v34080_v0 = vpack.c.bf16 %v36035_v14, %v36034_v40  ;;  %v34092_v11 = vsub.f32 %v33997_v6, %v36039_v60  ;;  %v36042_v14 = vld [vmem:[#allocation125_spill] sm:$0xff]  ;;  %v36043_v40 = vand.u32 4294901760, %v34003_v7  ;;  %v36050_v60 = vand.u32 4294901760, %v34027_v8  ;;  %36057 = vst [vmem:[#allocation52_spill] sm:$0xff] %v34152_v19 }
0x1477   : > { %36031 = vst [vmem:[#allocation110_spill] sm:$0xff] %v34067_v21  ;;  %36033 = vst [vmem:[#allocation111_spill] sm:$0xff] %v34074_v49  ;;  %v34087_v30 = vsub.f32 %v33994_v57, %v36037_v15  ;;  %v36041_v21 = vpack.c.bf16 %v33412_v25, %v33407_v10  ;;  %26653 = vmatpush3.bf16.msra.mxu1 %v36042_v14  ;;  %v36045_v15 = vand.u32 4294901760, %v34006_v17  ;;  %v34111_v10 = vld [vmem:[%s28539_s1 + $0x1e0] sm:$0xff]  ;;  %v34114_v25 = vld [vmem:[%s28539_s1 + $0x1e8] sm:$0xff]  ;;  %v36052_v6 = vand.u32 4294901760, %v34023_v16 }
0x1478   : > { %36036 = vst [vmem:[#allocation39_spill] sm:$0xff] %v34080_v0  ;;  %36040 = vst [vmem:[#allocation41_spill] sm:$0xff] %v34092_v11  ;;  %v34101_v62 = vsub.f32 %v34003_v7, %v36043_v40  ;;  %v36048_v7 = vpack.c.bf16 %v33448_v48, %v33443_v38  ;;  %v34126_v0 = vsub.f32 %v34027_v8, %v36050_v60  ;;  %v34139_v38 = vld [vmem:[%s28539_s1 + $0x168] sm:$0xff]  ;;  %v36054_v48 = vand.u32 4294901760, %v34038_v47 }
0x1479   : > { %36038 = vst [vmem:[#allocation40_spill] sm:$0xff] %v34087_v30  ;;  %26613 = vmatpush3.bf16.msra.mxu0 %v36041_v21  ;;  %v34106_v59 = vsub.f32 %v34006_v17, %v36045_v15  ;;  %v36047_v21 = vsub.s32 3, %v35959_v36  ;;  %v36049_v15 = vld [vmem:[#allocation89_spill] sm:$0xff]  ;;  %v36051_v17 = vand.u32 4294901760, %v34018_v13  ;;  %v36059_v13 = vpack.c.bf16 %v33467_v45, %v33459_v63  ;;  %v34177_v45 = vld [vmem:[%s28539_s1 + $0x178] sm:$0xff] }
0x147a   : > { %36044 = vst [vmem:[#allocation134_spill] sm:$0xff] %v34101_v62  ;;  %26615 = vmatprep.subr.bf16.mxu0 %v36048_v7  ;;  %26655 = vmatprep.subr.bf16.mxu1 %v36049_v15  ;;  %v36055_v7 = vand.u32 4294901760, %v34043_v50  ;;  %v36060_v16 = vand.u32 4294901760, %v34058_v28 }
0x147b   : > { %36046 = vst [vmem:[#allocation43_spill] sm:$0xff] %v34106_v59  ;;  %v17655_v40 = vrot.slane %v33806_v9, %v36047_v21  ;;  %v34132_v57 = vpack.c.bf16 %v36052_v6, %v36051_v17  ;;  %v34136_v21 = vld [vmem:[%s28539_s1 + $0x160] sm:$0xff]  ;;  %26657 = vmatpush3.bf16.msra.mxu1 %v33678_v2  ;;  %v36061_v17 = vand.u32 4294901760, %v34061_v22 }
0x147c   : > { %v34145_v60 = vpack.c.bf16 %v36055_v7, %v36054_v48  ;;  %v34166_v6 = vsub.f32 %v34058_v28, %v36060_v16  ;;  %26659 = vmatprep.subr.bf16.mxu1 %v33695_v35  ;;  %v36064_v48 = vand.u32 4294901760, %v34087_v30  ;;  %v36069_v16 = vand.u32 4294901760, %v34111_v10 }
0x147d   : > { %36053 = vst [vmem:[#allocation59_spill] sm:$0xff] %v34132_v57  ;;  %v34155_v57 = vld [vmem:[%s28539_s1 + $0x1f8] sm:$0xff]  ;;  %26617 = vmatpush3.bf16.msra.mxu0 %v36059_v13  ;;  %v34171_v8 = vsub.f32 %v34061_v22, %v36061_v17  ;;  %v34180_v63 = vadd.f32 %v33815_v33, %v17655_v40  ;;  %v36062_v13 = vpack.c.bf16 %v33537_v34, %v33534_v5  ;;  %v36063_v17 = vand.u32 4294901760, %v34074_v49 }
0x147e   : > { %36056 = vst [vmem:[#allocation62_spill] sm:$0xff] %v34145_v60  ;;  %36058 = vst [vmem:[#allocation51_spill] sm:$0xff] %v34155_v57  ;;  %v34174_v60 = vld [vmem:[%s28539_s1 + $0x170] sm:$0xff]  ;;  %v36066_v5 = vand.u32 4294901760, %v34092_v11  ;;  %v36067_v34 = vand.u32 4294901760, %v34101_v62  ;;  %v34206_v7 = vsub.f32 %v34111_v10, %v36069_v16  ;;  %v36071_v28 = vpack.c.bf16 %v33544_v31, %v33541_v43 }
0x147f   : > { %26619 = vmatprep.subr.bf16.mxu0 %v36062_v13  ;;  %v34192_v22 = vpack.c.bf16 %v36064_v48, %v36063_v17  ;;  %v36070_v48 = vand.u32 4294901760, %v34114_v25  ;;  %26661 = vmatpush3.bf16.msra.mxu1 %v33700_v1  ;;  %v36073_v40 = vand.u32 4294901760, %v34136_v21  ;;  %v36075_v43 = vand.u32 4294901760, %v34126_v0 }
0x1480   : > { %v34201_v13 = vpack.c.bf16 %v36067_v34, %v36066_v5  ;;  %v19377_v34 = vmin.f32 %v34180_v63, 0.0  ;;  %26663 = vmatprep.subr.bf16.mxu1 %v33704_v46  ;;  %v36077_v16 = vand.u32 4294901760, %v34139_v38  ;;  %vm19373_vm8 = vcmp.gt.f32.partialorder %v34180_v63, 0.0 }
0x1481   : > { %36065 = vst [vmem:[#allocation56_spill] sm:$0xff] %v34192_v22  ;;  %v34211_v17 = vsub.f32 %v34114_v25, %v36070_v48  ;;  %26621 = vmatpush3.bf16.msra.mxu0 %v36071_v28  ;;  %v36072_v48 = vpack.c.bf16 %v33584_v56, %v33561_v61  ;;  %v34229_v33 = vsub.f32 %v34136_v21, %v36073_v40  ;;  %v36074_v28 = vand.u32 4294901760, %v34106_v59 }
0x1482   : > { %36068 = vst [vmem:[#allocation74_spill] sm:$0xff] %v34201_v13  ;;  %v34240_v5 = vsub.f32 %v34139_v38, %v36077_v16  ;;  %v36078_v61 = vand.u32 4294901760, %v34152_v19  ;;  %v36082_v13 = vand.u32 4294901760, %v34166_v6  ;;  %v36085_v22 = vand.u32 4294901760, %v34174_v60 }
0x1483   : > { %26623 = vmatprep.subr.bf16.mxu0 %v36072_v48  ;;  %v34235_v31 = vpack.c.bf16 %v36075_v43, %v36074_v28  ;;  %v36080_v48 = vand.u32 4294901760, %v34155_v57  ;;  %v36083_v28 = vand.u32 4294901760, %v34171_v8  ;;  %v35258_v16 = vand.u32 4294901760, %v34211_v17  ;;  %26665 = vmatpush3.bf16.msra.mxu1 %v33708_v51 }
0x1484   : > { %v34245_v56 = vsub.f32 %v34152_v19, %v36078_v61  ;;  %v34263_v61 = vsub.f32 %v34174_v60, %v36085_v22  ;;  %v36087_v19 = vand.u32 4294901760, %v34177_v45  ;;  %26699 = vmatprep.subr.bf16.mxu1 %v33473_v24 }
0x1485   : > { %36076 = vst [vmem:[#allocation75_spill] sm:$0xff] %v34235_v31  ;;  %v34250_v40 = vsub.f32 %v34155_v57, %v36080_v48  ;;  %v34256_v43 = vpack.c.bf16 %v36083_v28, %v36082_v13  ;;  %v35259_v31 = vand.u32 4294901760, %v34206_v7  ;;  %v36088_v57 = vpack.c.bf16 %v33630_v37, %v33614_v32 }
0x1486   : > { %36079 = vst [vmem:[#allocation80_spill] sm:$0xff] %v34245_v56  ;;  %36086 = vst [vmem:[#allocation86_spill] sm:$0xff] %v34263_v61  ;;  %v34268_v48 = vsub.f32 %v34177_v45, %v36087_v19  ;;  %v19384_v13 = vmul.f32 1.442695, %v19377_v34  ;;  %v36089_v28 = vpack.c.bf16 %v33647_v53, %v33637_v12  ;;  %v35261_v19 = vand.u32 4294901760, %v34229_v33 }
0x1487   : > { %36081 = vst [vmem:[#allocation81_spill] sm:$0xff] %v34250_v40  ;;  %36084 = vst [vmem:[#allocation82_spill] sm:$0xff] %v34256_v43  ;;  %26625 = vmatpush3.bf16.msra.mxu0 %v36088_v57  ;;  %v34282_v22 = vpack.c.bf16 %v35258_v16, %v35259_v31  ;;  %v35260_v32 = vand.u32 4294901760, %v34240_v5  ;;  %v35263_v37 = vand.u32 4294901760, %v34245_v56  ;;  %v35262_v57 = vand.u32 4294901760, %v34250_v40  ;;  %v36095_v16 = vld [vmem:[#allocation92_spill] sm:$0xff] }
0x1488   : > { %26627 = vmatprep.subr.bf16.mxu0 %v36089_v28  ;;  %v36091_v34 = vand.u32 4294901760, %v33841_v26  ;;  %v36092_v53 = vpack.c.bf16 %v33657_v52, %v33654_v18  ;;  %v36096_v31 = vld [vmem:[#allocation90_spill] sm:$0xff]  ;;  %v36098_v18 = vld [vmem:[#allocation112_spill] sm:$0xff]  ;;  %27362 = vpow2.f32 %v19384_v13 }
0x1489   : > { %36090 = vst [vmem:[#allocation87_spill] sm:$0xff] %v34282_v22  ;;  %v34300_v28 = vpack.c.bf16 %v35260_v32, %v35261_v19  ;;  %v36097_v52 = vpack.c.bf16 %v36095_v16, %v36096_v31  ;;  %v36102_v32 = vand.u32 4294901760, %v34263_v61  ;;  %v36103_v19 = vand.u32 4294901760, %v34268_v48  ;;  %v36109_v31 = vld [vmem:[#allocation121_spill] sm:$0xff]  ;;  %v36110_v16 = vld [vmem:[#allocation114_spill] sm:$0xff]  ;;  %v36115_v43 = vld [vmem:[#allocation116_spill] sm:$0xff] }
0x148a   : > { %20047 = vmatmul.mubr.f32.vlgmr.msra.gmra.mrb[76].mxu1 %v36091_v34  ;;  %v34306_v34 = vpack.c.bf16 %v35262_v57, %v35263_v37  ;;  %v36105_v57 = vld [vmem:[#allocation120_spill] sm:$0xff] }
0x148b   : > { %26629 = vmatpush3.bf16.msra.mxu0 %v36092_v53  ;;  %26701 = vmatpush3.bf16.msra.mxu1 %v33491_v58  ;;  %36093 = vst [vmem:[#allocation93_spill] sm:$0xff] %v34300_v28  ;;  %v36099_v58 = vand.u32 4294901760, %v36098_v18  ;;  %v36100_v53 = vld [vmem:[#allocation113_spill] sm:$0xff]  ;;  %v34320_v28 = vpack.c.bf16 %v36103_v19, %v36102_v32  ;;  %v36106_v37 = vld [vmem:[#allocation100_spill] sm:$0xff]  ;;  %v36112_v18 = vld [vmem:[#allocation115_spill] sm:$0xff]  ;;  %v36116_v19 = vand.u32 4294901760, %v36115_v43 }
0x148c   : > { %36094 = vst [vmem:[#allocation94_spill] sm:$0xff] %v34306_v34  ;;  %20317 = vmatprep.mubr.f32.mxu1 %v33843_v44  ;;  %26631 = vmatprep.subr.bf16.mxu0 %v36097_v52  ;;  %v36101_v24 = vand.u32 4294901760, %v36100_v53  ;;  %v36107_v34 = vld [vmem:[#allocation126_spill] sm:$0xff]  ;;  %v36111_v52 = vand.u32 4294901760, %v36110_v16  ;;  %v36113_v53 = vand.u32 4294901760, %v36112_v18  ;;  %v36117_v32 = vld [vmem:[#allocation117_spill] sm:$0xff] }
0x148d   : > { %36104 = vst [vmem:[#allocation98_spill] sm:$0xff] %v34320_v28  ;;  %26703 = vmatprep.subr.bf16.mxu1 %v36105_v57  ;;  %v36108_v22 = vpack.c.bf16 %v36106_v37, %v36107_v34  ;;  %v36118_v13 = vand.u32 4294901760, %v36117_v32  ;;  %v36121_v57 = vld [vmem:[#allocation119_spill] sm:$0xff]  ;;  %v35264_v43 = vsub.s32 2, %v35959_v36  ;;  %v36124_v16 = vld [vmem:[#allocation105_spill] sm:$0xff]  ;;  %v36132_v32 = vand.u32 4294901760, %v33896_v55 }
0x148e   : > { %v26666_v12 = vpack.c.bf16 %v36101_v24, %v36099_v58  ;;  %v26668_v24 = vpack.c.bf16 %v36113_v53, %v36111_v52  ;;  %v36114_v58 = vld [vmem:[#allocation122_spill] sm:$0xff]  ;;  %v36122_v34 = vand.u32 4294901760, %v36121_v57  ;;  %v36128_v53 = vld [vmem:[#allocation128_spill] sm:$0xff] }
0x148f   : > { %26633 = vmatpush3.bf16.msra.mxu0 %v36108_v22  ;;  %26705 = vmatpush3.bf16.msra.mxu1 %v36109_v31  ;;  %v26670_v28 = vpack.c.bf16 %v36118_v13, %v36116_v19  ;;  %v36119_v22 = vld [vmem:[#allocation118_spill] sm:$0xff]  ;;  %v36131_v19 = vand.u32 4294901760, %v33879_v29  ;;  %v20447_v13 = vsub.f32 %v33896_v55, %v36132_v32 }
0x1490   : > { %26667 = vmatprep.subr.bf16.mxu0 %v26666_v12  ;;  %26707 = vmatprep.subr.bf16.mxu1 %v36114_v58  ;;  %v36120_v37 = vand.u32 4294901760, %v36119_v22  ;;  %v36147_v36 = vld [vmem:[#allocation58_spill] sm:$0xff] }
0x1492   : > { %19939 = vmatmul.mubr.f32.vlgmr.msra.gmra.mrb[70].mxu0 %v33841_v26  ;;  %v26672_v31 = vpack.c.bf16 %v36122_v34, %v36120_v37  ;;  %v27363_v12 = vpop.eup %27362  ;;  %v36123_v26 = vld [vmem:[#allocation101_spill] sm:$0xff] }
0x1493   : > { %26669 = vmatpush3.bf16.msra.mxu0 %v26668_v24  ;;  %20213 = vmatprep.mubr.f32.mxu0 %v33843_v44  ;;  %v21578_v44 = vadd.f32 -1.0, %v27363_v12  ;;  %v36130_v24 = vld [vmem:[#allocation129_spill] sm:$0xff] }
0x1494   : > { %26709 = vmatpush3.bf16.msra.mxu1 %v33573_v41  ;;  %26671 = vmatprep.subr.bf16.mxu0 %v26670_v28  ;;  %v17651_v41 = vrot.slane %v33806_v9, %v35264_v43  ;;  %v36126_v28 = vand.u32 4294901760, %v33869_v3  ;;  %v36129_v9 = vld [vmem:[#allocation34_spill] sm:$0xff]  ;;  %v36134_v37 = vld [vmem:[#allocation49_spill] sm:$0xff] }
0x1495   : > { %26711 = vmatprep.subr.bf16.mxu1 %v36012_v23  ;;  %v36125_v23 = vld [vmem:[#allocation127_spill] sm:$0xff]  ;;  %v19393_v18 = vsel %vm19373_vm8, %v34180_v63, %v21578_v44  ;;  %v36135_v57 = vand.u32 4294901760, %v36134_v37  ;;  %v36136_v34 = vld [vmem:[#allocation37_spill] sm:$0xff] }
0x1496   : > { %v20552_v52 = vsub.f32 %v33869_v3, %v36126_v28  ;;  %v34375_v22 = vand.u32 4294901760, %v19393_v18  ;;  %v36141_v28 = vld [vmem:[#allocation130_spill] sm:$0xff] }
0x1497   : > { %26673 = vmatpush3.bf16.msra.mxu0 %v26672_v31  ;;  %v36137_v31 = vand.u32 4294901760, %v36136_v34 }
0x1498   : > { %26713 = vmatpush3.bf16.msra.mxu1 %v36024_v42  ;;  %26675 = vmatprep.subr.bf16.mxu0 %v36123_v26  ;;  %v36127_v42 = vand.u32 4294901760, %v33874_v20  ;;  %v20553_v58 = vand.u32 4294901760, %v20552_v52  ;;  %36133 = vst [vmem:[#allocation103_spill] sm:$0xff] %v34375_v22  ;;  %v36138_v26 = vld [vmem:[#allocation54_spill] sm:$0xff] }
0x1499   : > { %26715 = vmatprep.subr.bf16.mxu1 %v36026_v4  ;;  %v20573_v12 = vsub.f32 %v36136_v34, %v36137_v31  ;;  %v36139_v44 = vand.u32 4294901760, %v36138_v26  ;;  %v34401_v31 = vsub.f32 %v19393_v18, %v34375_v22 }
0x149a   : > { %v20559_v4 = vsub.f32 %v33874_v20, %v36127_v42 }
0x149b   : > { %26677 = vmatpush3.bf16.msra.mxu0 %v36124_v16  ;;  %v20454_v16 = vsub.f32 %v36138_v26, %v36139_v44 }
0x149c   : > { %26717 = vmatpush3.bf16.msra.mxu1 %v36042_v14  ;;  %26679 = vmatprep.subr.bf16.mxu0 %v36125_v23  ;;  %v34365_v14 = vadd.f32 %v36129_v9, %v17651_v41  ;;  %v20560_v63 = vand.u32 4294901760, %v20559_v4  ;;  %v36140_v41 = vand.u32 4294901760, %v33937_v54  ;;  %v36144_v4 = vld [vmem:[#allocation69_spill] sm:$0xff] }
0x149d   : > { %26719 = vmatprep.subr.bf16.mxu1 %v36049_v15  ;;  %v20440_v15 = vsub.f32 %v33879_v29, %v36131_v19  ;;  %v36146_v19 = vld [vmem:[#allocation47_spill] sm:$0xff] }
0x149e   : > { %v20461_v23 = vsub.f32 %v33937_v54, %v36140_v41  ;;  %v26762_v44 = vpack.c.bf16 %v20560_v63, %v20553_v58  ;;  %v36151_v63 = vld [vmem:[#allocation97_spill] sm:$0xff]  ;;  %vm19372_vm9 = vcmp.gt.f32.partialorder %v34365_v14, 0.0 }
0x149f   : > { %26681 = vmatpush3.bf16.msra.mxu0 %v36128_v53  ;;  %v36145_v53 = vand.u32 4294901760, %v36144_v4  ;;  %v20441_v32 = vand.u32 4294901760, %v20440_v15  ;;  %v36149_v15 = vand.u32 4294901760, %v33991_v39 }
0x14a0   : > { %26721 = vmatpush3.bf16.msra.mxu1 %v33678_v2  ;;  %26683 = vmatprep.subr.bf16.mxu0 %v36130_v24  ;;  %v20566_v2 = vsub.f32 %v36134_v37, %v36135_v57  ;;  %v19376_v24 = vmin.f32 %v34365_v14, 0.0  ;;  %v20448_v57 = vand.u32 4294901760, %v20447_v13  ;;  %v20462_v43 = vand.u32 4294901760, %v20461_v23  ;;  %v36153_v23 = vld [vmem:[#allocation99_spill] sm:$0xff] }
0x14a1   : > { %26723 = vmatprep.subr.bf16.mxu1 %v33695_v35  ;;  %v36142_v35 = vld [vmem:[#allocation68_spill] sm:$0xff]  ;;  %v20587_v9 = vsub.f32 %v36144_v4, %v36145_v53  ;;  %v20475_v18 = vsub.f32 %v33991_v39, %v36149_v15 }
0x14a2   : > { %v36143_v52 = vand.u32 4294901760, %v36142_v35  ;;  %v20567_v41 = vand.u32 4294901760, %v20566_v2  ;;  %v19382_v13 = vmul.f32 1.442695, %v19376_v24  ;;  %v26764_v58 = vpack.c.bf16 %v20448_v57, %v20441_v32  ;;  %v36157_v24 = vld [vmem:[#allocation63_spill] sm:$0xff]  ;;  %v36160_v32 = vld [vmem:[#allocation42_spill] sm:$0xff] }
0x14a3   : > { %26685 = vmatpush3.bf16.msra.mxu0 %v36141_v28  ;;  %v20574_v28 = vand.u32 4294901760, %v20573_v12  ;;  %v20588_v4 = vand.u32 4294901760, %v20587_v9  ;;  %v36152_v2 = vand.u32 4294901760, %v36151_v63  ;;  %v36158_v39 = vand.u32 4294901760, %v36157_v24  ;;  %v36163_v24 = vld [vmem:[#allocation35_spill] sm:$0xff] }
0x14a4   : > { %v20580_v42 = vsub.f32 %v36142_v35, %v36143_v52  ;;  %26725 = vmatpush3.bf16.msra.mxu1 %v33700_v1  ;;  %26687 = vmatprep.subr.bf16.mxu0 %v36146_v19  ;;  %v20455_v52 = vand.u32 4294901760, %v20454_v16  ;;  %v36148_v1 = vand.u32 4294901760, %v33986_v27  ;;  %v35268_v16 = vand.u32 4294901760, %v34401_v31 }
0x14a5   : > { %26727 = vmatprep.subr.bf16.mxu1 %v33704_v46  ;;  %v36150_v46 = vld [vmem:[#allocation38_spill] sm:$0xff]  ;;  %v26766_v12 = vpack.c.bf16 %v20574_v28, %v20567_v41  ;;  %v20476_v41 = vand.u32 4294901760, %v20475_v18  ;;  %27364 = vpow2.f32 %v19382_v13  ;;  %v36166_v13 = vld [vmem:[#allocation67_spill] sm:$0xff] }
0x14a6   : > { %v20581_v53 = vand.u32 4294901760, %v20580_v42  ;;  %v20468_v19 = vsub.f32 %v33986_v27, %v36148_v1  ;;  %v36154_v42 = vand.u32 4294901760, %v36153_v23  ;;  %v36155_v1 = vld [vmem:[#allocation61_spill] sm:$0xff]  ;;  %v26768_v57 = vpack.c.bf16 %v20462_v43, %v20455_v52 }
0x14a7   : > { %26689 = vmatpush3.bf16.msra.mxu0 %v36147_v36  ;;  %v20594_v36 = vsub.f32 %v36151_v63, %v36152_v2  ;;  %v36156_v15 = vand.u32 4294901760, %v36155_v1  ;;  %v20423_v43 = vsub.f32 %v34401_v31, %v35268_v16  ;;  %v36164_v52 = vand.u32 4294901760, %v34074_v49 }
0x14a8   : > { %26729 = vmatpush3.bf16.msra.mxu1 %v33708_v51  ;;  %26691 = vmatprep.subr.bf16.mxu0 %v36150_v46  ;;  %v20601_v9 = vsub.f32 %v36153_v23, %v36154_v42  ;;  %v36159_v46 = vld [vmem:[#allocation66_spill] sm:$0xff]  ;;  %v26770_v2 = vpack.c.bf16 %v20588_v4, %v20581_v53  ;;  %v36161_v42 = vand.u32 4294901760, %v34038_v47 }
0x14a9   : > { %26763 = vmatprep.subr.bf16.mxu1 %v26762_v44  ;;  %v34424_v51 = vpack.c.bf16 %v36158_v39, %v36156_v15  ;;  %v20469_v44 = vand.u32 4294901760, %v20468_v19  ;;  %v20595_v28 = vand.u32 4294901760, %v20594_v36  ;;  %v36162_v39 = vand.u32 4294901760, %v34043_v50  ;;  %v36168_v36 = vld [vmem:[#allocation70_spill] sm:$0xff] }
0x14aa   : > { %v20482_v1 = vsub.f32 %v34038_v47, %v36161_v42  ;;  %v20602_v4 = vand.u32 4294901760, %v20601_v9  ;;  %v20608_v53 = vsub.f32 %v34074_v49, %v36164_v52  ;;  %v36165_v19 = vand.u32 4294901760, %v34087_v30  ;;  %v36173_v9 = vld [vmem:[#allocation78_spill] sm:$0xff] }
0x14ab   : > { %20319 = vmatmul.mubr.f32.vlgmr.msra.gmra.mrb[78].mxu1 %v36159_v46  ;;  %26693 = vmatpush3.bf16.msra.mxu0 %v36160_v32  ;;  %v20489_v15 = vsub.f32 %v34043_v50, %v36162_v39  ;;  %v36169_v32 = vand.u32 4294901760, %v36168_v36  ;;  %v26772_v39 = vpack.c.bf16 %v20476_v41, %v20469_v44  ;;  %v36175_v52 = vand.u32 4294901760, %v34092_v11 }
0x14ac   : > { %26765 = vmatpush3.bf16.msra.mxu1 %v26764_v58  ;;  %20661 = vmatprep.mubr.f32.mxu1 %v34375_v22  ;;  %v20615_v18 = vsub.f32 %v34087_v30, %v36165_v19  ;;  %v36167_v58 = vand.u32 4294901760, %v36166_v13  ;;  %v36174_v22 = vand.u32 4294901760, %v36173_v9  ;;  %v36176_v19 = vand.u32 4294901760, %v34101_v62 }
0x14ad   : > { %26695 = vmatprep.subr.bf16.mxu0 %v36163_v24  ;;  %26767 = vmatprep.subr.bf16.mxu1 %v26766_v12  ;;  %v36170_v12 = vld [vmem:[#allocation44_spill] sm:$0xff]  ;;  %v36171_v24 = vld [vmem:[#allocation71_spill] sm:$0xff]  ;;  %v20496_v49 = vsub.f32 %v34092_v11, %v36175_v52  ;;  %v20490_v36 = vand.u32 4294901760, %v20489_v15  ;;  %v36177_v44 = vand.u32 4294901760, %v34106_v59 }
0x14ae   : > { %v34449_v42 = vpack.c.bf16 %v36169_v32, %v36167_v58  ;;  %v36172_v16 = vand.u32 4294901760, %v36171_v24  ;;  %v20503_v13 = vsub.f32 %v34101_v62, %v36176_v19  ;;  %v20483_v58 = vand.u32 4294901760, %v20482_v1  ;;  %v36181_v19 = vld [vmem:[#allocation45_spill] sm:$0xff] }
0x14af   : > { %26697 = vmatpush3.bf16.msra.mxu0 %v36170_v12  ;;  %v20622_v41 = vsub.f32 %v34106_v59, %v36177_v44  ;;  %v20424_v32 = vand.u32 4294901760, %v20423_v43  ;;  %v26774_v12 = vpack.c.bf16 %v20602_v4, %v20595_v28  ;;  %v20609_v24 = vand.u32 4294901760, %v20608_v53  ;;  %v36183_v62 = vld [vmem:[#allocation53_spill] sm:$0xff]  ;;  %v36185_v44 = vld [vmem:[#allocation55_spill] sm:$0xff] }
0x14b0   : > { %v34456_v50 = vpack.c.bf16 %v36174_v22, %v36172_v16  ;;  %26769 = vmatpush3.bf16.msra.mxu1 %v26768_v57  ;;  %26731 = vmatprep.subr.bf16.mxu0 %v34424_v51  ;;  %v36178_v22 = vand.u32 4294901760, %v34126_v0  ;;  %v20616_v9 = vand.u32 4294901760, %v20615_v18  ;;  %v36179_v57 = vld [vmem:[#allocation77_spill] sm:$0xff]  ;;  %v36182_v1 = vand.u32 4294901760, %v36181_v19 }
0x14b1   : > { %26771 = vmatprep.subr.bf16.mxu1 %v26770_v2  ;;  %v36180_v52 = vand.u32 4294901760, %v36179_v57  ;;  %v36184_v11 = vand.u32 4294901760, %v36183_v62  ;;  %v36186_v59 = vand.u32 4294901760, %v36185_v44  ;;  %v20497_v2 = vand.u32 4294901760, %v20496_v49  ;;  %v27365_v57 = vpop.eup %27364 }
0x14b2   : > { %v20629_v16 = vsub.f32 %v34126_v0, %v36178_v22  ;;  %20215 = vmatmul.mubr.f32.vlgmr.msra.gmra.mrb[72].mxu0 %v36159_v46  ;;  %v20504_v28 = vand.u32 4294901760, %v20503_v13  ;;  %v36187_v43 = vand.u32 4294901760, %v34166_v6  ;;  %v36188_v4 = vand.u32 4294901760, %v34171_v8 }
0x14b3   : > { %v34476_v15 = vpack.c.bf16 %v36182_v1, %v36180_v52  ;;  %v34482_v30 = vpack.c.bf16 %v36186_v59, %v36184_v11  ;;  %26733 = vmatpush3.bf16.msra.mxu0 %v34449_v42  ;;  %20425 = vmatprep.mubr.f32.mxu0 %v20424_v32  ;;  %v26776_v62 = vpack.c.bf16 %v20490_v36, %v20483_v58  ;;  %v20623_v18 = vand.u32 4294901760, %v20622_v41  ;;  %v36191_v52 = vld [vmem:[#allocation57_spill] sm:$0xff]  ;;  %v36193_v1 = vld [vmem:[#allocation48_spill] sm:$0xff]  ;;  %v36195_v36 = vld [vmem:[#allocation50_spill] sm:$0xff] }
0x14b4   : > { %v20510_v46 = vsub.f32 %v34166_v6, %v36187_v43  ;;  %v20517_v53 = vsub.f32 %v34171_v8, %v36188_v4  ;;  %26773 = vmatpush3.bf16.msra.mxu1 %v26772_v39  ;;  %26735 = vmatprep.subr.bf16.mxu0 %v34456_v50  ;;  %v20630_v59 = vand.u32 4294901760, %v20629_v16  ;;  %v36189_v11 = vand.u32 4294901760, %v34206_v7  ;;  %v36197_v16 = vld [vmem:[#allocation60_spill] sm:$0xff] }
0x14b5   : > { %26775 = vmatprep.subr.bf16.mxu1 %v26774_v12  ;;  %v26778_v49 = vpack.c.bf16 %v20616_v9, %v20609_v24  ;;  %v36190_v13 = vand.u32 4294901760, %v34211_v17  ;;  %v36192_v19 = vand.u32 4294901760, %v36191_v52  ;;  %v36194_v39 = vand.u32 4294901760, %v36193_v1 }
0x14b6   : > { %v20636_v22 = vsub.f32 %v34206_v7, %v36189_v11  ;;  %v26780_v58 = vpack.c.bf16 %v20504_v28, %v20497_v2  ;;  %v36196_v41 = vand.u32 4294901760, %v36195_v36  ;;  %v36198_v43 = vand.u32 4294901760, %v36197_v16  ;;  %v36209_v16 = vld [vmem:[#allocation83_spill] sm:$0xff] }
0x14b7   : > { %v20643_v32 = vsub.f32 %v34211_v17, %v36190_v13  ;;  %v34502_v44 = vpack.c.bf16 %v36194_v39, %v36192_v19  ;;  %26737 = vmatpush3.bf16.msra.mxu0 %v34476_v15  ;;  %v20511_v24 = vand.u32 4294901760, %v20510_v46  ;;  %v20518_v9 = vand.u32 4294901760, %v20517_v53 }
0x14b8   : > { %v34509_v12 = vpack.c.bf16 %v36198_v43, %v36196_v41  ;;  %26777 = vmatpush3.bf16.msra.mxu1 %v26776_v62  ;;  %26739 = vmatprep.subr.bf16.mxu0 %v34482_v30  ;;  %v26782_v4 = vpack.c.bf16 %v20630_v59, %v20623_v18  ;;  %v20637_v11 = vand.u32 4294901760, %v20636_v22  ;;  %v36199_v13 = vand.u32 4294901760, %v34229_v33  ;;  %v36203_v18 = vld [vmem:[#allocation64_spill] sm:$0xff]  ;;  %v36205_v22 = vld [vmem:[#allocation65_spill] sm:$0xff] }
0x14b9   : > { %v36200_v19 = vand.u32 4294901760, %v34240_v5  ;;  %v21577_v28 = vadd.f32 -1.0, %v27365_v57  ;;  %26779 = vmatprep.subr.bf16.mxu1 %v26778_v49  ;;  %v20644_v1 = vand.u32 4294901760, %v20643_v32  ;;  %v36201_v39 = vand.u32 4294901760, %v34245_v56  ;;  %v36207_v32 = vld [vmem:[#allocation72_spill] sm:$0xff] }
0x14ba   : > { %v20524_v52 = vsub.f32 %v34229_v33, %v36199_v13  ;;  %v36202_v53 = vand.u32 4294901760, %v34250_v40  ;;  %v36204_v59 = vand.u32 4294901760, %v36203_v18  ;;  %v36206_v36 = vand.u32 4294901760, %v36205_v22 }
0x14bb   : > { %v20531_v2 = vsub.f32 %v34240_v5, %v36200_v19  ;;  %v20650_v46 = vsub.f32 %v34245_v56, %v36201_v39  ;;  %26741 = vmatpush3.bf16.msra.mxu0 %v34502_v44  ;;  %v26784_v49 = vpack.c.bf16 %v20518_v9, %v20511_v24  ;;  %v36208_v57 = vand.u32 4294901760, %v36207_v32 }
0x14bc   : > { %v20657_v62 = vsub.f32 %v34250_v40, %v36202_v53  ;;  %v34530_v41 = vpack.c.bf16 %v36206_v36, %v36204_v59  ;;  %v36210_v43 = vand.u32 4294901760, %v36209_v16  ;;  %26781 = vmatpush3.bf16.msra.mxu1 %v26780_v58  ;;  %26743 = vmatprep.subr.bf16.mxu0 %v34509_v12  ;;  %v20525_v19 = vand.u32 4294901760, %v20524_v52  ;;  %v36213_v58 = vld [vmem:[#allocation85_spill] sm:$0xff]  ;;  %v36215_v52 = vld [vmem:[#allocation88_spill] sm:$0xff] }
0x14bd   : > { %v20532_v39 = vand.u32 4294901760, %v20531_v2  ;;  %v36211_v53 = vand.u32 4294901760, %v34263_v61  ;;  %v36212_v22 = vand.u32 4294901760, %v34268_v48  ;;  %v19392_v24 = vsel %vm19372_vm9, %v34365_v14, %v21577_v28  ;;  %26783 = vmatprep.subr.bf16.mxu1 %v26782_v4 }
0x14be   : > { %v34536_v13 = vpack.c.bf16 %v36210_v43, %v36208_v57  ;;  %v26786_v9 = vpack.c.bf16 %v20644_v1, %v20637_v11  ;;  %v20651_v36 = vand.u32 4294901760, %v20650_v46  ;;  %v20658_v32 = vand.u32 4294901760, %v20657_v62  ;;  %v36217_v43 = vld [vmem:[#allocation91_spill] sm:$0xff]  ;;  %v36221_v1 = vld [vmem:[#allocation108_spill] sm:$0xff]  ;;  %v36223_v62 = vld [vmem:[#allocation109_spill] sm:$0xff] }
0x14bf   : > { %v20538_v18 = vsub.f32 %v34263_v61, %v36211_v53  ;;  %v20545_v59 = vsub.f32 %v34268_v48, %v36212_v22  ;;  %26745 = vmatpush3.bf16.msra.mxu0 %v34530_v41  ;;  %v36214_v57 = vand.u32 4294901760, %v36213_v58  ;;  %v36216_v2 = vand.u32 4294901760, %v36215_v52  ;;  %v36219_v61 = vld [vmem:[#allocation102_spill] sm:$0xff] }
0x14c0   : > { %v36218_v53 = vand.u32 4294901760, %v36217_v43  ;;  %v36220_v40 = vand.u32 4294901760, %v36219_v61  ;;  %v34559_v22 = vand.u32 4294901760, %v19392_v24  ;;  %26785 = vmatpush3.bf16.msra.mxu1 %v26784_v49  ;;  %26747 = vmatprep.subr.bf16.mxu0 %v34536_v13  ;;  %v26788_v14 = vpack.c.bf16 %v20532_v39, %v20525_v19 }
0x14c1   : > { %v34551_v16 = vpack.c.bf16 %v36216_v2, %v36214_v57  ;;  %v20539_v4 = vand.u32 4294901760, %v20538_v18  ;;  %v20546_v11 = vand.u32 4294901760, %v20545_v59  ;;  %26787 = vmatprep.subr.bf16.mxu1 %v26786_v9  ;;  %v26790_v28 = vpack.c.bf16 %v20658_v32, %v20651_v36  ;;  %v36231_v36 = vld [vmem:[#allocation51_spill] sm:$0xff] }
0x14c2   : > { %v34557_v56 = vpack.c.bf16 %v36220_v40, %v36218_v53  ;;  %v36222_v46 = vand.u32 4294901760, %v36221_v1  ;;  %v36224_v58 = vand.u32 4294901760, %v36223_v62  ;;  %v34570_v40 = vsub.f32 %v19392_v24, %v34559_v22 }
0x14c3   : > { %26749 = vmatpush3.bf16.msra.mxu0 %v34551_v16  ;;  %v26792_v61 = vpack.c.bf16 %v20546_v11, %v20539_v4  ;;  %v36225_v49 = vand.u32 4294901760, %v34111_v10  ;;  %v36226_v19 = vand.u32 4294901760, %v34114_v25  ;;  %v36227_v18 = vand.u32 4294901760, %v34136_v21  ;;  %v36229_v10 = vld [vmem:[#allocation52_spill] sm:$0xff] }
0x14c4   : > { %v34567_v57 = vpack.c.bf16 %v36224_v58, %v36222_v46  ;;  %26789 = vmatpush3.bf16.msra.mxu1 %v26788_v14  ;;  %26751 = vmatprep.subr.bf16.mxu0 %v34557_v56  ;;  %v36228_v59 = vand.u32 4294901760, %v34139_v38  ;;  %v20428_v24 = vand.u32 4294901760, %v34570_v40  ;;  %v36230_v25 = vand.u32 4294901760, %v36229_v10  ;;  %v36245_v58 = vld [vmem:[#allocation81_spill] sm:$0xff] }
0x14c5   : > { %v34577_v39 = vpack.c.bf16 %v36226_v19, %v36225_v49  ;;  %26791 = vmatprep.subr.bf16.mxu1 %v26790_v28  ;;  %v36232_v32 = vand.u32 4294901760, %v36231_v36  ;;  %v36233_v21 = vand.u32 4294901760, %v34174_v60  ;;  %v36234_v38 = vand.u32 4294901760, %v34177_v45  ;;  %v36242_v28 = vld [vmem:[#allocation134_spill] sm:$0xff] }
0x14c6   : > { %v34584_v9 = vpack.c.bf16 %v36228_v59, %v36227_v18  ;;  %v36235_v43 = vand.u32 4294901760, %v34401_v31  ;;  %v20429_v53 = vsub.f32 %v34570_v40, %v20428_v24  ;;  %v26794_v14 = vpack.c.bf16 %v33874_v20, %v33869_v3  ;;  %v36237_v3 = vld [vmem:[#allocation79_spill] sm:$0xff]  ;;  %v36264_v59 = vld [vmem:[#allocation33_spill] sm:$0xff] }
0x14c7   : > { %26753 = vmatpush3.bf16.msra.mxu0 %v34567_v57  ;;  %v34593_v52 = vpack.c.bf16 %v36232_v32, %v36230_v25  ;;  %v34601_v2 = vpack.c.bf16 %v36234_v38, %v36233_v21  ;;  %v26796_v60 = vpack.c.bf16 %v33896_v55, %v33879_v29  ;;  %v26798_v4 = vpack.c.bf16 %v36136_v34, %v36134_v37  ;;  %v36236_v55 = vld [vmem:[#allocation69_spill] sm:$0xff]  ;;  %v27373_v18 = vld [vmem:[%s28525_s23] sm:$0xff] }
0x14c8   : > { %26793 = vmatpush3.bf16.msra.mxu1 %v26792_v61  ;;  %26755 = vmatprep.subr.bf16.mxu0 %v34577_v39  ;;  %v20430_v45 = vand.u32 4294901760, %v20429_v53  ;;  %v26800_v20 = vpack.c.bf16 %v33937_v54, %v36138_v26  ;;  %v26802_v29 = vpack.c.bf16 %v36236_v55, %v36142_v35  ;;  %v26804_v37 = vpack.c.bf16 %v36237_v3, %v33986_v27  ;;  %v36238_v54 = vld [vmem:[#allocation107_spill] sm:$0xff]  ;;  %v36241_v27 = vld [vmem:[#allocation41_spill] sm:$0xff] }
0x14c9   : > { %26827 = vmatprep.subr.bf16.mxu1 %v34424_v51  ;;  %v26806_v34 = vpack.c.bf16 %v36153_v23, %v36151_v63  ;;  %v26808_v26 = vpack.c.bf16 %v36238_v54, %v34038_v47  ;;  %v36239_v35 = vld [vmem:[#allocation111_spill] sm:$0xff]  ;;  %v26812_v1 = vpack.c.bf16 %v36242_v28, %v36241_v27  ;;  %v26816_v47 = vpack.c.bf16 %v34171_v8, %v34166_v6  ;;  %v36246_v6 = vld [vmem:[#allocation86_spill] sm:$0xff] }
0x14ca   : > { %v36243_v63 = vld [vmem:[#allocation43_spill] sm:$0xff]  ;;  %v26818_v46 = vpack.c.bf16 %v34211_v17, %v34206_v7  ;;  %v26820_v62 = vpack.c.bf16 %v34240_v5, %v34229_v33  ;;  %v26824_v61 = vpack.c.bf16 %v34268_v48, %v36246_v6  ;;  %v36248_v33 = vld [vmem:[#allocation73_spill] sm:$0xff]  ;;  %v36249_v17 = vld [vmem:[#allocation76_spill] sm:$0xff] }
0x14cb   : > { %20663 = vmatmul.mubr.f32.vlgmr.msra.gmra.mrb[80].mxu1 %v34559_v22  ;;  %26757 = vmatpush3.bf16.msra.mxu0 %v34584_v9  ;;  %v26814_v23 = vpack.c.bf16 %v34126_v0, %v36243_v63  ;;  %v36244_v0 = vld [vmem:[#allocation80_spill] sm:$0xff]  ;;  %v36247_v7 = vld [vmem:[#allocation103_spill] sm:$0xff]  ;;  %v36252_v48 = vld [vmem:[#allocation110_spill] sm:$0xff] }
0x14cc   : > { %26829 = vmatpush3.bf16.msra.mxu1 %v34449_v42  ;;  %20905 = vmatprep.mubr.f32.mxu1 %v36235_v43  ;;  %v26822_v8 = vpack.c.bf16 %v36245_v58, %v36244_v0  ;;  %v36250_v5 = vld [vmem:[#allocation95_spill] sm:$0xff] }
0x14cd   : > { %26759 = vmatprep.subr.bf16.mxu0 %v34593_v52  ;;  %26831 = vmatprep.subr.bf16.mxu1 %v34456_v50 }
0x14cf   : > { %26761 = vmatpush3.bf16.msra.mxu0 %v34601_v2 }
0x14d0   : > { %26833 = vmatpush3.bf16.msra.mxu1 %v34476_v15  ;;  %26795 = vmatprep.subr.bf16.mxu0 %v26794_v14 }
0x14d1   : > { %26835 = vmatprep.subr.bf16.mxu1 %v34482_v30 }
0x14d2   : > { %20431 = vmatmul.mubr.f32.vlgmr.msra.gmra.mrb[74].mxu0 %v20430_v45 }
0x14d3   : > { %26797 = vmatpush3.bf16.msra.mxu0 %v26796_v60  ;;  %20798 = vmatprep.mubr.f32.mxu0 %v34401_v31  ;;  %v36240_v31 = vld [vmem:[#allocation40_spill] sm:$0xff] }
0x14d4   : > { %26837 = vmatpush3.bf16.msra.mxu1 %v34502_v44  ;;  %26799 = vmatprep.subr.bf16.mxu0 %v26798_v4  ;;  %v26810_v11 = vpack.c.bf16 %v36240_v31, %v36239_v35 }
0x14d5   : > { %26839 = vmatprep.subr.bf16.mxu1 %v34509_v12 }
0x14d7   : > { %26801 = vmatpush3.bf16.msra.mxu0 %v26800_v20 }
0x14d8   : > { %26841 = vmatpush3.bf16.msra.mxu1 %v34530_v41  ;;  %26803 = vmatprep.subr.bf16.mxu0 %v26802_v29 }
0x14d9   : > { %26843 = vmatprep.subr.bf16.mxu1 %v34536_v13 }
0x14db   : > { %26805 = vmatpush3.bf16.msra.mxu0 %v26804_v37 }
0x14dc   : > { %26845 = vmatpush3.bf16.msra.mxu1 %v34551_v16  ;;  %26807 = vmatprep.subr.bf16.mxu0 %v26806_v34 }
0x14dd   : > { %26847 = vmatprep.subr.bf16.mxu1 %v34557_v56 }
0x14df   : > { %26809 = vmatpush3.bf16.msra.mxu0 %v26808_v26 }
0x14e0   : > { %26849 = vmatpush3.bf16.msra.mxu1 %v34567_v57  ;;  %26811 = vmatprep.subr.bf16.mxu0 %v26810_v11 }
0x14e1   : > { %26851 = vmatprep.subr.bf16.mxu1 %v34577_v39 }
0x14e3   : > { %26813 = vmatpush3.bf16.msra.mxu0 %v26812_v1 }
0x14e4   : > { %26853 = vmatpush3.bf16.msra.mxu1 %v34584_v9  ;;  %26815 = vmatprep.subr.bf16.mxu0 %v26814_v23 }
0x14e5   : > { %26855 = vmatprep.subr.bf16.mxu1 %v34593_v52 }
0x14e7   : > { %26817 = vmatpush3.bf16.msra.mxu0 %v26816_v47 }
0x14e8   : > { %26857 = vmatpush3.bf16.msra.mxu1 %v34601_v2  ;;  %26819 = vmatprep.subr.bf16.mxu0 %v26818_v46 }
0x14e9   : > { %26891 = vmatprep.subr.bf16.mxu1 %v34424_v51  ;;  %v36254_v51 = vld [vmem:[#allocation59_spill] sm:$0xff] }
0x14eb   : > { %20909 = vmatmul.mubr.f32.vlgmr.msra.gmra.mrb[82].mxu1 %v20428_v24  ;;  %26821 = vmatpush3.bf16.msra.mxu0 %v26820_v62 }
0x14ec   : > { %26893 = vmatpush3.bf16.msra.mxu1 %v34449_v42  ;;  %21179 = vmatprep.mubr.f32.mxu1 %v36247_v7  ;;  %v36255_v42 = vld [vmem:[#allocation62_spill] sm:$0xff] }
0x14ed   : > { %26823 = vmatprep.subr.bf16.mxu0 %v26822_v8  ;;  %26895 = vmatprep.subr.bf16.mxu1 %v34456_v50  ;;  %v36251_v50 = vld [vmem:[#allocation106_spill] sm:$0xff] }
0x14ef   : > { %26825 = vmatpush3.bf16.msra.mxu0 %v26824_v61 }
0x14f0   : > { %26897 = vmatpush3.bf16.msra.mxu1 %v34476_v15  ;;  %26859 = vmatprep.subr.bf16.mxu0 %v36248_v33  ;;  %v36256_v15 = vld [vmem:[#allocation56_spill] sm:$0xff] }
0x14f1   : > { %26899 = vmatprep.subr.bf16.mxu1 %v34482_v30  ;;  %v36253_v30 = vld [vmem:[#allocation39_spill] sm:$0xff] }
0x14f2   : > { %20801 = vmatmul.mubr.f32.vlgmr.msra.gmra.mrb[76].mxu0 %v34570_v40 }
0x14f3   : > { %26861 = vmatpush3.bf16.msra.mxu0 %v36249_v17  ;;  %21075 = vmatprep.mubr.f32.mxu0 %v36247_v7 }
0x14f4   : > { %26901 = vmatpush3.bf16.msra.mxu1 %v34502_v44  ;;  %26863 = vmatprep.subr.bf16.mxu0 %v36250_v5  ;;  %v36257_v44 = vld [vmem:[#allocation74_spill] sm:$0xff] }
0x14f5   : > { %26903 = vmatprep.subr.bf16.mxu1 %v34509_v12  ;;  %v36258_v12 = vld [vmem:[#allocation75_spill] sm:$0xff] }
0x14f7   : > { %26865 = vmatpush3.bf16.msra.mxu0 %v36251_v50 }
0x14f8   : > { %26905 = vmatpush3.bf16.msra.mxu1 %v34530_v41  ;;  %26867 = vmatprep.subr.bf16.mxu0 %v36252_v48  ;;  %v36259_v41 = vld [vmem:[#allocation82_spill] sm:$0xff]  ;;  %v36266_v48 = vld [vmem:[#allocation96_spill] sm:$0xff] }
0x14f9   : > { %26907 = vmatprep.subr.bf16.mxu1 %v34536_v13  ;;  %v36261_v13 = vld [vmem:[#allocation93_spill] sm:$0xff] }
0x14fb   : > { %26869 = vmatpush3.bf16.msra.mxu0 %v36253_v30 }
0x14fc   : > { %26909 = vmatpush3.bf16.msra.mxu1 %v34551_v16  ;;  %26871 = vmatprep.subr.bf16.mxu0 %v36254_v51  ;;  %v36262_v16 = vld [vmem:[#allocation94_spill] sm:$0xff] }
0x14fd   : > { %26911 = vmatprep.subr.bf16.mxu1 %v34557_v56  ;;  %v36260_v56 = vld [vmem:[#allocation87_spill] sm:$0xff] }
0x14ff   : > { %26873 = vmatpush3.bf16.msra.mxu0 %v36255_v42 }
0x1500   : > { %26913 = vmatpush3.bf16.msra.mxu1 %v34567_v57  ;;  %26875 = vmatprep.subr.bf16.mxu0 %v36256_v15  ;;  %v36263_v57 = vld [vmem:[#allocation98_spill] sm:$0xff] }
0x1501   : > { %26915 = vmatprep.subr.bf16.mxu1 %v34577_v39 }
0x1503   : > { %26877 = vmatpush3.bf16.msra.mxu0 %v36257_v44 }
0x1504   : > { %26917 = vmatpush3.bf16.msra.mxu1 %v34584_v9  ;;  %26879 = vmatprep.subr.bf16.mxu0 %v36258_v12  ;;  %v36265_v9 = vsub.s32 2, %v36264_v59 }
0x1505   : > { %26919 = vmatprep.subr.bf16.mxu1 %v34593_v52 }
0x1506   : > { %v19461_v24 = vrot.slane %v27373_v18, %v36265_v9 }
0x1507   : > { %26881 = vmatpush3.bf16.msra.mxu0 %v36259_v41 }
0x1508   : > { %26921 = vmatpush3.bf16.msra.mxu1 %v34601_v2  ;;  %26883 = vmatprep.subr.bf16.mxu0 %v36260_v56 }
0x150b   : > { %21181 = vmatmul.mubr.f32.vlgmr.msra.gmra.mrb[84].mxu1 %v34559_v22  ;;  %26885 = vmatpush3.bf16.msra.mxu0 %v36261_v13  ;;  %v21200_v13 = vsub.s32 7, %v36264_v59 }
0x150c   : > { %26887 = vmatprep.subr.bf16.mxu0 %v36262_v16 }
0x150d   : > { %v21201_v16 = vrot.slane %v27373_v18, %v21200_v13 }
0x150f   : > { %26889 = vmatpush3.bf16.msra.mxu0 %v36263_v57 }
0x1512   : > { %21077 = vmatmul.mubr.f32.vlgmr.msra.gmra.mrb[78].mxu0 %v34559_v22 }
0x1537   : > { %v22561_v40 = vpop.f32.mrb[74].mxu1 }
0x1538   : > { %v22562_v49 = vpop.f32.mrb[75].mxu1 }
0x1539   : > { %v22563_v19 = vadd.f32 %v22562_v49, %v22561_v40  ;;  %v21579_v49 = vld [vmem:[%s28525_s23 + $0x8] ss:$0 sm:$0xff] }
0x153f   : > { %v22526_v39 = vpop.f32.mrb[68].mxu0 }
0x1540   : > { %v22527_v10 = vpop.f32.mrb[69].mxu0 }
0x1541   : > { %v22528_v25 = vadd.f32 %v22527_v10, %v22526_v39 }
0x1543   : > { %v19571_v36 = vadd.f32 %v22528_v25, %v19461_v24 }
0x1545   : > { %v19803_v32 = vadd.f32 %v22563_v19, %v19571_v36 }
0x155d   : > { %v22631_v52 = vpop.f32.mrb[76].mxu1 }
0x155e   : > { %v22632_v21 = vpop.f32.mrb[77].mxu1 }
0x155f   : > { %v22633_v38 = vadd.f32 %v22632_v21, %v22631_v52 }
0x1565   : > { %v22596_v2 = vpop.f32.mrb[70].mxu0 }
0x1566   : > { %v22597_v43 = vpop.f32.mrb[71].mxu0 }
0x1567   : > { %v22598_v53 = vadd.f32 %v22597_v43, %v22596_v2 }
0x1569   : > { %v19941_v14 = vadd.f32 %v22598_v53, %v19803_v32 }
0x156b   : > { %v20049_v22 = vadd.f32 %v22633_v38, %v19941_v14 }
0x157e   : > { %v22701_v60 = vpop.f32.mrb[78].mxu1 }
0x157f   : > { %v22702_v45 = vpop.f32.mrb[79].mxu1 }
0x1580   : > { %v22703_v4 = vadd.f32 %v22702_v45, %v22701_v60 }
0x1585   : > { %v22666_v20 = vpop.f32.mrb[72].mxu0 }
0x1586   : > { %v22667_v55 = vpop.f32.mrb[73].mxu0 }
0x1587   : > { %v22668_v29 = vadd.f32 %v22667_v55, %v22666_v20 }
0x1589   : > { %v20217_v3 = vadd.f32 %v22668_v29, %v20049_v22 }
0x158b   : > { %v20321_v37 = vadd.f32 %v22703_v4, %v20217_v3 }
0x159e   : > { %v22771_v34 = vpop.f32.mrb[80].mxu1 }
0x159f   : > { %v22772_v54 = vpop.f32.mrb[81].mxu1 }
0x15a0   : > { %v22773_v26 = vadd.f32 %v22772_v54, %v22771_v34 }
0x15a5   : > { %v22736_v35 = vpop.f32.mrb[74].mxu0 }
0x15a6   : > { %v22737_v31 = vpop.f32.mrb[75].mxu0 }
0x15a7   : > { %v22738_v11 = vadd.f32 %v22737_v31, %v22736_v35 }
0x15a9   : > { %v20433_v27 = vadd.f32 %v22738_v11, %v20321_v37 }
0x15ab   : > { %v20665_v28 = vadd.f32 %v22773_v26, %v20433_v27 }
0x15be   : > { %v22841_v1 = vpop.f32.mrb[82].mxu1 }
0x15bf   : > { %v22842_v63 = vpop.f32.mrb[83].mxu1 }
0x15c0   : > { %v22843_v23 = vadd.f32 %v22842_v63, %v22841_v1 }
0x15c5   : > { %v22806_v47 = vpop.f32.mrb[76].mxu0 }
0x15c6   : > { %v22807_v46 = vpop.f32.mrb[77].mxu0 }
0x15c7   : > { %v22808_v62 = vadd.f32 %v22807_v46, %v22806_v47 }
0x15c9   : > { %v20803_v0 = vadd.f32 %v22808_v62, %v20665_v28 }
0x15cb   : > { %v20911_v58 = vadd.f32 %v22843_v23, %v20803_v0 }
0x15de   : > { %v22911_v8 = vpop.f32.mrb[84].mxu1 }
0x15df   : > { %v22912_v6 = vpop.f32.mrb[85].mxu1 }
0x15e0   : > { %v22913_v61 = vadd.f32 %v22912_v6, %v22911_v8 }
0x15e5   : > { %v22876_v7 = vpop.f32.mrb[78].mxu0 }
0x15e6   : > { %v22877_v33 = vpop.f32.mrb[79].mxu0 }
0x15e7   : > { %v22878_v17 = vadd.f32 %v22877_v33, %v22876_v7 }
0x15e9   : > { %v21079_v5 = vadd.f32 %v22878_v17, %v20911_v58 }
0x15eb   : > { %v21183_v50 = vadd.f32 %v22913_v61, %v21079_v5 }
0x15ed   : > { %v21186_v30 = vadd.f32 %v21183_v50, %v36266_v48 }
0x15ef   : > { %21187 = vadd.xlane.f32.xlu1 %v21186_v30 }
0x167c   : > { %v21188_v51 = vpop.xlane.xlu1 %21187 }
0x167d   : > { %v21189_v42 = vmul.f32 0.0078125, %v21188_v51 }
0x167f   : > { %v21190_v15 = vsub.f32 %v21186_v30, %v21189_v42 }
0x1681   : > { %v21191_v44 = vmul.f32 %v21190_v15, %v21190_v15 }
0x1683   : > { %21192 = vadd.xlane.f32.xlu0 %v21191_v44 }
0x1710   : > { %v21193_v12 = vpop.xlane.xlu0 %21192 }
0x1711   : > { %v21194_v41 = vmul.f32 0.0078125, %v21193_v12 }
0x1713   : > { %v21195_v56 = vadd.f32 1e-05, %v21194_v41 }
0x1715   : > { %27366 = vrsqrt.f32 %v21195_v56 }
0x171f   : > { %v27367_v57 = vpop.eup %27366 }
0x1720   : > { %v21197_v40 = vmul.f32 %v27367_v57, %v21190_v15  ;;  %21212 = sbr.rel (%p21580_p10) target bundleno = 5927 (0x1727), region = 164 }
0x1722   : > { %v21202_v19 = vmul.f32 %v21201_v16, %v21197_v40 }
0x1724   : > { %v21207_v39 = vadd.f32 %v21579_v49, %v21202_v19 }
0x1726   : > { %21208 = vst [vmem:[#allocation2] sm:$0xff] %v21207_v39  ;;  %21213 = vst [vmem:[#allocation22] sm:$0xff] (!%p21580_p10), %v21207_v39 }
0x1727 PF: > { %p27264_p8 = scmp.eq.s32.totalorder %s28020_s2, 1  ;;  %s27895_s9 = smov [#allocation22]  }
0x1728   : > { %s21221_s21 = sshll.u32 %s27895_s9, 4  ;;  %s21222_s21 = int_to_ptr.vmem [resolvable:$true] %s21221_s21 }
0x1729   : > { %s27782_s30 = scalar_lea.vmem %s21222_s21, 128  ;;  %p27789_p6 = scmp.lt.s32.totalorder %s21222_s21, %s21222_s21 }
0x172a   : > { %p27783_p2 = scmp.ne.s32.totalorder %s21222_s21, %s27782_s30  ;;  %p27790_p13 = scmp.lt.s32.totalorder %s27782_s30, %s27782_s30 }
0x172c   : > { %p27784_p5 = pnand %p27783_p2, %p27264_p8  ;;  %p27791_p9 = por %p27790_p13, %p27789_p6 }
0x172e   : > { %p27785_p11 = pneg %p27784_p5 }
0x1730   : > { %p27792_p7 = pnand %p27791_p9, %p27785_p11 }
0x1732   : > { %27795 = shalt.err (!%p27792_p7)
}
0x1733   : > { %s36267_s1 = sld [smem:[#allocation155_spill]] }
0x1739   : > { %s36268_s11 = smov %s36267_s1  ;;  %s27796_s29 = scalar_lea.hbm %s36267_s1, 128 }
0x173a   : > { %p27797_p3 = scmp.ne.s32.totalorder %s36268_s11, %s27796_s29  ;;  %p27802_p0 = scmp.lt.u32.totalorder %s27796_s29, %s36268_s11 }
0x173c   : > { %p27798_p12 = pnand %p27797_p3, %p27264_p8 }
0x173e   : > { %p27799_p1 = pneg %p27798_p12 }
0x1740   : > { %p27804_p4 = pnand %p27802_p0, %p27799_p1 }
0x1742   : > { %27807 = shalt.err (!%p27804_p4)
}
0x1743   : > { %27204 = dma.vmem_to_hbm [thread:$0]  (%p27264_p8), %s21222_s21, 128, %s36268_s11, [#allocation5]  }
0x1744   : > { %27845 = dma.done.wait (%p27264_p8), [#allocation5], 128  }
0x1745   : > { %27847 = vsyncadd (%p27264_p8), [#allocation5], 4294967168 }
0x1746 PF: > { %s36269_s24 = sld [smem:[#allocation31_spill]]  ;;  %s36270_s0 = sld [smem:[#allocation29_spill]] }
0x1747   : > { %s36271_s23 = sld [smem:[#allocation32_spill]]  ;;  %s36272_s1 = smov %s27854_s22 }
0x174c   : > { %p32_p10 = scmp.ge.s32.totalorder %s36269_s24, 4   ;;  %s36273_s22 = smov %s36270_s0 }
0x174e   :  { %34 = sbr.rel (!%p32_p10) target bundleno = 25 (0x19), region = 254 }
0x1755   :  { %21234 = vsyncpa [#allocation4], 1 }
0x1756   :  { %21236 = vsyncpa [#allocation4 + $0x1], 1 }
0x1757   :  { %21237 = vsyncpa [#allocation7], 1 }
0x1758   :  { %21238 = vsyncpa [#allocation10], 1 }
0x1759   :  { %21239 = vsyncpa [#allocation13], 1 }
0x175a   :  { %21240 = vsyncpa [#allocation5], 1 }
0x175b   :  { %21242 = vsyncpa [#allocation5 + $0x1], 1 }

</bundles_post_ra>
